<compile_context>
chip_gen: v7x
topology: tpu7x:2x2x1
jax: 0.10.0
libtpu: 0.0.40
codegen_flags: <defaults>
</compile_context>

<pallas_src>
import functools

import jax
import jax.numpy as jnp
import numpy as np
from jax.experimental import pallas as pl
from jax.experimental.pallas import tpu as pltpu


# -----------------------------------------------------------------------------
# Global configuration
# -----------------------------------------------------------------------------
# bf16 storage between kernels: half the HBM traffic and native MXU rate on
# v5e/v6e/v7x.  Accumulators and the epilogue are f32 inside every kernel.
ACT_DTYPE = jnp.bfloat16

_MAX_TILE_COLS = 2048  # >1-2k lane cols gains <2% roofline; smaller tiles buy
                       # grid depth for the v7x dual TensorCore + VMEM headroom.


def _vmem_capacity_bytes():
    try:
        info = pltpu.get_tpu_info()
        cap = int(getattr(info, "vmem_capacity_bytes", 0))
        if cap > 0:
            return cap
    except Exception:
        pass
    return 128 * 1024 * 1024  # v5e/v6e default


_VMEM_CAP = _vmem_capacity_bytes()
# Double-buffered block budget (v7x 64MiB -> ~21MiB, v5e/v6e 128MiB -> 24MiB) and
# the explicit scoped-VMEM limit (v7x -> 48MiB, v5e/v6e -> 64MiB).
_TILE_VMEM_BUDGET = min(24 * 1024 * 1024, _VMEM_CAP // 3)
_VMEM_LIMIT_BYTES = min(64 * 1024 * 1024, (3 * _VMEM_CAP) // 4)


def _pick_tile_cols(m, per_col_bytes, fixed_bytes):
    """Lane-tile width: a divisor of M (no padding), dtype/VMEM aware, >=4 steps
    when possible (v7x dual-TC), capped at _MAX_TILE_COLS."""
    if m <= 128 or m % 128 != 0:
        # TODO(synk): for large non-128-multiple M, pad once at the cascade top.
        return m
    q = m // 128
    budget = max(0, _TILE_VMEM_BUDGET - fixed_bytes)
    cap = max(1, min(_MAX_TILE_COLS // 128, budget // max(1, per_col_bytes * 128)))
    divs = [d for d in range(1, q + 1) if q % d == 0 and d <= cap] or [1]
    for min_steps in (4, 2, 1):
        cand = [d for d in divs if q // d >= min_steps]
        if cand:
            return 128 * max(cand)
    return 128 * max(divs)


# -----------------------------------------------------------------------------
# Generic multi-head fused conv kernel
#   head_h output = [lrelu]( sum_t term_t ) [+ residual]
#   term  = ("plain", w_idx, x_idx)            -> W @ X
#         | ("act",  wo_idx, wi_idx, x_idx)    -> W_out @ lrelu(W_in @ X)
# -----------------------------------------------------------------------------
def _heads_kernel(*refs, spec, n_w, n_x):
    w_refs = refs[:n_w]
    x_refs = refs[n_w:n_w + n_x]
    o_refs = refs[n_w + n_x:]
    for h_i, head in enumerate(spec):
        acc = None
        for t in head["terms"]:
            if t[0] == "plain":
                _, wi, xi = t
                d = jnp.dot(w_refs[wi][...], x_refs[xi][...],
                            preferred_element_type=jnp.float32)
            else:  # "act"
                _, wo, wi, xi = t
                inner = jnp.dot(w_refs[wi][...], x_refs[xi][...],
                                preferred_element_type=jnp.float32)
                inner = jnp.where(inner >= 0, inner, 0.1 * inner)
                d = jnp.dot(w_refs[wo][...], inner.astype(ACT_DTYPE),
                            preferred_element_type=jnp.float32)
            acc = d if acc is None else acc + d
        if head["lrelu"]:
            acc = jnp.where(acc >= 0, acc, 0.1 * acc)
        if head["res"] is not None:
            acc = acc + x_refs[head["res"]][...].astype(jnp.float32)
        o_refs[h_i][...] = acc.astype(o_refs[h_i].dtype)


def fused_conv_heads(heads):
    """heads: list of dicts
         terms:    list of ("plain", W(Co,K), X(K,M))
                        or ("act", Wout(Co,Ki), Win(Ki,K), X(K,M))
         lrelu:    bool
         residual: (Co, M) array or None  (deduped against X operands -> no extra DMA)
       All heads must share M.  Returns a list of (Co_h, M) arrays in ACT_DTYPE."""
    m = int(heads[0]["terms"][0][-1].shape[1])

    w_ops, x_ops = [], []
    w_idx, x_idx = {}, {}

    def _add(arr, ops, idx):
        k = id(arr)
        if k not in idx:
            idx[k] = len(ops)
            ops.append(arr)
        return idx[k]

    spec = []
    for hd in heads:
        terms = []
        for t in hd["terms"]:
            if t[0] == "plain":
                _, wgt, x = t
                assert int(x.shape[1]) == m, "all heads must share M"
                terms.append(("plain", _add(wgt, w_ops, w_idx),
                              _add(x, x_ops, x_idx)))
            elif t[0] == "act":
                _, w_out, w_in, x = t
                assert int(x.shape[1]) == m, "all heads must share M"
                terms.append(("act", _add(w_out, w_ops, w_idx),
                              _add(w_in, w_ops, w_idx), _add(x, x_ops, x_idx)))
            else:
                raise ValueError(f"unknown term kind {t[0]}")
        co = int(hd["terms"][0][1].shape[0])
        res = hd.get("residual")
        res_idx = None if res is None else _add(res, x_ops, x_idx)
        spec.append(dict(terms=tuple(terms), lrelu=bool(hd["lrelu"]),
                         res=res_idx, co=co))
    spec = tuple(spec)

    # Dtype-aware VMEM accounting: 2x (double-buffer) for streamed X/out blocks,
    # 1x for the f32 accumulators / inner activations, weights counted as fixed.
    out_isize = np.dtype(ACT_DTYPE).itemsize
    x_cols = sum(int(x.shape[0]) * x.dtype.itemsize for x in x_ops)
    o_cols = sum(h["co"] for h in spec) * out_isize
    f32_cols = 4 * (sum(h["co"] for h in spec)
                    + sum(int(w_ops[t[2]].shape[0])
                          for h in spec for t in h["terms"] if t[0] == "act"))
    per_col = 2 * (x_cols + o_cols) + f32_cols
    fixed = 2 * sum(int(w.size) * w.dtype.itemsize for w in w_ops)

    tn = _pick_tile_cols(m, per_col, fixed)
    grid = (m // tn,)

    in_specs = [pl.BlockSpec(tuple(int(s) for s in w.shape), lambda j: (0, 0))
                for w in w_ops]
    in_specs += [pl.BlockSpec((int(x.shape[0]), tn), lambda j: (0, j))
                 for x in x_ops]
    out_specs = tuple(pl.BlockSpec((h["co"], tn), lambda j: (0, j)) for h in spec)
    out_shape = tuple(jax.ShapeDtypeStruct((h["co"], m), ACT_DTYPE) for h in spec)

    outs = pl.pallas_call(
        functools.partial(_heads_kernel, spec=spec, n_w=len(w_ops), n_x=len(x_ops)),
        out_shape=out_shape,
        grid=grid,
        in_specs=in_specs,
        out_specs=out_specs,
        compiler_params=pltpu.CompilerParams(
            dimension_semantics=("parallel",),
            vmem_limit_bytes=_VMEM_LIMIT_BYTES,
        ),
    )(*w_ops, *x_ops)
    return list(outs)


# -----------------------------------------------------------------------------
# im2col / pixel-shuffle glue (channel-major layout: activations are (C, B, H, W))
# TODO(synk): move im2col into the kernel (shifted-dot accumulation with halo
# blocks) and fold the pixel shuffles into the output BlockSpec index_map.
# -----------------------------------------------------------------------------
def _flat(x):
    return x.reshape(x.shape[0], -1)


def epi_h_patches(x, a):
    """Patches for Conv2d kernel [1, a*a], stride [1, a], pad [0, a*(a-1)//2]."""
    c, B, H, W = x.shape
    K = a * a
    pad = a * (a - 1) // 2
    xp = jnp.pad(x, ((0, 0), (0, 0), (0, 0), (pad, pad)))
    Wo = (W + 2 * pad - K) // a + 1
    cols = [xp[:, :, :, k:k + a * Wo:a] for k in range(K)]
    return jnp.stack(cols, axis=1).reshape(c * K, B * H * Wo), (B, H, Wo)


def epi_v_patches(x, a):
    """Patches for Conv2d kernel [a*a, 1], stride [a, 1], pad [a*(a-1)//2, 0]."""
    c, B, H, W = x.shape
    K = a * a
    pad = a * (a - 1) // 2
    xp = jnp.pad(x, ((0, 0), (0, 0), (pad, pad), (0, 0)))
    Ho = (H + 2 * pad - K) // a + 1
    cols = [xp[:, :, k:k + a * Ho:a, :] for k in range(K)]
    return jnp.stack(cols, axis=1).reshape(c * K, B * Ho * W), (B, Ho, W)


def conv3_patches(x):
    """Patches for Conv2d 3x3, stride 1, pad 1."""
    c, B, H, W = x.shape
    xp = jnp.pad(x, ((0, 0), (0, 0), (1, 1), (1, 1)))
    cols = [xp[:, :, kh:kh + H, kw:kw + W] for kh in range(3) for kw in range(3)]
    return jnp.stack(cols, axis=1).reshape(c * 9, B * H * W), (B, H, W)


def afe_patches(x, a):
    """Patches for Conv2d a x a, stride a, pad 0."""
    c, B, H, W = x.shape
    Ho, Wo = H // a, W // a
    xr = x.reshape(c, B, Ho, a, Wo, a)
    pats = jnp.transpose(xr, (0, 3, 5, 1, 2, 4)).reshape(c * a * a, B * Ho * Wo)
    return pats, (B, Ho, Wo)


def ps1d_w(x, f):
    """(f*c, B, H, W) -> (c, B, H, W*f)  == PixelShuffle1D along W."""
    fc, B, H, W = x.shape
    c = fc // f
    x = x.reshape(f, c, B, H, W)
    x = jnp.transpose(x, (1, 2, 3, 4, 0))
    return x.reshape(c, B, H, W * f)


def ps1d_h(x, f):
    """(f*c, B, H, W) -> (c, B, H*f, W)  == transpose_hw o PixelShuffle1D o transpose_hw."""
    fc, B, H, W = x.shape
    c = fc // f
    x = x.reshape(f, c, B, H, W)
    x = jnp.transpose(x, (1, 2, 3, 0, 4))
    return x.reshape(c, B, H * f, W)


def ps2d(x, r):
    """(c*r*r, B, H, W) -> (c, B, H*r, W*r)  == nn.PixelShuffle(r)."""
    crr, B, H, W = x.shape
    c = crr // (r * r)
    x = x.reshape(c, r, r, B, H, W)
    x = jnp.transpose(x, (0, 3, 4, 1, 5, 2))
    return x.reshape(c, B, H * r, W * r)


def transpose_hw(x):
    return jnp.transpose(x, (0, 1, 3, 2))


# -----------------------------------------------------------------------------
# Fuse stages (semantics of A_HV_Fuse / S_HV_Fuse / A_S_HV_Fuse)
# -----------------------------------------------------------------------------
def a_hv_fuse(p, xa, xh, xv, a):
    c, B, h, w = xa.shape
    xa_f, xh_f, xv_f = _flat(xa), _flat(xh), _flat(xv)

    # EUP 1x1 conv on xa computed ONCE (feeds both pixel-shuffle branches).
    eup_f = fused_conv_heads([dict(terms=[("plain", p["w_eup"], xa_f)],
                                   lrelu=False, residual=None)])[0]
    eup = eup_f.reshape(a * c, B, h, w)
    buf_eh = ps1d_w(eup, a)   # EUP(xa)
    buf_ev = ps1d_h(eup, a)   # EUP(xa^T)^T

    # out_a = lrelu(W1a@xa + W1b@lrelu(EPIv(xh)) + W1c@lrelu(EPIh(xv))) + xa
    # (the whole conv1 chain, including the inner LeakyReLUs, in ONE call).
    pv, _ = epi_v_patches(xh, a)
    ph, _ = epi_h_patches(xv, a)
    oa_f = fused_conv_heads([dict(
        terms=[("plain", p["w1_a"], xa_f),
               ("act", p["w1_ang2"], p["w_epi_v"], pv),
               ("act", p["w1_ang3"], p["w_epi_h"], ph)],
        lrelu=True, residual=xa_f)])[0]
    out_a = oa_f.reshape(xa.shape)

    # out_h / out_v share conv2 weights -> one 2-head call (same M).
    bev_f, beh_f = _flat(buf_ev), _flat(buf_eh)
    oh_f, ov_f = fused_conv_heads([
        dict(terms=[("plain", p["w2_buf"], bev_f), ("plain", p["w2_x"], xh_f)],
             lrelu=True, residual=xh_f),
        dict(terms=[("plain", p["w2_buf"], beh_f), ("plain", p["w2_x"], xv_f)],
             lrelu=True, residual=xv_f),
    ])
    return out_a, oh_f.reshape(xh.shape), ov_f.reshape(xv.shape)


def s_hv_fuse(p, xs, xh, xv, a):
    c = xs.shape[0]
    xs_f, xh_f, xv_f = _flat(xs), _flat(xh), _flat(xv)

    # EUP 1x1 conv applied to xh and xv: one 2-head call (shared weight, same M).
    eh_f, ev_f = fused_conv_heads([
        dict(terms=[("plain", p["w_eup"], xh_f)], lrelu=False, residual=None),
        dict(terms=[("plain", p["w_eup"], xv_f)], lrelu=False, residual=None),
    ])
    spa2 = ps1d_w(eh_f.reshape((a * c,) + xh.shape[1:]), a)   # EUP(x_h)
    spa3 = ps1d_h(ev_f.reshape((a * c,) + xv.shape[1:]), a)   # EUP(x_v^T)^T

    os_f = fused_conv_heads([dict(
        terms=[("plain", p["w1_s"], xs_f),
               ("plain", p["w1_spa2"], _flat(spa2)),
               ("plain", p["w1_spa3"], _flat(spa3))],
        lrelu=True, residual=xs_f)])[0]
    out_s = os_f.reshape(xs.shape)

    # EPIConv_{h,v}(xs) -> conv2 is a linear chain: weights pre-multiplied at
    # prep time (w2_epi_*_fold), so out_h/out_v are ONE 2-head call each, no
    # intermediate (c, M) buffers through HBM.
    ph, _ = epi_h_patches(xs, a)
    pv, _ = epi_v_patches(xs, a)
    oh_f, ov_f = fused_conv_heads([
        dict(terms=[("plain", p["w2_epi_h_fold"], ph), ("plain", p["w2_x"], xh_f)],
             lrelu=True, residual=xh_f),
        dict(terms=[("plain", p["w2_epi_v_fold"], pv), ("plain", p["w2_x"], xv_f)],
             lrelu=True, residual=xv_f),
    ])
    return out_s, oh_f.reshape(xh.shape), ov_f.reshape(xv.shape)


def a_s_hv_fuse(p, xa, xs, xh, xv, a):
    c, B, h, w = xa.shape
    xa_f, xs_f, xh_f, xv_f = _flat(xa), _flat(xs), _flat(xh), _flat(xv)

    # out_a: AFE(xs) -> conv1 is linear; fold W1b @ W_afe at prep time.
    pafe, _ = afe_patches(xs, a)
    oa_f = fused_conv_heads([dict(
        terms=[("plain", p["w1_x"], xa_f), ("plain", p["w1_afe_fold"], pafe)],
        lrelu=True, residual=xa_f)])[0]
    out_a = oa_f.reshape(xa.shape)

    # out_s: AUP = 1x1 conv -> PixelShuffle(a)  (pixel shuffle blocks the fold).
    aup_f = fused_conv_heads([dict(terms=[("plain", p["w_aup"], xa_f)],
                                   lrelu=False, residual=None)])[0]
    aup = ps2d(aup_f.reshape(a * a * c, B, h, w), a)
    os_f = fused_conv_heads([dict(
        terms=[("plain", p["w1_x"], xs_f), ("plain", p["w1_aup"], _flat(aup))],
        lrelu=True, residual=xs_f)])[0]
    out_s = os_f.reshape(xs.shape)

    # conv_h(x_v) and conv_v(x_h): one 2-head call (same M), then spatial transpose.
    p3v, _ = conv3_patches(xv)
    p3h, _ = conv3_patches(xh)
    mh_f, mv_f = fused_conv_heads([
        dict(terms=[("plain", p["w_conv_h"], p3v)], lrelu=False, residual=None),
        dict(terms=[("plain", p["w_conv_v"], p3h)], lrelu=False, residual=None),
    ])
    map_xh = transpose_hw(mh_f.reshape((c,) + xv.shape[1:]))
    map_xv = transpose_hw(mv_f.reshape((c,) + xh.shape[1:]))

    # out_h / out_v share conv2 weights -> one 2-head call.
    oh_f, ov_f = fused_conv_heads([
        dict(terms=[("plain", p["w2_x"], xh_f), ("plain", p["w2_map"], _flat(map_xh))],
             lrelu=True, residual=xh_f),
        dict(terms=[("plain", p["w2_x"], xv_f), ("plain", p["w2_map"], _flat(map_xv))],
             lrelu=True, residual=xv_f),
    ])
    return out_a, out_s, oh_f.reshape(xh.shape), ov_f.reshape(xv.shape)


def cascade_inter_block(prepped, xa, xs, xh, xv, a, n_blocks):
    # NCHW f32 -> channel-major bf16 once; cross-block accumulation in f32.
    to_cm = lambda t: jnp.transpose(t, (1, 0, 2, 3)).astype(ACT_DTYPE)
    from_cm = lambda t: jnp.transpose(t, (1, 0, 2, 3))
    xa, xs, xh, xv = map(to_cm, (xa, xs, xh, xv))

    acc_a = acc_s = acc_h = acc_v = None
    for i in range(n_blocks):
        p = prepped[i]
        xa, xh, xv = a_hv_fuse(p["ahv"], xa, xh, xv, a)
        xs, xh, xv = s_hv_fuse(p["shv"], xs, xh, xv, a)
        xa, xs, xh, xv = a_s_hv_fuse(p["ashv"], xa, xs, xh, xv, a)
        if i == 0:
            acc_a, acc_s = xa.astype(jnp.float32), xs.astype(jnp.float32)
            acc_h, acc_v = xh.astype(jnp.float32), xv.astype(jnp.float32)
        else:
            acc_a = acc_a + xa.astype(jnp.float32)
            acc_s = acc_s + xs.astype(jnp.float32)
            acc_h = acc_h + xh.astype(jnp.float32)
            acc_v = acc_v + xv.astype(jnp.float32)
    return tuple(map(from_cm, (acc_a, acc_s, acc_h, acc_v)))


# -----------------------------------------------------------------------------
# Parameters: raw PyTorch-layout init + one-time prep (split concats / fold
# linear chains / cast to bf16).
# -----------------------------------------------------------------------------
def init_params(key, n_blocks, c, a):
    params = []
    for _ in range(n_blocks):
        key, *ks = jax.random.split(key, 18)

        def nrm(k, shape):
            return 0.1 * jax.random.normal(k, shape, jnp.float32)

        blk = {
            "ahv": {
                "epi_h": nrm(ks[0], (c, c, 1, a * a)),
                "epi_v": nrm(ks[1], (c, c, a * a, 1)),
                "eup": nrm(ks[2], (a * c, c, 1, 1)),
                "conv1": nrm(ks[3], (c, 3 * c, 1, 1)),
                "conv2": nrm(ks[4], (c, 2 * c, 1, 1)),
            },
            "shv": {
                "eup": nrm(ks[5], (a * c, c, 1, 1)),
                "epi_h": nrm(ks[6], (c, c, 1, a * a)),
                "epi_v": nrm(ks[7], (c, c, a * a, 1)),
                "conv1": nrm(ks[8], (c, 3 * c, 1, 1)),
                "conv2": nrm(ks[9], (c, 2 * c, 1, 1)),
            },
            "ashv": {
                "afe": nrm(ks[10], (c, c, a, a)),
                "aup": nrm(ks[11], (a * a * c, c, 1, 1)),
                "conv_h": nrm(ks[12], (c, c, 3, 3)),
                "conv_v": nrm(ks[13], (c, c, 3, 3)),
                "conv1": nrm(ks[14], (c, 2 * c, 1, 1)),
                "conv2": nrm(ks[15], (c, 2 * c, 1, 1)),
            },
        }
        params.append(blk)
    return params


def prepare_params(raw, c, a):
    """Split concat weights, pre-multiply linear chains, cast to bf16 ONCE."""
    def mat(w):
        return w.reshape(w.shape[0], -1)

    def bf(w):
        return w.astype(ACT_DTYPE)

    prepped = []
    for blk in raw:
        ahv, shv, ashv = blk["ahv"], blk["shv"], blk["ashv"]

        w1, w2 = mat(ahv["conv1"]), mat(ahv["conv2"])
        p_ahv = dict(
            w_eup=bf(mat(ahv["eup"])),
            w_epi_v=bf(mat(ahv["epi_v"])),
            w_epi_h=bf(mat(ahv["epi_h"])),
            w1_a=bf(w1[:, :c]), w1_ang2=bf(w1[:, c:2 * c]), w1_ang3=bf(w1[:, 2 * c:]),
            w2_buf=bf(w2[:, :c]), w2_x=bf(w2[:, c:]),
        )

        w1, w2 = mat(shv["conv1"]), mat(shv["conv2"])
        p_shv = dict(
            w_eup=bf(mat(shv["eup"])),
            w1_s=bf(w1[:, :c]), w1_spa2=bf(w1[:, c:2 * c]), w1_spa3=bf(w1[:, 2 * c:]),
            w2_x=bf(w2[:, c:]),
            # fold linear EPIConv -> conv2 chains (no intermediate activations)
            w2_epi_h_fold=bf(w2[:, :c] @ mat(shv["epi_h"])),
            w2_epi_v_fold=bf(w2[:, :c] @ mat(shv["epi_v"])),
        )

        w1, w2 = mat(ashv["conv1"]), mat(ashv["conv2"])
        p_ashv = dict(
            w1_x=bf(w1[:, :c]),
            w1_afe_fold=bf(w1[:, c:] @ mat(ashv["afe"])),  # fold AFE -> conv1
            w1_aup=bf(w1[:, c:]),
            w_aup=bf(mat(ashv["aup"])),
            w_conv_h=bf(mat(ashv["conv_h"])),
            w_conv_v=bf(mat(ashv["conv_v"])),
            w2_x=bf(w2[:, :c]), w2_map=bf(w2[:, c:]),
        )
        prepped.append(dict(ahv=p_ahv, shv=p_shv, ashv=p_ashv))
    return prepped


# -----------------------------------------------------------------------------
# Pure-JAX f32 reference (mirrors the PyTorch module) for a correctness check.
# -----------------------------------------------------------------------------
def _conv_ref(x, w, stride=(1, 1), padding=((0, 0), (0, 0))):
    return jax.lax.conv_general_dilated(
        x, w, window_strides=stride, padding=padding,
        dimension_numbers=("NCHW", "OIHW", "NCHW"),
        precision=jax.lax.Precision.HIGHEST)


def _ps1d_ref(x, f):
    b, fc, h, w = x.shape
    c = fc // f
    x = x.reshape(b, f, c, h, w).transpose(0, 2, 3, 4, 1)
    return x.reshape(b, c, h, w * f)


def _ps2d_ref(x, r):
    b, crr, h, w = x.shape
    c = crr // (r * r)
    x = x.reshape(b, c, r, r, h, w).transpose(0, 1, 4, 2, 5, 3)
    return x.reshape(b, c, h * r, w * r)


def _lrelu_ref(x):
    return jnp.where(x >= 0, x, 0.1 * x)


def _a_hv_ref(p, xa, xh, xv, a):
    pad = a * (a - 1) // 2
    ang2 = _lrelu_ref(_conv_ref(xh, p["epi_v"], (a, 1), ((pad, pad), (0, 0))))
    ang3 = _lrelu_ref(_conv_ref(xv, p["epi_h"], (1, a), ((0, 0), (pad, pad))))
    eup = lambda t: _ps1d_ref(_conv_ref(t, p["eup"]), a)
    beh = eup(xa)
    bev = jnp.transpose(eup(jnp.transpose(xa, (0, 1, 3, 2))), (0, 1, 3, 2))
    out_a = _lrelu_ref(_conv_ref(jnp.concatenate([xa, ang2, ang3], 1), p["conv1"])) + xa
    out_h = _lrelu_ref(_conv_ref(jnp.concatenate([bev, xh], 1), p["conv2"])) + xh
    out_v = _lrelu_ref(_conv_ref(jnp.concatenate([beh, xv], 1), p["conv2"])) + xv
    return out_a, out_h, out_v


def _s_hv_ref(p, xs, xh, xv, a):
    pad = a * (a - 1) // 2
    eup = lambda t: _ps1d_ref(_conv_ref(t, p["eup"]), a)
    spa2 = eup(xh)
    spa3 = jnp.transpose(eup(jnp.transpose(xv, (0, 1, 3, 2))), (0, 1, 3, 2))
    beh = _conv_ref(xs, p["epi_h"], (1, a), ((0, 0), (pad, pad)))
    bev = _conv_ref(xs, p["epi_v"], (a, 1), ((pad, pad), (0, 0)))
    out_s = _lrelu_ref(_conv_ref(jnp.concatenate([xs, spa2, spa3], 1), p["conv1"])) + xs
    out_h = _lrelu_ref(_conv_ref(jnp.concatenate([beh, xh], 1), p["conv2"])) + xh
    out_v = _lrelu_ref(_conv_ref(jnp.concatenate([bev, xv], 1), p["conv2"])) + xv
    return out_s, out_h, out_v


def _a_s_hv_ref(p, xa, xs, xh, xv, a):
    afe = _conv_ref(xs, p["afe"], (a, a))
    aup = _ps2d_ref(_conv_ref(xa, p["aup"]), a)
    out_a = _lrelu_ref(_conv_ref(jnp.concatenate([xa, afe], 1), p["conv1"])) + xa
    out_s = _lrelu_ref(_conv_ref(jnp.concatenate([xs, aup], 1), p["conv1"])) + xs
    map_h = jnp.transpose(_conv_ref(xv, p["conv_h"], (1, 1), ((1, 1), (1, 1))), (0, 1, 3, 2))
    map_v = jnp.transpose(_conv_ref(xh, p["conv_v"], (1, 1), ((1, 1), (1, 1))), (0, 1, 3, 2))
    out_h = _lrelu_ref(_conv_ref(jnp.concatenate([xh, map_h], 1), p["conv2"])) + xh
    out_v = _lrelu_ref(_conv_ref(jnp.concatenate([xv, map_v], 1), p["conv2"])) + xv
    return out_a, out_s, out_h, out_v


def cascade_ref(params, xa, xs, xh, xv, a, n_blocks):
    oa = os_ = oh = ov = None
    for i in range(n_blocks):
        p = params[i]
        xa, xh, xv = _a_hv_ref(p["ahv"], xa, xh, xv, a)
        xs, xh, xv = _s_hv_ref(p["shv"], xs, xh, xv, a)
        xa, xs, xh, xv = _a_s_hv_ref(p["ashv"], xa, xs, xh, xv, a)
        if i == 0:
            oa, os_, oh, ov = xa, xs, xh, xv
        else:
            oa, os_, oh, ov = oa + xa, os_ + xs, oh + xh, ov + xv
    return oa, os_, oh, ov


# -----------------------------------------------------------------------------
# Main
# -----------------------------------------------------------------------------
if __name__ == "__main__":
    angRes = 2
    n_blocks = 2
    channels = 16   # multiple of 16 so every bf16 output block is a dense packed tile
    b = 2
    h = w = 8       # spatial patch size of the "angular" stream (square)

    key = jax.random.PRNGKey(0)
    k1, k2, k3, k4, kp = jax.random.split(key, 5)
    # Stream shapes implied by the module's convolutions (NCHW):
    #   xa: [b, c, h, w]                 (angular)
    #   xs: [b, c, h*angRes, w*angRes]   (spatial)
    #   xh: [b, c, h*angRes, w]          (horizontal EPI)
    #   xv: [b, c, h, w*angRes]          (vertical EPI)
    xa = jax.random.normal(k1, (b, channels, h, w), jnp.float32)
    xs = jax.random.normal(k2, (b, channels, h * angRes, w * angRes), jnp.float32)
    xh = jax.random.normal(k3, (b, channels, h * angRes, w), jnp.float32)
    xv = jax.random.normal(k4, (b, channels, h, w * angRes), jnp.float32)

    raw_params = init_params(kp, n_blocks, channels, angRes)
    prepped = prepare_params(raw_params, channels, angRes)   # fold + bf16 cast once

    fwd = jax.jit(
        lambda prm, a_, s_, h_, v_: cascade_inter_block(
            prm, a_, s_, h_, v_, angRes, n_blocks
        )
    )
    out_a, out_s, out_h, out_v = fwd(prepped, xa, xs, xh, xv)
    jax.block_until_ready((out_a, out_s, out_h, out_v))

    assert out_a.shape == xa.shape
    assert out_s.shape == xs.shape
    assert out_h.shape == xh.shape
    assert out_v.shape == xv.shape

    # Correctness check against a pure-JAX f32 reference of the PyTorch module
    # (loose tolerance: activations are stored in bf16 between kernels).
    ref = jax.jit(
        lambda prm, a_, s_, h_, v_: cascade_ref(prm, a_, s_, h_, v_, angRes, n_blocks)
    )(raw_params, xa, xs, xh, xv)
    jax.block_until_ready(ref)
    for y, r in zip((out_a, out_s, out_h, out_v), ref):
        np.testing.assert_allclose(np.asarray(y), np.asarray(r), rtol=1e-1, atol=1e-1)

    print("KERNEL_OK")
</pallas_src>

<mosaic_0001>
module attributes {stable_mosaic.version = 11 : i64} {
  func.func @_heads_kernel(%arg0: i32, %arg1: memref<32x16xbf16, #tpu.memory_space<vmem>>, %arg2: memref<16x128xbf16, #tpu.memory_space<vmem>>, %arg3: memref<32x128xbf16, #tpu.memory_space<vmem>>) attributes {dimension_semantics = [#tpu.dimension_semantics<parallel>], iteration_bounds = array<i64: 1>, scalar_prefetch = 0 : i64, scratch_operands = 0 : i64, tpu.core_type = #tpu.core_type<tc>, window_params = [{pipeline_mode = #tpu.pipeline_mode<synchronous>, transform_indices = @transform_0, window_bounds = array<i64: 32, 16>}, {transform_indices = @transform_1, window_bounds = array<i64: 16, 128>}, {transform_indices = @transform_2, window_bounds = array<i64: 32, 128>}]} {
    %c0 = arith.constant 0 : index
    %c0_0 = arith.constant 0 : index
    %0 = vector.load %arg1[%c0, %c0_0] : memref<32x16xbf16, #tpu.memory_space<vmem>>, vector<32x16xbf16>
    %c0_1 = arith.constant 0 : index
    %c0_2 = arith.constant 0 : index
    %1 = vector.load %arg2[%c0_1, %c0_2] : memref<16x128xbf16, #tpu.memory_space<vmem>>, vector<16x128xbf16>
    %cst = arith.constant dense<0.000000e+00> : vector<32x128xf32>
    %2 = tpu.matmul %0, %1, %cst {dimension_numbers = #tpu.dot_dimension_numbers<[1], [0], [0], [1], [0, 0, 1, 1], [], []>} : vector<32x16xbf16>, vector<16x128xbf16>, vector<32x128xf32> -> vector<32x128xf32>
    %3 = arith.truncf %2 : vector<32x128xf32> to vector<32x128xbf16>
    %c0_3 = arith.constant 0 : index
    %c0_4 = arith.constant 0 : index
    %4 = vector.load %arg3[%c0_3, %c0_4] : memref<32x128xbf16, #tpu.memory_space<vmem>>, vector<32x128xbf16>
    tpu.vector_store %arg3[%c0_3, %c0_4], %3 {strides = array<i32>} : memref<32x128xbf16, #tpu.memory_space<vmem>>, vector<32x128xbf16>,
    return
  }
  func.func @transform_0(%arg0: i32) -> (i32, i32) {
    %c0_i32 = arith.constant 0 : i32
    %c0_i32_0 = arith.constant 0 : i32
    %c0_i32_1 = arith.constant 0 : i32
    return %c0_i32, %c0_i32_0 : i32, i32
  }
  func.func @transform_1(%arg0: i32) -> (i32, i32) {
    %c0_i32 = arith.constant 0 : i32
    %c0_i32_0 = arith.constant 0 : i32
    return %c0_i32, %arg0 : i32, i32
  }
  func.func @transform_2(%arg0: i32) -> (i32, i32) {
    %c0_i32 = arith.constant 0 : i32
    %c0_i32_0 = arith.constant 0 : i32
    return %c0_i32, %arg0 : i32, i32
  }
}

module attributes {stable_mosaic.version = 11 : i64} {
  func.func @_heads_kernel(%arg0: i32, %arg1: memref<16x16xbf16, #tpu.memory_space<vmem>>, %arg2: memref<16x16xbf16, #tpu.memory_space<vmem>>, %arg3: memref<16x128xbf16, #tpu.memory_space<vmem>>, %arg4: memref<16x128xbf16, #tpu.memory_space<vmem>>, %arg5: memref<16x128xbf16, #tpu.memory_space<vmem>>, %arg6: memref<16x128xbf16, #tpu.memory_space<vmem>>, %arg7: memref<16x128xbf16, #tpu.memory_space<vmem>>, %arg8: memref<16x128xbf16, #tpu.memory_space<vmem>>) attributes {dimension_semantics = [#tpu.dimension_semantics<parallel>], iteration_bounds = array<i64: 2>, scalar_prefetch = 0 : i64, scratch_operands = 0 : i64, tpu.core_type = #tpu.core_type<tc>, window_params = [{pipeline_mode = #tpu.pipeline_mode<synchronous>, transform_indices = @transform_0, window_bounds = array<i64: 16, 16>}, {pipeline_mode = #tpu.pipeline_mode<synchronous>, transform_indices = @transform_1, window_bounds = array<i64: 16, 16>}, {transform_indices = @transform_2, window_bounds = array<i64: 16, 128>}, {transform_indices = @transform_3, window_bounds = array<i64: 16, 128>}, {transform_indices = @transform_4, window_bounds = array<i64: 16, 128>}, {transform_indices = @transform_5, window_bounds = array<i64: 16, 128>}, {transform_indices = @transform_6, window_bounds = array<i64: 16, 128>}, {transform_indices = @transform_7, window_bounds = array<i64: 16, 128>}]} {
    %c0 = arith.constant 0 : index
    %c0_0 = arith.constant 0 : index
    %0 = vector.load %arg1[%c0, %c0_0] : memref<16x16xbf16, #tpu.memory_space<vmem>>, vector<16x16xbf16>
    %c0_1 = arith.constant 0 : index
    %c0_2 = arith.constant 0 : index
    %1 = vector.load %arg3[%c0_1, %c0_2] : memref<16x128xbf16, #tpu.memory_space<vmem>>, vector<16x128xbf16>
    %cst = arith.constant dense<0.000000e+00> : vector<16x128xf32>
    %2 = tpu.matmul %0, %1, %cst {dimension_numbers = #tpu.dot_dimension_numbers<[1], [0], [0], [1], [0, 0, 1, 1], [], []>} : vector<16x16xbf16>, vector<16x128xbf16>, vector<16x128xf32> -> vector<16x128xf32>
    %c0_3 = arith.constant 0 : index
    %c0_4 = arith.constant 0 : index
    %3 = vector.load %arg2[%c0_3, %c0_4] : memref<16x16xbf16, #tpu.memory_space<vmem>>, vector<16x16xbf16>
    %c0_5 = arith.constant 0 : index
    %c0_6 = arith.constant 0 : index
    %4 = vector.load %arg4[%c0_5, %c0_6] : memref<16x128xbf16, #tpu.memory_space<vmem>>, vector<16x128xbf16>
    %cst_7 = arith.constant dense<0.000000e+00> : vector<16x128xf32>
    %5 = tpu.matmul %3, %4, %cst_7 {dimension_numbers = #tpu.dot_dimension_numbers<[1], [0], [0], [1], [0, 0, 1, 1], [], []>} : vector<16x16xbf16>, vector<16x128xbf16>, vector<16x128xf32> -> vector<16x128xf32>
    %6 = arith.addf %2, %5 : vector<16x128xf32>
    %cst_8 = arith.constant 0.000000e+00 : f32
    %7 = vector.broadcast %cst_8 : f32 to vector<16x128xf32>
    %8 = arith.cmpf oge, %6, %7 : vector<16x128xf32>
    %cst_9 = arith.constant 1.000000e-01 : f32
    %9 = vector.broadcast %cst_9 : f32 to vector<16x128xf32>
    %10 = arith.mulf %9, %6 : vector<16x128xf32>
    %11 = arith.select %8, %6, %10 : vector<16x128xi1>, vector<16x128xf32>
    %c0_10 = arith.constant 0 : index
    %c0_11 = arith.constant 0 : index
    %12 = vector.load %arg4[%c0_10, %c0_11] : memref<16x128xbf16, #tpu.memory_space<vmem>>, vector<16x128xbf16>
    %13 = arith.extf %12 : vector<16x128xbf16> to vector<16x128xf32>
    %14 = arith.addf %11, %13 : vector<16x128xf32>
    %15 = arith.truncf %14 : vector<16x128xf32> to vector<16x128xbf16>
    %c0_12 = arith.constant 0 : index
    %c0_13 = arith.constant 0 : index
    %16 = vector.load %arg7[%c0_12, %c0_13] : memref<16x128xbf16, #tpu.memory_space<vmem>>, vector<16x128xbf16>
    tpu.vector_store %arg7[%c0_12, %c0_13], %15 {strides = array<i32>} : memref<16x128xbf16, #tpu.memory_space<vmem>>, vector<16x128xbf16>,
    %c0_14 = arith.constant 0 : index
    %c0_15 = arith.constant 0 : index
    %17 = vector.load %arg1[%c0_14, %c0_15] : memref<16x16xbf16, #tpu.memory_space<vmem>>, vector<16x16xbf16>
    %c0_16 = arith.constant 0 : index
    %c0_17 = arith.constant 0 : index
    %18 = vector.load %arg5[%c0_16, %c0_17] : memref<16x128xbf16, #tpu.memory_space<vmem>>, vector<16x128xbf16>
    %cst_18 = arith.constant dense<0.000000e+00> : vector<16x128xf32>
    %19 = tpu.matmul %17, %18, %cst_18 {dimension_numbers = #tpu.dot_dimension_numbers<[1], [0], [0], [1], [0, 0, 1, 1], [], []>} : vector<16x16xbf16>, vector<16x128xbf16>, vector<16x128xf32> -> vector<16x128xf32>
    %c0_19 = arith.constant 0 : index
    %c0_20 = arith.constant 0 : index
    %20 = vector.load %arg2[%c0_19, %c0_20] : memref<16x16xbf16, #tpu.memory_space<vmem>>, vector<16x16xbf16>
    %c0_21 = arith.constant 0 : index
    %c0_22 = arith.constant 0 : index
    %21 = vector.load %arg6[%c0_21, %c0_22] : memref<16x128xbf16, #tpu.memory_space<vmem>>, vector<16x128xbf16>
    %cst_23 = arith.constant dense<0.000000e+00> : vector<16x128xf32>
    %22 = tpu.matmul %20, %21, %cst_23 {dimension_numbers = #tpu.dot_dimension_numbers<[1], [0], [0], [1], [0, 0, 1, 1], [], []>} : vector<16x16xbf16>, vector<16x128xbf16>, vector<16x128xf32> -> vector<16x128xf32>
    %23 = arith.addf %19, %22 : vector<16x128xf32>
    %cst_24 = arith.constant 0.000000e+00 : f32
    %24 = vector.broadcast %cst_24 : f32 to vector<16x128xf32>
    %25 = arith.cmpf oge, %23, %24 : vector<16x128xf32>
    %cst_25 = arith.constant 1.000000e-01 : f32
    %26 = vector.broadcast %cst_25 : f32 to vector<16x128xf32>
    %27 = arith.mulf %26, %23 : vector<16x128xf32>
    %28 = arith.select %25, %23, %27 : vector<16x128xi1>, vector<16x128xf32>
    %c0_26 = arith.constant 0 : index
    %c0_27 = arith.constant 0 : index
    %29 = vector.load %arg6[%c0_26, %c0_27] : memref<16x128xbf16, #tpu.memory_space<vmem>>, vector<16x128xbf16>
    %30 = arith.extf %29 : vector<16x128xbf16> to vector<16x128xf32>
    %31 = arith.addf %28, %30 : vector<16x128xf32>
    %32 = arith.truncf %31 : vector<16x128xf32> to vector<16x128xbf16>
    %c0_28 = arith.constant 0 : index
    %c0_29 = arith.constant 0 : index
    %33 = vector.load %arg8[%c0_28, %c0_29] : memref<16x128xbf16, #tpu.memory_space<vmem>>, vector<16x128xbf16>
    tpu.vector_store %arg8[%c0_28, %c0_29], %32 {strides = array<i32>} : memref<16x128xbf16, #tpu.memory_space<vmem>>, vector<16x128xbf16>,
    return
  }
  func.func @transform_0(%arg0: i32) -> (i32, i32) {
    %c0_i32 = arith.constant 0 : i32
    %c0_i32_0 = arith.constant 0 : i32
    %c0_i32_1 = arith.constant 0 : i32
    return %c0_i32, %c0_i32_0 : i32, i32
  }
  func.func @transform_1(%arg0: i32) -> (i32, i32) {
    %c0_i32 = arith.constant 0 : i32
    %c0_i32_0 = arith.constant 0 : i32
    %c0_i32_1 = arith.constant 0 : i32
    return %c0_i32, %c0_i32_0 : i32, i32
  }
  func.func @transform_2(%arg0: i32) -> (i32, i32) {
    %c0_i32 = arith.constant 0 : i32
    %c0_i32_0 = arith.constant 0 : i32
    return %c0_i32, %arg0 : i32, i32
  }
  func.func @transform_3(%arg0: i32) -> (i32, i32) {
    %c0_i32 = arith.constant 0 : i32
    %c0_i32_0 = arith.constant 0 : i32
    return %c0_i32, %arg0 : i32, i32
  }
  func.func @transform_4(%arg0: i32) -> (i32, i32) {
    %c0_i32 = arith.constant 0 : i32
    %c0_i32_0 = arith.constant 0 : i32
    return %c0_i32, %arg0 : i32, i32
  }
  func.func @transform_5(%arg0: i32) -> (i32, i32) {
    %c0_i32 = arith.constant 0 : i32
    %c0_i32_0 = arith.constant 0 : i32
    return %c0_i32, %arg0 : i32, i32
  }
  func.func @transform_6(%arg0: i32) -> (i32, i32) {
    %c0_i32 = arith.constant 0 : i32
    %c0_i32_0 = arith.constant 0 : i32
    return %c0_i32, %arg0 : i32, i32
  }
  func.func @transform_7(%arg0: i32) -> (i32, i32) {
    %c0_i32 = arith.constant 0 : i32
    %c0_i32_0 = arith.constant 0 : i32
    return %c0_i32, %arg0 : i32, i32
  }
}

module attributes {stable_mosaic.version = 11 : i64} {
  func.func @_heads_kernel(%arg0: i32, %arg1: memref<16x64xbf16, #tpu.memory_space<vmem>>, %arg2: memref<16x16xbf16, #tpu.memory_space<vmem>>, %arg3: memref<16x64xbf16, #tpu.memory_space<vmem>>, %arg4: memref<64x128xbf16, #tpu.memory_space<vmem>>, %arg5: memref<16x128xbf16, #tpu.memory_space<vmem>>, %arg6: memref<64x128xbf16, #tpu.memory_space<vmem>>, %arg7: memref<16x128xbf16, #tpu.memory_space<vmem>>, %arg8: memref<16x128xbf16, #tpu.memory_space<vmem>>, %arg9: memref<16x128xbf16, #tpu.memory_space<vmem>>) attributes {dimension_semantics = [#tpu.dimension_semantics<parallel>], iteration_bounds = array<i64: 2>, scalar_prefetch = 0 : i64, scratch_operands = 0 : i64, tpu.core_type = #tpu.core_type<tc>, window_params = [{pipeline_mode = #tpu.pipeline_mode<synchronous>, transform_indices = @transform_0, window_bounds = array<i64: 16, 64>}, {pipeline_mode = #tpu.pipeline_mode<synchronous>, transform_indices = @transform_1, window_bounds = array<i64: 16, 16>}, {pipeline_mode = #tpu.pipeline_mode<synchronous>, transform_indices = @transform_2, window_bounds = array<i64: 16, 64>}, {transform_indices = @transform_3, window_bounds = array<i64: 64, 128>}, {transform_indices = @transform_4, window_bounds = array<i64: 16, 128>}, {transform_indices = @transform_5, window_bounds = array<i64: 64, 128>}, {transform_indices = @transform_6, window_bounds = array<i64: 16, 128>}, {transform_indices = @transform_7, window_bounds = array<i64: 16, 128>}, {transform_indices = @transform_8, window_bounds = array<i64: 16, 128>}]} {
    %c0 = arith.constant 0 : index
    %c0_0 = arith.constant 0 : index
    %0 = vector.load %arg1[%c0, %c0_0] : memref<16x64xbf16, #tpu.memory_space<vmem>>, vector<16x64xbf16>
    %c0_1 = arith.constant 0 : index
    %c0_2 = arith.constant 0 : index
    %1 = vector.load %arg4[%c0_1, %c0_2] : memref<64x128xbf16, #tpu.memory_space<vmem>>, vector<64x128xbf16>
    %cst = arith.constant dense<0.000000e+00> : vector<16x128xf32>
    %2 = tpu.matmul %0, %1, %cst {dimension_numbers = #tpu.dot_dimension_numbers<[1], [0], [0], [1], [0, 0, 1, 1], [], []>} : vector<16x64xbf16>, vector<64x128xbf16>, vector<16x128xf32> -> vector<16x128xf32>
    %c0_3 = arith.constant 0 : index
    %c0_4 = arith.constant 0 : index
    %3 = vector.load %arg2[%c0_3, %c0_4] : memref<16x16xbf16, #tpu.memory_space<vmem>>, vector<16x16xbf16>
    %c0_5 = arith.constant 0 : index
    %c0_6 = arith.constant 0 : index
    %4 = vector.load %arg5[%c0_5, %c0_6] : memref<16x128xbf16, #tpu.memory_space<vmem>>, vector<16x128xbf16>
    %cst_7 = arith.constant dense<0.000000e+00> : vector<16x128xf32>
    %5 = tpu.matmul %3, %4, %cst_7 {dimension_numbers = #tpu.dot_dimension_numbers<[1], [0], [0], [1], [0, 0, 1, 1], [], []>} : vector<16x16xbf16>, vector<16x128xbf16>, vector<16x128xf32> -> vector<16x128xf32>
    %6 = arith.addf %2, %5 : vector<16x128xf32>
    %cst_8 = arith.constant 0.000000e+00 : f32
    %7 = vector.broadcast %cst_8 : f32 to vector<16x128xf32>
    %8 = arith.cmpf oge, %6, %7 : vector<16x128xf32>
    %cst_9 = arith.constant 1.000000e-01 : f32
    %9 = vector.broadcast %cst_9 : f32 to vector<16x128xf32>
    %10 = arith.mulf %9, %6 : vector<16x128xf32>
    %11 = arith.select %8, %6, %10 : vector<16x128xi1>, vector<16x128xf32>
    %c0_10 = arith.constant 0 : index
    %c0_11 = arith.constant 0 : index
    %12 = vector.load %arg5[%c0_10, %c0_11] : memref<16x128xbf16, #tpu.memory_space<vmem>>, vector<16x128xbf16>
    %13 = arith.extf %12 : vector<16x128xbf16> to vector<16x128xf32>
    %14 = arith.addf %11, %13 : vector<16x128xf32>
    %15 = arith.truncf %14 : vector<16x128xf32> to vector<16x128xbf16>
    %c0_12 = arith.constant 0 : index
    %c0_13 = arith.constant 0 : index
    %16 = vector.load %arg8[%c0_12, %c0_13] : memref<16x128xbf16, #tpu.memory_space<vmem>>, vector<16x128xbf16>
    tpu.vector_store %arg8[%c0_12, %c0_13], %15 {strides = array<i32>} : memref<16x128xbf16, #tpu.memory_space<vmem>>, vector<16x128xbf16>,
    %c0_14 = arith.constant 0 : index
    %c0_15 = arith.constant 0 : index
    %17 = vector.load %arg3[%c0_14, %c0_15] : memref<16x64xbf16, #tpu.memory_space<vmem>>, vector<16x64xbf16>
    %c0_16 = arith.constant 0 : index
    %c0_17 = arith.constant 0 : index
    %18 = vector.load %arg6[%c0_16, %c0_17] : memref<64x128xbf16, #tpu.memory_space<vmem>>, vector<64x128xbf16>
    %cst_18 = arith.constant dense<0.000000e+00> : vector<16x128xf32>
    %19 = tpu.matmul %17, %18, %cst_18 {dimension_numbers = #tpu.dot_dimension_numbers<[1], [0], [0], [1], [0, 0, 1, 1], [], []>} : vector<16x64xbf16>, vector<64x128xbf16>, vector<16x128xf32> -> vector<16x128xf32>
    %c0_19 = arith.constant 0 : index
    %c0_20 = arith.constant 0 : index
    %20 = vector.load %arg2[%c0_19, %c0_20] : memref<16x16xbf16, #tpu.memory_space<vmem>>, vector<16x16xbf16>
    %c0_21 = arith.constant 0 : index
    %c0_22 = arith.constant 0 : index
    %21 = vector.load %arg7[%c0_21, %c0_22] : memref<16x128xbf16, #tpu.memory_space<vmem>>, vector<16x128xbf16>
    %cst_23 = arith.constant dense<0.000000e+00> : vector<16x128xf32>
    %22 = tpu.matmul %20, %21, %cst_23 {dimension_numbers = #tpu.dot_dimension_numbers<[1], [0], [0], [1], [0, 0, 1, 1], [], []>} : vector<16x16xbf16>, vector<16x128xbf16>, vector<16x128xf32> -> vector<16x128xf32>
    %23 = arith.addf %19, %22 : vector<16x128xf32>
    %cst_24 = arith.constant 0.000000e+00 : f32
    %24 = vector.broadcast %cst_24 : f32 to vector<16x128xf32>
    %25 = arith.cmpf oge, %23, %24 : vector<16x128xf32>
    %cst_25 = arith.constant 1.000000e-01 : f32
    %26 = vector.broadcast %cst_25 : f32 to vector<16x128xf32>
    %27 = arith.mulf %26, %23 : vector<16x128xf32>
    %28 = arith.select %25, %23, %27 : vector<16x128xi1>, vector<16x128xf32>
    %c0_26 = arith.constant 0 : index
    %c0_27 = arith.constant 0 : index
    %29 = vector.load %arg7[%c0_26, %c0_27] : memref<16x128xbf16, #tpu.memory_space<vmem>>, vector<16x128xbf16>
    %30 = arith.extf %29 : vector<16x128xbf16> to vector<16x128xf32>
    %31 = arith.addf %28, %30 : vector<16x128xf32>
    %32 = arith.truncf %31 : vector<16x128xf32> to vector<16x128xbf16>
    %c0_28 = arith.constant 0 : index
    %c0_29 = arith.constant 0 : index
    %33 = vector.load %arg9[%c0_28, %c0_29] : memref<16x128xbf16, #tpu.memory_space<vmem>>, vector<16x128xbf16>
    tpu.vector_store %arg9[%c0_28, %c0_29], %32 {strides = array<i32>} : memref<16x128xbf16, #tpu.memory_space<vmem>>, vector<16x128xbf16>,
    return
  }
  func.func @transform_0(%arg0: i32) -> (i32, i32) {
    %c0_i32 = arith.constant 0 : i32
    %c0_i32_0 = arith.constant 0 : i32
    %c0_i32_1 = arith.constant 0 : i32
    return %c0_i32, %c0_i32_0 : i32, i32
  }
  func.func @transform_1(%arg0: i32) -> (i32, i32) {
    %c0_i32 = arith.constant 0 : i32
    %c0_i32_0 = arith.constant 0 : i32
    %c0_i32_1 = arith.constant 0 : i32
    return %c0_i32, %c0_i32_0 : i32, i32
  }
  func.func @transform_2(%arg0: i32) -> (i32, i32) {
    %c0_i32 = arith.constant 0 : i32
    %c0_i32_0 = arith.constant 0 : i32
    %c0_i32_1 = arith.constant 0 : i32
    return %c0_i32, %c0_i32_0 : i32, i32
  }
  func.func @transform_3(%arg0: i32) -> (i32, i32) {
    %c0_i32 = arith.constant 0 : i32
    %c0_i32_0 = arith.constant 0 : i32
    return %c0_i32, %arg0 : i32, i32
  }
  func.func @transform_4(%arg0: i32) -> (i32, i32) {
    %c0_i32 = arith.constant 0 : i32
    %c0_i32_0 = arith.constant 0 : i32
    return %c0_i32, %arg0 : i32, i32
  }
  func.func @transform_5(%arg0: i32) -> (i32, i32) {
    %c0_i32 = arith.constant 0 : i32
    %c0_i32_0 = arith.constant 0 : i32
    return %c0_i32, %arg0 : i32, i32
  }
  func.func @transform_6(%arg0: i32) -> (i32, i32) {
    %c0_i32 = arith.constant 0 : i32
    %c0_i32_0 = arith.constant 0 : i32
    return %c0_i32, %arg0 : i32, i32
  }
  func.func @transform_7(%arg0: i32) -> (i32, i32) {
    %c0_i32 = arith.constant 0 : i32
    %c0_i32_0 = arith.constant 0 : i32
    return %c0_i32, %arg0 : i32, i32
  }
  func.func @transform_8(%arg0: i32) -> (i32, i32) {
    %c0_i32 = arith.constant 0 : i32
    %c0_i32_0 = arith.constant 0 : i32
    return %c0_i32, %arg0 : i32, i32
  }
}

module attributes {stable_mosaic.version = 11 : i64} {
  func.func @_heads_kernel(%arg0: i32, %arg1: memref<16x144xbf16, #tpu.memory_space<vmem>>, %arg2: memref<16x144xbf16, #tpu.memory_space<vmem>>, %arg3: memref<144x128xbf16, #tpu.memory_space<vmem>>, %arg4: memref<144x128xbf16, #tpu.memory_space<vmem>>, %arg5: memref<16x128xbf16, #tpu.memory_space<vmem>>, %arg6: memref<16x128xbf16, #tpu.memory_space<vmem>>) attributes {dimension_semantics = [#tpu.dimension_semantics<parallel>], iteration_bounds = array<i64: 2>, scalar_prefetch = 0 : i64, scratch_operands = 0 : i64, tpu.core_type = #tpu.core_type<tc>, window_params = [{pipeline_mode = #tpu.pipeline_mode<synchronous>, transform_indices = @transform_0, window_bounds = array<i64: 16, 144>}, {pipeline_mode = #tpu.pipeline_mode<synchronous>, transform_indices = @transform_1, window_bounds = array<i64: 16, 144>}, {transform_indices = @transform_2, window_bounds = array<i64: 144, 128>}, {transform_indices = @transform_3, window_bounds = array<i64: 144, 128>}, {transform_indices = @transform_4, window_bounds = array<i64: 16, 128>}, {transform_indices = @transform_5, window_bounds = array<i64: 16, 128>}]} {
    %c0 = arith.constant 0 : index
    %c0_0 = arith.constant 0 : index
    %0 = vector.load %arg1[%c0, %c0_0] : memref<16x144xbf16, #tpu.memory_space<vmem>>, vector<16x144xbf16>
    %c0_1 = arith.constant 0 : index
    %c0_2 = arith.constant 0 : index
    %1 = vector.load %arg3[%c0_1, %c0_2] : memref<144x128xbf16, #tpu.memory_space<vmem>>, vector<144x128xbf16>
    %cst = arith.constant dense<0.000000e+00> : vector<16x128xf32>
    %2 = tpu.matmul %0, %1, %cst {dimension_numbers = #tpu.dot_dimension_numbers<[1], [0], [0], [1], [0, 0, 1, 1], [], []>} : vector<16x144xbf16>, vector<144x128xbf16>, vector<16x128xf32> -> vector<16x128xf32>
    %3 = arith.truncf %2 : vector<16x128xf32> to vector<16x128xbf16>
    %c0_3 = arith.constant 0 : index
    %c0_4 = arith.constant 0 : index
    %4 = vector.load %arg5[%c0_3, %c0_4] : memref<16x128xbf16, #tpu.memory_space<vmem>>, vector<16x128xbf16>
    tpu.vector_store %arg5[%c0_3, %c0_4], %3 {strides = array<i32>} : memref<16x128xbf16, #tpu.memory_space<vmem>>, vector<16x128xbf16>,
    %c0_5 = arith.constant 0 : index
    %c0_6 = arith.constant 0 : index
    %5 = vector.load %arg2[%c0_5, %c0_6] : memref<16x144xbf16, #tpu.memory_space<vmem>>, vector<16x144xbf16>
    %c0_7 = arith.constant 0 : index
    %c0_8 = arith.constant 0 : index
    %6 = vector.load %arg4[%c0_7, %c0_8] : memref<144x128xbf16, #tpu.memory_space<vmem>>, vector<144x128xbf16>
    %cst_9 = arith.constant dense<0.000000e+00> : vector<16x128xf32>
    %7 = tpu.matmul %5, %6, %cst_9 {dimension_numbers = #tpu.dot_dimension_numbers<[1], [0], [0], [1], [0, 0, 1, 1], [], []>} : vector<16x144xbf16>, vector<144x128xbf16>, vector<16x128xf32> -> vector<16x128xf32>
    %8 = arith.truncf %7 : vector<16x128xf32> to vector<16x128xbf16>
    %c0_10 = arith.constant 0 : index
    %c0_11 = arith.constant 0 : index
    %9 = vector.load %arg6[%c0_10, %c0_11] : memref<16x128xbf16, #tpu.memory_space<vmem>>, vector<16x128xbf16>
    tpu.vector_store %arg6[%c0_10, %c0_11], %8 {strides = array<i32>} : memref<16x128xbf16, #tpu.memory_space<vmem>>, vector<16x128xbf16>,
    return
  }
  func.func @transform_0(%arg0: i32) -> (i32, i32) {
    %c0_i32 = arith.constant 0 : i32
    %c0_i32_0 = arith.constant 0 : i32
    %c0_i32_1 = arith.constant 0 : i32
    return %c0_i32, %c0_i32_0 : i32, i32
  }
  func.func @transform_1(%arg0: i32) -> (i32, i32) {
    %c0_i32 = arith.constant 0 : i32
    %c0_i32_0 = arith.constant 0 : i32
    %c0_i32_1 = arith.constant 0 : i32
    return %c0_i32, %c0_i32_0 : i32, i32
  }
  func.func @transform_2(%arg0: i32) -> (i32, i32) {
    %c0_i32 = arith.constant 0 : i32
    %c0_i32_0 = arith.constant 0 : i32
    return %c0_i32, %arg0 : i32, i32
  }
  func.func @transform_3(%arg0: i32) -> (i32, i32) {
    %c0_i32 = arith.constant 0 : i32
    %c0_i32_0 = arith.constant 0 : i32
    return %c0_i32, %arg0 : i32, i32
  }
  func.func @transform_4(%arg0: i32) -> (i32, i32) {
    %c0_i32 = arith.constant 0 : i32
    %c0_i32_0 = arith.constant 0 : i32
    return %c0_i32, %arg0 : i32, i32
  }
  func.func @transform_5(%arg0: i32) -> (i32, i32) {
    %c0_i32 = arith.constant 0 : i32
    %c0_i32_0 = arith.constant 0 : i32
    return %c0_i32, %arg0 : i32, i32
  }
}

module attributes {stable_mosaic.version = 11 : i64} {
  func.func @_heads_kernel(%arg0: i32, %arg1: memref<16x16xbf16, #tpu.memory_space<vmem>>, %arg2: memref<16x16xbf16, #tpu.memory_space<vmem>>, %arg3: memref<16x128xbf16, #tpu.memory_space<vmem>>, %arg4: memref<16x128xbf16, #tpu.memory_space<vmem>>, %arg5: memref<16x128xbf16, #tpu.memory_space<vmem>>, %arg6: memref<16x128xbf16, #tpu.memory_space<vmem>>, %arg7: memref<16x128xbf16, #tpu.memory_space<vmem>>, %arg8: memref<16x128xbf16, #tpu.memory_space<vmem>>) attributes {dimension_semantics = [#tpu.dimension_semantics<parallel>], iteration_bounds = array<i64: 2>, scalar_prefetch = 0 : i64, scratch_operands = 0 : i64, tpu.core_type = #tpu.core_type<tc>, window_params = [{pipeline_mode = #tpu.pipeline_mode<synchronous>, transform_indices = @transform_0, window_bounds = array<i64: 16, 16>}, {pipeline_mode = #tpu.pipeline_mode<synchronous>, transform_indices = @transform_1, window_bounds = array<i64: 16, 16>}, {transform_indices = @transform_2, window_bounds = array<i64: 16, 128>}, {transform_indices = @transform_3, window_bounds = array<i64: 16, 128>}, {transform_indices = @transform_4, window_bounds = array<i64: 16, 128>}, {transform_indices = @transform_5, window_bounds = array<i64: 16, 128>}, {transform_indices = @transform_6, window_bounds = array<i64: 16, 128>}, {transform_indices = @transform_7, window_bounds = array<i64: 16, 128>}]} {
    %c0 = arith.constant 0 : index
    %c0_0 = arith.constant 0 : index
    %0 = vector.load %arg1[%c0, %c0_0] : memref<16x16xbf16, #tpu.memory_space<vmem>>, vector<16x16xbf16>
    %c0_1 = arith.constant 0 : index
    %c0_2 = arith.constant 0 : index
    %1 = vector.load %arg3[%c0_1, %c0_2] : memref<16x128xbf16, #tpu.memory_space<vmem>>, vector<16x128xbf16>
    %cst = arith.constant dense<0.000000e+00> : vector<16x128xf32>
    %2 = tpu.matmul %0, %1, %cst {dimension_numbers = #tpu.dot_dimension_numbers<[1], [0], [0], [1], [0, 0, 1, 1], [], []>} : vector<16x16xbf16>, vector<16x128xbf16>, vector<16x128xf32> -> vector<16x128xf32>
    %c0_3 = arith.constant 0 : index
    %c0_4 = arith.constant 0 : index
    %3 = vector.load %arg2[%c0_3, %c0_4] : memref<16x16xbf16, #tpu.memory_space<vmem>>, vector<16x16xbf16>
    %c0_5 = arith.constant 0 : index
    %c0_6 = arith.constant 0 : index
    %4 = vector.load %arg4[%c0_5, %c0_6] : memref<16x128xbf16, #tpu.memory_space<vmem>>, vector<16x128xbf16>
    %cst_7 = arith.constant dense<0.000000e+00> : vector<16x128xf32>
    %5 = tpu.matmul %3, %4, %cst_7 {dimension_numbers = #tpu.dot_dimension_numbers<[1], [0], [0], [1], [0, 0, 1, 1], [], []>} : vector<16x16xbf16>, vector<16x128xbf16>, vector<16x128xf32> -> vector<16x128xf32>
    %6 = arith.addf %2, %5 : vector<16x128xf32>
    %cst_8 = arith.constant 0.000000e+00 : f32
    %7 = vector.broadcast %cst_8 : f32 to vector<16x128xf32>
    %8 = arith.cmpf oge, %6, %7 : vector<16x128xf32>
    %cst_9 = arith.constant 1.000000e-01 : f32
    %9 = vector.broadcast %cst_9 : f32 to vector<16x128xf32>
    %10 = arith.mulf %9, %6 : vector<16x128xf32>
    %11 = arith.select %8, %6, %10 : vector<16x128xi1>, vector<16x128xf32>
    %c0_10 = arith.constant 0 : index
    %c0_11 = arith.constant 0 : index
    %12 = vector.load %arg3[%c0_10, %c0_11] : memref<16x128xbf16, #tpu.memory_space<vmem>>, vector<16x128xbf16>
    %13 = arith.extf %12 : vector<16x128xbf16> to vector<16x128xf32>
    %14 = arith.addf %11, %13 : vector<16x128xf32>
    %15 = arith.truncf %14 : vector<16x128xf32> to vector<16x128xbf16>
    %c0_12 = arith.constant 0 : index
    %c0_13 = arith.constant 0 : index
    %16 = vector.load %arg7[%c0_12, %c0_13] : memref<16x128xbf16, #tpu.memory_space<vmem>>, vector<16x128xbf16>
    tpu.vector_store %arg7[%c0_12, %c0_13], %15 {strides = array<i32>} : memref<16x128xbf16, #tpu.memory_space<vmem>>, vector<16x128xbf16>,
    %c0_14 = arith.constant 0 : index
    %c0_15 = arith.constant 0 : index
    %17 = vector.load %arg1[%c0_14, %c0_15] : memref<16x16xbf16, #tpu.memory_space<vmem>>, vector<16x16xbf16>
    %c0_16 = arith.constant 0 : index
    %c0_17 = arith.constant 0 : index
    %18 = vector.load %arg5[%c0_16, %c0_17] : memref<16x128xbf16, #tpu.memory_space<vmem>>, vector<16x128xbf16>
    %cst_18 = arith.constant dense<0.000000e+00> : vector<16x128xf32>
    %19 = tpu.matmul %17, %18, %cst_18 {dimension_numbers = #tpu.dot_dimension_numbers<[1], [0], [0], [1], [0, 0, 1, 1], [], []>} : vector<16x16xbf16>, vector<16x128xbf16>, vector<16x128xf32> -> vector<16x128xf32>
    %c0_19 = arith.constant 0 : index
    %c0_20 = arith.constant 0 : index
    %20 = vector.load %arg2[%c0_19, %c0_20] : memref<16x16xbf16, #tpu.memory_space<vmem>>, vector<16x16xbf16>
    %c0_21 = arith.constant 0 : index
    %c0_22 = arith.constant 0 : index
    %21 = vector.load %arg6[%c0_21, %c0_22] : memref<16x128xbf16, #tpu.memory_space<vmem>>, vector<16x128xbf16>
    %cst_23 = arith.constant dense<0.000000e+00> : vector<16x128xf32>
    %22 = tpu.matmul %20, %21, %cst_23 {dimension_numbers = #tpu.dot_dimension_numbers<[1], [0], [0], [1], [0, 0, 1, 1], [], []>} : vector<16x16xbf16>, vector<16x128xbf16>, vector<16x128xf32> -> vector<16x128xf32>
    %23 = arith.addf %19, %22 : vector<16x128xf32>
    %cst_24 = arith.constant 0.000000e+00 : f32
    %24 = vector.broadcast %cst_24 : f32 to vector<16x128xf32>
    %25 = arith.cmpf oge, %23, %24 : vector<16x128xf32>
    %cst_25 = arith.constant 1.000000e-01 : f32
    %26 = vector.broadcast %cst_25 : f32 to vector<16x128xf32>
    %27 = arith.mulf %26, %23 : vector<16x128xf32>
    %28 = arith.select %25, %23, %27 : vector<16x128xi1>, vector<16x128xf32>
    %c0_26 = arith.constant 0 : index
    %c0_27 = arith.constant 0 : index
    %29 = vector.load %arg5[%c0_26, %c0_27] : memref<16x128xbf16, #tpu.memory_space<vmem>>, vector<16x128xbf16>
    %30 = arith.extf %29 : vector<16x128xbf16> to vector<16x128xf32>
    %31 = arith.addf %28, %30 : vector<16x128xf32>
    %32 = arith.truncf %31 : vector<16x128xf32> to vector<16x128xbf16>
    %c0_28 = arith.constant 0 : index
    %c0_29 = arith.constant 0 : index
    %33 = vector.load %arg8[%c0_28, %c0_29] : memref<16x128xbf16, #tpu.memory_space<vmem>>, vector<16x128xbf16>
    tpu.vector_store %arg8[%c0_28, %c0_29], %32 {strides = array<i32>} : memref<16x128xbf16, #tpu.memory_space<vmem>>, vector<16x128xbf16>,
    return
  }
  func.func @transform_0(%arg0: i32) -> (i32, i32) {
    %c0_i32 = arith.constant 0 : i32
    %c0_i32_0 = arith.constant 0 : i32
    %c0_i32_1 = arith.constant 0 : i32
    return %c0_i32, %c0_i32_0 : i32, i32
  }
  func.func @transform_1(%arg0: i32) -> (i32, i32) {
    %c0_i32 = arith.constant 0 : i32
    %c0_i32_0 = arith.constant 0 : i32
    %c0_i32_1 = arith.constant 0 : i32
    return %c0_i32, %c0_i32_0 : i32, i32
  }
  func.func @transform_2(%arg0: i32) -> (i32, i32) {
    %c0_i32 = arith.constant 0 : i32
    %c0_i32_0 = arith.constant 0 : i32
    return %c0_i32, %arg0 : i32, i32
  }
  func.func @transform_3(%arg0: i32) -> (i32, i32) {
    %c0_i32 = arith.constant 0 : i32
    %c0_i32_0 = arith.constant 0 : i32
    return %c0_i32, %arg0 : i32, i32
  }
  func.func @transform_4(%arg0: i32) -> (i32, i32) {
    %c0_i32 = arith.constant 0 : i32
    %c0_i32_0 = arith.constant 0 : i32
    return %c0_i32, %arg0 : i32, i32
  }
  func.func @transform_5(%arg0: i32) -> (i32, i32) {
    %c0_i32 = arith.constant 0 : i32
    %c0_i32_0 = arith.constant 0 : i32
    return %c0_i32, %arg0 : i32, i32
  }
  func.func @transform_6(%arg0: i32) -> (i32, i32) {
    %c0_i32 = arith.constant 0 : i32
    %c0_i32_0 = arith.constant 0 : i32
    return %c0_i32, %arg0 : i32, i32
  }
  func.func @transform_7(%arg0: i32) -> (i32, i32) {
    %c0_i32 = arith.constant 0 : i32
    %c0_i32_0 = arith.constant 0 : i32
    return %c0_i32, %arg0 : i32, i32
  }
}

module attributes {stable_mosaic.version = 11 : i64} {
  func.func @_heads_kernel(%arg0: i32, %arg1: memref<32x16xbf16, #tpu.memory_space<vmem>>, %arg2: memref<16x128xbf16, #tpu.memory_space<vmem>>, %arg3: memref<16x128xbf16, #tpu.memory_space<vmem>>, %arg4: memref<32x128xbf16, #tpu.memory_space<vmem>>, %arg5: memref<32x128xbf16, #tpu.memory_space<vmem>>) attributes {dimension_semantics = [#tpu.dimension_semantics<parallel>], iteration_bounds = array<i64: 2>, scalar_prefetch = 0 : i64, scratch_operands = 0 : i64, tpu.core_type = #tpu.core_type<tc>, window_params = [{pipeline_mode = #tpu.pipeline_mode<synchronous>, transform_indices = @transform_0, window_bounds = array<i64: 32, 16>}, {transform_indices = @transform_1, window_bounds = array<i64: 16, 128>}, {transform_indices = @transform_2, window_bounds = array<i64: 16, 128>}, {transform_indices = @transform_3, window_bounds = array<i64: 32, 128>}, {transform_indices = @transform_4, window_bounds = array<i64: 32, 128>}]} {
    %c0 = arith.constant 0 : index
    %c0_0 = arith.constant 0 : index
    %0 = vector.load %arg1[%c0, %c0_0] : memref<32x16xbf16, #tpu.memory_space<vmem>>, vector<32x16xbf16>
    %c0_1 = arith.constant 0 : index
    %c0_2 = arith.constant 0 : index
    %1 = vector.load %arg2[%c0_1, %c0_2] : memref<16x128xbf16, #tpu.memory_space<vmem>>, vector<16x128xbf16>
    %cst = arith.constant dense<0.000000e+00> : vector<32x128xf32>
    %2 = tpu.matmul %0, %1, %cst {dimension_numbers = #tpu.dot_dimension_numbers<[1], [0], [0], [1], [0, 0, 1, 1], [], []>} : vector<32x16xbf16>, vector<16x128xbf16>, vector<32x128xf32> -> vector<32x128xf32>
    %3 = arith.truncf %2 : vector<32x128xf32> to vector<32x128xbf16>
    %c0_3 = arith.constant 0 : index
    %c0_4 = arith.constant 0 : index
    %4 = vector.load %arg4[%c0_3, %c0_4] : memref<32x128xbf16, #tpu.memory_space<vmem>>, vector<32x128xbf16>
    tpu.vector_store %arg4[%c0_3, %c0_4], %3 {strides = array<i32>} : memref<32x128xbf16, #tpu.memory_space<vmem>>, vector<32x128xbf16>,
    %c0_5 = arith.constant 0 : index
    %c0_6 = arith.constant 0 : index
    %5 = vector.load %arg1[%c0_5, %c0_6] : memref<32x16xbf16, #tpu.memory_space<vmem>>, vector<32x16xbf16>
    %c0_7 = arith.constant 0 : index
    %c0_8 = arith.constant 0 : index
    %6 = vector.load %arg3[%c0_7, %c0_8] : memref<16x128xbf16, #tpu.memory_space<vmem>>, vector<16x128xbf16>
    %cst_9 = arith.constant dense<0.000000e+00> : vector<32x128xf32>
    %7 = tpu.matmul %5, %6, %cst_9 {dimension_numbers = #tpu.dot_dimension_numbers<[1], [0], [0], [1], [0, 0, 1, 1], [], []>} : vector<32x16xbf16>, vector<16x128xbf16>, vector<32x128xf32> -> vector<32x128xf32>
    %8 = arith.truncf %7 : vector<32x128xf32> to vector<32x128xbf16>
    %c0_10 = arith.constant 0 : index
    %c0_11 = arith.constant 0 : index
    %9 = vector.load %arg5[%c0_10, %c0_11] : memref<32x128xbf16, #tpu.memory_space<vmem>>, vector<32x128xbf16>
    tpu.vector_store %arg5[%c0_10, %c0_11], %8 {strides = array<i32>} : memref<32x128xbf16, #tpu.memory_space<vmem>>, vector<32x128xbf16>,
    return
  }
  func.func @transform_0(%arg0: i32) -> (i32, i32) {
    %c0_i32 = arith.constant 0 : i32
    %c0_i32_0 = arith.constant 0 : i32
    %c0_i32_1 = arith.constant 0 : i32
    return %c0_i32, %c0_i32_0 : i32, i32
  }
  func.func @transform_1(%arg0: i32) -> (i32, i32) {
    %c0_i32 = arith.constant 0 : i32
    %c0_i32_0 = arith.constant 0 : i32
    return %c0_i32, %arg0 : i32, i32
  }
  func.func @transform_2(%arg0: i32) -> (i32, i32) {
    %c0_i32 = arith.constant 0 : i32
    %c0_i32_0 = arith.constant 0 : i32
    return %c0_i32, %arg0 : i32, i32
  }
  func.func @transform_3(%arg0: i32) -> (i32, i32) {
    %c0_i32 = arith.constant 0 : i32
    %c0_i32_0 = arith.constant 0 : i32
    return %c0_i32, %arg0 : i32, i32
  }
  func.func @transform_4(%arg0: i32) -> (i32, i32) {
    %c0_i32 = arith.constant 0 : i32
    %c0_i32_0 = arith.constant 0 : i32
    return %c0_i32, %arg0 : i32, i32
  }
}

module attributes {stable_mosaic.version = 11 : i64} {
  func.func @_heads_kernel(%arg0: i32, %arg1: memref<16x16xbf16, #tpu.memory_space<vmem>>, %arg2: memref<16x16xbf16, #tpu.memory_space<vmem>>, %arg3: memref<16x16xbf16, #tpu.memory_space<vmem>>, %arg4: memref<16x128xbf16, #tpu.memory_space<vmem>>, %arg5: memref<16x128xbf16, #tpu.memory_space<vmem>>, %arg6: memref<16x128xbf16, #tpu.memory_space<vmem>>, %arg7: memref<16x128xbf16, #tpu.memory_space<vmem>>) attributes {dimension_semantics = [#tpu.dimension_semantics<parallel>], iteration_bounds = array<i64: 4>, scalar_prefetch = 0 : i64, scratch_operands = 0 : i64, tpu.core_type = #tpu.core_type<tc>, window_params = [{pipeline_mode = #tpu.pipeline_mode<synchronous>, transform_indices = @transform_0, window_bounds = array<i64: 16, 16>}, {pipeline_mode = #tpu.pipeline_mode<synchronous>, transform_indices = @transform_1, window_bounds = array<i64: 16, 16>}, {pipeline_mode = #tpu.pipeline_mode<synchronous>, transform_indices = @transform_2, window_bounds = array<i64: 16, 16>}, {transform_indices = @transform_3, window_bounds = array<i64: 16, 128>}, {transform_indices = @transform_4, window_bounds = array<i64: 16, 128>}, {transform_indices = @transform_5, window_bounds = array<i64: 16, 128>}, {transform_indices = @transform_6, window_bounds = array<i64: 16, 128>}]} {
    %c0 = arith.constant 0 : index
    %c0_0 = arith.constant 0 : index
    %0 = vector.load %arg1[%c0, %c0_0] : memref<16x16xbf16, #tpu.memory_space<vmem>>, vector<16x16xbf16>
    %c0_1 = arith.constant 0 : index
    %c0_2 = arith.constant 0 : index
    %1 = vector.load %arg4[%c0_1, %c0_2] : memref<16x128xbf16, #tpu.memory_space<vmem>>, vector<16x128xbf16>
    %cst = arith.constant dense<0.000000e+00> : vector<16x128xf32>
    %2 = tpu.matmul %0, %1, %cst {dimension_numbers = #tpu.dot_dimension_numbers<[1], [0], [0], [1], [0, 0, 1, 1], [], []>} : vector<16x16xbf16>, vector<16x128xbf16>, vector<16x128xf32> -> vector<16x128xf32>
    %c0_3 = arith.constant 0 : index
    %c0_4 = arith.constant 0 : index
    %3 = vector.load %arg2[%c0_3, %c0_4] : memref<16x16xbf16, #tpu.memory_space<vmem>>, vector<16x16xbf16>
    %c0_5 = arith.constant 0 : index
    %c0_6 = arith.constant 0 : index
    %4 = vector.load %arg5[%c0_5, %c0_6] : memref<16x128xbf16, #tpu.memory_space<vmem>>, vector<16x128xbf16>
    %cst_7 = arith.constant dense<0.000000e+00> : vector<16x128xf32>
    %5 = tpu.matmul %3, %4, %cst_7 {dimension_numbers = #tpu.dot_dimension_numbers<[1], [0], [0], [1], [0, 0, 1, 1], [], []>} : vector<16x16xbf16>, vector<16x128xbf16>, vector<16x128xf32> -> vector<16x128xf32>
    %6 = arith.addf %2, %5 : vector<16x128xf32>
    %c0_8 = arith.constant 0 : index
    %c0_9 = arith.constant 0 : index
    %7 = vector.load %arg3[%c0_8, %c0_9] : memref<16x16xbf16, #tpu.memory_space<vmem>>, vector<16x16xbf16>
    %c0_10 = arith.constant 0 : index
    %c0_11 = arith.constant 0 : index
    %8 = vector.load %arg6[%c0_10, %c0_11] : memref<16x128xbf16, #tpu.memory_space<vmem>>, vector<16x128xbf16>
    %cst_12 = arith.constant dense<0.000000e+00> : vector<16x128xf32>
    %9 = tpu.matmul %7, %8, %cst_12 {dimension_numbers = #tpu.dot_dimension_numbers<[1], [0], [0], [1], [0, 0, 1, 1], [], []>} : vector<16x16xbf16>, vector<16x128xbf16>, vector<16x128xf32> -> vector<16x128xf32>
    %10 = arith.addf %6, %9 : vector<16x128xf32>
    %cst_13 = arith.constant 0.000000e+00 : f32
    %11 = vector.broadcast %cst_13 : f32 to vector<16x128xf32>
    %12 = arith.cmpf oge, %10, %11 : vector<16x128xf32>
    %cst_14 = arith.constant 1.000000e-01 : f32
    %13 = vector.broadcast %cst_14 : f32 to vector<16x128xf32>
    %14 = arith.mulf %13, %10 : vector<16x128xf32>
    %15 = arith.select %12, %10, %14 : vector<16x128xi1>, vector<16x128xf32>
    %c0_15 = arith.constant 0 : index
    %c0_16 = arith.constant 0 : index
    %16 = vector.load %arg4[%c0_15, %c0_16] : memref<16x128xbf16, #tpu.memory_space<vmem>>, vector<16x128xbf16>
    %17 = arith.extf %16 : vector<16x128xbf16> to vector<16x128xf32>
    %18 = arith.addf %15, %17 : vector<16x128xf32>
    %19 = arith.truncf %18 : vector<16x128xf32> to vector<16x128xbf16>
    %c0_17 = arith.constant 0 : index
    %c0_18 = arith.constant 0 : index
    %20 = vector.load %arg7[%c0_17, %c0_18] : memref<16x128xbf16, #tpu.memory_space<vmem>>, vector<16x128xbf16>
    tpu.vector_store %arg7[%c0_17, %c0_18], %19 {strides = array<i32>} : memref<16x128xbf16, #tpu.memory_space<vmem>>, vector<16x128xbf16>,
    return
  }
  func.func @transform_0(%arg0: i32) -> (i32, i32) {
    %c0_i32 = arith.constant 0 : i32
    %c0_i32_0 = arith.constant 0 : i32
    %c0_i32_1 = arith.constant 0 : i32
    return %c0_i32, %c0_i32_0 : i32, i32
  }
  func.func @transform_1(%arg0: i32) -> (i32, i32) {
    %c0_i32 = arith.constant 0 : i32
    %c0_i32_0 = arith.constant 0 : i32
    %c0_i32_1 = arith.constant 0 : i32
    return %c0_i32, %c0_i32_0 : i32, i32
  }
  func.func @transform_2(%arg0: i32) -> (i32, i32) {
    %c0_i32 = arith.constant 0 : i32
    %c0_i32_0 = arith.constant 0 : i32
    %c0_i32_1 = arith.constant 0 : i32
    return %c0_i32, %c0_i32_0 : i32, i32
  }
  func.func @transform_3(%arg0: i32) -> (i32, i32) {
    %c0_i32 = arith.constant 0 : i32
    %c0_i32_0 = arith.constant 0 : i32
    return %c0_i32, %arg0 : i32, i32
  }
  func.func @transform_4(%arg0: i32) -> (i32, i32) {
    %c0_i32 = arith.constant 0 : i32
    %c0_i32_0 = arith.constant 0 : i32
    return %c0_i32, %arg0 : i32, i32
  }
  func.func @transform_5(%arg0: i32) -> (i32, i32) {
    %c0_i32 = arith.constant 0 : i32
    %c0_i32_0 = arith.constant 0 : i32
    return %c0_i32, %arg0 : i32, i32
  }
  func.func @transform_6(%arg0: i32) -> (i32, i32) {
    %c0_i32 = arith.constant 0 : i32
    %c0_i32_0 = arith.constant 0 : i32
    return %c0_i32, %arg0 : i32, i32
  }
}

module attributes {stable_mosaic.version = 11 : i64} {
  func.func @_heads_kernel(%arg0: i32, %arg1: memref<16x16xbf16, #tpu.memory_space<vmem>>, %arg2: memref<16x64xbf16, #tpu.memory_space<vmem>>, %arg3: memref<16x128xbf16, #tpu.memory_space<vmem>>, %arg4: memref<64x128xbf16, #tpu.memory_space<vmem>>, %arg5: memref<16x128xbf16, #tpu.memory_space<vmem>>) attributes {dimension_semantics = [#tpu.dimension_semantics<parallel>], iteration_bounds = array<i64: 1>, scalar_prefetch = 0 : i64, scratch_operands = 0 : i64, tpu.core_type = #tpu.core_type<tc>, window_params = [{pipeline_mode = #tpu.pipeline_mode<synchronous>, transform_indices = @transform_0, window_bounds = array<i64: 16, 16>}, {pipeline_mode = #tpu.pipeline_mode<synchronous>, transform_indices = @transform_1, window_bounds = array<i64: 16, 64>}, {transform_indices = @transform_2, window_bounds = array<i64: 16, 128>}, {transform_indices = @transform_3, window_bounds = array<i64: 64, 128>}, {transform_indices = @transform_4, window_bounds = array<i64: 16, 128>}]} {
    %c0 = arith.constant 0 : index
    %c0_0 = arith.constant 0 : index
    %0 = vector.load %arg1[%c0, %c0_0] : memref<16x16xbf16, #tpu.memory_space<vmem>>, vector<16x16xbf16>
    %c0_1 = arith.constant 0 : index
    %c0_2 = arith.constant 0 : index
    %1 = vector.load %arg3[%c0_1, %c0_2] : memref<16x128xbf16, #tpu.memory_space<vmem>>, vector<16x128xbf16>
    %cst = arith.constant dense<0.000000e+00> : vector<16x128xf32>
    %2 = tpu.matmul %0, %1, %cst {dimension_numbers = #tpu.dot_dimension_numbers<[1], [0], [0], [1], [0, 0, 1, 1], [], []>} : vector<16x16xbf16>, vector<16x128xbf16>, vector<16x128xf32> -> vector<16x128xf32>
    %c0_3 = arith.constant 0 : index
    %c0_4 = arith.constant 0 : index
    %3 = vector.load %arg2[%c0_3, %c0_4] : memref<16x64xbf16, #tpu.memory_space<vmem>>, vector<16x64xbf16>
    %c0_5 = arith.constant 0 : index
    %c0_6 = arith.constant 0 : index
    %4 = vector.load %arg4[%c0_5, %c0_6] : memref<64x128xbf16, #tpu.memory_space<vmem>>, vector<64x128xbf16>
    %cst_7 = arith.constant dense<0.000000e+00> : vector<16x128xf32>
    %5 = tpu.matmul %3, %4, %cst_7 {dimension_numbers = #tpu.dot_dimension_numbers<[1], [0], [0], [1], [0, 0, 1, 1], [], []>} : vector<16x64xbf16>, vector<64x128xbf16>, vector<16x128xf32> -> vector<16x128xf32>
    %6 = arith.addf %2, %5 : vector<16x128xf32>
    %cst_8 = arith.constant 0.000000e+00 : f32
    %7 = vector.broadcast %cst_8 : f32 to vector<16x128xf32>
    %8 = arith.cmpf oge, %6, %7 : vector<16x128xf32>
    %cst_9 = arith.constant 1.000000e-01 : f32
    %9 = vector.broadcast %cst_9 : f32 to vector<16x128xf32>
    %10 = arith.mulf %9, %6 : vector<16x128xf32>
    %11 = arith.select %8, %6, %10 : vector<16x128xi1>, vector<16x128xf32>
    %c0_10 = arith.constant 0 : index
    %c0_11 = arith.constant 0 : index
    %12 = vector.load %arg3[%c0_10, %c0_11] : memref<16x128xbf16, #tpu.memory_space<vmem>>, vector<16x128xbf16>
    %13 = arith.extf %12 : vector<16x128xbf16> to vector<16x128xf32>
    %14 = arith.addf %11, %13 : vector<16x128xf32>
    %15 = arith.truncf %14 : vector<16x128xf32> to vector<16x128xbf16>
    %c0_12 = arith.constant 0 : index
    %c0_13 = arith.constant 0 : index
    %16 = vector.load %arg5[%c0_12, %c0_13] : memref<16x128xbf16, #tpu.memory_space<vmem>>, vector<16x128xbf16>
    tpu.vector_store %arg5[%c0_12, %c0_13], %15 {strides = array<i32>} : memref<16x128xbf16, #tpu.memory_space<vmem>>, vector<16x128xbf16>,
    return
  }
  func.func @transform_0(%arg0: i32) -> (i32, i32) {
    %c0_i32 = arith.constant 0 : i32
    %c0_i32_0 = arith.constant 0 : i32
    %c0_i32_1 = arith.constant 0 : i32
    return %c0_i32, %c0_i32_0 : i32, i32
  }
  func.func @transform_1(%arg0: i32) -> (i32, i32) {
    %c0_i32 = arith.constant 0 : i32
    %c0_i32_0 = arith.constant 0 : i32
    %c0_i32_1 = arith.constant 0 : i32
    return %c0_i32, %c0_i32_0 : i32, i32
  }
  func.func @transform_2(%arg0: i32) -> (i32, i32) {
    %c0_i32 = arith.constant 0 : i32
    %c0_i32_0 = arith.constant 0 : i32
    return %c0_i32, %arg0 : i32, i32
  }
  func.func @transform_3(%arg0: i32) -> (i32, i32) {
    %c0_i32 = arith.constant 0 : i32
    %c0_i32_0 = arith.constant 0 : i32
    return %c0_i32, %arg0 : i32, i32
  }
  func.func @transform_4(%arg0: i32) -> (i32, i32) {
    %c0_i32 = arith.constant 0 : i32
    %c0_i32_0 = arith.constant 0 : i32
    return %c0_i32, %arg0 : i32, i32
  }
}

module attributes {stable_mosaic.version = 11 : i64} {
  func.func @_heads_kernel(%arg0: i32, %arg1: memref<16x16xbf16, #tpu.memory_space<vmem>>, %arg2: memref<16x16xbf16, #tpu.memory_space<vmem>>, %arg3: memref<16x64xbf16, #tpu.memory_space<vmem>>, %arg4: memref<16x16xbf16, #tpu.memory_space<vmem>>, %arg5: memref<16x64xbf16, #tpu.memory_space<vmem>>, %arg6: memref<16x128xbf16, #tpu.memory_space<vmem>>, %arg7: memref<64x128xbf16, #tpu.memory_space<vmem>>, %arg8: memref<64x128xbf16, #tpu.memory_space<vmem>>, %arg9: memref<16x128xbf16, #tpu.memory_space<vmem>>) attributes {dimension_semantics = [#tpu.dimension_semantics<parallel>], iteration_bounds = array<i64: 1>, scalar_prefetch = 0 : i64, scratch_operands = 0 : i64, tpu.core_type = #tpu.core_type<tc>, window_params = [{pipeline_mode = #tpu.pipeline_mode<synchronous>, transform_indices = @transform_0, window_bounds = array<i64: 16, 16>}, {pipeline_mode = #tpu.pipeline_mode<synchronous>, transform_indices = @transform_1, window_bounds = array<i64: 16, 16>}, {pipeline_mode = #tpu.pipeline_mode<synchronous>, transform_indices = @transform_2, window_bounds = array<i64: 16, 64>}, {pipeline_mode = #tpu.pipeline_mode<synchronous>, transform_indices = @transform_3, window_bounds = array<i64: 16, 16>}, {pipeline_mode = #tpu.pipeline_mode<synchronous>, transform_indices = @transform_4, window_bounds = array<i64: 16, 64>}, {transform_indices = @transform_5, window_bounds = array<i64: 16, 128>}, {transform_indices = @transform_6, window_bounds = array<i64: 64, 128>}, {transform_indices = @transform_7, window_bounds = array<i64: 64, 128>}, {transform_indices = @transform_8, window_bounds = array<i64: 16, 128>}]} {
    %c0 = arith.constant 0 : index
    %c0_0 = arith.constant 0 : index
    %0 = vector.load %arg1[%c0, %c0_0] : memref<16x16xbf16, #tpu.memory_space<vmem>>, vector<16x16xbf16>
    %c0_1 = arith.constant 0 : index
    %c0_2 = arith.constant 0 : index
    %1 = vector.load %arg6[%c0_1, %c0_2] : memref<16x128xbf16, #tpu.memory_space<vmem>>, vector<16x128xbf16>
    %cst = arith.constant dense<0.000000e+00> : vector<16x128xf32>
    %2 = tpu.matmul %0, %1, %cst {dimension_numbers = #tpu.dot_dimension_numbers<[1], [0], [0], [1], [0, 0, 1, 1], [], []>} : vector<16x16xbf16>, vector<16x128xbf16>, vector<16x128xf32> -> vector<16x128xf32>
    %c0_3 = arith.constant 0 : index
    %c0_4 = arith.constant 0 : index
    %3 = vector.load %arg3[%c0_3, %c0_4] : memref<16x64xbf16, #tpu.memory_space<vmem>>, vector<16x64xbf16>
    %c0_5 = arith.constant 0 : index
    %c0_6 = arith.constant 0 : index
    %4 = vector.load %arg7[%c0_5, %c0_6] : memref<64x128xbf16, #tpu.memory_space<vmem>>, vector<64x128xbf16>
    %cst_7 = arith.constant dense<0.000000e+00> : vector<16x128xf32>
    %5 = tpu.matmul %3, %4, %cst_7 {dimension_numbers = #tpu.dot_dimension_numbers<[1], [0], [0], [1], [0, 0, 1, 1], [], []>} : vector<16x64xbf16>, vector<64x128xbf16>, vector<16x128xf32> -> vector<16x128xf32>
    %cst_8 = arith.constant 0.000000e+00 : f32
    %6 = vector.broadcast %cst_8 : f32 to vector<16x128xf32>
    %7 = arith.cmpf oge, %5, %6 : vector<16x128xf32>
    %cst_9 = arith.constant 1.000000e-01 : f32
    %8 = vector.broadcast %cst_9 : f32 to vector<16x128xf32>
    %9 = arith.mulf %8, %5 : vector<16x128xf32>
    %10 = arith.select %7, %5, %9 : vector<16x128xi1>, vector<16x128xf32>
    %c0_10 = arith.constant 0 : index
    %c0_11 = arith.constant 0 : index
    %11 = vector.load %arg2[%c0_10, %c0_11] : memref<16x16xbf16, #tpu.memory_space<vmem>>, vector<16x16xbf16>
    %12 = arith.truncf %10 : vector<16x128xf32> to vector<16x128xbf16>
    %cst_12 = arith.constant dense<0.000000e+00> : vector<16x128xf32>
    %13 = tpu.matmul %11, %12, %cst_12 {dimension_numbers = #tpu.dot_dimension_numbers<[1], [0], [0], [1], [0, 0, 1, 1], [], []>} : vector<16x16xbf16>, vector<16x128xbf16>, vector<16x128xf32> -> vector<16x128xf32>
    %14 = arith.addf %2, %13 : vector<16x128xf32>
    %c0_13 = arith.constant 0 : index
    %c0_14 = arith.constant 0 : index
    %15 = vector.load %arg5[%c0_13, %c0_14] : memref<16x64xbf16, #tpu.memory_space<vmem>>, vector<16x64xbf16>
    %c0_15 = arith.constant 0 : index
    %c0_16 = arith.constant 0 : index
    %16 = vector.load %arg8[%c0_15, %c0_16] : memref<64x128xbf16, #tpu.memory_space<vmem>>, vector<64x128xbf16>
    %cst_17 = arith.constant dense<0.000000e+00> : vector<16x128xf32>
    %17 = tpu.matmul %15, %16, %cst_17 {dimension_numbers = #tpu.dot_dimension_numbers<[1], [0], [0], [1], [0, 0, 1, 1], [], []>} : vector<16x64xbf16>, vector<64x128xbf16>, vector<16x128xf32> -> vector<16x128xf32>
    %cst_18 = arith.constant 0.000000e+00 : f32
    %18 = vector.broadcast %cst_18 : f32 to vector<16x128xf32>
    %19 = arith.cmpf oge, %17, %18 : vector<16x128xf32>
    %cst_19 = arith.constant 1.000000e-01 : f32
    %20 = vector.broadcast %cst_19 : f32 to vector<16x128xf32>
    %21 = arith.mulf %20, %17 : vector<16x128xf32>
    %22 = arith.select %19, %17, %21 : vector<16x128xi1>, vector<16x128xf32>
    %c0_20 = arith.constant 0 : index
    %c0_21 = arith.constant 0 : index
    %23 = vector.load %arg4[%c0_20, %c0_21] : memref<16x16xbf16, #tpu.memory_space<vmem>>, vector<16x16xbf16>
    %24 = arith.truncf %22 : vector<16x128xf32> to vector<16x128xbf16>
    %cst_22 = arith.constant dense<0.000000e+00> : vector<16x128xf32>
    %25 = tpu.matmul %23, %24, %cst_22 {dimension_numbers = #tpu.dot_dimension_numbers<[1], [0], [0], [1], [0, 0, 1, 1], [], []>} : vector<16x16xbf16>, vector<16x128xbf16>, vector<16x128xf32> -> vector<16x128xf32>
    %26 = arith.addf %14, %25 : vector<16x128xf32>
    %cst_23 = arith.constant 0.000000e+00 : f32
    %27 = vector.broadcast %cst_23 : f32 to vector<16x128xf32>
    %28 = arith.cmpf oge, %26, %27 : vector<16x128xf32>
    %cst_24 = arith.constant 1.000000e-01 : f32
    %29 = vector.broadcast %cst_24 : f32 to vector<16x128xf32>
    %30 = arith.mulf %29, %26 : vector<16x128xf32>
    %31 = arith.select %28, %26, %30 : vector<16x128xi1>, vector<16x128xf32>
    %c0_25 = arith.constant 0 : index
    %c0_26 = arith.constant 0 : index
    %32 = vector.load %arg6[%c0_25, %c0_26] : memref<16x128xbf16, #tpu.memory_space<vmem>>, vector<16x128xbf16>
    %33 = arith.extf %32 : vector<16x128xbf16> to vector<16x128xf32>
    %34 = arith.addf %31, %33 : vector<16x128xf32>
    %35 = arith.truncf %34 : vector<16x128xf32> to vector<16x128xbf16>
    %c0_27 = arith.constant 0 : index
    %c0_28 = arith.constant 0 : index
    %36 = vector.load %arg9[%c0_27, %c0_28] : memref<16x128xbf16, #tpu.memory_space<vmem>>, vector<16x128xbf16>
    tpu.vector_store %arg9[%c0_27, %c0_28], %35 {strides = array<i32>} : memref<16x128xbf16, #tpu.memory_space<vmem>>, vector<16x128xbf16>,
    return
  }
  func.func @transform_0(%arg0: i32) -> (i32, i32) {
    %c0_i32 = arith.constant 0 : i32
    %c0_i32_0 = arith.constant 0 : i32
    %c0_i32_1 = arith.constant 0 : i32
    return %c0_i32, %c0_i32_0 : i32, i32
  }
  func.func @transform_1(%arg0: i32) -> (i32, i32) {
    %c0_i32 = arith.constant 0 : i32
    %c0_i32_0 = arith.constant 0 : i32
    %c0_i32_1 = arith.constant 0 : i32
    return %c0_i32, %c0_i32_0 : i32, i32
  }
  func.func @transform_2(%arg0: i32) -> (i32, i32) {
    %c0_i32 = arith.constant 0 : i32
    %c0_i32_0 = arith.constant 0 : i32
    %c0_i32_1 = arith.constant 0 : i32
    return %c0_i32, %c0_i32_0 : i32, i32
  }
  func.func @transform_3(%arg0: i32) -> (i32, i32) {
    %c0_i32 = arith.constant 0 : i32
    %c0_i32_0 = arith.constant 0 : i32
    %c0_i32_1 = arith.constant 0 : i32
    return %c0_i32, %c0_i32_0 : i32, i32
  }
  func.func @transform_4(%arg0: i32) -> (i32, i32) {
    %c0_i32 = arith.constant 0 : i32
    %c0_i32_0 = arith.constant 0 : i32
    %c0_i32_1 = arith.constant 0 : i32
    return %c0_i32, %c0_i32_0 : i32, i32
  }
  func.func @transform_5(%arg0: i32) -> (i32, i32) {
    %c0_i32 = arith.constant 0 : i32
    %c0_i32_0 = arith.constant 0 : i32
    return %c0_i32, %arg0 : i32, i32
  }
  func.func @transform_6(%arg0: i32) -> (i32, i32) {
    %c0_i32 = arith.constant 0 : i32
    %c0_i32_0 = arith.constant 0 : i32
    return %c0_i32, %arg0 : i32, i32
  }
  func.func @transform_7(%arg0: i32) -> (i32, i32) {
    %c0_i32 = arith.constant 0 : i32
    %c0_i32_0 = arith.constant 0 : i32
    return %c0_i32, %arg0 : i32, i32
  }
  func.func @transform_8(%arg0: i32) -> (i32, i32) {
    %c0_i32 = arith.constant 0 : i32
    %c0_i32_0 = arith.constant 0 : i32
    return %c0_i32, %arg0 : i32, i32
  }
}

module attributes {stable_mosaic.version = 11 : i64} {
  func.func @_heads_kernel(%arg0: i32, %arg1: memref<64x16xbf16, #tpu.memory_space<vmem>>, %arg2: memref<16x128xbf16, #tpu.memory_space<vmem>>, %arg3: memref<64x128xbf16, #tpu.memory_space<vmem>>) attributes {dimension_semantics = [#tpu.dimension_semantics<parallel>], iteration_bounds = array<i64: 1>, scalar_prefetch = 0 : i64, scratch_operands = 0 : i64, tpu.core_type = #tpu.core_type<tc>, window_params = [{pipeline_mode = #tpu.pipeline_mode<synchronous>, transform_indices = @transform_0, window_bounds = array<i64: 64, 16>}, {transform_indices = @transform_1, window_bounds = array<i64: 16, 128>}, {transform_indices = @transform_2, window_bounds = array<i64: 64, 128>}]} {
    %c0 = arith.constant 0 : index
    %c0_0 = arith.constant 0 : index
    %0 = vector.load %arg1[%c0, %c0_0] : memref<64x16xbf16, #tpu.memory_space<vmem>>, vector<64x16xbf16>
    %c0_1 = arith.constant 0 : index
    %c0_2 = arith.constant 0 : index
    %1 = vector.load %arg2[%c0_1, %c0_2] : memref<16x128xbf16, #tpu.memory_space<vmem>>, vector<16x128xbf16>
    %cst = arith.constant dense<0.000000e+00> : vector<64x128xf32>
    %2 = tpu.matmul %0, %1, %cst {dimension_numbers = #tpu.dot_dimension_numbers<[1], [0], [0], [1], [0, 0, 1, 1], [], []>} : vector<64x16xbf16>, vector<16x128xbf16>, vector<64x128xf32> -> vector<64x128xf32>
    %3 = arith.truncf %2 : vector<64x128xf32> to vector<64x128xbf16>
    %c0_3 = arith.constant 0 : index
    %c0_4 = arith.constant 0 : index
    %4 = vector.load %arg3[%c0_3, %c0_4] : memref<64x128xbf16, #tpu.memory_space<vmem>>, vector<64x128xbf16>
    tpu.vector_store %arg3[%c0_3, %c0_4], %3 {strides = array<i32>} : memref<64x128xbf16, #tpu.memory_space<vmem>>, vector<64x128xbf16>,
    return
  }
  func.func @transform_0(%arg0: i32) -> (i32, i32) {
    %c0_i32 = arith.constant 0 : i32
    %c0_i32_0 = arith.constant 0 : i32
    %c0_i32_1 = arith.constant 0 : i32
    return %c0_i32, %c0_i32_0 : i32, i32
  }
  func.func @transform_1(%arg0: i32) -> (i32, i32) {
    %c0_i32 = arith.constant 0 : i32
    %c0_i32_0 = arith.constant 0 : i32
    return %c0_i32, %arg0 : i32, i32
  }
  func.func @transform_2(%arg0: i32) -> (i32, i32) {
    %c0_i32 = arith.constant 0 : i32
    %c0_i32_0 = arith.constant 0 : i32
    return %c0_i32, %arg0 : i32, i32
  }
}

module attributes {stable_mosaic.version = 11 : i64} {
  func.func @_heads_kernel(%arg0: i32, %arg1: memref<16x16xbf16, #tpu.memory_space<vmem>>, %arg2: memref<16x16xbf16, #tpu.memory_space<vmem>>, %arg3: memref<16x128xbf16, #tpu.memory_space<vmem>>, %arg4: memref<16x128xbf16, #tpu.memory_space<vmem>>, %arg5: memref<16x128xbf16, #tpu.memory_space<vmem>>) attributes {dimension_semantics = [#tpu.dimension_semantics<parallel>], iteration_bounds = array<i64: 4>, scalar_prefetch = 0 : i64, scratch_operands = 0 : i64, tpu.core_type = #tpu.core_type<tc>, window_params = [{pipeline_mode = #tpu.pipeline_mode<synchronous>, transform_indices = @transform_0, window_bounds = array<i64: 16, 16>}, {pipeline_mode = #tpu.pipeline_mode<synchronous>, transform_indices = @transform_1, window_bounds = array<i64: 16, 16>}, {transform_indices = @transform_2, window_bounds = array<i64: 16, 128>}, {transform_indices = @transform_3, window_bounds = array<i64: 16, 128>}, {transform_indices = @transform_4, window_bounds = array<i64: 16, 128>}]} {
    %c0 = arith.constant 0 : index
    %c0_0 = arith.constant 0 : index
    %0 = vector.load %arg1[%c0, %c0_0] : memref<16x16xbf16, #tpu.memory_space<vmem>>, vector<16x16xbf16>
    %c0_1 = arith.constant 0 : index
    %c0_2 = arith.constant 0 : index
    %1 = vector.load %arg3[%c0_1, %c0_2] : memref<16x128xbf16, #tpu.memory_space<vmem>>, vector<16x128xbf16>
    %cst = arith.constant dense<0.000000e+00> : vector<16x128xf32>
    %2 = tpu.matmul %0, %1, %cst {dimension_numbers = #tpu.dot_dimension_numbers<[1], [0], [0], [1], [0, 0, 1, 1], [], []>} : vector<16x16xbf16>, vector<16x128xbf16>, vector<16x128xf32> -> vector<16x128xf32>
    %c0_3 = arith.constant 0 : index
    %c0_4 = arith.constant 0 : index
    %3 = vector.load %arg2[%c0_3, %c0_4] : memref<16x16xbf16, #tpu.memory_space<vmem>>, vector<16x16xbf16>
    %c0_5 = arith.constant 0 : index
    %c0_6 = arith.constant 0 : index
    %4 = vector.load %arg4[%c0_5, %c0_6] : memref<16x128xbf16, #tpu.memory_space<vmem>>, vector<16x128xbf16>
    %cst_7 = arith.constant dense<0.000000e+00> : vector<16x128xf32>
    %5 = tpu.matmul %3, %4, %cst_7 {dimension_numbers = #tpu.dot_dimension_numbers<[1], [0], [0], [1], [0, 0, 1, 1], [], []>} : vector<16x16xbf16>, vector<16x128xbf16>, vector<16x128xf32> -> vector<16x128xf32>
    %6 = arith.addf %2, %5 : vector<16x128xf32>
    %cst_8 = arith.constant 0.000000e+00 : f32
    %7 = vector.broadcast %cst_8 : f32 to vector<16x128xf32>
    %8 = arith.cmpf oge, %6, %7 : vector<16x128xf32>
    %cst_9 = arith.constant 1.000000e-01 : f32
    %9 = vector.broadcast %cst_9 : f32 to vector<16x128xf32>
    %10 = arith.mulf %9, %6 : vector<16x128xf32>
    %11 = arith.select %8, %6, %10 : vector<16x128xi1>, vector<16x128xf32>
    %c0_10 = arith.constant 0 : index
    %c0_11 = arith.constant 0 : index
    %12 = vector.load %arg3[%c0_10, %c0_11] : memref<16x128xbf16, #tpu.memory_space<vmem>>, vector<16x128xbf16>
    %13 = arith.extf %12 : vector<16x128xbf16> to vector<16x128xf32>
    %14 = arith.addf %11, %13 : vector<16x128xf32>
    %15 = arith.truncf %14 : vector<16x128xf32> to vector<16x128xbf16>
    %c0_12 = arith.constant 0 : index
    %c0_13 = arith.constant 0 : index
    %16 = vector.load %arg5[%c0_12, %c0_13] : memref<16x128xbf16, #tpu.memory_space<vmem>>, vector<16x128xbf16>
    tpu.vector_store %arg5[%c0_12, %c0_13], %15 {strides = array<i32>} : memref<16x128xbf16, #tpu.memory_space<vmem>>, vector<16x128xbf16>,
    return
  }
  func.func @transform_0(%arg0: i32) -> (i32, i32) {
    %c0_i32 = arith.constant 0 : i32
    %c0_i32_0 = arith.constant 0 : i32
    %c0_i32_1 = arith.constant 0 : i32
    return %c0_i32, %c0_i32_0 : i32, i32
  }
  func.func @transform_1(%arg0: i32) -> (i32, i32) {
    %c0_i32 = arith.constant 0 : i32
    %c0_i32_0 = arith.constant 0 : i32
    %c0_i32_1 = arith.constant 0 : i32
    return %c0_i32, %c0_i32_0 : i32, i32
  }
  func.func @transform_2(%arg0: i32) -> (i32, i32) {
    %c0_i32 = arith.constant 0 : i32
    %c0_i32_0 = arith.constant 0 : i32
    return %c0_i32, %arg0 : i32, i32
  }
  func.func @transform_3(%arg0: i32) -> (i32, i32) {
    %c0_i32 = arith.constant 0 : i32
    %c0_i32_0 = arith.constant 0 : i32
    return %c0_i32, %arg0 : i32, i32
  }
  func.func @transform_4(%arg0: i32) -> (i32, i32) {
    %c0_i32 = arith.constant 0 : i32
    %c0_i32_0 = arith.constant 0 : i32
    return %c0_i32, %arg0 : i32, i32
  }
}

</mosaic_0001>

<bundles_post_ra>
// kernel: _lambda_.22
= control target key start
LH: loop header
LB: loop body
LE: loop exit
PB: predicated region body
PF: predicated region fallthrough
CT: control target
= control target key end

     0   :  { %7 = vsyncpa [#allocation3], 0  ;;  %s335_s0 = inlined_call_operand.hbm [shape: bf16[32,16], index: 0, kind: input, shape index: {}]   ;;  %s336_s1 = inlined_call_operand.hbm [shape: bf16[16,128], index: 1, kind: input, shape index: {}]   ;;  %s337_s2 = inlined_call_operand.hbm [shape: bf16[32,128], index: 2, kind: output, shape index: {}]  }
   0x1   :  { %8 = vsyncpa [#allocation6], 0 }
   0x2   :  { %9 = vsyncpa [#allocation4], 0  ;;  %s270_s9 = smov [#allocation2]   ;;  %s198_s13 = scalar_lea.hbm %s335_s0, 256 }
   0x3   :  { %s15_s10 = sshll.u32 %s270_s9, 4  ;;  %p199_p0 = scmp.ne.s32.totalorder %s335_s0, %s198_s13  ;;  %s16_s10 = int_to_ptr.vmem [resolvable:$true] %s15_s10 }
   0x4   :  { %p202_p1 = scmp.lt.u32.totalorder %s198_s13, %s335_s0 }
   0x6   :  { %p204_p2 = pnand %p202_p1, %p199_p0 }
   0x8   :  { %207 = shalt.err (!%p204_p2)
}
   0x9   :  { %s208_s18 = scalar_lea.vmem %s16_s10, 256  ;;  %p213_p4 = scmp.lt.s32.totalorder %s16_s10, %s16_s10 }
   0xa   :  { %p209_p3 = scmp.ne.s32.totalorder %s16_s10, %s208_s18  ;;  %p214_p5 = scmp.lt.s32.totalorder %s208_s18, %s208_s18 }
   0xc   :  { %p215_p6 = por %p214_p5, %p213_p4 }
   0xe   :  { %p216_p7 = pnand %p215_p6, %p209_p3 }
  0x10   :  { %219 = shalt.err (!%p216_p7)
}
  0x11   :  { %s271_s19 = smov 64   ;;  %s272_s20 = smov 4  }
  0x12   :  { %21 = dma.hbm_to_vmem [thread:$0]  %s335_s0, 256, %s16_s10, [#allocation3], %s271_s19, %s271_s19, %s272_s20  }
  0x13   :  { %s273_s23 = smov [#allocation5]   ;;  %s220_s27 = scalar_lea.hbm %s336_s1, 128 }
  0x14   :  { %s27_s24 = sshll.u32 %s273_s23, 4  ;;  %p221_p8 = scmp.ne.s32.totalorder %s336_s1, %s220_s27  ;;  %s28_s24 = int_to_ptr.vmem [resolvable:$true] %s27_s24 }
  0x15   :  { %p224_p9 = scmp.lt.u32.totalorder %s220_s27, %s336_s1 }
  0x17   :  { %p226_p10 = pnand %p224_p9, %p221_p8 }
  0x19   :  { %229 = shalt.err (!%p226_p10)
}
  0x1a   :  { %s230_s4 = scalar_lea.vmem %s28_s24, 128  ;;  %p235_p12 = scmp.lt.s32.totalorder %s28_s24, %s28_s24 }
  0x1b   :  { %p231_p11 = scmp.ne.s32.totalorder %s28_s24, %s230_s4  ;;  %p236_p13 = scmp.lt.s32.totalorder %s230_s4, %s230_s4 }
  0x1d   :  { %p237_p0 = por %p236_p13, %p235_p12 }
  0x1f   :  { %p238_p1 = pnand %p237_p0, %p231_p11 }
  0x21   :  { %241 = shalt.err (!%p238_p1)
}
  0x22   :  { %33 = dma.hbm_to_vmem [thread:$0]  %s336_s1, 128, %s28_s24, [#allocation6], %s271_s19, %s271_s19, %s272_s20  }
  0x23   :  { %264 = dma.done.wait [#allocation3], 256  }
  0x24   :  { %265 = vsyncadd [#allocation3], 4294967040 }
  0x25   :  { %266 = dma.done.wait [#allocation6], 128  }
  0x26   :  { %267 = vsyncadd [#allocation6], 4294967168  ;;  %v195_v0 = vld [vmem:[#allocation5] sm:$0xff]   ;;  %vm63_vm0 = vcmask 130048   ;;  %v196_v1 = vld [vmem:[#allocation2] sm:$0xff]   ;;  %s274_s6 = smov [#allocation7]  }
  0x27   :  { %184 = vmatprep.subr.bf16.mxu0 %v195_v0  ;;  %v197_v2 = vld [vmem:[#allocation2 + $0x8] sm:$0xff]   ;;  %186 = vmatprep.mubr.msk.bf16.mxu0 %vm63_vm0, %v196_v1  ;;  %s144_s7 = sshll.u32 %s274_s6, 4  ;;  %s145_s7 = int_to_ptr.vmem [resolvable:$true] %s144_s7 }
  0x28   :  { %185 = vmatpush3.bf16.msra.mxu0 %v195_v0  ;;  %s242_s1 = scalar_lea.vmem %s145_s7, 256  ;;  %p247_p3 = scmp.lt.s32.totalorder %s145_s7, %s145_s7 }
  0x29   :  { %p243_p2 = scmp.ne.s32.totalorder %s145_s7, %s242_s1  ;;  %p248_p4 = scmp.lt.s32.totalorder %s242_s1, %s242_s1 }
  0x2b   :  { %187 = vmatmul.mubr.msk.bf16.vlgmr.msra.gmra.mrb[0].mxu0 %vm63_vm0, %v197_v2  ;;  %p249_p5 = por %p248_p4, %p247_p3 }
  0x2d   :  { %p250_p6 = pnand %p249_p5, %p243_p2 }
  0xfe   :  { %v188_v3 = vpop.f32.mrb[0].mxu0 }
  0xff   :  { %v104_v4 = vpop.f32.mrb[1].mxu0 }
 0x100   :  { %v189_v5 = vpop.f32.mrb[2].mxu0 }
 0x101   :  { %v178_v6 = vpack.c.bf16 %v189_v5, %v188_v3  ;;  %v107_v7 = vpop.f32.mrb[3].mxu0 }
 0x102   :  { %v173_v8 = vpack.c.bf16 %v107_v7, %v104_v4 }
 0x103   :  { %180 = vst [vmem:[#allocation7 + $0x8] sm:$0xff] %v178_v6  }
 0x104   :  { %174 = vst [vmem:[#allocation7] sm:$0xff] %v173_v8  }
 0x105   :  { %253 = shalt.err (!%p250_p6)
}
 0x106   :  { %s254_s10 = scalar_lea.hbm %s337_s2, 256 }
 0x107   :  { %p255_p7 = scmp.ne.s32.totalorder %s337_s2, %s254_s10  ;;  %p258_p8 = scmp.lt.u32.totalorder %s254_s10, %s337_s2 }
 0x109   :  { %p260_p9 = pnand %p258_p8, %p255_p7 }
 0x10b   :  { %263 = shalt.err (!%p260_p9)
}
 0x10c   :  { %150 = dma.vmem_to_hbm [thread:$0]  %s145_s7, 256, %s337_s2, [#allocation4], %s271_s19, %s271_s19, %s272_s20  }
 0x10d   :  { %268 = dma.done.wait [#allocation4], 256  }
 0x10e   :  { %269 = vsyncadd [#allocation4], 4294967040 }
 0x10f   :  { %154 = vsyncpa [#allocation3], 1 }
 0x110   :  { %155 = vsyncpa [#allocation6], 1 }
 0x111   :  { %156 = vsyncpa [#allocation4], 1 }

// kernel: _lambda_.24
= control target key start
LH: loop header
LB: loop body
LE: loop exit
PB: predicated region body
PF: predicated region fallthrough
CT: control target
= control target key end

     0   :  { %s1882_s0 = inlined_call_operand.hbm [shape: bf16[16,16], index: 0, kind: input, shape index: {}]   ;;  %s1883_s1 = inlined_call_operand.hbm [shape: bf16[16,16], index: 1, kind: input, shape index: {}]   ;;  %s1884_s2 = inlined_call_operand.hbm [shape: bf16[16,256], index: 2, kind: input, shape index: {}]   ;;  %s1885_s3 = inlined_call_operand.hbm [shape: bf16[16,256], index: 3, kind: input, shape index: {}]   ;;  %s1886_s4 = inlined_call_operand.hbm [shape: bf16[16,256], index: 4, kind: input, shape index: {}]   ;;  %s1887_s5 = inlined_call_operand.hbm [shape: bf16[16,256], index: 5, kind: input, shape index: {}]   ;;  %s1888_s6 = inlined_call_operand.hbm [shape: bf16[16,256], index: 6, kind: output, shape index: {0}]   ;;  %s1889_s7 = inlined_call_operand.hbm [shape: bf16[16,256], index: 7, kind: output, shape index: {1}]  }
   0x1   :  { %1913 = sst [smem:[#allocation25_spill]] %s1882_s0 }
   0x2   :  { %1914 = sst [smem:[#allocation26_spill]] %s1884_s2 }
   0x3   :  { %1915 = sst [smem:[#allocation27_spill]] %s1885_s3 }
   0x4   :  { %1916 = sst [smem:[#allocation28_spill]] %s1889_s7 }
   0x5   :  { %13 = vsyncpa [#allocation3], 0 }
   0x6   :  { %14 = vsyncpa [#allocation6], 0 }
   0x7   :  { %15 = vsyncpa [#allocation4], 0 }
   0x8   :  { %17 = vsyncpa [#allocation4 + $0x1], 0 }
   0x9   :  { %18 = vsyncpa [#allocation13], 0 }
   0xa   :  { %20 = vsyncpa [#allocation13 + $0x1], 0  ;;  %s1480_s24 = smov 0   ;;  %s1482_s25 = smov 0  }
   0xb   :  { %s1484_s26 = smov 0   ;;  %s1486_s27 = smov 0  }
   0xc LB: > { %1917 = sst [smem:[#allocation19_spill]] %s1410_s24  ;;  %s1501_s28 = sadd.s32 4294967295, %s1422_s27   ;;  %s1422_s27 = sphi %s1486_s27, %s1957_s27   ;;  %s1418_s26 = sphi %s1484_s26, %s1959_s26   ;;  %s1414_s25 = sphi %s1482_s25, %s1961_s25   ;;  %s1410_s24 = sphi %s1480_s24, %s1960_s24  }
   0xd   : > { %1918 = sst [smem:[#allocation20_spill]] %s1418_s26  ;;  %s937_s29 = sadd.s32 4294967294, %s1422_s27  }
   0xe   : > { %1919 = sst [smem:[#allocation21_spill]] %s1422_s27  ;;  %s1505_s30 = sadd.s32 1, %s1422_s27  }
   0xf   : > { %1920 = sst [smem:[#allocation22_spill]] %s1505_s30  ;;  %s75_s8 = sadd.s32 1, %s1418_s26 }
  0x10   : > { %s72_s9 = ssub.s32 %s1422_s27, %s1505_s30  ;;  %p82_p0 = scmp.ne.s32.totalorder %s1418_s26, %s1414_s25 }
  0x11   : > { %p73_p1 = scmp.eq.s32.totalorder %s72_s9, 0  ;;  %p83_p2 = scmp.eq.s32.totalorder %s1422_s27, 0 }
  0x12   : > { %p88_p3 = scmp.ne.s32.totalorder %s1414_s25, %s1410_s24  ;;  %p1890_p4 = scmp.eq.s32.totalorder %s1501_s28, 0 }
  0x13   : > { %s1517_s10 = scalar_select %p73_p1, %s1418_s26, %s75_s8  }
  0x14   : > { %p1519_p5 = por %p83_p2, %p82_p0  ;;  %p1525_p6 = por %p1890_p4, %p88_p3 }
  0x15   : > { %1921 = sst [smem:[#allocation23_spill]] %s1517_s10  ;;  %p190_p7 = scmp.eq.s32.totalorder %s1501_s28, 1 }
  0x16   : > { %s1922_s11 = scalar_select %p1519_p5, 1, 0 }
  0x17   : > { %s1923_s12 = scalar_select %p1525_p6, 1, 0 }
  0x18   : > { %p196_p8 = scmp.eq.s32.totalorder %s937_s29, 1  ;;  %p938_p9 = scmp.ge.s32.totalorder %s1422_s27, 1 }
  0x19   : > { %p229_p10 = scmp.lt.s32.totalorder %s1422_s27, 3  ;;  %p1532_p11 = por %p190_p7, %p82_p0 }
  0x1a   : > { %p1536_p12 = por %p196_p8, %p88_p3  ;;  %s1424_s16 = smov [#allocation2]  }
  0x1b   : > { %s1924_s13 = scalar_select %p1532_p11, 1, 0 }
  0x1c   : > { %s1925_s14 = scalar_select %p1536_p12, 1, 0 }
  0x1d   : > { %p1540_p13 = pnand %p938_p9, %p229_p10  ;;  %s241_s17 = sshll.u32 %s1424_s16, 4  ;;  %s242_s17 = int_to_ptr.vmem [resolvable:$true] %s241_s17 }
  0x1e   : > { %1926 = sst [smem:[#allocation24_spill]] %s1925_s14  ;;  %s268_s19 = sand.u32 1, %s1422_s27  }
  0x1f   : > { %s1927_s15 = scalar_select %p1540_p13, 1, 0 }
  0x20   : > { %p1055_p1 = pneg %p1540_p13  ;;  %s1929_s0 = sld [smem:[#allocation25_spill]] }
  0x22   : > { %p1548_p2 = pnand %p1055_p1, %p1890_p4 }
  0x24   : > { %s1928_s18 = scalar_select %p1548_p2, 1, 0 }
  0x25   : > { %p1901_p8 = pneg %p1548_p2 }
  0x26   : > { %s1140_s22 = scalar_lea.hbm %s1929_s0, 128 }
  0x27   : > { %p1141_p7 = scmp.ne.s32.totalorder %s1929_s0, %s1140_s22  ;;  %p1147_p1 = scmp.lt.u32.totalorder %s1140_s22, %s1929_s0 }
  0x29   : > { %p1143_p9 = pnand %p1901_p8, %p1141_p7 }
  0x2b   : > { %p1144_p10 = pneg %p1143_p9 }
  0x2d   : > { %p1149_p0 = pnand %p1147_p1, %p1144_p10 }
  0x2f   : > { %1152 = shalt.err (!%p1149_p0)
}
  0x30   : > { %s1153_s16 = scalar_lea.vmem %s242_s17, 128  ;;  %p1161_p11 = scmp.lt.s32.totalorder %s242_s17, %s242_s17 }
  0x31   : > { %p1154_p4 = scmp.ne.s32.totalorder %s242_s17, %s1153_s16  ;;  %p1162_p6 = scmp.lt.s32.totalorder %s1153_s16, %s1153_s16 }
  0x33   : > { %p1156_p3 = pnand %p1154_p4, %p1901_p8  ;;  %p1163_p13 = por %p1162_p6, %p1161_p11 }
  0x35   : > { %p1157_p12 = pneg %p1156_p3 }
  0x37   : > { %p1164_p5 = pnand %p1163_p13, %p1157_p12 }
  0x39   : > { %1167 = shalt.err (!%p1164_p5)
}
  0x3a   : > { %s1897_s20 = smov 64   ;;  %s1899_s21 = smov 4  }
  0x3b   : > { %1058 = dma.hbm_to_vmem [thread:$0]  (!%p1548_p2), %s1929_s0, 128, %s242_s17, [#allocation3], %s1897_s20, %s1897_s20, %s1899_s21  }
  0x3c   : > { %p1930_p4 = scmp.ne.s32.totalorder %s1922_s11, 0  ;;  %p1931_p0 = scmp.lt.s32.totalorder %s1422_s27, 2 }
  0x3d   : > { %s270_s8 = sand.u32 1, %s1418_s26   ;;  %s1592_s16 = sshll.u32 %s1422_s27, 6 }
  0x3e   : > { %p1584_p6 = pnand %p1931_p0, %p1930_p4  ;;  %s1589_s9 = sshll.u32 %s270_s8, 3 }
  0x3f   : > { %s1933_s2 = sld [smem:[#allocation26_spill]]  ;;  %s272_s11 = scalar_lea.vmem [#allocation7], %s1589_s9 }
  0x40   : > { %s1932_s29 = scalar_select %p1584_p6, 1, 0 }
  0x41   : > { %s278_s17 = sshll.u32 %s272_s11, 4  ;;  %s1603_s22 = scalar_lea.sflag [#allocation3], %s268_s19  ;;  %s1601_s17 = int_to_ptr.vmem [resolvable:$true] %s278_s17 }
  0x42   : > { %p1609_p11 = pneg %p1584_p6 }
  0x44   : > { %s1934_s8 = scalar_select %p1609_p11, 1, 0 }
  0x45   : > { %s1598_s14 = scalar_lea.hbm %s1933_s2, %s1592_s16  ;;  %s1173_s20 = scalar_lea.hbm %s1933_s2, 256 }
  0x46   : > { %s1168_s23 = scalar_lea.hbm %s1598_s14, 128  ;;  %p1174_p3 = scmp.lt.u32.totalorder %s1598_s14, %s1933_s2 }
  0x47   : > { %p1169_p5 = scmp.ne.s32.totalorder %s1598_s14, %s1168_s23  ;;  %p1175_p7 = scmp.lt.u32.totalorder %s1173_s20, %s1168_s23 }
  0x48   : > { %p1177_p10 = scmp.lt.u32.totalorder %s1168_s23, %s1598_s14 }
  0x49   : > { %p1171_p12 = pnand %p1609_p11, %p1169_p5  ;;  %p1176_p9 = por %p1175_p7, %p1174_p3 }
  0x4b   : > { %p1172_p13 = pneg %p1171_p12  ;;  %p1178_p1 = por %p1177_p10, %p1176_p9 }
  0x4d   : > { %p1179_p4 = pnand %p1178_p1, %p1172_p13 }
  0x4f   : > { %1182 = shalt.err (!%p1179_p4)
}
  0x50   : > { %s1183_s19 = scalar_lea.vmem %s1601_s17, 128  ;;  %s1427_s30 = smov [#allocation7]  }
  0x51   : > { %p1184_p0 = scmp.ne.s32.totalorder %s1601_s17, %s1183_s19  ;;  %s1188_s10 = sshll.u32 %s1427_s30, 4  ;;  %s1189_s10 = int_to_ptr.vmem [resolvable:$false] %s1188_s10 }
  0x52   : > { %s1190_s21 = scalar_lea.vmem %s1189_s10, 256  ;;  %p1191_p8 = scmp.lt.s32.totalorder %s1601_s17, %s1189_s10 }
  0x53   : > { %p1186_p5 = pnand %p1184_p0, %p1609_p11  ;;  %p1192_p2 = scmp.lt.s32.totalorder %s1190_s21, %s1183_s19 }
  0x55   : > { %p1187_p12 = pneg %p1186_p5  ;;  %p1193_p3 = por %p1192_p2, %p1191_p8 }
  0x57   : > { %p1194_p7 = pnand %p1193_p3, %p1187_p12 }
  0x59   : > { %1197 = shalt.err (!%p1194_p7)
}
  0x5a   : > { %s1907_s20 = smov 128   ;;  %s1935_s23 = smov 4  }
  0x5b   : > { %s1936_s11 = smov 64   ;;  %s1937_s3 = sld [smem:[#allocation27_spill]] }
  0x5c   : > { %1065 = dma.hbm_to_vmem [thread:$0]  (!%p1584_p6), %s1598_s14, 128, %s1601_s17, %s1603_s22, %s1907_s20, %s1936_s11, %s1935_s23  }
  0x5d   : > { %s292_s21 = scalar_lea.vmem [#allocation8], %s1589_s9  ;;  %s1649_s27 = scalar_lea.hbm %s1886_s4, %s1592_s16 }
  0x5e   : > { %s298_s0 = sshll.u32 %s292_s21, 4  ;;  %s1643_s0 = int_to_ptr.vmem [resolvable:$true] %s298_s0 }
  0x61   : > { %s1640_s19 = scalar_lea.hbm %s1937_s3, %s1592_s16  ;;  %s1203_s30 = scalar_lea.hbm %s1937_s3, 256 }
  0x62   : > { %s1198_s24 = scalar_lea.hbm %s1640_s19, 128  ;;  %p1204_p9 = scmp.lt.u32.totalorder %s1640_s19, %s1937_s3 }
  0x63   : > { %p1199_p2 = scmp.ne.s32.totalorder %s1640_s19, %s1198_s24  ;;  %p1205_p10 = scmp.lt.u32.totalorder %s1203_s30, %s1198_s24 }
  0x64   : > { %p1207_p4 = scmp.lt.u32.totalorder %s1198_s24, %s1640_s19 }
  0x65   : > { %p1201_p8 = pnand %p1199_p2, %p1609_p11  ;;  %p1206_p1 = por %p1205_p10, %p1204_p9 }
  0x67   : > { %p1202_p13 = pneg %p1201_p8  ;;  %p1208_p0 = por %p1207_p4, %p1206_p1 }
  0x69   : > { %p1209_p5 = pnand %p1208_p0, %p1202_p13 }
  0x6b   : > { %1212 = shalt.err (!%p1209_p5)
}
  0x6c   : > { %s1213_s2 = scalar_lea.vmem %s1643_s0, 128  ;;  %s1429_s26 = smov [#allocation8]  }
  0x6d   : > { %p1214_p12 = scmp.ne.s32.totalorder %s1643_s0, %s1213_s2  ;;  %s1218_s21 = sshll.u32 %s1429_s26, 4  ;;  %s1219_s21 = int_to_ptr.vmem [resolvable:$false] %s1218_s21 }
  0x6e   : > { %s1220_s20 = scalar_lea.vmem %s1219_s21, 256  ;;  %p1221_p2 = scmp.lt.s32.totalorder %s1643_s0, %s1219_s21 }
  0x6f   : > { %p1216_p3 = pnand %p1214_p12, %p1609_p11  ;;  %p1222_p8 = scmp.lt.s32.totalorder %s1220_s20, %s1213_s2 }
  0x71   : > { %p1217_p7 = pneg %p1216_p3  ;;  %p1223_p9 = por %p1222_p8, %p1221_p2 }
  0x73   : > { %p1224_p10 = pnand %p1223_p9, %p1217_p7 }
  0x75   : > { %1227 = shalt.err (!%p1224_p10)
}
  0x76   : > { %s1938_s24 = smov 128   ;;  %s312_s14 = scalar_lea.vmem [#allocation9], %s1589_s9 }
  0x77   : > { %1068 = dma.hbm_to_vmem [thread:$0]  (!%p1584_p6), %s1640_s19, 128, %s1643_s0, %s1603_s22, %s1938_s24, %s1936_s11, %s1935_s23  }
  0x78   : > { %s318_s17 = sshll.u32 %s312_s14, 4  ;;  %s1430_s30 = smov [#allocation5]   ;;  %s1677_s17 = int_to_ptr.vmem [resolvable:$true] %s318_s17 }
  0x79   : > { %s1679_s10 = sshll.u32 %s1430_s30, 4  ;;  %s1228_s2 = scalar_lea.hbm %s1649_s27, 128  ;;  %s255_s10 = int_to_ptr.vmem [resolvable:$true] %s1679_s10 }
  0x7a   : > { %p1229_p13 = scmp.ne.s32.totalorder %s1649_s27, %s1228_s2  ;;  %s1233_s20 = scalar_lea.hbm %s1886_s4, 256 }
  0x7b   : > { %p1234_p0 = scmp.lt.u32.totalorder %s1649_s27, %s1886_s4  ;;  %p1235_p5 = scmp.lt.u32.totalorder %s1233_s20, %s1228_s2 }
  0x7c   : > { %p1231_p1 = pnand %p1229_p13, %p1609_p11  ;;  %p1237_p3 = scmp.lt.u32.totalorder %s1228_s2, %s1649_s27 }
  0x7d   : > { %p1236_p12 = por %p1235_p5, %p1234_p0 }
  0x7e   : > { %p1232_p4 = pneg %p1231_p1 }
  0x7f   : > { %p1238_p7 = por %p1237_p3, %p1236_p12 }
  0x81   : > { %p1239_p2 = pnand %p1238_p7, %p1232_p4 }
  0x83   : > { %1242 = shalt.err (!%p1239_p2)
}
  0x84   : > { %s1243_s0 = scalar_lea.vmem %s1677_s17, 128  ;;  %s1431_s19 = smov [#allocation9]  }
  0x85   : > { %p1244_p8 = scmp.ne.s32.totalorder %s1677_s17, %s1243_s0  ;;  %s1248_s14 = sshll.u32 %s1431_s19, 4  ;;  %s1249_s14 = int_to_ptr.vmem [resolvable:$false] %s1248_s14 }
  0x86   : > { %s1250_s3 = scalar_lea.vmem %s1249_s14, 256  ;;  %p1251_p13 = scmp.lt.s32.totalorder %s1677_s17, %s1249_s14 }
  0x87   : > { %p1246_p9 = pnand %p1244_p8, %p1609_p11  ;;  %p1252_p1 = scmp.lt.s32.totalorder %s1250_s3, %s1243_s0 }
  0x89   : > { %p1247_p10 = pneg %p1246_p9  ;;  %p1253_p0 = por %p1252_p1, %p1251_p13 }
  0x8b   : > { %p1254_p5 = pnand %p1253_p0, %p1247_p10 }
  0x8d   : > { %1257 = shalt.err (!%p1254_p5)
}
  0x8e   : > { %1071 = dma.hbm_to_vmem [thread:$0]  (!%p1584_p6), %s1649_s27, 128, %s1677_s17, %s1603_s22, %s1938_s24, %s1936_s11, %s1935_s23  }
  0x8f   : > { %s1258_s2 = scalar_lea.hbm %s1883_s1, 128  ;;  %p1939_p12 = scmp.ne.s32.totalorder %s1928_s18, 0 }
  0x90   : > { %p1259_p4 = scmp.ne.s32.totalorder %s1883_s1, %s1258_s2  ;;  %p1265_p8 = scmp.lt.u32.totalorder %s1258_s2, %s1883_s1 }
  0x91   : > { %p1940_p3 = pneg %p1939_p12 }
  0x93   : > { %p1261_p7 = pnand %p1259_p4, %p1940_p3 }
  0x95   : > { %p1262_p2 = pneg %p1261_p7 }
  0x97   : > { %p1267_p9 = pnand %p1265_p8, %p1262_p2 }
  0x99   : > { %1270 = shalt.err (!%p1267_p9)
}
  0x9a   : > { %s1271_s27 = scalar_lea.vmem %s255_s10, 128  ;;  %p1941_p13 = pmov %p1940_p3 }
  0x9b   : > { %p1272_p10 = scmp.ne.s32.totalorder %s255_s10, %s1271_s27  ;;  %p1279_p5 = scmp.lt.s32.totalorder %s255_s10, %s255_s10 }
  0x9c   : > { %p1280_p6 = scmp.lt.s32.totalorder %s1271_s27, %s1271_s27 }
  0x9d   : > { %p1274_p1 = pnand %p1272_p10, %p1941_p13 }
  0x9e   : > { %p1281_p11 = por %p1280_p6, %p1279_p5 }
  0x9f   : > { %p1275_p0 = pneg %p1274_p1 }
  0xa1   : > { %p1282_p3 = pnand %p1281_p11, %p1275_p0 }
  0xa3   : > { %1285 = shalt.err (!%p1282_p3)
}
  0xa4   : > { %1061 = dma.hbm_to_vmem [thread:$0]  (!%p1939_p12), %s1883_s1, 128, %s255_s10, [#allocation6], %s1936_s11, %s1936_s11, %s1935_s23  }
  0xa5   : > { %s1734_s7 = scalar_lea.hbm %s1887_s5, %s1592_s16  ;;  %s332_s18 = scalar_lea.vmem [#allocation10], %s1589_s9 }
  0xa6   : > { %s338_s30 = sshll.u32 %s332_s18, 4  ;;  %s1286_s2 = scalar_lea.hbm %s1734_s7, 128  ;;  %s1737_s30 = int_to_ptr.vmem [resolvable:$true] %s338_s30 }
  0xa7   : > { %p1287_p6 = scmp.ne.s32.totalorder %s1734_s7, %s1286_s2  ;;  %p1942_p11 = scmp.ne.s32.totalorder %s1934_s8, 0 }
  0xa8   : > { %s1291_s21 = scalar_lea.hbm %s1887_s5, 256  ;;  %p1292_p12 = scmp.lt.u32.totalorder %s1734_s7, %s1887_s5 }
  0xa9   : > { %p1289_p4 = pnand %p1287_p6, %p1942_p11  ;;  %p1293_p2 = scmp.lt.u32.totalorder %s1291_s21, %s1286_s2 }
  0xaa   : > { %p1295_p9 = scmp.lt.u32.totalorder %s1286_s2, %s1734_s7 }
  0xab   : > { %p1290_p7 = pneg %p1289_p4  ;;  %p1294_p8 = por %p1293_p2, %p1292_p12 }
  0xad   : > { %p1296_p10 = por %p1295_p9, %p1294_p8 }
  0xaf   : > { %p1297_p13 = pnand %p1296_p10, %p1290_p7 }
  0xb1   : > { %1300 = shalt.err (!%p1297_p13)
}
  0xb2   : > { %s1301_s9 = scalar_lea.vmem %s1737_s30, 128  ;;  %s1432_s0 = smov [#allocation10]  }
  0xb3   : > { %p1302_p1 = scmp.ne.s32.totalorder %s1737_s30, %s1301_s9  ;;  %s1306_s27 = sshll.u32 %s1432_s0, 4  ;;  %s1307_s27 = int_to_ptr.vmem [resolvable:$false] %s1306_s27 }
  0xb4   : > { %s1308_s17 = scalar_lea.vmem %s1307_s27, 256  ;;  %p1309_p3 = scmp.lt.s32.totalorder %s1737_s30, %s1307_s27 }
  0xb5   : > { %p1304_p0 = pnand %p1302_p1, %p1942_p11  ;;  %p1310_p6 = scmp.lt.s32.totalorder %s1308_s17, %s1301_s9 }
  0xb7   : > { %p1305_p5 = pneg %p1304_p0  ;;  %p1311_p4 = por %p1310_p6, %p1309_p3 }
  0xb9   : > { %p1312_p12 = pnand %p1311_p4, %p1305_p5 }
  0xbb   : > { %1315 = shalt.err (!%p1312_p12)
}
  0xbc   : > { %p1943_p7 = scmp.ne.s32.totalorder %s1932_s29, 0  ;;  %p1944_p11 = scmp.ne.s32.totalorder %s1927_s15, 0 }
  0xbd   : > { %p1945_p2 = scmp.eq.s32.totalorder (!%p1944_p11), %s1501_s28, 0 }
  0xbe   : > { %1074 = dma.hbm_to_vmem [thread:$0]  (!%p1943_p7), %s1734_s7, 128, %s1737_s30, %s1603_s22, %s1938_s24, %s1936_s11, %s1935_s23  }
  0xbf   : > { %350 = sbr.rel (%p1944_p11) target bundleno = 486 (0x1e6), region = 44 }
  0xc6   : > { %1389 = dma.done.wait (%p1945_p2), [#allocation3], 128   ;;  %p1946_p8 = pmov %p1945_p2 }
  0xc7   : > { %p1947_p9 = pmov %p1945_p2 }
  0xc8   : > { %1391 = vsyncadd (%p1946_p8), [#allocation3], 4294967168 }
  0xc9   : > { %1393 = dma.done.wait (%p1947_p9), [#allocation6], 128   ;;  %p1948_p10 = pmov %p1945_p2 }
  0xca   : > { %s360_s29 = sand.u32 1, %s1501_s28   ;;  %s1776_s22 = sand.u32 1, %s1414_s25  }
  0xcb   : > { %1395 = vsyncadd (%p1948_p10), [#allocation6], 4294967168  ;;  %s1779_s15 = sshll.u32 %s1776_s22, 3  ;;  %s361_s8 = scalar_lea.sflag [#allocation3], %s360_s29 }
  0xcc   : > { %s364_s23 = scalar_lea.vmem [#allocation7], %s1779_s15  ;;  %p1949_p13 = scmp.ne.s32.totalorder %s1923_s12, 0 }
  0xce   : > { %1397 = dma.done.wait (%p1949_p13), %s361_s8, 512  }
  0xcf   : > { %1399 = vsyncadd (%p1949_p13), %s361_s8, 4294966784  ;;  %v1433_v0 = vmov 0.0   ;;  %vm1434_vm0 = vmmov 0   ;;  %s373_s11 = scalar_lea.vmem [#allocation8], %s1779_s15  ;;  %s391_s24 = scalar_lea.vmem [#allocation10], %s1779_s15  ;;  %v1132_v3 = vld [vmem:[#allocation5] sm:$0xff]  }
  0xd0   : > { %1003 = vmatprep.subr.bf16.mxu0 %v1433_v0  ;;  %1015 = vmatprep.subr.bf16.mxu1 %v1433_v0  ;;  %v449_v1 = vld [vmem:[%s373_s11] sm:$0xff]   ;;  %vm462_vm1 = vcmask 130048   ;;  %v1134_v5 = vld [vmem:[%s364_s23] sm:$0xff]   ;;  %s382_s12 = scalar_lea.vmem [#allocation9], %s1779_s15  ;;  %s434_s19 = scalar_lea.vmem [#allocation11], %s1779_s15 }
  0xd1   : > { %1005 = vmatprep.mubr.msk.bf16.mxu0 %vm1434_vm0, %v1433_v0  ;;  %1017 = vmatprep.mubr.msk.bf16.mxu1 %vm1434_vm0, %v1433_v0  ;;  %v588_v2 = vld [vmem:[%s391_s24] sm:$0xff]   ;;  %v1135_v6 = vld [vmem:[%s382_s12] sm:$0xff]   ;;  %v568_v9 = vunpack.c.l.bf16 %v449_v1  ;;  %v569_v17 = vunpack.c.h.bf16 %v449_v1  ;;  %s738_s14 = sshll.u32 %s434_s19, 4  ;;  %s441_s3 = scalar_lea.vmem [#allocation12], %s1779_s15  ;;  %s1796_s14 = int_to_ptr.vmem [resolvable:$true] %s738_s14 }
  0xd2   : > { %v1133_v4 = vld [vmem:[#allocation5] sm:$0xff]   ;;  %1004 = vmatpush3.bf16.msra.mxu0 %v449_v1  ;;  %1016 = vmatpush3.bf16.msra.mxu1 %v588_v2  ;;  %v1136_v7 = vld [vmem:[#allocation2] sm:$0xff]   ;;  %v706_v10 = vunpack.c.l.bf16 %v588_v2  ;;  %v707_v18 = vunpack.c.h.bf16 %v588_v2  ;;  %s753_s7 = sshll.u32 %s441_s3, 4  ;;  %s977_s18 = sshll.u32 %s1501_s28, 6  ;;  %s1798_s7 = int_to_ptr.vmem [resolvable:$true] %s753_s7 }
  0xd3   : > { %1009 = vmatprep.subr.bf16.mxu0 %v1433_v0  ;;  %1021 = vmatprep.subr.bf16.mxu1 %v1433_v0  ;;  %v1137_v8 = vld [vmem:[#allocation2] sm:$0xff]   ;;  %s1803_s26 = scalar_lea.hbm %s1888_s6, %s977_s18  ;;  %s1950_s21 = sld [smem:[#allocation28_spill]] }
  0xd4   : > { %s721_s16 = scalar_lea.sflag [#allocation4], %s1776_s22  ;;  %s1316_s9 = scalar_lea.vmem %s1796_s14, 128 }
  0xd5   : > { %1006 = vmatmul.mubr.msk.bf16.vlgmr.msra.gmra.mrb[0].mxu0 %vm462_vm1, %v1132_v3  ;;  %1018 = vmatmul.mubr.msk.bf16.vlgmr.msra.gmra.mrb[0].mxu1 %vm462_vm1, %v1133_v4  ;;  %p1317_p1 = scmp.ne.s32.totalorder %s1796_s14, %s1316_s9  ;;  %p1951_p0 = scmp.ne.s32.totalorder %s1924_s13, 0 }
  0xd6   : > { %1010 = vmatpush3.bf16.msra.mxu0 %v1134_v5  ;;  %1022 = vmatpush3.bf16.msra.mxu1 %v1135_v6  ;;  %s1435_s0 = smov [#allocation11]  }
  0xd7   : > { %1011 = vmatprep.mubr.msk.bf16.mxu0 %vm1434_vm0, %v1433_v0  ;;  %1023 = vmatprep.mubr.msk.bf16.mxu1 %vm1434_vm0, %v1433_v0  ;;  %p1318_p5 = pnand %p1317_p1, %p1951_p0  ;;  %s1320_s27 = sshll.u32 %s1435_s0, 4  ;;  %s1321_s27 = int_to_ptr.vmem [resolvable:$false] %s1320_s27 }
  0xd8   : > { %s1322_s17 = scalar_lea.vmem %s1321_s27, 256  ;;  %p1323_p6 = scmp.lt.s32.totalorder %s1796_s14, %s1321_s27 }
  0xd9   : > { %s1808_s20 = scalar_lea.hbm %s1950_s21, %s977_s18  ;;  %p1319_p3 = pneg %p1318_p5 }
  0xda   : > { %p1324_p4 = scmp.lt.s32.totalorder %s1322_s17, %s1316_s9 }
  0xdc   : > { %p1325_p12 = por %p1324_p4, %p1323_p6 }
  0xde   : > { %p1326_p7 = pnand %p1325_p12, %p1319_p3 }
  0xe1   : > { %1012 = vmatmul.mubr.msk.bf16.vlgmr.msra.gmra.mrb[0].mxu0 %vm462_vm1, %v1136_v7  ;;  %1024 = vmatmul.mubr.msk.bf16.vlgmr.msra.gmra.mrb[0].mxu1 %vm462_vm1, %v1137_v8 }
 0x1b4   : > { %v555_v11 = vpop.f32.mrb[0].mxu0  ;;  %v693_v12 = vpop.f32.mrb[0].mxu1 }
 0x1b5   : > { %vm562_vm2 = vcmp.ge.f32.partialorder %v555_v11, 0.0  ;;  %v564_v13 = vmul.f32 0.1, %v555_v11  ;;  %vm700_vm3 = vcmp.ge.f32.partialorder %v693_v12, 0.0  ;;  %v702_v14 = vmul.f32 0.1, %v693_v12 }
 0x1b6   : > { %v1013_v15 = vpop.f32.mrb[1].mxu0  ;;  %v1025_v16 = vpop.f32.mrb[1].mxu1 }
 0x1b7   : > { %v566_v19 = vsel %vm562_vm2, %v555_v11, %v564_v13  ;;  %v704_v20 = vsel %vm700_vm3, %v693_v12, %v702_v14  ;;  %v558_v21 = vpop.f32.mrb[2].mxu0  ;;  %v696_v22 = vpop.f32.mrb[2].mxu1 }
 0x1b8   : > { %v570_v23 = vadd.f32 %v568_v9, %v566_v19  ;;  %v708_v24 = vadd.f32 %v706_v10, %v704_v20  ;;  %vm563_vm4 = vcmp.ge.f32.partialorder %v558_v21, 0.0  ;;  %v565_v25 = vmul.f32 0.1, %v558_v21  ;;  %v1014_v26 = vpop.f32.mrb[3].mxu0  ;;  %v1026_v27 = vpop.f32.mrb[3].mxu1 }
 0x1b9   : > { %vm701_vm5 = vcmp.ge.f32.partialorder %v696_v22, 0.0  ;;  %v703_v28 = vmul.f32 0.1, %v696_v22 }
 0x1ba   : > { %v567_v29 = vsel %vm563_vm4, %v558_v21, %v565_v25 }
 0x1bb   : > { %v571_v30 = vadd.f32 %v569_v17, %v567_v29  ;;  %v705_v31 = vsel %vm701_vm5, %v696_v22, %v703_v28 }
 0x1bc   : > { %v709_v32 = vadd.f32 %v707_v18, %v705_v31 }
 0x1bd   : > { %v988_v33 = vpack.c.bf16 %v571_v30, %v570_v23 }
 0x1be   : > { %v993_v34 = vpack.c.bf16 %v709_v32, %v708_v24 }
 0x1bf   : > { %989 = vst [vmem:[%s434_s19] sm:$0xff] %v988_v33  }
 0x1c0   : > { %994 = vst [vmem:[%s441_s3] sm:$0xff] %v993_v34  }
 0x1c1   : > { %1329 = shalt.err (!%p1326_p7)
}
 0x1c2   : > { %s1330_s29 = scalar_lea.hbm %s1803_s26, 128  ;;  %s1334_s23 = scalar_lea.hbm %s1888_s6, 256 }
 0x1c3   : > { %p1331_p11 = scmp.ne.s32.totalorder %s1803_s26, %s1330_s29  ;;  %p1335_p9 = scmp.lt.u32.totalorder %s1803_s26, %s1888_s6 }
 0x1c4   : > { %p1336_p10 = scmp.lt.u32.totalorder %s1334_s23, %s1330_s29  ;;  %p1338_p1 = scmp.lt.u32.totalorder %s1330_s29, %s1803_s26 }
 0x1c5   : > { %p1332_p2 = pnand %p1331_p11, %p1951_p0 }
 0x1c6   : > { %p1337_p13 = por %p1336_p10, %p1335_p9 }
 0x1c7   : > { %p1333_p8 = pneg %p1332_p2 }
 0x1c8   : > { %p1339_p5 = por %p1338_p1, %p1337_p13 }
 0x1ca   : > { %p1340_p3 = pnand %p1339_p5, %p1333_p8 }
 0x1cc   : > { %1343 = shalt.err (!%p1340_p3)
}
 0x1cd   : > { %s1436_s12 = smov 64   ;;  %s1437_s19 = smov 128  }
 0x1ce   : > { %s1438_s3 = smov 4   ;;  %s726_s18 = scalar_lea.sflag [#allocation13], %s1776_s22 }
 0x1cf   : > { %1051 = dma.vmem_to_hbm [thread:$0]  (%p1951_p0), %s1796_s14, 128, %s1803_s26, %s721_s16, %s1436_s12, %s1437_s19, %s1438_s3  }
 0x1d0   : > { %s1344_s30 = scalar_lea.vmem %s1798_s7, 128  ;;  %s1439_s2 = smov [#allocation12]  }
 0x1d1   : > { %p1345_p6 = scmp.ne.s32.totalorder %s1798_s7, %s1344_s30  ;;  %s1348_s28 = sshll.u32 %s1439_s2, 4  ;;  %s1349_s28 = int_to_ptr.vmem [resolvable:$false] %s1348_s28 }
 0x1d2   : > { %s1350_s10 = scalar_lea.vmem %s1349_s28, 256  ;;  %p1351_p7 = scmp.lt.s32.totalorder %s1798_s7, %s1349_s28 }
 0x1d3   : > { %p1346_p4 = pnand %p1345_p6, %p1951_p0  ;;  %p1352_p11 = scmp.lt.s32.totalorder %s1350_s10, %s1344_s30 }
 0x1d5   : > { %p1347_p12 = pneg %p1346_p4  ;;  %p1353_p2 = por %p1352_p11, %p1351_p7 }
 0x1d7   : > { %p1354_p8 = pnand %p1353_p2, %p1347_p12 }
 0x1d9   : > { %1357 = shalt.err (!%p1354_p8)
}
 0x1da   : > { %s1358_s14 = scalar_lea.hbm %s1808_s20, 128  ;;  %s1362_s9 = scalar_lea.hbm %s1950_s21, 256 }
 0x1db   : > { %p1359_p9 = scmp.ne.s32.totalorder %s1808_s20, %s1358_s14  ;;  %p1363_p1 = scmp.lt.u32.totalorder %s1808_s20, %s1950_s21 }
 0x1dc   : > { %p1364_p5 = scmp.lt.u32.totalorder %s1362_s9, %s1358_s14  ;;  %p1366_p6 = scmp.lt.u32.totalorder %s1358_s14, %s1808_s20 }
 0x1dd   : > { %p1360_p10 = pnand %p1359_p9, %p1951_p0 }
 0x1de   : > { %p1365_p3 = por %p1364_p5, %p1363_p1 }
 0x1df   : > { %p1361_p13 = pneg %p1360_p10 }
 0x1e0   : > { %p1367_p4 = por %p1366_p6, %p1365_p3 }
 0x1e2   : > { %p1368_p12 = pnand %p1367_p4, %p1361_p13 }
 0x1e4   : > { %1371 = shalt.err (!%p1368_p12)
}
 0x1e5   : > { %1052 = dma.vmem_to_hbm [thread:$0]  (%p1951_p0), %s1798_s7, 128, %s1808_s20, %s726_s18, %s1436_s12, %s1437_s19, %s1438_s3  }
 0x1e6 PF: > { %s1952_s17 = sld [smem:[#allocation19_spill]]  ;;  %s1953_s29 = sld [smem:[#allocation24_spill]] }
 0x1e7   : > { %s1954_s15 = sld [smem:[#allocation21_spill]] }
 0x1ec   : > { %s768_s8 = sand.u32 1, %s1952_s17   ;;  %p1955_p7 = scmp.ne.s32.totalorder %s1953_s29, 0 }
 0x1ed   : > { %p1956_p11 = scmp.ge.s32.totalorder %s1954_s15, 2  ;;  %s769_s23 = scalar_lea.sflag [#allocation4], %s768_s8 }
 0x1ef   : > { %p1076_p2 = pnand %p1956_p11, %p1955_p7 }
 0x1f1   : > { %1401 = dma.done.wait (!%p1076_p2), %s769_s23, 128  }
 0x1f2   : > { %1403 = vsyncadd (!%p1076_p2), %s769_s23, 4294967168  ;;  %s778_s13 = scalar_lea.sflag [#allocation13], %s768_s8 }
 0x1f3   : > { %1405 = dma.done.wait (!%p1076_p2), %s778_s13, 128  }
 0x1f4   : > { %1407 = vsyncadd (!%p1076_p2), %s778_s13, 4294967168  ;;  %s1957_s27 = sld [smem:[#allocation22_spill]]  ;;  %s1958_s22 = sld [smem:[#allocation20_spill]] }
 0x1f5   : > { %s1959_s26 = sld [smem:[#allocation23_spill]]  ;;  %s1960_s24 = smov %s1414_s25 }
 0x1fa   : > { %p23_p0 = scmp.ge.s32.totalorder %s1957_s27, 4   ;;  %s1961_s25 = smov %s1958_s22 }
 0x1fc   :  { %25 = sbr.rel (!%p23_p0) target bundleno = 12 (0xc), region = 146 }
 0x203   :  { %783 = vsyncpa [#allocation3], 1 }
 0x204   :  { %785 = vsyncpa [#allocation3 + $0x1], 1 }
 0x205   :  { %786 = vsyncpa [#allocation6], 1 }
 0x206   :  { %787 = vsyncpa [#allocation4], 1 }
 0x207   :  { %789 = vsyncpa [#allocation4 + $0x1], 1 }
 0x208   :  { %790 = vsyncpa [#allocation13], 1 }
 0x209   :  { %792 = vsyncpa [#allocation13 + $0x1], 1 }

// kernel: _lambda_.27
= control target key start
LH: loop header
LB: loop body
LE: loop exit
PB: predicated region body
PF: predicated region fallthrough
CT: control target
= control target key end

     0   :  { %s2131_s0 = inlined_call_operand.hbm [shape: bf16[16,64], index: 0, kind: input, shape index: {}]   ;;  %s2132_s1 = inlined_call_operand.hbm [shape: bf16[16,16], index: 1, kind: input, shape index: {}]   ;;  %s2133_s2 = inlined_call_operand.hbm [shape: bf16[16,64], index: 2, kind: input, shape index: {}]   ;;  %s2134_s3 = inlined_call_operand.hbm [shape: bf16[64,256], index: 3, kind: input, shape index: {}]   ;;  %s2135_s4 = inlined_call_operand.hbm [shape: bf16[16,256], index: 4, kind: input, shape index: {}]   ;;  %s2136_s5 = inlined_call_operand.hbm [shape: bf16[64,256], index: 5, kind: input, shape index: {}]   ;;  %s2137_s6 = inlined_call_operand.hbm [shape: bf16[16,256], index: 6, kind: input, shape index: {}]   ;;  %s2138_s7 = inlined_call_operand.hbm [shape: bf16[16,256], index: 7, kind: output, shape index: {0}]   ;;  %s2139_s8 = inlined_call_operand.hbm [shape: bf16[16,256], index: 8, kind: output, shape index: {1}]  }
   0x1   :  { %2171 = sst [smem:[#allocation31_spill]] %s2132_s1 }
   0x2   :  { %2172 = sst [smem:[#allocation32_spill]] %s2134_s3 }
   0x3   :  { %2173 = sst [smem:[#allocation33_spill]] %s2136_s5 }
   0x4   :  { %2174 = sst [smem:[#allocation34_spill]] %s2138_s7 }
   0x5   :  { %2175 = sst [smem:[#allocation35_spill]] %s2139_s8 }
   0x6   :  { %14 = vsyncpa [#allocation3], 0 }
   0x7   :  { %15 = vsyncpa [#allocation6], 0 }
   0x8   :  { %16 = vsyncpa [#allocation9], 0 }
   0x9   :  { %18 = vsyncpa [#allocation9 + $0x1], 0 }
   0xa   :  { %19 = vsyncpa [#allocation12], 0 }
   0xb   :  { %21 = vsyncpa [#allocation12 + $0x1], 0 }
   0xc   :  { %22 = vsyncpa [#allocation4], 0 }
   0xd   :  { %24 = vsyncpa [#allocation4 + $0x1], 0 }
   0xe   :  { %25 = vsyncpa [#allocation16], 0 }
   0xf   :  { %27 = vsyncpa [#allocation16 + $0x1], 0  ;;  %s1671_s27 = smov 0   ;;  %s1673_s28 = smov 0  }
  0x10   :  { %s1675_s29 = smov 0   ;;  %s1677_s30 = smov 0  }
  0x11 LB: > { %2176 = sst [smem:[#allocation23_spill]] %s1595_s27  ;;  %s1692_s9 = sadd.s32 4294967295, %s1607_s30   ;;  %s1607_s30 = sphi %s1677_s30, %s2224_s30   ;;  %s1603_s29 = sphi %s1675_s29, %s2226_s29   ;;  %s1599_s28 = sphi %s1673_s28, %s2228_s28   ;;  %s1595_s27 = sphi %s1671_s27, %s2227_s27  }
  0x12   : > { %2177 = sst [smem:[#allocation24_spill]] %s1603_s29  ;;  %s1048_s10 = sadd.s32 4294967294, %s1607_s30  }
  0x13   : > { %2178 = sst [smem:[#allocation25_spill]] %s1607_s30  ;;  %s1696_s11 = sadd.s32 1, %s1607_s30  }
  0x14   : > { %2179 = sst [smem:[#allocation26_spill]] %s1696_s11  ;;  %s103_s12 = sadd.s32 1, %s1603_s29 }
  0x15   : > { %s100_s13 = ssub.s32 %s1607_s30, %s1696_s11  ;;  %p110_p0 = scmp.ne.s32.totalorder %s1603_s29, %s1599_s28 }
  0x16   : > { %p101_p1 = scmp.eq.s32.totalorder %s100_s13, 0  ;;  %p111_p2 = scmp.eq.s32.totalorder %s1607_s30, 0 }
  0x17   : > { %p116_p3 = scmp.ne.s32.totalorder %s1599_s28, %s1595_s27  ;;  %p2141_p4 = scmp.eq.s32.totalorder %s1692_s9, 0 }
  0x18   : > { %s1708_s14 = scalar_select %p101_p1, %s1603_s29, %s103_s12  }
  0x19   : > { %p1710_p5 = por %p111_p2, %p110_p0  ;;  %p1716_p6 = por %p2141_p4, %p116_p3 }
  0x1a   : > { %2180 = sst [smem:[#allocation27_spill]] %s1708_s14  ;;  %p218_p7 = scmp.eq.s32.totalorder %s1692_s9, 1 }
  0x1b   : > { %s2181_s15 = scalar_select %p1710_p5, 1, 0 }
  0x1c   : > { %s2182_s16 = scalar_select %p1716_p6, 1, 0 }
  0x1d   : > { %p224_p8 = scmp.eq.s32.totalorder %s1048_s10, 1  ;;  %p1049_p9 = scmp.ge.s32.totalorder %s1607_s30, 1 }
  0x1e   : > { %2183 = sst [smem:[#allocation28_spill]] %s2182_s16  ;;  %p257_p10 = scmp.lt.s32.totalorder %s1607_s30, 3 }
  0x1f   : > { %p1723_p11 = por %p218_p7, %p110_p0  ;;  %p1727_p12 = por %p224_p8, %p116_p3 }
  0x20   : > { %p1731_p13 = pnand %p1049_p9, %p257_p10  ;;  %s1609_s20 = smov [#allocation5]  }
  0x21   : > { %s2184_s17 = scalar_select %p1723_p11, 1, 0 }
  0x22   : > { %s2186_s18 = scalar_select %p1727_p12, 1, 0 }
  0x23   : > { %2185 = sst [smem:[#allocation29_spill]] %s2184_s17  ;;  %p1196_p1 = pneg %p1731_p13 }
  0x24   : > { %2187 = sst [smem:[#allocation30_spill]] %s2186_s18  ;;  %s282_s21 = sshll.u32 %s1609_s20, 4  ;;  %s283_s21 = int_to_ptr.vmem [resolvable:$true] %s282_s21 }
  0x25   : > { %s2188_s19 = scalar_select %p1731_p13, 1, 0 }
  0x26   : > { %p1740_p6 = pnand %p1196_p1, %p2141_p4  ;;  %s2190_s1 = sld [smem:[#allocation31_spill]] }
  0x28   : > { %s2189_s22 = scalar_select %p1740_p6, 1, 0 }
  0x29   : > { %p1754_p7 = pneg %p1740_p6 }
  0x2b   : > { %s2191_s13 = scalar_select %p1754_p7, 1, 0 }
  0x2c   : > { %s1293_s26 = scalar_lea.hbm %s2190_s1, 128 }
  0x2d   : > { %p1294_p3 = scmp.ne.s32.totalorder %s2190_s1, %s1293_s26  ;;  %p1300_p10 = scmp.lt.u32.totalorder %s1293_s26, %s2190_s1 }
  0x2f   : > { %p1296_p8 = pnand %p1754_p7, %p1294_p3 }
  0x31   : > { %p1297_p9 = pneg %p1296_p8 }
  0x33   : > { %p1302_p1 = pnand %p1300_p10, %p1297_p9 }
  0x35   : > { %1305 = shalt.err (!%p1302_p1)
}
  0x36   : > { %s1306_s24 = scalar_lea.vmem %s283_s21, 128  ;;  %p1314_p12 = scmp.lt.s32.totalorder %s283_s21, %s283_s21 }
  0x37   : > { %p1307_p2 = scmp.ne.s32.totalorder %s283_s21, %s1306_s24  ;;  %p1315_p11 = scmp.lt.s32.totalorder %s1306_s24, %s1306_s24 }
  0x39   : > { %p1309_p4 = pnand %p1307_p2, %p1754_p7  ;;  %p1316_p13 = por %p1315_p11, %p1314_p12 }
  0x3b   : > { %p1310_p0 = pneg %p1309_p4 }
  0x3d   : > { %p1317_p5 = pnand %p1316_p13, %p1310_p0 }
  0x3f   : > { %1320 = shalt.err (!%p1317_p5)
}
  0x40   : > { %s2148_s25 = smov 64   ;;  %s2150_s14 = smov 4  }
  0x41   : > { %1202 = dma.hbm_to_vmem [thread:$0]  (!%p1740_p6), %s2190_s1, 128, %s283_s21, [#allocation6], %s2148_s25, %s2148_s25, %s2150_s14  }
  0x42   : > { %p2192_p4 = scmp.ne.s32.totalorder %s2181_s15, 0  ;;  %p2193_p11 = scmp.lt.s32.totalorder %s1607_s30, 2 }
  0x43   : > { %s2147_s20 = sand.u32 1, %s1603_s29   ;;  %s1787_s23 = sshll.u32 %s1607_s30, 6 }
  0x44   : > { %p1777_p5 = pnand %p2193_p11, %p2192_p4  ;;  %s1784_s24 = sshll.u32 %s2147_s20, 5 }
  0x45   : > { %s2195_s3 = sld [smem:[#allocation32_spill]]  ;;  %s313_s15 = scalar_lea.vmem [#allocation8], %s1784_s24 }
  0x46   : > { %s2194_s12 = scalar_select %p1777_p5, 1, 0 }
  0x47   : > { %s319_s21 = sshll.u32 %s313_s15, 4  ;;  %s2196_s10 = sand.u32 1, %s1607_s30   ;;  %s1796_s21 = int_to_ptr.vmem [resolvable:$true] %s319_s21 }
  0x48   : > { %s1800_s20 = scalar_lea.sflag [#allocation9], %s2196_s10  ;;  %p1806_p13 = pneg %p1777_p5 }
  0x4a   : > { %s2197_s14 = scalar_select %p1806_p13, 1, 0 }
  0x4b   : > { %s1793_s26 = scalar_lea.hbm %s2195_s3, %s1787_s23  ;;  %s1326_s15 = scalar_lea.hbm %s2195_s3, 1024 }
  0x4c   : > { %s1321_s25 = scalar_lea.hbm %s1793_s26, 512  ;;  %p1327_p3 = scmp.lt.u32.totalorder %s1793_s26, %s2195_s3 }
  0x4d   : > { %p1322_p12 = scmp.ne.s32.totalorder %s1793_s26, %s1321_s25  ;;  %p1328_p8 = scmp.lt.u32.totalorder %s1326_s15, %s1321_s25 }
  0x4e   : > { %p1330_p10 = scmp.lt.u32.totalorder %s1321_s25, %s1793_s26 }
  0x4f   : > { %p1324_p2 = pnand %p1806_p13, %p1322_p12  ;;  %p1329_p9 = por %p1328_p8, %p1327_p3 }
  0x51   : > { %p1325_p0 = pneg %p1324_p2  ;;  %p1331_p1 = por %p1330_p10, %p1329_p9 }
  0x53   : > { %p1332_p4 = pnand %p1331_p1, %p1325_p0 }
  0x55   : > { %1335 = shalt.err (!%p1332_p4)
}
  0x56   : > { %s1336_s10 = scalar_lea.vmem %s1796_s21, 512  ;;  %s1612_s11 = smov [#allocation8]  }
  0x57   : > { %p1337_p11 = scmp.ne.s32.totalorder %s1796_s21, %s1336_s10  ;;  %s1341_s18 = sshll.u32 %s1612_s11, 4  ;;  %s1342_s18 = int_to_ptr.vmem [resolvable:$false] %s1341_s18 }
  0x58   : > { %s1343_s1 = scalar_lea.vmem %s1342_s18, 1024  ;;  %p1344_p6 = scmp.lt.s32.totalorder %s1796_s21, %s1342_s18 }
  0x59   : > { %p1339_p12 = pnand %p1337_p11, %p1806_p13  ;;  %p1345_p7 = scmp.lt.s32.totalorder %s1343_s1, %s1336_s10 }
  0x5b   : > { %p1340_p2 = pneg %p1339_p12  ;;  %p1346_p3 = por %p1345_p7, %p1344_p6 }
  0x5d   : > { %p1347_p8 = pnand %p1346_p3, %p1340_p2 }
  0x5f   : > { %1350 = shalt.err (!%p1347_p8)
}
  0x60   : > { %s2163_s27 = smov 128   ;;  %s2198_s25 = smov 4  }
  0x61   : > { %s2199_s15 = smov 64   ;;  %s2200_s11 = sand.u32 1, %s1603_s29  }
  0x62   : > { %1209 = dma.hbm_to_vmem [thread:$0]  (!%p1777_p5), %s1793_s26, 512, %s1796_s21, %s1800_s20, %s2163_s27, %s2199_s15, %s2198_s25  }
  0x63   : > { %s1835_s10 = sshll.u32 %s2200_s11, 3  ;;  %s2201_s5 = sld [smem:[#allocation33_spill]] }
  0x64   : > { %s353_s8 = scalar_lea.vmem [#allocation11], %s1784_s24  ;;  %s1614_s17 = smov [#allocation2]  }
  0x65   : > { %s359_s7 = sshll.u32 %s353_s8, 4  ;;  %s1846_s16 = sshll.u32 %s1614_s17, 4  ;;  %s1844_s7 = int_to_ptr.vmem [resolvable:$true] %s359_s7  ;;  %s270_s16 = int_to_ptr.vmem [resolvable:$true] %s1846_s16 }
  0x66   : > { %s2202_s26 = sand.u32 1, %s1607_s30  }
  0x67   : > { %s1850_s21 = scalar_lea.sflag [#allocation12], %s2202_s26 }
  0x69   : > { %s1841_s3 = scalar_lea.hbm %s2201_s5, %s1787_s23  ;;  %s1356_s27 = scalar_lea.hbm %s2201_s5, 1024 }
  0x6a   : > { %s1351_s11 = scalar_lea.hbm %s1841_s3, 512  ;;  %p1357_p9 = scmp.lt.u32.totalorder %s1841_s3, %s2201_s5 }
  0x6b   : > { %p1352_p6 = scmp.ne.s32.totalorder %s1841_s3, %s1351_s11  ;;  %p1358_p10 = scmp.lt.u32.totalorder %s1356_s27, %s1351_s11 }
  0x6c   : > { %p1360_p4 = scmp.lt.u32.totalorder %s1351_s11, %s1841_s3 }
  0x6d   : > { %p1354_p7 = pnand %p1352_p6, %p1806_p13  ;;  %p1359_p1 = por %p1358_p10, %p1357_p9 }
  0x6f   : > { %p1355_p0 = pneg %p1354_p7  ;;  %p1361_p11 = por %p1360_p4, %p1359_p1 }
  0x71   : > { %p1362_p12 = pnand %p1361_p11, %p1355_p0 }
  0x73   : > { %1365 = shalt.err (!%p1362_p12)
}
  0x74   : > { %s1366_s8 = scalar_lea.vmem %s1844_s7, 512  ;;  %s1615_s17 = smov [#allocation11]  }
  0x75   : > { %p1367_p2 = scmp.ne.s32.totalorder %s1844_s7, %s1366_s8  ;;  %s1371_s26 = sshll.u32 %s1615_s17, 4  ;;  %s1372_s26 = int_to_ptr.vmem [resolvable:$false] %s1371_s26 }
  0x76   : > { %s1373_s29 = scalar_lea.vmem %s1372_s26, 1024  ;;  %p1374_p6 = scmp.lt.s32.totalorder %s1844_s7, %s1372_s26 }
  0x77   : > { %p1369_p3 = pnand %p1367_p2, %p1806_p13  ;;  %p1375_p7 = scmp.lt.s32.totalorder %s1373_s29, %s1366_s8 }
  0x79   : > { %p1370_p8 = pneg %p1369_p3  ;;  %p1376_p9 = por %p1375_p7, %p1374_p6 }
  0x7b   : > { %p1377_p10 = pnand %p1376_p9, %p1370_p8 }
  0x7d   : > { %1380 = shalt.err (!%p1377_p10)
}
  0x7e   : > { %s2203_s27 = smov 128   ;;  %s1381_s1 = scalar_lea.hbm %s2131_s0, 128 }
  0x7f   : > { %1215 = dma.hbm_to_vmem [thread:$0]  (!%p1777_p5), %s1841_s3, 512, %s1844_s7, %s1850_s21, %s2203_s27, %s2199_s15, %s2198_s25  }
  0x80   : > { %p1382_p0 = scmp.ne.s32.totalorder %s2131_s0, %s1381_s1  ;;  %p2204_p1 = scmp.ne.s32.totalorder %s2191_s13, 0 }
  0x81   : > { %p1388_p12 = scmp.lt.u32.totalorder %s1381_s1, %s2131_s0 }
  0x82   : > { %p1384_p4 = pnand %p1382_p0, %p2204_p1 }
  0x84   : > { %p1385_p11 = pneg %p1384_p4 }
  0x86   : > { %p1390_p2 = pnand %p1388_p12, %p1385_p11 }
  0x88   : > { %1393 = shalt.err (!%p1390_p2)
}
  0x89   : > { %s1394_s29 = scalar_lea.vmem %s270_s16, 128  ;;  %p1402_p7 = scmp.lt.s32.totalorder %s270_s16, %s270_s16 }
  0x8a   : > { %p1395_p3 = scmp.ne.s32.totalorder %s270_s16, %s1394_s29  ;;  %p1403_p9 = scmp.lt.s32.totalorder %s1394_s29, %s1394_s29 }
  0x8c   : > { %p1397_p8 = pnand %p1395_p3, %p2204_p1  ;;  %p1404_p10 = por %p1403_p9, %p1402_p7 }
  0x8e   : > { %p1398_p6 = pneg %p1397_p8 }
  0x90   : > { %p1405_p5 = pnand %p1404_p10, %p1398_p6 }
  0x92   : > { %1408 = shalt.err (!%p1405_p5)
}
  0x93   : > { %p2205_p0 = scmp.ne.s32.totalorder %s2189_s22, 0  ;;  %s1616_s11 = smov [#allocation7]  }
  0x94   : > { %s295_s18 = sshll.u32 %s1616_s11, 4  ;;  %s1903_s8 = scalar_lea.hbm %s2135_s4, %s1787_s23  ;;  %s296_s18 = int_to_ptr.vmem [resolvable:$true] %s295_s18 }
  0x95   : > { %1199 = dma.hbm_to_vmem [thread:$0]  (!%p2205_p0), %s2131_s0, 128, %s270_s16, [#allocation3], %s2199_s15, %s2199_s15, %s2198_s25  }
  0x96   : > { %s1409_s29 = scalar_lea.hbm %s2133_s2, 128 }
  0x97   : > { %p1410_p5 = scmp.ne.s32.totalorder %s2133_s2, %s1409_s29  ;;  %p1416_p12 = scmp.lt.u32.totalorder %s1409_s29, %s2133_s2 }
  0x99   : > { %p1412_p4 = pnand %p1410_p5, %p2204_p1 }
  0x9b   : > { %p1413_p11 = pneg %p1412_p4 }
  0x9d   : > { %p1418_p2 = pnand %p1416_p12, %p1413_p11 }
  0x9f   : > { %1421 = shalt.err (!%p1418_p2)
}
  0xa0   : > { %s1422_s7 = scalar_lea.vmem %s296_s18, 128  ;;  %p1430_p7 = scmp.lt.s32.totalorder %s296_s18, %s296_s18 }
  0xa1   : > { %p1423_p3 = scmp.ne.s32.totalorder %s296_s18, %s1422_s7  ;;  %p1431_p9 = scmp.lt.s32.totalorder %s1422_s7, %s1422_s7 }
  0xa3   : > { %p1425_p8 = pnand %p1423_p3, %p2204_p1  ;;  %p1432_p10 = por %p1431_p9, %p1430_p7 }
  0xa5   : > { %p1426_p6 = pneg %p1425_p8 }
  0xa7   : > { %p1433_p13 = pnand %p1432_p10, %p1426_p6 }
  0xa9   : > { %1436 = shalt.err (!%p1433_p13)
}
  0xaa   : > { %1205 = dma.hbm_to_vmem [thread:$0]  (!%p2205_p0), %s2133_s2, 128, %s296_s18, [#allocation6], %s2199_s15, %s2199_s15, %s2198_s25  }
  0xab   : > { %s333_s13 = scalar_lea.vmem [#allocation10], %s1835_s10  ;;  %s1933_s24 = scalar_lea.hbm %s2137_s6, %s1787_s23 }
  0xac   : > { %s339_s11 = sshll.u32 %s333_s13, 4  ;;  %s1437_s17 = scalar_lea.hbm %s1903_s8, 128  ;;  %s1927_s11 = int_to_ptr.vmem [resolvable:$true] %s339_s11 }
  0xad   : > { %p1438_p13 = scmp.ne.s32.totalorder %s1903_s8, %s1437_s17  ;;  %p2206_p1 = scmp.ne.s32.totalorder %s2197_s14, 0 }
  0xae   : > { %s1442_s16 = scalar_lea.hbm %s2135_s4, 256  ;;  %p1443_p0 = scmp.lt.u32.totalorder %s1903_s8, %s2135_s4 }
  0xaf   : > { %p1440_p5 = pnand %p1438_p13, %p2206_p1  ;;  %p1444_p11 = scmp.lt.u32.totalorder %s1442_s16, %s1437_s17 }
  0xb0   : > { %p1446_p2 = scmp.lt.u32.totalorder %s1437_s17, %s1903_s8 }
  0xb1   : > { %p1441_p4 = pneg %p1440_p5  ;;  %p1445_p12 = por %p1444_p11, %p1443_p0 }
  0xb3   : > { %p1447_p3 = por %p1446_p2, %p1445_p12 }
  0xb5   : > { %p1448_p8 = pnand %p1447_p3, %p1441_p4 }
  0xb7   : > { %1451 = shalt.err (!%p1448_p8)
}
  0xb8   : > { %s1452_s23 = scalar_lea.vmem %s1927_s11, 128  ;;  %s1617_s7 = smov [#allocation10]  }
  0xb9   : > { %p1453_p6 = scmp.ne.s32.totalorder %s1927_s11, %s1452_s23  ;;  %s1457_s5 = sshll.u32 %s1617_s7, 4  ;;  %s1458_s5 = int_to_ptr.vmem [resolvable:$false] %s1457_s5 }
  0xba   : > { %s1459_s30 = scalar_lea.vmem %s1458_s5, 256  ;;  %p1460_p10 = scmp.lt.s32.totalorder %s1927_s11, %s1458_s5 }
  0xbb   : > { %p1455_p7 = pnand %p1453_p6, %p2206_p1  ;;  %p1461_p13 = scmp.lt.s32.totalorder %s1459_s30, %s1452_s23 }
  0xbd   : > { %p1456_p9 = pneg %p1455_p7  ;;  %p1462_p5 = por %p1461_p13, %p1460_p10 }
  0xbf   : > { %p1463_p0 = pnand %p1462_p5, %p1456_p9 }
  0xc1   : > { %1466 = shalt.err (!%p1463_p0)
}
  0xc2   : > { %p2207_p4 = scmp.ne.s32.totalorder %s2194_s12, 0  ;;  %s373_s13 = scalar_lea.vmem [#allocation13], %s1835_s10 }
  0xc3   : > { %s379_s1 = sshll.u32 %s373_s13, 4  ;;  %s1467_s22 = scalar_lea.hbm %s1933_s24, 128  ;;  %s1961_s1 = int_to_ptr.vmem [resolvable:$true] %s379_s1 }
  0xc4   : > { %1212 = dma.hbm_to_vmem [thread:$0]  (!%p2207_p4), %s1903_s8, 128, %s1927_s11, %s1800_s20, %s2203_s27, %s2199_s15, %s2198_s25  }
  0xc5   : > { %p1468_p11 = scmp.ne.s32.totalorder %s1933_s24, %s1467_s22  ;;  %s1472_s29 = scalar_lea.hbm %s2137_s6, 256 }
  0xc6   : > { %p1473_p3 = scmp.lt.u32.totalorder %s1933_s24, %s2137_s6  ;;  %p1474_p8 = scmp.lt.u32.totalorder %s1472_s29, %s1467_s22 }
  0xc7   : > { %p1470_p12 = pnand %p1468_p11, %p2206_p1  ;;  %p1476_p7 = scmp.lt.u32.totalorder %s1467_s22, %s1933_s24 }
  0xc8   : > { %p1475_p6 = por %p1474_p8, %p1473_p3 }
  0xc9   : > { %p1471_p2 = pneg %p1470_p12 }
  0xca   : > { %p1477_p9 = por %p1476_p7, %p1475_p6 }
  0xcc   : > { %p1478_p10 = pnand %p1477_p9, %p1471_p2 }
  0xce   : > { %1481 = shalt.err (!%p1478_p10)
}
  0xcf   : > { %s1482_s20 = scalar_lea.vmem %s1961_s1, 128  ;;  %s1618_s10 = smov [#allocation13]  }
  0xd0   : > { %p1483_p13 = scmp.ne.s32.totalorder %s1961_s1, %s1482_s20  ;;  %s1487_s8 = sshll.u32 %s1618_s10, 4  ;;  %s1488_s8 = int_to_ptr.vmem [resolvable:$false] %s1487_s8 }
  0xd1   : > { %s1489_s11 = scalar_lea.vmem %s1488_s8, 256  ;;  %p1490_p11 = scmp.lt.s32.totalorder %s1961_s1, %s1488_s8 }
  0xd2   : > { %p1485_p5 = pnand %p1483_p13, %p2206_p1  ;;  %p1491_p12 = scmp.lt.s32.totalorder %s1489_s11, %s1482_s20 }
  0xd4   : > { %p1486_p0 = pneg %p1485_p5  ;;  %p1492_p3 = por %p1491_p12, %p1490_p11 }
  0xd6   : > { %p1493_p8 = pnand %p1492_p3, %p1486_p0 }
  0xd8   : > { %1496 = shalt.err (!%p1493_p8)
}
  0xd9   : > { %1218 = dma.hbm_to_vmem [thread:$0]  (!%p2207_p4), %s1933_s24, 128, %s1961_s1, %s1850_s21, %s2203_s27, %s2199_s15, %s2198_s25  }
  0xda   : > { %p2208_p1 = scmp.ne.s32.totalorder %s2188_s19, 0 }
  0xdb   : > { %p2209_p2 = scmp.eq.s32.totalorder (!%p2208_p1), %s1692_s9, 0 }
  0xdc   : > { %391 = sbr.rel (%p2208_p1) target bundleno = 526 (0x20e), region = 48 }
  0xe3   : > { %1570 = dma.done.wait (%p2209_p2), [#allocation3], 128   ;;  %p2210_p6 = pmov %p2209_p2 }
  0xe4   : > { %p2211_p7 = pmov %p2209_p2 }
  0xe5   : > { %1572 = vsyncadd (%p2210_p6), [#allocation3], 4294967168 }
  0xe6   : > { %1574 = dma.done.wait (%p2211_p7), [#allocation6], 256   ;;  %p2212_p9 = pmov %p2209_p2 }
  0xe7   : > { %s2213_s14 = sld [smem:[#allocation28_spill]]  ;;  %s405_s12 = sand.u32 1, %s1692_s9  }
  0xe8   : > { %1576 = vsyncadd (%p2212_p9), [#allocation6], 4294967040  ;;  %s2000_s25 = sand.u32 1, %s1599_s28   ;;  %s406_s15 = scalar_lea.sflag [#allocation9], %s405_s12 }
  0xe9   : > { %s1066_s19 = sshll.u32 %s2000_s25, 5 }
  0xea   : > { %s2003_s21 = scalar_lea.vmem [#allocation8], %s1066_s19 }
  0xed   : > { %p2214_p4 = scmp.ne.s32.totalorder %s2213_s14, 0 }
  0xef   : > { %1578 = dma.done.wait (%p2214_p4), %s406_s15, 640  }
  0xf0   : > { %1580 = vsyncadd (%p2214_p4), %s406_s15, 4294966656  ;;  %s2010_s27 = sshll.u32 %s2000_s25, 3  ;;  %s424_s18 = scalar_lea.sflag [#allocation12], %s405_s12 }
  0xf1   : > { %s418_s24 = scalar_lea.vmem [#allocation10], %s2010_s27  ;;  %s2013_s23 = scalar_lea.vmem [#allocation11], %s1066_s19 }
  0xf2   : > { %1582 = dma.done.wait (%p2214_p4), %s424_s18, 640  }
  0xf3   : > { %1584 = vsyncadd (%p2214_p4), %s424_s18, 4294966656  ;;  %v1619_v0 = vmov 0.0   ;;  %vm1620_vm0 = vmmov 0   ;;  %v2021_v1 = vld [vmem:[%s418_s24] sm:$0xff]   ;;  %s436_s7 = scalar_lea.vmem [#allocation13], %s2010_s27  ;;  %v1279_v3 = vld [vmem:[#allocation5] sm:$0xff]  }
  0xf4   : > { %1128 = vmatprep.subr.bf16.mxu0 %v1619_v0  ;;  %1146 = vmatprep.subr.bf16.mxu1 %v1619_v0  ;;  %v2024_v2 = vld [vmem:[%s436_s7] sm:$0xff]   ;;  %v1280_v4 = vld [vmem:[%s2003_s21] sm:$0xff]   ;;  %vm515_vm1 = vcmask 130048   ;;  %v1283_v7 = vld [vmem:[%s2003_s21 + $0x8] sm:$0xff]   ;;  %vm589_vm2 = vcmask 523264   ;;  %v640_v15 = vunpack.c.l.bf16 %v2021_v1  ;;  %v641_v23 = vunpack.c.h.bf16 %v2021_v1  ;;  %s481_s5 = scalar_lea.vmem [#allocation14], %s2010_s27 }
  0xf5   : > { %1130 = vmatprep.mubr.msk.bf16.mxu0 %vm1620_vm0, %v1619_v0  ;;  %1148 = vmatprep.mubr.msk.bf16.mxu1 %vm1620_vm0, %v1619_v0  ;;  %v1281_v5 = vld [vmem:[#allocation5] sm:$0xff]   ;;  %v1284_v8 = vld [vmem:[%s2013_s23 + $0x8] sm:$0xff]   ;;  %v1286_v10 = vld [vmem:[%s2013_s23 + $0x10] sm:$0xff]   ;;  %v802_v16 = vunpack.c.l.bf16 %v2024_v2  ;;  %v803_v24 = vunpack.c.h.bf16 %v2024_v2  ;;  %s834_s30 = sshll.u32 %s481_s5, 4  ;;  %s488_s13 = scalar_lea.vmem [#allocation15], %s2010_s27  ;;  %s2045_s30 = int_to_ptr.vmem [resolvable:$true] %s834_s30 }
  0xf6   : > { %1129 = vmatpush3.bf16.msra.mxu0 %v2021_v1  ;;  %1147 = vmatpush3.bf16.msra.mxu1 %v2024_v2  ;;  %v1282_v6 = vld [vmem:[%s2013_s23] sm:$0xff]   ;;  %v1287_v11 = vld [vmem:[%s2003_s21 + $0x18] sm:$0xff]   ;;  %v1288_v12 = vld [vmem:[%s2013_s23 + $0x18] sm:$0xff]   ;;  %s849_s1 = sshll.u32 %s488_s13, 4  ;;  %s1096_s22 = sshll.u32 %s1692_s9, 6  ;;  %s2047_s1 = int_to_ptr.vmem [resolvable:$true] %s849_s1 }
  0xf7   : > { %1134 = vmatprep.subr.bf16.mxu0 %v1619_v0  ;;  %1152 = vmatprep.subr.bf16.mxu1 %v1619_v0  ;;  %v1285_v9 = vld [vmem:[%s2003_s21 + $0x10] sm:$0xff]   ;;  %v1289_v13 = vld [vmem:[#allocation2] sm:$0xff]   ;;  %v1290_v14 = vld [vmem:[#allocation7] sm:$0xff]   ;;  %s2215_s17 = sld [smem:[#allocation29_spill]]  ;;  %s2217_s10 = sld [smem:[#allocation35_spill]] }
  0xf8   : > { %s2216_s16 = sld [smem:[#allocation34_spill]]  ;;  %s817_s11 = scalar_lea.sflag [#allocation4], %s2000_s25 }
  0xf9   : > { %1131 = vmatmul.mubr.msk.bf16.vlgmr.msra.gmra.mrb[0].mxu0 %vm515_vm1, %v1279_v3  ;;  %1149 = vmatmul.mubr.msk.bf16.vlgmr.msra.gmra.mrb[0].mxu1 %vm515_vm1, %v1281_v5  ;;  %s1497_s14 = scalar_lea.vmem %s2045_s30, 128  ;;  %s1621_s12 = smov [#allocation14]  }
  0xfa   : > { %1135 = vmatpush3.bf16.msra.mxu0 %v1280_v4  ;;  %1153 = vmatpush3.bf16.msra.mxu1 %v1282_v6  ;;  %p1498_p10 = scmp.ne.s32.totalorder %s2045_s30, %s1497_s14  ;;  %s1501_s19 = sshll.u32 %s1621_s12, 4  ;;  %s1502_s19 = int_to_ptr.vmem [resolvable:$false] %s1501_s19 }
  0xfb   : > { %1136 = vmatprep.subr.bf16.mxu0 %v1619_v0  ;;  %1154 = vmatprep.subr.bf16.mxu1 %v1619_v0  ;;  %s1503_s15 = scalar_lea.vmem %s1502_s19, 256  ;;  %p1504_p11 = scmp.lt.s32.totalorder %s2045_s30, %s1502_s19 }
  0xfc   : > { %1142 = vmatprep.mubr.msk.bf16.mxu0 %vm1620_vm0, %v1619_v0  ;;  %1160 = vmatprep.mubr.msk.bf16.mxu1 %vm1620_vm0, %v1619_v0  ;;  %p1505_p12 = scmp.lt.s32.totalorder %s1503_s15, %s1497_s14 }
  0xfd   : > { %s2057_s8 = scalar_lea.hbm %s2217_s10, %s1096_s22  ;;  %p2218_p13 = scmp.ne.s32.totalorder %s2215_s17, 0 }
  0xfe   : > { %1137 = vmatpush3.bf16.msra.mxu0 %v1283_v7  ;;  %1155 = vmatpush3.bf16.msra.mxu1 %v1284_v8  ;;  %s2052_s3 = scalar_lea.hbm %s2216_s16, %s1096_s22  ;;  %p1506_p3 = por %p1505_p12, %p1504_p11 }
  0xff   : > { %1138 = vmatprep.subr.bf16.mxu0 %v1619_v0  ;;  %1156 = vmatprep.subr.bf16.mxu1 %v1619_v0  ;;  %p1499_p5 = pnand %p1498_p10, %p2218_p13 }
 0x101   : > { %p1500_p0 = pneg %p1499_p5 }
 0x102   : > { %1139 = vmatpush3.bf16.msra.mxu0 %v1285_v9  ;;  %1157 = vmatpush3.bf16.msra.mxu1 %v1286_v10 }
 0x103   : > { %1140 = vmatprep.subr.bf16.mxu0 %v1619_v0  ;;  %1158 = vmatprep.subr.bf16.mxu1 %v1619_v0  ;;  %p1507_p8 = pnand %p1506_p3, %p1500_p0 }
 0x106   : > { %1141 = vmatpush3.bf16.msra.mxu0 %v1287_v11  ;;  %1159 = vmatpush3.bf16.msra.mxu1 %v1288_v12 }
 0x109   : > { %1143 = vmatmul.mubr.msk.bf16.vlgmr.msra.gmra.mrb[0].mxu0 %vm589_vm2, %v1289_v13  ;;  %1161 = vmatmul.mubr.msk.bf16.vlgmr.msra.gmra.mrb[0].mxu1 %vm589_vm2, %v1290_v14 }
 0x1dc   : > { %v627_v17 = vpop.f32.mrb[0].mxu0  ;;  %v789_v18 = vpop.f32.mrb[0].mxu1 }
 0x1dd   : > { %vm634_vm3 = vcmp.ge.f32.partialorder %v627_v17, 0.0  ;;  %v636_v19 = vmul.f32 0.1, %v627_v17  ;;  %vm796_vm4 = vcmp.ge.f32.partialorder %v789_v18, 0.0  ;;  %v798_v20 = vmul.f32 0.1, %v789_v18 }
 0x1de   : > { %v1144_v21 = vpop.f32.mrb[1].mxu0  ;;  %v1162_v22 = vpop.f32.mrb[1].mxu1 }
 0x1df   : > { %v638_v25 = vsel %vm634_vm3, %v627_v17, %v636_v19  ;;  %v800_v26 = vsel %vm796_vm4, %v789_v18, %v798_v20  ;;  %v630_v27 = vpop.f32.mrb[2].mxu0  ;;  %v792_v28 = vpop.f32.mrb[2].mxu1 }
 0x1e0   : > { %v642_v29 = vadd.f32 %v640_v15, %v638_v25  ;;  %v804_v30 = vadd.f32 %v802_v16, %v800_v26  ;;  %vm635_vm5 = vcmp.ge.f32.partialorder %v630_v27, 0.0  ;;  %v637_v31 = vmul.f32 0.1, %v630_v27  ;;  %v1145_v32 = vpop.f32.mrb[3].mxu0  ;;  %v1163_v33 = vpop.f32.mrb[3].mxu1 }
 0x1e1   : > { %vm797_vm6 = vcmp.ge.f32.partialorder %v792_v28, 0.0  ;;  %v799_v34 = vmul.f32 0.1, %v792_v28 }
 0x1e2   : > { %v639_v35 = vsel %vm635_vm5, %v630_v27, %v637_v31 }
 0x1e3   : > { %v643_v36 = vadd.f32 %v641_v23, %v639_v35  ;;  %v801_v37 = vsel %vm797_vm6, %v792_v28, %v799_v34 }
 0x1e4   : > { %v805_v38 = vadd.f32 %v803_v24, %v801_v37 }
 0x1e5   : > { %v1107_v39 = vpack.c.bf16 %v643_v36, %v642_v29 }
 0x1e6   : > { %v1112_v40 = vpack.c.bf16 %v805_v38, %v804_v30 }
 0x1e7   : > { %1108 = vst [vmem:[%s481_s5] sm:$0xff] %v1107_v39  }
 0x1e8   : > { %1113 = vst [vmem:[%s488_s13] sm:$0xff] %v1112_v40  }
 0x1e9   : > { %1510 = shalt.err (!%p1507_p8)
}
 0x1ea   : > { %s1511_s21 = scalar_lea.hbm %s2052_s3, 128  ;;  %s1515_s18 = scalar_lea.hbm %s2216_s16, 256 }
 0x1eb   : > { %p1512_p1 = scmp.ne.s32.totalorder %s2052_s3, %s1511_s21  ;;  %p1516_p7 = scmp.lt.u32.totalorder %s2052_s3, %s2216_s16 }
 0x1ec   : > { %p1517_p9 = scmp.lt.u32.totalorder %s1515_s18, %s1511_s21  ;;  %p1519_p10 = scmp.lt.u32.totalorder %s1511_s21, %s2052_s3 }
 0x1ed   : > { %p1513_p2 = pnand %p1512_p1, %p2218_p13 }
 0x1ee   : > { %p1518_p4 = por %p1517_p9, %p1516_p7 }
 0x1ef   : > { %p1514_p6 = pneg %p1513_p2 }
 0x1f0   : > { %p1520_p5 = por %p1519_p10, %p1518_p4 }
 0x1f2   : > { %p1521_p0 = pnand %p1520_p5, %p1514_p6 }
 0x1f4   : > { %1524 = shalt.err (!%p1521_p0)
}
 0x1f5   : > { %s1622_s5 = smov 64   ;;  %s1623_s13 = smov 128  }
 0x1f6   : > { %s1624_s22 = smov 4   ;;  %s822_s26 = scalar_lea.sflag [#allocation16], %s2000_s25 }
 0x1f7   : > { %1192 = dma.vmem_to_hbm [thread:$0]  (%p2218_p13), %s2045_s30, 128, %s2052_s3, %s817_s11, %s1622_s5, %s1623_s13, %s1624_s22  }
 0x1f8   : > { %s1525_s29 = scalar_lea.vmem %s2047_s1, 128  ;;  %s1625_s9 = smov [#allocation15]  }
 0x1f9   : > { %p1526_p11 = scmp.ne.s32.totalorder %s2047_s1, %s1525_s29  ;;  %s1529_s20 = sshll.u32 %s1625_s9, 4  ;;  %s1530_s20 = int_to_ptr.vmem [resolvable:$false] %s1529_s20 }
 0x1fa   : > { %s1531_s14 = scalar_lea.vmem %s1530_s20, 256  ;;  %p1532_p8 = scmp.lt.s32.totalorder %s2047_s1, %s1530_s20 }
 0x1fb   : > { %p1527_p12 = pnand %p1526_p11, %p2218_p13  ;;  %p1533_p1 = scmp.lt.s32.totalorder %s1531_s14, %s1525_s29 }
 0x1fd   : > { %p1528_p3 = pneg %p1527_p12  ;;  %p1534_p2 = por %p1533_p1, %p1532_p8 }
 0x1ff   : > { %p1535_p6 = pnand %p1534_p2, %p1528_p3 }
 0x201   : > { %1538 = shalt.err (!%p1535_p6)
}
 0x202   : > { %s1539_s30 = scalar_lea.hbm %s2057_s8, 128  ;;  %s1543_s12 = scalar_lea.hbm %s2217_s10, 256 }
 0x203   : > { %p1540_p7 = scmp.ne.s32.totalorder %s2057_s8, %s1539_s30  ;;  %p1544_p10 = scmp.lt.u32.totalorder %s2057_s8, %s2217_s10 }
 0x204   : > { %p1545_p5 = scmp.lt.u32.totalorder %s1543_s12, %s1539_s30  ;;  %p1547_p11 = scmp.lt.u32.totalorder %s1539_s30, %s2057_s8 }
 0x205   : > { %p1541_p9 = pnand %p1540_p7, %p2218_p13 }
 0x206   : > { %p1546_p0 = por %p1545_p5, %p1544_p10 }
 0x207   : > { %p1542_p4 = pneg %p1541_p9 }
 0x208   : > { %p1548_p12 = por %p1547_p11, %p1546_p0 }
 0x20a   : > { %p1549_p3 = pnand %p1548_p12, %p1542_p4 }
 0x20c   : > { %1552 = shalt.err (!%p1549_p3)
}
 0x20d   : > { %1193 = dma.vmem_to_hbm [thread:$0]  (%p2218_p13), %s2047_s1, 128, %s2057_s8, %s822_s26, %s1622_s5, %s1623_s13, %s1624_s22  }
 0x20e PF: > { %s2219_s21 = sld [smem:[#allocation23_spill]]  ;;  %s2220_s27 = sld [smem:[#allocation30_spill]] }
 0x20f   : > { %s2221_s24 = sld [smem:[#allocation25_spill]] }
 0x214   : > { %s864_s18 = sand.u32 1, %s2219_s21   ;;  %p2222_p8 = scmp.ne.s32.totalorder %s2220_s27, 0 }
 0x215   : > { %p2223_p1 = scmp.ge.s32.totalorder %s2221_s24, 2  ;;  %s865_s23 = scalar_lea.sflag [#allocation4], %s864_s18 }
 0x217   : > { %p1220_p2 = pnand %p2223_p1, %p2222_p8 }
 0x219   : > { %1586 = dma.done.wait (!%p1220_p2), %s865_s23, 128  }
 0x21a   : > { %1588 = vsyncadd (!%p1220_p2), %s865_s23, 4294967168  ;;  %s874_s17 = scalar_lea.sflag [#allocation16], %s864_s18 }
 0x21b   : > { %1590 = dma.done.wait (!%p1220_p2), %s874_s17, 128  }
 0x21c   : > { %1592 = vsyncadd (!%p1220_p2), %s874_s17, 4294967168  ;;  %s2224_s30 = sld [smem:[#allocation26_spill]]  ;;  %s2225_s25 = sld [smem:[#allocation24_spill]] }
 0x21d   : > { %s2226_s29 = sld [smem:[#allocation27_spill]]  ;;  %s2227_s27 = smov %s1599_s28 }
 0x222   : > { %p30_p13 = scmp.ge.s32.totalorder %s2224_s30, 4   ;;  %s2228_s28 = smov %s2225_s25 }
 0x224   :  { %32 = sbr.rel (!%p30_p13) target bundleno = 17 (0x11), region = 158 }
 0x22b   :  { %879 = vsyncpa [#allocation3], 1 }
 0x22c   :  { %881 = vsyncpa [#allocation3 + $0x1], 1 }
 0x22d   :  { %882 = vsyncpa [#allocation6], 1 }
 0x22e   :  { %883 = vsyncpa [#allocation9], 1 }
 0x22f   :  { %885 = vsyncpa [#allocation9 + $0x1], 1 }
 0x230   :  { %886 = vsyncpa [#allocation12], 1 }
 0x231   :  { %888 = vsyncpa [#allocation12 + $0x1], 1 }
 0x232   :  { %889 = vsyncpa [#allocation4], 1 }
 0x233   :  { %891 = vsyncpa [#allocation4 + $0x1], 1 }
 0x234   :  { %892 = vsyncpa [#allocation16], 1 }
 0x235   :  { %894 = vsyncpa [#allocation16 + $0x1], 1 }

// kernel: _lambda_.31
= control target key start
LH: loop header
LB: loop body
LE: loop exit
PB: predicated region body
PF: predicated region fallthrough
CT: control target
= control target key end

     0   :  { %s1551_s0 = inlined_call_operand.hbm [shape: bf16[16,144], index: 0, kind: input, shape index: {}]   ;;  %s1552_s1 = inlined_call_operand.hbm [shape: bf16[16,144], index: 1, kind: input, shape index: {}]   ;;  %s1553_s2 = inlined_call_operand.hbm [shape: bf16[144,256], index: 2, kind: input, shape index: {}]   ;;  %s1554_s3 = inlined_call_operand.hbm [shape: bf16[144,256], index: 3, kind: input, shape index: {}]   ;;  %s1555_s4 = inlined_call_operand.hbm [shape: bf16[16,256], index: 4, kind: output, shape index: {0}]   ;;  %s1556_s5 = inlined_call_operand.hbm [shape: bf16[16,256], index: 5, kind: output, shape index: {1}]  }
   0x1   :  { %1571 = sst [smem:[#allocation21_spill]] %s1551_s0 }
   0x2   :  { %1572 = sst [smem:[#allocation22_spill]] %s1553_s2 }
   0x3   :  { %11 = vsyncpa [#allocation3], 0 }
   0x4   :  { %12 = vsyncpa [#allocation6], 0 }
   0x5   :  { %13 = vsyncpa [#allocation4], 0 }
   0x6   :  { %15 = vsyncpa [#allocation4 + $0x1], 0 }
   0x7   :  { %16 = vsyncpa [#allocation11], 0 }
   0x8   :  { %18 = vsyncpa [#allocation11 + $0x1], 0  ;;  %s1209_s18 = smov 0   ;;  %s1211_s19 = smov 0  }
   0x9   :  { %s1213_s20 = smov 0   ;;  %s1215_s21 = smov 0  }
   0xa LB: > { %1573 = sst [smem:[#allocation17_spill]] %s1159_s20  ;;  %s1230_s22 = sadd.s32 4294967295, %s1163_s21   ;;  %s1163_s21 = sphi %s1215_s21, %s1605_s21   ;;  %s1159_s20 = sphi %s1213_s20, %s1607_s20   ;;  %s1155_s19 = sphi %s1211_s19, %s1609_s19   ;;  %s1151_s18 = sphi %s1209_s18, %s1608_s18  }
   0xb   : > { %s769_s23 = sadd.s32 4294967294, %s1163_s21   ;;  %s1234_s24 = sadd.s32 1, %s1163_s21  }
   0xc   : > { %1574 = sst [smem:[#allocation18_spill]] %s1234_s24  ;;  %s73_s25 = sadd.s32 1, %s1159_s20 }
   0xd   : > { %s70_s26 = ssub.s32 %s1163_s21, %s1234_s24  ;;  %p80_p0 = scmp.ne.s32.totalorder %s1159_s20, %s1155_s19 }
   0xe   : > { %p71_p1 = scmp.eq.s32.totalorder %s70_s26, 0  ;;  %p81_p2 = scmp.eq.s32.totalorder %s1163_s21, 0 }
   0xf   : > { %p86_p3 = scmp.ne.s32.totalorder %s1155_s19, %s1151_s18  ;;  %p1557_p4 = scmp.eq.s32.totalorder %s1230_s22, 0 }
  0x10   : > { %s1246_s27 = scalar_select %p71_p1, %s1159_s20, %s73_s25  }
  0x11   : > { %p1248_p5 = por %p81_p2, %p80_p0  ;;  %p1254_p6 = por %p1557_p4, %p86_p3 }
  0x12   : > { %1575 = sst [smem:[#allocation19_spill]] %s1246_s27  ;;  %p136_p7 = scmp.eq.s32.totalorder %s1230_s22, 1 }
  0x13   : > { %s1576_s28 = scalar_select %p1248_p5, 1, 0 }
  0x14   : > { %s1577_s29 = scalar_select %p1254_p6, 1, 0 }
  0x15   : > { %p142_p8 = scmp.eq.s32.totalorder %s769_s23, 1  ;;  %p770_p9 = scmp.ge.s32.totalorder %s1163_s21, 1 }
  0x16   : > { %p175_p10 = scmp.lt.s32.totalorder %s1163_s21, 3  ;;  %p1261_p11 = por %p136_p7, %p80_p0 }
  0x17   : > { %p1265_p12 = por %p142_p8, %p86_p3  ;;  %s1165_s8 = smov [#allocation2]  }
  0x18   : > { %s1578_s30 = scalar_select %p1261_p11, 1, 0 }
  0x19   : > { %s1579_s6 = scalar_select %p1265_p12, 1, 0 }
  0x1a   : > { %p1269_p13 = pnand %p770_p9, %p175_p10  ;;  %s187_s9 = sshll.u32 %s1165_s8, 4  ;;  %s188_s9 = int_to_ptr.vmem [resolvable:$true] %s187_s9 }
  0x1b   : > { %1580 = sst [smem:[#allocation20_spill]] %s1579_s6  ;;  %s214_s11 = sand.u32 1, %s1163_s21  }
  0x1c   : > { %s1581_s7 = scalar_select %p1269_p13, 1, 0 }
  0x1d   : > { %p848_p1 = pneg %p1269_p13  ;;  %s1583_s0 = sld [smem:[#allocation21_spill]] }
  0x1f   : > { %p1277_p2 = pnand %p848_p1, %p1557_p4 }
  0x21   : > { %p1563_p8 = pneg %p1277_p2 }
  0x23   : > { %s941_s14 = scalar_lea.hbm %s1583_s0, 256 }
  0x24   : > { %p942_p7 = scmp.ne.s32.totalorder %s1583_s0, %s941_s14  ;;  %p948_p1 = scmp.lt.u32.totalorder %s941_s14, %s1583_s0 }
  0x26   : > { %p944_p9 = pnand %p1563_p8, %p942_p7 }
  0x28   : > { %p945_p10 = pneg %p944_p9 }
  0x2a   : > { %p950_p0 = pnand %p948_p1, %p945_p10 }
  0x2c   : > { %953 = shalt.err (!%p950_p0)
}
  0x2d   : > { %s954_s25 = scalar_lea.vmem %s188_s9, 256  ;;  %p962_p11 = scmp.lt.s32.totalorder %s188_s9, %s188_s9 }
  0x2e   : > { %p955_p4 = scmp.ne.s32.totalorder %s188_s9, %s954_s25  ;;  %p963_p6 = scmp.lt.s32.totalorder %s954_s25, %s954_s25 }
  0x30   : > { %p957_p3 = pnand %p955_p4, %p1563_p8  ;;  %p964_p13 = por %p963_p6, %p962_p11 }
  0x32   : > { %p958_p12 = pneg %p957_p3 }
  0x34   : > { %p965_p5 = pnand %p964_p13, %p958_p12 }
  0x36   : > { %968 = shalt.err (!%p965_p5)
}
  0x37   : > { %s1166_s26 = smov 128   ;;  %s1561_s8 = smov 8  }
  0x38   : > { %851 = dma.hbm_to_vmem [thread:$0]  (!%p1277_p2), %s1583_s0, 256, %s188_s9, [#allocation3], %s1166_s26, %s1166_s26, %s1561_s8  }
  0x39   : > { %p1584_p4 = scmp.ne.s32.totalorder %s1576_s28, 0  ;;  %p1585_p6 = scmp.lt.s32.totalorder %s1163_s21, 2 }
  0x3a   : > { %s216_s15 = sand.u32 1, %s1159_s20   ;;  %s1562_s17 = sshll.u32 %s1163_s21, 6 }
  0x3b   : > { %p1313_p11 = pnand %p1585_p6, %p1584_p4  ;;  %s1318_s16 = smul.u32 72, %s216_s15 }
  0x3c   : > { %s1587_s2 = sld [smem:[#allocation22_spill]]  ;;  %s1331_s12 = scalar_lea.sflag [#allocation3], %s214_s11 }
  0x3d   : > { %s1586_s14 = scalar_select %p1313_p11, 1, 0 }
  0x3e   : > { %s218_s28 = scalar_lea.vmem [#allocation7], %s1318_s16  ;;  %p1568_p12 = pneg %p1313_p11 }
  0x3f   : > { %s224_s9 = sshll.u32 %s218_s28, 4  ;;  %s1329_s9 = int_to_ptr.vmem [resolvable:$true] %s224_s9 }
  0x42   : > { %s1326_s27 = scalar_lea.hbm %s1587_s2, %s1562_s17  ;;  %s974_s25 = scalar_lea.hbm %s1587_s2, 2304 }
  0x43   : > { %s969_s13 = scalar_lea.hbm %s1326_s27, 1152  ;;  %p975_p3 = scmp.lt.u32.totalorder %s1326_s27, %s1587_s2 }
  0x44   : > { %p970_p5 = scmp.ne.s32.totalorder %s1326_s27, %s969_s13  ;;  %p976_p7 = scmp.lt.u32.totalorder %s974_s25, %s969_s13 }
  0x45   : > { %p978_p10 = scmp.lt.u32.totalorder %s969_s13, %s1326_s27 }
  0x46   : > { %p972_p13 = pnand %p1568_p12, %p970_p5  ;;  %p977_p9 = por %p976_p7, %p975_p3 }
  0x48   : > { %p973_p0 = pneg %p972_p13  ;;  %p979_p1 = por %p978_p10, %p977_p9 }
  0x4a   : > { %p980_p4 = pnand %p979_p1, %p973_p0 }
  0x4c   : > { %983 = shalt.err (!%p980_p4)
}
  0x4d   : > { %s984_s11 = scalar_lea.vmem %s1329_s9, 1152  ;;  %s1168_s28 = smov [#allocation7]  }
  0x4e   : > { %p985_p6 = scmp.ne.s32.totalorder %s1329_s9, %s984_s11  ;;  %s989_s15 = sshll.u32 %s1168_s28, 4  ;;  %s990_s15 = int_to_ptr.vmem [resolvable:$false] %s989_s15 }
  0x4f   : > { %s991_s8 = scalar_lea.vmem %s990_s15, 2304  ;;  %p992_p8 = scmp.lt.s32.totalorder %s1329_s9, %s990_s15 }
  0x50   : > { %p987_p5 = pnand %p985_p6, %p1568_p12  ;;  %p993_p3 = scmp.lt.s32.totalorder %s991_s8, %s984_s11 }
  0x52   : > { %p988_p13 = pneg %p987_p5  ;;  %p994_p7 = por %p993_p3, %p992_p8 }
  0x54   : > { %p995_p9 = pnand %p994_p7, %p988_p13 }
  0x56   : > { %998 = shalt.err (!%p995_p9)
}
  0x57   : > { %s1169_s17 = smov 64   ;;  %s1170_s13 = smov 4  }
  0x58   : > { %858 = dma.hbm_to_vmem [thread:$0]  (!%p1313_p11), %s1326_s27, 1152, %s1329_s9, %s1331_s12, %s1166_s26, %s1169_s17, %s1170_s13  }
  0x59   : > { %s1171_s23 = smov [#allocation5]   ;;  %s1588_s11 = sshll.u32 %s1163_s21, 6 }
  0x5a   : > { %s200_s25 = sshll.u32 %s1171_s23, 4  ;;  %s1367_s8 = scalar_lea.hbm %s1554_s3, %s1588_s11  ;;  %s201_s25 = int_to_ptr.vmem [resolvable:$true] %s200_s25 }
  0x5b   : > { %s999_s20 = scalar_lea.hbm %s1552_s1, 256  ;;  %p1589_p0 = pneg %p1277_p2 }
  0x5c   : > { %p1000_p8 = scmp.ne.s32.totalorder %s1552_s1, %s999_s20  ;;  %p1006_p4 = scmp.lt.u32.totalorder %s999_s20, %s1552_s1 }
  0x5e   : > { %p1002_p10 = pnand %p1000_p8, %p1589_p0 }
  0x60   : > { %p1003_p1 = pneg %p1002_p10 }
  0x62   : > { %p1008_p6 = pnand %p1006_p4, %p1003_p1 }
  0x64   : > { %1011 = shalt.err (!%p1008_p6)
}
  0x65   : > { %s1012_s23 = scalar_lea.vmem %s201_s25, 256  ;;  %p1590_p13 = pmov %p1589_p0 }
  0x66   : > { %p1013_p5 = scmp.ne.s32.totalorder %s201_s25, %s1012_s23  ;;  %p1020_p9 = scmp.lt.s32.totalorder %s201_s25, %s201_s25 }
  0x67   : > { %p1021_p12 = scmp.lt.s32.totalorder %s1012_s23, %s1012_s23 }
  0x68   : > { %p1015_p3 = pnand %p1013_p5, %p1590_p13 }
  0x69   : > { %p1022_p11 = por %p1021_p12, %p1020_p9 }
  0x6a   : > { %p1016_p7 = pneg %p1015_p3 }
  0x6c   : > { %p1023_p0 = pnand %p1022_p11, %p1016_p7 }
  0x6e   : > { %1026 = shalt.err (!%p1023_p0)
}
  0x6f   : > { %s1591_s0 = smov 8   ;;  %s238_s24 = scalar_lea.vmem [#allocation8], %s1318_s16 }
  0x70   : > { %854 = dma.hbm_to_vmem [thread:$0]  (!%p1277_p2), %s1552_s1, 256, %s201_s25, [#allocation6], %s1166_s26, %s1166_s26, %s1591_s0  }
  0x71   : > { %s244_s6 = sshll.u32 %s238_s24, 4  ;;  %s1027_s11 = scalar_lea.hbm %s1367_s8, 1152  ;;  %s1393_s6 = int_to_ptr.vmem [resolvable:$true] %s244_s6 }
  0x72   : > { %p1028_p11 = scmp.ne.s32.totalorder %s1367_s8, %s1027_s11  ;;  %p1592_p12 = scmp.ne.s32.totalorder %s1586_s14, 0 }
  0x73   : > { %s1032_s15 = scalar_lea.hbm %s1554_s3, 2304  ;;  %p1033_p4 = scmp.lt.u32.totalorder %s1367_s8, %s1554_s3 }
  0x74   : > { %p1593_p8 = pneg %p1592_p12  ;;  %p1034_p6 = scmp.lt.u32.totalorder %s1032_s15, %s1027_s11 }
  0x75   : > { %p1036_p5 = scmp.lt.u32.totalorder %s1027_s11, %s1367_s8 }
  0x76   : > { %p1030_p10 = pnand %p1028_p11, %p1593_p8  ;;  %p1035_p2 = por %p1034_p6, %p1033_p4 }
  0x78   : > { %p1031_p1 = pneg %p1030_p10  ;;  %p1037_p13 = por %p1036_p5, %p1035_p2 }
  0x7a   : > { %p1038_p3 = pnand %p1037_p13, %p1031_p1 }
  0x7c   : > { %1041 = shalt.err (!%p1038_p3)
}
  0x7d   : > { %s1042_s16 = scalar_lea.vmem %s1393_s6, 1152  ;;  %p1594_p9 = pmov %p1593_p8 }
  0x7e   : > { %p1043_p7 = scmp.ne.s32.totalorder %s1393_s6, %s1042_s16  ;;  %s1172_s25 = smov [#allocation8]  }
  0x7f   : > { %s1047_s23 = sshll.u32 %s1172_s25, 4  ;;  %s1048_s23 = int_to_ptr.vmem [resolvable:$false] %s1047_s23 }
  0x80   : > { %p1045_p0 = pnand %p1043_p7, %p1594_p9  ;;  %s1049_s0 = scalar_lea.vmem %s1048_s23, 2304 }
  0x81   : > { %p1050_p8 = scmp.lt.s32.totalorder %s1393_s6, %s1048_s23  ;;  %p1051_p10 = scmp.lt.s32.totalorder %s1049_s0, %s1042_s16 }
  0x82   : > { %p1046_p11 = pneg %p1045_p0 }
  0x83   : > { %p1052_p4 = por %p1051_p10, %p1050_p8 }
  0x85   : > { %p1053_p6 = pnand %p1052_p4, %p1046_p11 }
  0x87   : > { %1056 = shalt.err (!%p1053_p6)
}
  0x88   : > { %861 = dma.hbm_to_vmem [thread:$0]  (!%p1592_p12), %s1367_s8, 1152, %s1393_s6, %s1331_s12, %s1166_s26, %s1169_s17, %s1170_s13  }
  0x89   : > { %p1595_p1 = scmp.ne.s32.totalorder %s1581_s7, 0 }
  0x8a   : > { %p1596_p2 = scmp.eq.s32.totalorder (!%p1595_p1), %s1230_s22, 0 }
  0x8b   : > { %256 = sbr.rel (%p1595_p1) target bundleno = 446 (0x1be), region = 36 }
  0x92   : > { %1130 = dma.done.wait (%p1596_p2), [#allocation3], 256   ;;  %p1597_p5 = pmov %p1596_p2 }
  0x93   : > { %p1598_p13 = pmov %p1596_p2 }
  0x94   : > { %1132 = vsyncadd (%p1597_p5), [#allocation3], 4294967040 }
  0x95   : > { %1134 = dma.done.wait (%p1598_p13), [#allocation6], 256   ;;  %p1599_p3 = pmov %p1596_p2 }
  0x96   : > { %s266_s14 = sand.u32 1, %s1230_s22   ;;  %s1434_s26 = sand.u32 1, %s1155_s19  }
  0x97   : > { %1136 = vsyncadd (%p1599_p3), [#allocation6], 4294967040  ;;  %s831_s7 = smul.u32 72, %s1434_s26  ;;  %s267_s12 = scalar_lea.sflag [#allocation3], %s266_s14 }
  0x98   : > { %p1600_p12 = scmp.ne.s32.totalorder %s1577_s29, 0 }
  0x99   : > { %s1437_s17 = scalar_lea.vmem [#allocation7], %s831_s7 }
  0x9a   : > { %1138 = dma.done.wait (%p1600_p12), %s267_s12, 2304  }
  0x9b   : > { %1140 = vsyncadd (%p1600_p12), %s267_s12, 4294964992  ;;  %v1173_v0 = vmov 0   ;;  %v917_v1 = vld [vmem:[%s1437_s17] sm:$0xff]   ;;  %s1444_s13 = scalar_lea.vmem [#allocation8], %s831_s7  ;;  %v919_v3 = vld [vmem:[%s1437_s17 + $0x8] sm:$0xff]   ;;  %vm400_vm0 = vcmask 130048  }
  0x9c   : > { %404 = vmatprep.subr.bf16.mxu0 %v1173_v0  ;;  %541 = vmatprep.subr.bf16.mxu1 %v1173_v0  ;;  %v918_v2 = vld [vmem:[%s1444_s13] sm:$0xff]   ;;  %v920_v4 = vld [vmem:[%s1444_s13 + $0x8] sm:$0xff]   ;;  %v922_v6 = vld [vmem:[%s1444_s13 + $0x10] sm:$0xff]   ;;  %s779_s29 = sshll.u32 %s1434_s26, 3  ;;  %s811_s6 = sshll.u32 %s1230_s22, 6 }
  0x9d   : > { %405 = vmatpush1.bf16.msra.mxu0 %v917_v1  ;;  %542 = vmatpush1.bf16.msra.mxu1 %v918_v2  ;;  %v921_v5 = vld [vmem:[%s1437_s17 + $0x10] sm:$0xff]   ;;  %v923_v7 = vld [vmem:[%s1437_s17 + $0x18] sm:$0xff]   ;;  %v924_v8 = vld [vmem:[%s1444_s13 + $0x18] sm:$0xff]   ;;  %s308_s8 = scalar_lea.vmem [#allocation9], %s779_s29  ;;  %s315_s20 = scalar_lea.vmem [#allocation10], %s779_s29 }
  0x9e   : > { %406 = vmatprep.subr.bf16.mxu0 %v1173_v0  ;;  %543 = vmatprep.subr.bf16.mxu1 %v1173_v0  ;;  %v925_v9 = vld [vmem:[%s1437_s17 + $0x20] sm:$0xff]   ;;  %v926_v10 = vld [vmem:[%s1444_s13 + $0x20] sm:$0xff]   ;;  %v927_v11 = vld [vmem:[%s1437_s17 + $0x28] sm:$0xff]   ;;  %s610_s2 = sshll.u32 %s308_s8, 4  ;;  %s625_s24 = sshll.u32 %s315_s20, 4  ;;  %s1465_s2 = int_to_ptr.vmem [resolvable:$true] %s610_s2  ;;  %s1467_s24 = int_to_ptr.vmem [resolvable:$true] %s625_s24 }
  0x9f   : > { %v928_v12 = vld [vmem:[%s1444_s13 + $0x28] sm:$0xff]   ;;  %v929_v15 = vld [vmem:[%s1437_s17 + $0x30] sm:$0xff]   ;;  %v930_v16 = vld [vmem:[%s1444_s13 + $0x30] sm:$0xff]   ;;  %s1472_s28 = scalar_lea.hbm %s1555_s4, %s811_s6  ;;  %s1477_s27 = scalar_lea.hbm %s1556_s5, %s811_s6 }
  0xa0   : > { %v937_v13 = vld [vmem:[#allocation2 + $0x4] ss:$8 sps:$4 sm:$0xff]   ;;  %v940_v14 = vld [vmem:[#allocation5 + $0x4] ss:$8 sps:$4 sm:$0xff]   ;;  %v935_v21 = vld [vmem:[#allocation2] ss:$8 sps:$4 sm:$0xff]  }
  0xa1   : > { %407 = vmatpush1.bf16.msra.mxu0 %v919_v3  ;;  %544 = vmatpush1.bf16.msra.mxu1 %v920_v4  ;;  %v931_v17 = vld [vmem:[%s1437_s17 + $0x38] sm:$0xff]   ;;  %v932_v18 = vld [vmem:[%s1444_s13 + $0x38] sm:$0xff]   ;;  %v933_v19 = vld [vmem:[%s1437_s17 + $0x40] sm:$0xff]   ;;  %s593_s9 = scalar_lea.sflag [#allocation4], %s1434_s26  ;;  %s1057_s16 = scalar_lea.vmem %s1465_s2, 128 }
  0xa2   : > { %408 = vmatprep.subr.bf16.mxu0 %v1173_v0  ;;  %545 = vmatprep.subr.bf16.mxu1 %v1173_v0  ;;  %v934_v20 = vld [vmem:[%s1444_s13 + $0x40] sm:$0xff]   ;;  %p1058_p7 = scmp.ne.s32.totalorder %s1465_s2, %s1057_s16  ;;  %p1601_p9 = scmp.ne.s32.totalorder %s1578_s30, 0 }
  0xa3   : > { %792 = vmatprep.mubr.msk.bf16.mxu0 %vm400_vm0, %v937_v13  ;;  %806 = vmatprep.mubr.msk.bf16.mxu1 %vm400_vm0, %v940_v14  ;;  %v938_v22 = vld [vmem:[#allocation5] ss:$8 sps:$4 sm:$0xff]   ;;  %s1174_s25 = smov [#allocation9]  }
  0xa4   : > { %p1059_p0 = pnand %p1058_p7, %p1601_p9  ;;  %s1061_s23 = sshll.u32 %s1174_s25, 4  ;;  %s1062_s23 = int_to_ptr.vmem [resolvable:$false] %s1061_s23 }
  0xa5   : > { %409 = vmatpush1.bf16.msra.mxu0 %v921_v5  ;;  %546 = vmatpush1.bf16.msra.mxu1 %v922_v6  ;;  %s1063_s0 = scalar_lea.vmem %s1062_s23, 256  ;;  %p1064_p8 = scmp.lt.s32.totalorder %s1465_s2, %s1062_s23 }
  0xa6   : > { %410 = vmatprep.subr.bf16.mxu0 %v1173_v0  ;;  %547 = vmatprep.subr.bf16.mxu1 %v1173_v0  ;;  %p1060_p11 = pneg %p1059_p0  ;;  %p1065_p10 = scmp.lt.s32.totalorder %s1063_s0, %s1057_s16 }
  0xa8   : > { %p1066_p4 = por %p1065_p10, %p1064_p8 }
  0xa9   : > { %411 = vmatpush1.bf16.msra.mxu0 %v923_v7  ;;  %548 = vmatpush1.bf16.msra.mxu1 %v924_v8 }
  0xaa   : > { %412 = vmatprep.subr.bf16.mxu0 %v1173_v0  ;;  %549 = vmatprep.subr.bf16.mxu1 %v1173_v0  ;;  %p1067_p6 = pnand %p1066_p4, %p1060_p11 }
  0xad   : > { %413 = vmatpush1.bf16.msra.mxu0 %v925_v9  ;;  %550 = vmatpush1.bf16.msra.mxu1 %v926_v10 }
  0xae   : > { %414 = vmatprep.subr.bf16.mxu0 %v1173_v0  ;;  %551 = vmatprep.subr.bf16.mxu1 %v1173_v0 }
  0xb1   : > { %415 = vmatpush1.bf16.msra.mxu0 %v927_v11  ;;  %552 = vmatpush1.bf16.msra.mxu1 %v928_v12 }
  0xb2   : > { %416 = vmatprep.subr.bf16.mxu0 %v1173_v0  ;;  %553 = vmatprep.subr.bf16.mxu1 %v1173_v0 }
  0xb5   : > { %417 = vmatpush1.bf16.msra.mxu0 %v929_v15  ;;  %554 = vmatpush1.bf16.msra.mxu1 %v930_v16 }
  0xb6   : > { %418 = vmatprep.subr.bf16.mxu0 %v1173_v0  ;;  %555 = vmatprep.subr.bf16.mxu1 %v1173_v0 }
  0xb9   : > { %419 = vmatpush1.bf16.msra.mxu0 %v931_v17  ;;  %556 = vmatpush1.bf16.msra.mxu1 %v932_v18 }
  0xba   : > { %420 = vmatprep.subr.bf16.mxu0 %v1173_v0  ;;  %557 = vmatprep.subr.bf16.mxu1 %v1173_v0 }
  0xbd   : > { %421 = vmatpush1.bf16.msra.mxu0 %v933_v19  ;;  %558 = vmatpush1.bf16.msra.mxu1 %v934_v20 }
  0xc0   : > { %437 = vmatmul.mubr.bf16.vlgmr.msra.gmra.mrb[0].mxu0 %v935_v21  ;;  %574 = vmatmul.mubr.bf16.vlgmr.msra.gmra.mrb[0].mxu1 %v938_v22 }
 0x193   : > { %v438_v23 = vpop.f32.mrb[0].mxu0  ;;  %v575_v24 = vpop.f32.mrb[0].mxu1 }
 0x194   : > { %v440_v25 = vpop.f32.mrb[1].mxu0  ;;  %v577_v26 = vpop.f32.mrb[1].mxu1 }
 0x195   : > { %v441_v27 = vpop.f32.mrb[2].mxu0  ;;  %v578_v29 = vpop.f32.mrb[2].mxu1 }
 0x196   : > { %v822_v28 = vpack.c.bf16 %v441_v27, %v438_v23  ;;  %v443_v30 = vpop.f32.mrb[3].mxu0  ;;  %v827_v31 = vpack.c.bf16 %v578_v29, %v575_v24  ;;  %v580_v32 = vpop.f32.mrb[3].mxu1 }
 0x198   : > { %823 = vst [vmem:[%s308_s8] sm:$0xff] %v822_v28   ;;  %828 = vst [vmem:[%s315_s20] sm:$0xff] %v827_v31  }
 0x199   : > { %1070 = shalt.err (!%p1067_p6)
}
 0x19a   : > { %s1071_s14 = scalar_lea.hbm %s1472_s28, 128  ;;  %s1075_s17 = scalar_lea.hbm %s1555_s4, 256 }
 0x19b   : > { %p1072_p1 = scmp.ne.s32.totalorder %s1472_s28, %s1071_s14  ;;  %p1076_p13 = scmp.lt.u32.totalorder %s1472_s28, %s1555_s4 }
 0x19c   : > { %p1077_p3 = scmp.lt.u32.totalorder %s1075_s17, %s1071_s14  ;;  %p1079_p7 = scmp.lt.u32.totalorder %s1071_s14, %s1472_s28 }
 0x19d   : > { %p1073_p2 = pnand %p1072_p1, %p1601_p9 }
 0x19e   : > { %p1078_p12 = por %p1077_p3, %p1076_p13 }
 0x19f   : > { %p1074_p5 = pneg %p1073_p2 }
 0x1a0   : > { %p1080_p0 = por %p1079_p7, %p1078_p12 }
 0x1a2   : > { %p1081_p11 = pnand %p1080_p0, %p1074_p5 }
 0x1a4   : > { %1084 = shalt.err (!%p1081_p11)
}
 0x1a5   : > { %s1175_s8 = smov 64   ;;  %s1176_s20 = smov 128  }
 0x1a6   : > { %s1177_s6 = smov 4   ;;  %s598_s11 = scalar_lea.sflag [#allocation11], %s1434_s26 }
 0x1a7   : > { %844 = dma.vmem_to_hbm [thread:$0]  (%p1601_p9), %s1465_s2, 128, %s1472_s28, %s593_s9, %s1175_s8, %s1176_s20, %s1177_s6  }
 0x1a8   : > { %s1085_s10 = scalar_lea.vmem %s1467_s24, 128  ;;  %s1178_s22 = smov [#allocation10]  }
 0x1a9   : > { %p1086_p8 = scmp.ne.s32.totalorder %s1467_s24, %s1085_s10  ;;  %s1089_s15 = sshll.u32 %s1178_s22, 4  ;;  %s1090_s15 = int_to_ptr.vmem [resolvable:$false] %s1089_s15 }
 0x1aa   : > { %s1091_s16 = scalar_lea.vmem %s1090_s15, 256  ;;  %p1092_p6 = scmp.lt.s32.totalorder %s1467_s24, %s1090_s15 }
 0x1ab   : > { %p1087_p10 = pnand %p1086_p8, %p1601_p9  ;;  %p1093_p1 = scmp.lt.s32.totalorder %s1091_s16, %s1085_s10 }
 0x1ad   : > { %p1088_p4 = pneg %p1087_p10  ;;  %p1094_p2 = por %p1093_p1, %p1092_p6 }
 0x1af   : > { %p1095_p5 = pnand %p1094_p2, %p1088_p4 }
 0x1b1   : > { %1098 = shalt.err (!%p1095_p5)
}
 0x1b2   : > { %s1099_s2 = scalar_lea.hbm %s1477_s27, 128  ;;  %s1103_s25 = scalar_lea.hbm %s1556_s5, 256 }
 0x1b3   : > { %p1100_p13 = scmp.ne.s32.totalorder %s1477_s27, %s1099_s2  ;;  %p1104_p7 = scmp.lt.u32.totalorder %s1477_s27, %s1556_s5 }
 0x1b4   : > { %p1105_p0 = scmp.lt.u32.totalorder %s1103_s25, %s1099_s2  ;;  %p1107_p8 = scmp.lt.u32.totalorder %s1099_s2, %s1477_s27 }
 0x1b5   : > { %p1101_p3 = pnand %p1100_p13, %p1601_p9 }
 0x1b6   : > { %p1106_p11 = por %p1105_p0, %p1104_p7 }
 0x1b7   : > { %p1102_p12 = pneg %p1101_p3 }
 0x1b8   : > { %p1108_p10 = por %p1107_p8, %p1106_p11 }
 0x1ba   : > { %p1109_p4 = pnand %p1108_p10, %p1102_p12 }
 0x1bc   : > { %1112 = shalt.err (!%p1109_p4)
}
 0x1bd   : > { %845 = dma.vmem_to_hbm [thread:$0]  (%p1601_p9), %s1467_s24, 128, %s1477_s27, %s598_s11, %s1175_s8, %s1176_s20, %s1177_s6  }
 0x1be PF: > { %s1602_s14 = sld [smem:[#allocation20_spill]]  ;;  %s640_s7 = sand.u32 1, %s1151_s18  }
 0x1bf   : > { %p1604_p1 = scmp.ge.s32.totalorder %s1163_s21, 2  ;;  %s641_s12 = scalar_lea.sflag [#allocation4], %s640_s7 }
 0x1c4   : > { %p1603_p6 = scmp.ne.s32.totalorder %s1602_s14, 0 }
 0x1c6   : > { %p863_p2 = pnand %p1604_p1, %p1603_p6 }
 0x1c8   : > { %1142 = dma.done.wait (!%p863_p2), %s641_s12, 128  }
 0x1c9   : > { %1144 = vsyncadd (!%p863_p2), %s641_s12, 4294967168  ;;  %s650_s30 = scalar_lea.sflag [#allocation11], %s640_s7 }
 0x1ca   : > { %1146 = dma.done.wait (!%p863_p2), %s650_s30, 128  }
 0x1cb   : > { %1148 = vsyncadd (!%p863_p2), %s650_s30, 4294967168  ;;  %s1605_s21 = sld [smem:[#allocation18_spill]]  ;;  %s1606_s26 = sld [smem:[#allocation17_spill]] }
 0x1cc   : > { %s1607_s20 = sld [smem:[#allocation19_spill]]  ;;  %s1608_s18 = smov %s1155_s19 }
 0x1d1   : > { %p21_p9 = scmp.ge.s32.totalorder %s1605_s21, 4   ;;  %s1609_s19 = smov %s1606_s26 }
 0x1d3   :  { %23 = sbr.rel (!%p21_p9) target bundleno = 10 (0xa), region = 116 }
 0x1da   :  { %655 = vsyncpa [#allocation3], 1 }
 0x1db   :  { %657 = vsyncpa [#allocation3 + $0x1], 1 }
 0x1dc   :  { %658 = vsyncpa [#allocation6], 1 }
 0x1dd   :  { %659 = vsyncpa [#allocation4], 1 }
 0x1de   :  { %661 = vsyncpa [#allocation4 + $0x1], 1 }
 0x1df   :  { %662 = vsyncpa [#allocation11], 1 }
 0x1e0   :  { %664 = vsyncpa [#allocation11 + $0x1], 1 }

// kernel: _lambda_.32
= control target key start
LH: loop header
LB: loop body
LE: loop exit
PB: predicated region body
PF: predicated region fallthrough
CT: control target
= control target key end

     0   :  { %s1887_s0 = inlined_call_operand.hbm [shape: bf16[16,16], index: 0, kind: input, shape index: {}]   ;;  %s1888_s1 = inlined_call_operand.hbm [shape: bf16[16,16], index: 1, kind: input, shape index: {}]   ;;  %s1889_s2 = inlined_call_operand.hbm [shape: bf16[16,256], index: 2, kind: input, shape index: {}]   ;;  %s1890_s3 = inlined_call_operand.hbm [shape: bf16[16,256], index: 3, kind: input, shape index: {}]   ;;  %s1891_s4 = inlined_call_operand.hbm [shape: bf16[16,256], index: 4, kind: input, shape index: {}]   ;;  %s1892_s5 = inlined_call_operand.hbm [shape: bf16[16,256], index: 5, kind: input, shape index: {}]   ;;  %s1893_s6 = inlined_call_operand.hbm [shape: bf16[16,256], index: 6, kind: output, shape index: {0}]   ;;  %s1894_s7 = inlined_call_operand.hbm [shape: bf16[16,256], index: 7, kind: output, shape index: {1}]  }
   0x1   :  { %1918 = sst [smem:[#allocation25_spill]] %s1887_s0 }
   0x2   :  { %1919 = sst [smem:[#allocation26_spill]] %s1889_s2 }
   0x3   :  { %1920 = sst [smem:[#allocation27_spill]] %s1890_s3 }
   0x4   :  { %1921 = sst [smem:[#allocation28_spill]] %s1894_s7 }
   0x5   :  { %13 = vsyncpa [#allocation3], 0 }
   0x6   :  { %14 = vsyncpa [#allocation6], 0 }
   0x7   :  { %15 = vsyncpa [#allocation4], 0 }
   0x8   :  { %17 = vsyncpa [#allocation4 + $0x1], 0 }
   0x9   :  { %18 = vsyncpa [#allocation13], 0 }
   0xa   :  { %20 = vsyncpa [#allocation13 + $0x1], 0  ;;  %s1480_s24 = smov 0   ;;  %s1482_s25 = smov 0  }
   0xb   :  { %s1484_s26 = smov 0   ;;  %s1486_s27 = smov 0  }
   0xc LB: > { %1922 = sst [smem:[#allocation19_spill]] %s1410_s24  ;;  %s1501_s28 = sadd.s32 4294967295, %s1422_s27   ;;  %s1422_s27 = sphi %s1486_s27, %s1962_s27   ;;  %s1418_s26 = sphi %s1484_s26, %s1964_s26   ;;  %s1414_s25 = sphi %s1482_s25, %s1966_s25   ;;  %s1410_s24 = sphi %s1480_s24, %s1965_s24  }
   0xd   : > { %1923 = sst [smem:[#allocation20_spill]] %s1418_s26  ;;  %s937_s29 = sadd.s32 4294967294, %s1422_s27  }
   0xe   : > { %1924 = sst [smem:[#allocation21_spill]] %s1422_s27  ;;  %s1505_s30 = sadd.s32 1, %s1422_s27  }
   0xf   : > { %1925 = sst [smem:[#allocation22_spill]] %s1505_s30  ;;  %s75_s8 = sadd.s32 1, %s1418_s26 }
  0x10   : > { %s72_s9 = ssub.s32 %s1422_s27, %s1505_s30  ;;  %p82_p0 = scmp.ne.s32.totalorder %s1418_s26, %s1414_s25 }
  0x11   : > { %p73_p1 = scmp.eq.s32.totalorder %s72_s9, 0  ;;  %p83_p2 = scmp.eq.s32.totalorder %s1422_s27, 0 }
  0x12   : > { %p88_p3 = scmp.ne.s32.totalorder %s1414_s25, %s1410_s24  ;;  %p1895_p4 = scmp.eq.s32.totalorder %s1501_s28, 0 }
  0x13   : > { %s1517_s10 = scalar_select %p73_p1, %s1418_s26, %s75_s8  }
  0x14   : > { %p1519_p5 = por %p83_p2, %p82_p0  ;;  %p1525_p6 = por %p1895_p4, %p88_p3 }
  0x15   : > { %1926 = sst [smem:[#allocation23_spill]] %s1517_s10  ;;  %p190_p7 = scmp.eq.s32.totalorder %s1501_s28, 1 }
  0x16   : > { %s1927_s11 = scalar_select %p1519_p5, 1, 0 }
  0x17   : > { %s1928_s12 = scalar_select %p1525_p6, 1, 0 }
  0x18   : > { %p196_p8 = scmp.eq.s32.totalorder %s937_s29, 1  ;;  %p938_p9 = scmp.ge.s32.totalorder %s1422_s27, 1 }
  0x19   : > { %p229_p10 = scmp.lt.s32.totalorder %s1422_s27, 3  ;;  %p1532_p11 = por %p190_p7, %p82_p0 }
  0x1a   : > { %p1536_p12 = por %p196_p8, %p88_p3  ;;  %s1424_s16 = smov [#allocation2]  }
  0x1b   : > { %s1929_s13 = scalar_select %p1532_p11, 1, 0 }
  0x1c   : > { %s1930_s14 = scalar_select %p1536_p12, 1, 0 }
  0x1d   : > { %p1540_p13 = pnand %p938_p9, %p229_p10  ;;  %s241_s17 = sshll.u32 %s1424_s16, 4  ;;  %s242_s17 = int_to_ptr.vmem [resolvable:$true] %s241_s17 }
  0x1e   : > { %1931 = sst [smem:[#allocation24_spill]] %s1930_s14  ;;  %s268_s19 = sand.u32 1, %s1422_s27  }
  0x1f   : > { %s1932_s15 = scalar_select %p1540_p13, 1, 0 }
  0x20   : > { %p1055_p1 = pneg %p1540_p13  ;;  %s1934_s0 = sld [smem:[#allocation25_spill]] }
  0x22   : > { %p1548_p2 = pnand %p1055_p1, %p1895_p4 }
  0x24   : > { %s1933_s18 = scalar_select %p1548_p2, 1, 0 }
  0x25   : > { %p1906_p8 = pneg %p1548_p2 }
  0x26   : > { %s1140_s22 = scalar_lea.hbm %s1934_s0, 128 }
  0x27   : > { %p1141_p7 = scmp.ne.s32.totalorder %s1934_s0, %s1140_s22  ;;  %p1147_p1 = scmp.lt.u32.totalorder %s1140_s22, %s1934_s0 }
  0x29   : > { %p1143_p9 = pnand %p1906_p8, %p1141_p7 }
  0x2b   : > { %p1144_p10 = pneg %p1143_p9 }
  0x2d   : > { %p1149_p0 = pnand %p1147_p1, %p1144_p10 }
  0x2f   : > { %1152 = shalt.err (!%p1149_p0)
}
  0x30   : > { %s1153_s16 = scalar_lea.vmem %s242_s17, 128  ;;  %p1161_p11 = scmp.lt.s32.totalorder %s242_s17, %s242_s17 }
  0x31   : > { %p1154_p4 = scmp.ne.s32.totalorder %s242_s17, %s1153_s16  ;;  %p1162_p6 = scmp.lt.s32.totalorder %s1153_s16, %s1153_s16 }
  0x33   : > { %p1156_p3 = pnand %p1154_p4, %p1906_p8  ;;  %p1163_p13 = por %p1162_p6, %p1161_p11 }
  0x35   : > { %p1157_p12 = pneg %p1156_p3 }
  0x37   : > { %p1164_p5 = pnand %p1163_p13, %p1157_p12 }
  0x39   : > { %1167 = shalt.err (!%p1164_p5)
}
  0x3a   : > { %s1902_s20 = smov 64   ;;  %s1904_s21 = smov 4  }
  0x3b   : > { %1058 = dma.hbm_to_vmem [thread:$0]  (!%p1548_p2), %s1934_s0, 128, %s242_s17, [#allocation3], %s1902_s20, %s1902_s20, %s1904_s21  }
  0x3c   : > { %p1935_p4 = scmp.ne.s32.totalorder %s1927_s11, 0  ;;  %p1936_p0 = scmp.lt.s32.totalorder %s1422_s27, 2 }
  0x3d   : > { %s270_s8 = sand.u32 1, %s1418_s26   ;;  %s1592_s16 = sshll.u32 %s1422_s27, 6 }
  0x3e   : > { %p1584_p6 = pnand %p1936_p0, %p1935_p4  ;;  %s1589_s9 = sshll.u32 %s270_s8, 3 }
  0x3f   : > { %s1938_s2 = sld [smem:[#allocation26_spill]]  ;;  %s272_s11 = scalar_lea.vmem [#allocation7], %s1589_s9 }
  0x40   : > { %s1937_s29 = scalar_select %p1584_p6, 1, 0 }
  0x41   : > { %s278_s17 = sshll.u32 %s272_s11, 4  ;;  %s1603_s22 = scalar_lea.sflag [#allocation3], %s268_s19  ;;  %s1601_s17 = int_to_ptr.vmem [resolvable:$true] %s278_s17 }
  0x42   : > { %p1609_p11 = pneg %p1584_p6 }
  0x44   : > { %s1939_s8 = scalar_select %p1609_p11, 1, 0 }
  0x45   : > { %s1598_s14 = scalar_lea.hbm %s1938_s2, %s1592_s16  ;;  %s1173_s20 = scalar_lea.hbm %s1938_s2, 256 }
  0x46   : > { %s1168_s23 = scalar_lea.hbm %s1598_s14, 128  ;;  %p1174_p3 = scmp.lt.u32.totalorder %s1598_s14, %s1938_s2 }
  0x47   : > { %p1169_p5 = scmp.ne.s32.totalorder %s1598_s14, %s1168_s23  ;;  %p1175_p7 = scmp.lt.u32.totalorder %s1173_s20, %s1168_s23 }
  0x48   : > { %p1177_p10 = scmp.lt.u32.totalorder %s1168_s23, %s1598_s14 }
  0x49   : > { %p1171_p12 = pnand %p1609_p11, %p1169_p5  ;;  %p1176_p9 = por %p1175_p7, %p1174_p3 }
  0x4b   : > { %p1172_p13 = pneg %p1171_p12  ;;  %p1178_p1 = por %p1177_p10, %p1176_p9 }
  0x4d   : > { %p1179_p4 = pnand %p1178_p1, %p1172_p13 }
  0x4f   : > { %1182 = shalt.err (!%p1179_p4)
}
  0x50   : > { %s1183_s19 = scalar_lea.vmem %s1601_s17, 128  ;;  %s1427_s30 = smov [#allocation7]  }
  0x51   : > { %p1184_p0 = scmp.ne.s32.totalorder %s1601_s17, %s1183_s19  ;;  %s1188_s10 = sshll.u32 %s1427_s30, 4  ;;  %s1189_s10 = int_to_ptr.vmem [resolvable:$false] %s1188_s10 }
  0x52   : > { %s1190_s21 = scalar_lea.vmem %s1189_s10, 256  ;;  %p1191_p8 = scmp.lt.s32.totalorder %s1601_s17, %s1189_s10 }
  0x53   : > { %p1186_p5 = pnand %p1184_p0, %p1609_p11  ;;  %p1192_p2 = scmp.lt.s32.totalorder %s1190_s21, %s1183_s19 }
  0x55   : > { %p1187_p12 = pneg %p1186_p5  ;;  %p1193_p3 = por %p1192_p2, %p1191_p8 }
  0x57   : > { %p1194_p7 = pnand %p1193_p3, %p1187_p12 }
  0x59   : > { %1197 = shalt.err (!%p1194_p7)
}
  0x5a   : > { %s1912_s20 = smov 128   ;;  %s1940_s23 = smov 4  }
  0x5b   : > { %s1941_s11 = smov 64   ;;  %s1942_s3 = sld [smem:[#allocation27_spill]] }
  0x5c   : > { %1065 = dma.hbm_to_vmem [thread:$0]  (!%p1584_p6), %s1598_s14, 128, %s1601_s17, %s1603_s22, %s1912_s20, %s1941_s11, %s1940_s23  }
  0x5d   : > { %s292_s21 = scalar_lea.vmem [#allocation8], %s1589_s9  ;;  %s1649_s27 = scalar_lea.hbm %s1891_s4, %s1592_s16 }
  0x5e   : > { %s298_s0 = sshll.u32 %s292_s21, 4  ;;  %s1643_s0 = int_to_ptr.vmem [resolvable:$true] %s298_s0 }
  0x61   : > { %s1640_s19 = scalar_lea.hbm %s1942_s3, %s1592_s16  ;;  %s1203_s30 = scalar_lea.hbm %s1942_s3, 256 }
  0x62   : > { %s1198_s24 = scalar_lea.hbm %s1640_s19, 128  ;;  %p1204_p9 = scmp.lt.u32.totalorder %s1640_s19, %s1942_s3 }
  0x63   : > { %p1199_p2 = scmp.ne.s32.totalorder %s1640_s19, %s1198_s24  ;;  %p1205_p10 = scmp.lt.u32.totalorder %s1203_s30, %s1198_s24 }
  0x64   : > { %p1207_p4 = scmp.lt.u32.totalorder %s1198_s24, %s1640_s19 }
  0x65   : > { %p1201_p8 = pnand %p1199_p2, %p1609_p11  ;;  %p1206_p1 = por %p1205_p10, %p1204_p9 }
  0x67   : > { %p1202_p13 = pneg %p1201_p8  ;;  %p1208_p0 = por %p1207_p4, %p1206_p1 }
  0x69   : > { %p1209_p5 = pnand %p1208_p0, %p1202_p13 }
  0x6b   : > { %1212 = shalt.err (!%p1209_p5)
}
  0x6c   : > { %s1213_s2 = scalar_lea.vmem %s1643_s0, 128  ;;  %s1429_s26 = smov [#allocation8]  }
  0x6d   : > { %p1214_p12 = scmp.ne.s32.totalorder %s1643_s0, %s1213_s2  ;;  %s1218_s21 = sshll.u32 %s1429_s26, 4  ;;  %s1219_s21 = int_to_ptr.vmem [resolvable:$false] %s1218_s21 }
  0x6e   : > { %s1220_s20 = scalar_lea.vmem %s1219_s21, 256  ;;  %p1221_p2 = scmp.lt.s32.totalorder %s1643_s0, %s1219_s21 }
  0x6f   : > { %p1216_p3 = pnand %p1214_p12, %p1609_p11  ;;  %p1222_p8 = scmp.lt.s32.totalorder %s1220_s20, %s1213_s2 }
  0x71   : > { %p1217_p7 = pneg %p1216_p3  ;;  %p1223_p9 = por %p1222_p8, %p1221_p2 }
  0x73   : > { %p1224_p10 = pnand %p1223_p9, %p1217_p7 }
  0x75   : > { %1227 = shalt.err (!%p1224_p10)
}
  0x76   : > { %s1943_s24 = smov 128   ;;  %s312_s14 = scalar_lea.vmem [#allocation9], %s1589_s9 }
  0x77   : > { %1068 = dma.hbm_to_vmem [thread:$0]  (!%p1584_p6), %s1640_s19, 128, %s1643_s0, %s1603_s22, %s1943_s24, %s1941_s11, %s1940_s23  }
  0x78   : > { %s318_s17 = sshll.u32 %s312_s14, 4  ;;  %s1430_s30 = smov [#allocation5]   ;;  %s1677_s17 = int_to_ptr.vmem [resolvable:$true] %s318_s17 }
  0x79   : > { %s1679_s10 = sshll.u32 %s1430_s30, 4  ;;  %s1228_s2 = scalar_lea.hbm %s1649_s27, 128  ;;  %s255_s10 = int_to_ptr.vmem [resolvable:$true] %s1679_s10 }
  0x7a   : > { %p1229_p13 = scmp.ne.s32.totalorder %s1649_s27, %s1228_s2  ;;  %s1233_s20 = scalar_lea.hbm %s1891_s4, 256 }
  0x7b   : > { %p1234_p0 = scmp.lt.u32.totalorder %s1649_s27, %s1891_s4  ;;  %p1235_p5 = scmp.lt.u32.totalorder %s1233_s20, %s1228_s2 }
  0x7c   : > { %p1231_p1 = pnand %p1229_p13, %p1609_p11  ;;  %p1237_p3 = scmp.lt.u32.totalorder %s1228_s2, %s1649_s27 }
  0x7d   : > { %p1236_p12 = por %p1235_p5, %p1234_p0 }
  0x7e   : > { %p1232_p4 = pneg %p1231_p1 }
  0x7f   : > { %p1238_p7 = por %p1237_p3, %p1236_p12 }
  0x81   : > { %p1239_p2 = pnand %p1238_p7, %p1232_p4 }
  0x83   : > { %1242 = shalt.err (!%p1239_p2)
}
  0x84   : > { %s1243_s0 = scalar_lea.vmem %s1677_s17, 128  ;;  %s1431_s19 = smov [#allocation9]  }
  0x85   : > { %p1244_p8 = scmp.ne.s32.totalorder %s1677_s17, %s1243_s0  ;;  %s1248_s14 = sshll.u32 %s1431_s19, 4  ;;  %s1249_s14 = int_to_ptr.vmem [resolvable:$false] %s1248_s14 }
  0x86   : > { %s1250_s3 = scalar_lea.vmem %s1249_s14, 256  ;;  %p1251_p13 = scmp.lt.s32.totalorder %s1677_s17, %s1249_s14 }
  0x87   : > { %p1246_p9 = pnand %p1244_p8, %p1609_p11  ;;  %p1252_p1 = scmp.lt.s32.totalorder %s1250_s3, %s1243_s0 }
  0x89   : > { %p1247_p10 = pneg %p1246_p9  ;;  %p1253_p0 = por %p1252_p1, %p1251_p13 }
  0x8b   : > { %p1254_p5 = pnand %p1253_p0, %p1247_p10 }
  0x8d   : > { %1257 = shalt.err (!%p1254_p5)
}
  0x8e   : > { %1071 = dma.hbm_to_vmem [thread:$0]  (!%p1584_p6), %s1649_s27, 128, %s1677_s17, %s1603_s22, %s1943_s24, %s1941_s11, %s1940_s23  }
  0x8f   : > { %s1258_s2 = scalar_lea.hbm %s1888_s1, 128  ;;  %p1944_p12 = scmp.ne.s32.totalorder %s1933_s18, 0 }
  0x90   : > { %p1259_p4 = scmp.ne.s32.totalorder %s1888_s1, %s1258_s2  ;;  %p1265_p8 = scmp.lt.u32.totalorder %s1258_s2, %s1888_s1 }
  0x91   : > { %p1945_p3 = pneg %p1944_p12 }
  0x93   : > { %p1261_p7 = pnand %p1259_p4, %p1945_p3 }
  0x95   : > { %p1262_p2 = pneg %p1261_p7 }
  0x97   : > { %p1267_p9 = pnand %p1265_p8, %p1262_p2 }
  0x99   : > { %1270 = shalt.err (!%p1267_p9)
}
  0x9a   : > { %s1271_s27 = scalar_lea.vmem %s255_s10, 128  ;;  %p1946_p13 = pmov %p1945_p3 }
  0x9b   : > { %p1272_p10 = scmp.ne.s32.totalorder %s255_s10, %s1271_s27  ;;  %p1279_p5 = scmp.lt.s32.totalorder %s255_s10, %s255_s10 }
  0x9c   : > { %p1280_p6 = scmp.lt.s32.totalorder %s1271_s27, %s1271_s27 }
  0x9d   : > { %p1274_p1 = pnand %p1272_p10, %p1946_p13 }
  0x9e   : > { %p1281_p11 = por %p1280_p6, %p1279_p5 }
  0x9f   : > { %p1275_p0 = pneg %p1274_p1 }
  0xa1   : > { %p1282_p3 = pnand %p1281_p11, %p1275_p0 }
  0xa3   : > { %1285 = shalt.err (!%p1282_p3)
}
  0xa4   : > { %1061 = dma.hbm_to_vmem [thread:$0]  (!%p1944_p12), %s1888_s1, 128, %s255_s10, [#allocation6], %s1941_s11, %s1941_s11, %s1940_s23  }
  0xa5   : > { %s1734_s7 = scalar_lea.hbm %s1892_s5, %s1592_s16  ;;  %s332_s18 = scalar_lea.vmem [#allocation10], %s1589_s9 }
  0xa6   : > { %s338_s30 = sshll.u32 %s332_s18, 4  ;;  %s1286_s2 = scalar_lea.hbm %s1734_s7, 128  ;;  %s1737_s30 = int_to_ptr.vmem [resolvable:$true] %s338_s30 }
  0xa7   : > { %p1287_p6 = scmp.ne.s32.totalorder %s1734_s7, %s1286_s2  ;;  %p1947_p11 = scmp.ne.s32.totalorder %s1939_s8, 0 }
  0xa8   : > { %s1291_s21 = scalar_lea.hbm %s1892_s5, 256  ;;  %p1292_p12 = scmp.lt.u32.totalorder %s1734_s7, %s1892_s5 }
  0xa9   : > { %p1289_p4 = pnand %p1287_p6, %p1947_p11  ;;  %p1293_p2 = scmp.lt.u32.totalorder %s1291_s21, %s1286_s2 }
  0xaa   : > { %p1295_p9 = scmp.lt.u32.totalorder %s1286_s2, %s1734_s7 }
  0xab   : > { %p1290_p7 = pneg %p1289_p4  ;;  %p1294_p8 = por %p1293_p2, %p1292_p12 }
  0xad   : > { %p1296_p10 = por %p1295_p9, %p1294_p8 }
  0xaf   : > { %p1297_p13 = pnand %p1296_p10, %p1290_p7 }
  0xb1   : > { %1300 = shalt.err (!%p1297_p13)
}
  0xb2   : > { %s1301_s9 = scalar_lea.vmem %s1737_s30, 128  ;;  %s1432_s0 = smov [#allocation10]  }
  0xb3   : > { %p1302_p1 = scmp.ne.s32.totalorder %s1737_s30, %s1301_s9  ;;  %s1306_s27 = sshll.u32 %s1432_s0, 4  ;;  %s1307_s27 = int_to_ptr.vmem [resolvable:$false] %s1306_s27 }
  0xb4   : > { %s1308_s17 = scalar_lea.vmem %s1307_s27, 256  ;;  %p1309_p3 = scmp.lt.s32.totalorder %s1737_s30, %s1307_s27 }
  0xb5   : > { %p1304_p0 = pnand %p1302_p1, %p1947_p11  ;;  %p1310_p6 = scmp.lt.s32.totalorder %s1308_s17, %s1301_s9 }
  0xb7   : > { %p1305_p5 = pneg %p1304_p0  ;;  %p1311_p4 = por %p1310_p6, %p1309_p3 }
  0xb9   : > { %p1312_p12 = pnand %p1311_p4, %p1305_p5 }
  0xbb   : > { %1315 = shalt.err (!%p1312_p12)
}
  0xbc   : > { %p1948_p7 = scmp.ne.s32.totalorder %s1937_s29, 0  ;;  %p1949_p11 = scmp.ne.s32.totalorder %s1932_s15, 0 }
  0xbd   : > { %p1950_p2 = scmp.eq.s32.totalorder (!%p1949_p11), %s1501_s28, 0 }
  0xbe   : > { %1074 = dma.hbm_to_vmem [thread:$0]  (!%p1948_p7), %s1734_s7, 128, %s1737_s30, %s1603_s22, %s1943_s24, %s1941_s11, %s1940_s23  }
  0xbf   : > { %350 = sbr.rel (%p1949_p11) target bundleno = 485 (0x1e5), region = 44 }
  0xc6   : > { %1389 = dma.done.wait (%p1950_p2), [#allocation3], 128   ;;  %p1951_p8 = pmov %p1950_p2 }
  0xc7   : > { %p1952_p9 = pmov %p1950_p2 }
  0xc8   : > { %1391 = vsyncadd (%p1951_p8), [#allocation3], 4294967168 }
  0xc9   : > { %1393 = dma.done.wait (%p1952_p9), [#allocation6], 128   ;;  %p1953_p10 = pmov %p1950_p2 }
  0xca   : > { %s360_s29 = sand.u32 1, %s1501_s28   ;;  %s1776_s22 = sand.u32 1, %s1414_s25  }
  0xcb   : > { %1395 = vsyncadd (%p1953_p10), [#allocation6], 4294967168  ;;  %s1779_s15 = sshll.u32 %s1776_s22, 3  ;;  %s361_s8 = scalar_lea.sflag [#allocation3], %s360_s29 }
  0xcc   : > { %s364_s23 = scalar_lea.vmem [#allocation7], %s1779_s15  ;;  %p1954_p13 = scmp.ne.s32.totalorder %s1928_s12, 0 }
  0xce   : > { %1397 = dma.done.wait (%p1954_p13), %s361_s8, 512  }
  0xcf   : > { %1399 = vsyncadd (%p1954_p13), %s361_s8, 4294966784  ;;  %v1433_v0 = vmov 0.0   ;;  %vm1434_vm0 = vmmov 0   ;;  %s373_s11 = scalar_lea.vmem [#allocation8], %s1779_s15  ;;  %s391_s24 = scalar_lea.vmem [#allocation10], %s1779_s15  ;;  %v1132_v3 = vld [vmem:[#allocation5] sm:$0xff]  }
  0xd0   : > { %1003 = vmatprep.subr.bf16.mxu0 %v1433_v0  ;;  %1015 = vmatprep.subr.bf16.mxu1 %v1433_v0  ;;  %v1130_v1 = vld [vmem:[%s373_s11] sm:$0xff]   ;;  %vm462_vm1 = vcmask 130048   ;;  %v445_v5 = vld [vmem:[%s364_s23] sm:$0xff]   ;;  %s382_s12 = scalar_lea.vmem [#allocation9], %s1779_s15  ;;  %s434_s19 = scalar_lea.vmem [#allocation11], %s1779_s15 }
  0xd1   : > { %1005 = vmatprep.mubr.msk.bf16.mxu0 %vm1434_vm0, %v1433_v0  ;;  %1017 = vmatprep.mubr.msk.bf16.mxu1 %vm1434_vm0, %v1433_v0  ;;  %v1131_v2 = vld [vmem:[%s391_s24] sm:$0xff]   ;;  %v584_v6 = vld [vmem:[%s382_s12] sm:$0xff]   ;;  %v568_v11 = vunpack.c.l.bf16 %v445_v5  ;;  %v569_v18 = vunpack.c.h.bf16 %v445_v5  ;;  %s738_s14 = sshll.u32 %s434_s19, 4  ;;  %s441_s3 = scalar_lea.vmem [#allocation12], %s1779_s15  ;;  %s1801_s14 = int_to_ptr.vmem [resolvable:$true] %s738_s14 }
  0xd2   : > { %1004 = vmatpush3.bf16.msra.mxu0 %v1130_v1  ;;  %1016 = vmatpush3.bf16.msra.mxu1 %v1131_v2  ;;  %v1133_v4 = vld [vmem:[#allocation5] sm:$0xff]   ;;  %v1136_v7 = vld [vmem:[#allocation2] sm:$0xff]   ;;  %v706_v15 = vunpack.c.l.bf16 %v584_v6  ;;  %v707_v22 = vunpack.c.h.bf16 %v584_v6  ;;  %s753_s7 = sshll.u32 %s441_s3, 4  ;;  %s977_s18 = sshll.u32 %s1501_s28, 6  ;;  %s1803_s7 = int_to_ptr.vmem [resolvable:$true] %s753_s7 }
  0xd3   : > { %1009 = vmatprep.subr.bf16.mxu0 %v1433_v0  ;;  %1021 = vmatprep.subr.bf16.mxu1 %v1433_v0  ;;  %v1137_v8 = vld [vmem:[#allocation2] sm:$0xff]   ;;  %s1808_s26 = scalar_lea.hbm %s1893_s6, %s977_s18  ;;  %s1955_s21 = sld [smem:[#allocation28_spill]] }
  0xd4   : > { %s721_s16 = scalar_lea.sflag [#allocation4], %s1776_s22  ;;  %s1316_s9 = scalar_lea.vmem %s1801_s14, 128 }
  0xd5   : > { %1006 = vmatmul.mubr.msk.bf16.vlgmr.msra.gmra.mrb[0].mxu0 %vm462_vm1, %v1132_v3  ;;  %1018 = vmatmul.mubr.msk.bf16.vlgmr.msra.gmra.mrb[0].mxu1 %vm462_vm1, %v1133_v4  ;;  %p1317_p1 = scmp.ne.s32.totalorder %s1801_s14, %s1316_s9  ;;  %p1956_p0 = scmp.ne.s32.totalorder %s1929_s13, 0 }
  0xd6   : > { %1011 = vmatprep.mubr.msk.bf16.mxu0 %vm1434_vm0, %v1433_v0  ;;  %1010 = vmatpush3.bf16.msra.mxu0 %v445_v5  ;;  %s1435_s0 = smov [#allocation11]  }
  0xd7   : > { %1022 = vmatpush3.bf16.msra.mxu1 %v584_v6  ;;  %1023 = vmatprep.mubr.msk.bf16.mxu1 %vm1434_vm0, %v1433_v0  ;;  %p1318_p5 = pnand %p1317_p1, %p1956_p0  ;;  %s1320_s27 = sshll.u32 %s1435_s0, 4  ;;  %s1321_s27 = int_to_ptr.vmem [resolvable:$false] %s1320_s27 }
  0xd8   : > { %s1322_s17 = scalar_lea.vmem %s1321_s27, 256  ;;  %p1323_p6 = scmp.lt.s32.totalorder %s1801_s14, %s1321_s27 }
  0xd9   : > { %s1813_s20 = scalar_lea.hbm %s1955_s21, %s977_s18  ;;  %p1319_p3 = pneg %p1318_p5 }
  0xda   : > { %p1324_p4 = scmp.lt.s32.totalorder %s1322_s17, %s1316_s9 }
  0xdc   : > { %p1325_p12 = por %p1324_p4, %p1323_p6 }
  0xde   : > { %p1326_p7 = pnand %p1325_p12, %p1319_p3 }
  0xe1   : > { %1012 = vmatmul.mubr.msk.bf16.vlgmr.msra.gmra.mrb[0].mxu0 %vm462_vm1, %v1136_v7  ;;  %1024 = vmatmul.mubr.msk.bf16.vlgmr.msra.gmra.mrb[0].mxu1 %vm462_vm1, %v1137_v8 }
 0x1b4   : > { %v555_v9 = vpop.f32.mrb[0].mxu0  ;;  %v693_v12 = vpop.f32.mrb[0].mxu1 }
 0x1b5   : > { %vm562_vm2 = vcmp.ge.f32.partialorder %v555_v9, 0.0  ;;  %v564_v10 = vmul.f32 0.1, %v555_v9  ;;  %v1013_v13 = vpop.f32.mrb[1].mxu0  ;;  %vm700_vm3 = vcmp.ge.f32.partialorder %v693_v12, 0.0  ;;  %v1025_v16 = vpop.f32.mrb[1].mxu1 }
 0x1b6   : > { %v702_v14 = vmul.f32 0.1, %v693_v12  ;;  %v558_v17 = vpop.f32.mrb[2].mxu0  ;;  %v696_v21 = vpop.f32.mrb[2].mxu1 }
 0x1b7   : > { %v566_v19 = vsel %vm562_vm2, %v555_v9, %v564_v10  ;;  %vm563_vm4 = vcmp.ge.f32.partialorder %v558_v17, 0.0  ;;  %v565_v20 = vmul.f32 0.1, %v558_v17  ;;  %v1014_v23 = vpop.f32.mrb[3].mxu0  ;;  %vm701_vm5 = vcmp.ge.f32.partialorder %v696_v21, 0.0  ;;  %v1026_v26 = vpop.f32.mrb[3].mxu1 }
 0x1b8   : > { %v704_v24 = vsel %vm700_vm3, %v693_v12, %v702_v14  ;;  %v703_v25 = vmul.f32 0.1, %v696_v21  ;;  %v570_v28 = vadd.f32 %v568_v11, %v566_v19 }
 0x1b9   : > { %v567_v27 = vsel %vm563_vm4, %v558_v17, %v565_v20  ;;  %v708_v31 = vadd.f32 %v706_v15, %v704_v24 }
 0x1ba   : > { %v571_v29 = vadd.f32 %v569_v18, %v567_v27  ;;  %v705_v30 = vsel %vm701_vm5, %v696_v21, %v703_v25 }
 0x1bb   : > { %v709_v32 = vadd.f32 %v707_v22, %v705_v30 }
 0x1bc   : > { %v988_v33 = vpack.c.bf16 %v571_v29, %v570_v28 }
 0x1bd   : > { %v993_v34 = vpack.c.bf16 %v709_v32, %v708_v31 }
 0x1be   : > { %989 = vst [vmem:[%s434_s19] sm:$0xff] %v988_v33  }
 0x1bf   : > { %994 = vst [vmem:[%s441_s3] sm:$0xff] %v993_v34  }
 0x1c0   : > { %1329 = shalt.err (!%p1326_p7)
}
 0x1c1   : > { %s1330_s29 = scalar_lea.hbm %s1808_s26, 128  ;;  %s1334_s23 = scalar_lea.hbm %s1893_s6, 256 }
 0x1c2   : > { %p1331_p11 = scmp.ne.s32.totalorder %s1808_s26, %s1330_s29  ;;  %p1335_p9 = scmp.lt.u32.totalorder %s1808_s26, %s1893_s6 }
 0x1c3   : > { %p1336_p10 = scmp.lt.u32.totalorder %s1334_s23, %s1330_s29  ;;  %p1338_p1 = scmp.lt.u32.totalorder %s1330_s29, %s1808_s26 }
 0x1c4   : > { %p1332_p2 = pnand %p1331_p11, %p1956_p0 }
 0x1c5   : > { %p1337_p13 = por %p1336_p10, %p1335_p9 }
 0x1c6   : > { %p1333_p8 = pneg %p1332_p2 }
 0x1c7   : > { %p1339_p5 = por %p1338_p1, %p1337_p13 }
 0x1c9   : > { %p1340_p3 = pnand %p1339_p5, %p1333_p8 }
 0x1cb   : > { %1343 = shalt.err (!%p1340_p3)
}
 0x1cc   : > { %s1436_s12 = smov 64   ;;  %s1437_s19 = smov 128  }
 0x1cd   : > { %s1438_s3 = smov 4   ;;  %s726_s18 = scalar_lea.sflag [#allocation13], %s1776_s22 }
 0x1ce   : > { %1051 = dma.vmem_to_hbm [thread:$0]  (%p1956_p0), %s1801_s14, 128, %s1808_s26, %s721_s16, %s1436_s12, %s1437_s19, %s1438_s3  }
 0x1cf   : > { %s1344_s30 = scalar_lea.vmem %s1803_s7, 128  ;;  %s1439_s2 = smov [#allocation12]  }
 0x1d0   : > { %p1345_p6 = scmp.ne.s32.totalorder %s1803_s7, %s1344_s30  ;;  %s1348_s28 = sshll.u32 %s1439_s2, 4  ;;  %s1349_s28 = int_to_ptr.vmem [resolvable:$false] %s1348_s28 }
 0x1d1   : > { %s1350_s10 = scalar_lea.vmem %s1349_s28, 256  ;;  %p1351_p7 = scmp.lt.s32.totalorder %s1803_s7, %s1349_s28 }
 0x1d2   : > { %p1346_p4 = pnand %p1345_p6, %p1956_p0  ;;  %p1352_p11 = scmp.lt.s32.totalorder %s1350_s10, %s1344_s30 }
 0x1d4   : > { %p1347_p12 = pneg %p1346_p4  ;;  %p1353_p2 = por %p1352_p11, %p1351_p7 }
 0x1d6   : > { %p1354_p8 = pnand %p1353_p2, %p1347_p12 }
 0x1d8   : > { %1357 = shalt.err (!%p1354_p8)
}
 0x1d9   : > { %s1358_s14 = scalar_lea.hbm %s1813_s20, 128  ;;  %s1362_s9 = scalar_lea.hbm %s1955_s21, 256 }
 0x1da   : > { %p1359_p9 = scmp.ne.s32.totalorder %s1813_s20, %s1358_s14  ;;  %p1363_p1 = scmp.lt.u32.totalorder %s1813_s20, %s1955_s21 }
 0x1db   : > { %p1364_p5 = scmp.lt.u32.totalorder %s1362_s9, %s1358_s14  ;;  %p1366_p6 = scmp.lt.u32.totalorder %s1358_s14, %s1813_s20 }
 0x1dc   : > { %p1360_p10 = pnand %p1359_p9, %p1956_p0 }
 0x1dd   : > { %p1365_p3 = por %p1364_p5, %p1363_p1 }
 0x1de   : > { %p1361_p13 = pneg %p1360_p10 }
 0x1df   : > { %p1367_p4 = por %p1366_p6, %p1365_p3 }
 0x1e1   : > { %p1368_p12 = pnand %p1367_p4, %p1361_p13 }
 0x1e3   : > { %1371 = shalt.err (!%p1368_p12)
}
 0x1e4   : > { %1052 = dma.vmem_to_hbm [thread:$0]  (%p1956_p0), %s1803_s7, 128, %s1813_s20, %s726_s18, %s1436_s12, %s1437_s19, %s1438_s3  }
 0x1e5 PF: > { %s1957_s17 = sld [smem:[#allocation19_spill]]  ;;  %s1958_s29 = sld [smem:[#allocation24_spill]] }
 0x1e6   : > { %s1959_s15 = sld [smem:[#allocation21_spill]] }
 0x1eb   : > { %s768_s8 = sand.u32 1, %s1957_s17   ;;  %p1960_p7 = scmp.ne.s32.totalorder %s1958_s29, 0 }
 0x1ec   : > { %p1961_p11 = scmp.ge.s32.totalorder %s1959_s15, 2  ;;  %s769_s23 = scalar_lea.sflag [#allocation4], %s768_s8 }
 0x1ee   : > { %p1076_p2 = pnand %p1961_p11, %p1960_p7 }
 0x1f0   : > { %1401 = dma.done.wait (!%p1076_p2), %s769_s23, 128  }
 0x1f1   : > { %1403 = vsyncadd (!%p1076_p2), %s769_s23, 4294967168  ;;  %s778_s13 = scalar_lea.sflag [#allocation13], %s768_s8 }
 0x1f2   : > { %1405 = dma.done.wait (!%p1076_p2), %s778_s13, 128  }
 0x1f3   : > { %1407 = vsyncadd (!%p1076_p2), %s778_s13, 4294967168  ;;  %s1962_s27 = sld [smem:[#allocation22_spill]]  ;;  %s1963_s22 = sld [smem:[#allocation20_spill]] }
 0x1f4   : > { %s1964_s26 = sld [smem:[#allocation23_spill]]  ;;  %s1965_s24 = smov %s1414_s25 }
 0x1f9   : > { %p23_p0 = scmp.ge.s32.totalorder %s1962_s27, 4   ;;  %s1966_s25 = smov %s1963_s22 }
 0x1fb   :  { %25 = sbr.rel (!%p23_p0) target bundleno = 12 (0xc), region = 146 }
 0x202   :  { %783 = vsyncpa [#allocation3], 1 }
 0x203   :  { %785 = vsyncpa [#allocation3 + $0x1], 1 }
 0x204   :  { %786 = vsyncpa [#allocation6], 1 }
 0x205   :  { %787 = vsyncpa [#allocation4], 1 }
 0x206   :  { %789 = vsyncpa [#allocation4 + $0x1], 1 }
 0x207   :  { %790 = vsyncpa [#allocation13], 1 }
 0x208   :  { %792 = vsyncpa [#allocation13 + $0x1], 1 }

// kernel: _lambda_.25
= control target key start
LH: loop header
LB: loop body
LE: loop exit
PB: predicated region body
PF: predicated region fallthrough
CT: control target
= control target key end

     0   :  { %10 = vsyncpa [#allocation3], 0  ;;  %s1327_s0 = inlined_call_operand.hbm [shape: bf16[32,16], index: 0, kind: input, shape index: {}]   ;;  %s1328_s1 = inlined_call_operand.hbm [shape: bf16[16,256], index: 1, kind: input, shape index: {}]   ;;  %s1329_s2 = inlined_call_operand.hbm [shape: bf16[16,256], index: 2, kind: input, shape index: {}]   ;;  %s1330_s3 = inlined_call_operand.hbm [shape: bf16[32,256], index: 3, kind: output, shape index: {0}]   ;;  %s1331_s4 = inlined_call_operand.hbm [shape: bf16[32,256], index: 4, kind: output, shape index: {1}]  }
   0x1   :  { %11 = vsyncpa [#allocation6], 0 }
   0x2   :  { %13 = vsyncpa [#allocation6 + $0x1], 0 }
   0x3   :  { %14 = vsyncpa [#allocation4], 0 }
   0x4   :  { %16 = vsyncpa [#allocation4 + $0x1], 0 }
   0x5   :  { %17 = vsyncpa [#allocation10], 0 }
   0x6   :  { %19 = vsyncpa [#allocation10 + $0x1], 0  ;;  %s1036_s15 = smov 0   ;;  %s1038_s16 = smov 0  }
   0x7   :  { %s1040_s17 = smov 0   ;;  %s1042_s18 = smov 0  }
   0x8 LB: > { %s1057_s19 = sadd.s32 1, %s998_s18   ;;  %s53_s20 = sadd.s32 1, %s994_s17  ;;  %s998_s18 = sphi %s1042_s18, %s1354_s18   ;;  %s994_s17 = sphi %s1040_s17, %s1353_s17   ;;  %s990_s16 = sphi %s1038_s16, %s1352_s16   ;;  %s986_s15 = sphi %s1036_s15, %s1351_s15  }
   0x9   : > { %s50_s21 = ssub.s32 %s998_s18, %s1057_s19  ;;  %p60_p0 = scmp.ne.s32.totalorder %s994_s17, %s990_s16 }
   0xa   : > { %p51_p1 = scmp.eq.s32.totalorder %s50_s21, 0  ;;  %p61_p2 = scmp.eq.s32.totalorder %s998_s18, 0 }
   0xb   : > { %p760_p5 = scmp.lt.s32.totalorder %s998_s18, 2  ;;  %s181_s23 = sand.u32 1, %s998_s18  }
   0xc   : > { %s1066_s22 = scalar_select %p51_p1, %s994_s17, %s53_s20  }
   0xd   : > { %p62_p3 = por %p61_p2, %p60_p0  ;;  %s183_s24 = sand.u32 1, %s994_s17  }
   0xe   : > { %s1075_s25 = sshll.u32 %s183_s24, 3  ;;  %s648_s26 = sshll.u32 %s998_s18, 6 }
   0xf   : > { %s1083_s29 = scalar_lea.hbm %s1328_s1, %s648_s26  ;;  %s185_s30 = scalar_lea.vmem [#allocation5], %s1075_s25 }
  0x10   : > { %s191_s5 = sshll.u32 %s185_s30, 4  ;;  %p1086_p6 = pnand %p760_p5, %p62_p3  ;;  %s1090_s5 = int_to_ptr.vmem [resolvable:$true] %s191_s5 }
  0x11   : > { %s1092_s7 = scalar_lea.sflag [#allocation6], %s181_s23  ;;  %s808_s8 = scalar_lea.hbm %s1083_s29, 128 }
  0x12   : > { %p809_p7 = scmp.ne.s32.totalorder %s1083_s29, %s808_s8  ;;  %p810_p8 = pneg %p1086_p6 }
  0x13   : > { %s813_s11 = scalar_lea.hbm %s1328_s1, 256  ;;  %p814_p11 = scmp.lt.u32.totalorder %s1083_s29, %s1328_s1 }
  0x14   : > { %p811_p9 = pnand %p810_p8, %p809_p7  ;;  %p815_p12 = scmp.lt.u32.totalorder %s813_s11, %s808_s8 }
  0x15   : > { %p817_p1 = scmp.lt.u32.totalorder %s808_s8, %s1083_s29 }
  0x16   : > { %p812_p10 = pneg %p811_p9  ;;  %p816_p13 = por %p815_p12, %p814_p11 }
  0x18   : > { %p818_p2 = por %p817_p1, %p816_p13 }
  0x1a   : > { %p819_p3 = pnand %p818_p2, %p812_p10 }
  0x1c   : > { %822 = shalt.err (!%p819_p3)
}
  0x1d   : > { %s823_s14 = scalar_lea.vmem %s1090_s5, 128  ;;  %s1000_s20 = smov [#allocation5]  }
  0x1e   : > { %p824_p5 = scmp.ne.s32.totalorder %s1090_s5, %s823_s14  ;;  %s828_s21 = sshll.u32 %s1000_s20, 4  ;;  %s829_s21 = int_to_ptr.vmem [resolvable:$false] %s828_s21 }
  0x1f   : > { %s830_s23 = scalar_lea.vmem %s829_s21, 256  ;;  %p831_p4 = scmp.lt.s32.totalorder %s1090_s5, %s829_s21 }
  0x20   : > { %p826_p7 = pnand %p824_p5, %p810_p8  ;;  %p832_p11 = scmp.lt.s32.totalorder %s830_s23, %s823_s14 }
  0x22   : > { %p827_p9 = pneg %p826_p7  ;;  %p833_p12 = por %p832_p11, %p831_p4 }
  0x24   : > { %p834_p13 = pnand %p833_p12, %p827_p9 }
  0x26   : > { %837 = shalt.err (!%p834_p13)
}
  0x27   : > { %s1001_s24 = smov 128   ;;  %s1002_s27 = smov 64  }
  0x28   : > { %s1003_s28 = smov 4   ;;  %s1128_s9 = scalar_lea.hbm %s1329_s2, %s648_s26 }
  0x29   : > { %748 = dma.hbm_to_vmem [thread:$0]  (!%p1086_p6), %s1083_s29, 128, %s1090_s5, %s1092_s7, %s1001_s24, %s1002_s27, %s1003_s28  }
  0x2a   : > { %s205_s10 = scalar_lea.vmem [#allocation7], %s1075_s25  ;;  %s1132_s12 = sadd.s32 4294967295, %s998_s18  }
  0x2b   : > { %s211_s11 = sshll.u32 %s205_s10, 4  ;;  %s643_s13 = sadd.s32 4294967294, %s998_s18   ;;  %s1158_s11 = int_to_ptr.vmem [resolvable:$true] %s211_s11 }
  0x2c   : > { %p66_p4 = scmp.ne.s32.totalorder %s990_s16, %s986_s15  ;;  %p1332_p10 = scmp.eq.s32.totalorder %s1132_s12, 0 }
  0x2d   : > { %p116_p1 = scmp.eq.s32.totalorder %s1132_s12, 1  ;;  %p122_p2 = scmp.eq.s32.totalorder %s643_s13, 1 }
  0x2e   : > { %p644_p3 = scmp.ge.s32.totalorder %s998_s18, 1  ;;  %p1142_p5 = por %p1332_p10, %p66_p4 }
  0x2f   : > { %p1149_p7 = por %p116_p1, %p60_p0  ;;  %p1153_p9 = por %p122_p2, %p66_p4 }
  0x30   : > { %s1337_s26 = scalar_select %p1142_p5, 1, 0 }
  0x31   : > { %s1338_s25 = scalar_select %p1149_p7, 1, 0 }
  0x32   : > { %s1339_s29 = scalar_select %p1153_p9, 1, 0 }
  0x33   : > { %p155_p11 = scmp.lt.s32.totalorder %s998_s18, 3  ;;  %s1004_s14 = smov [#allocation2]  }
  0x34   : > { %s1164_s20 = sshll.u32 %s1004_s14, 4  ;;  %s838_s21 = scalar_lea.hbm %s1128_s9, 128  ;;  %s168_s20 = int_to_ptr.vmem [resolvable:$true] %s1164_s20 }
  0x35   : > { %p1160_p12 = pnand %p644_p3, %p155_p11  ;;  %p839_p13 = scmp.ne.s32.totalorder %s1128_s9, %s838_s21 }
  0x36   : > { %s843_s8 = scalar_lea.hbm %s1329_s2, 256  ;;  %p844_p2 = scmp.lt.u32.totalorder %s1128_s9, %s1329_s2 }
  0x37   : > { %s1340_s5 = scalar_select %p1160_p12, 1, 0 }
  0x38   : > { %p841_p4 = pnand %p839_p13, %p810_p8  ;;  %p845_p3 = scmp.lt.u32.totalorder %s843_s8, %s838_s21 }
  0x39   : > { %p847_p10 = scmp.lt.u32.totalorder %s838_s21, %s1128_s9 }
  0x3a   : > { %p842_p1 = pneg %p841_p4  ;;  %p846_p11 = por %p845_p3, %p844_p2 }
  0x3c   : > { %p848_p9 = por %p847_p10, %p846_p11 }
  0x3e   : > { %p849_p7 = pnand %p848_p9, %p842_p1 }
  0x40   : > { %852 = shalt.err (!%p849_p7)
}
  0x41   : > { %s853_s14 = scalar_lea.vmem %s1158_s11, 128  ;;  %s1005_s23 = smov [#allocation7]  }
  0x42   : > { %p854_p13 = scmp.ne.s32.totalorder %s1158_s11, %s853_s14  ;;  %s858_s30 = sshll.u32 %s1005_s23, 4  ;;  %s859_s30 = int_to_ptr.vmem [resolvable:$false] %s858_s30 }
  0x43   : > { %s860_s10 = scalar_lea.vmem %s859_s30, 256  ;;  %p861_p5 = scmp.lt.s32.totalorder %s1158_s11, %s859_s30 }
  0x44   : > { %p856_p4 = pnand %p854_p13, %p810_p8  ;;  %p862_p2 = scmp.lt.s32.totalorder %s860_s10, %s853_s14 }
  0x46   : > { %p857_p0 = pneg %p856_p4  ;;  %p863_p3 = por %p862_p2, %p861_p5 }
  0x48   : > { %p864_p10 = pnand %p863_p3, %p857_p0 }
  0x4a   : > { %867 = shalt.err (!%p864_p10)
}
  0x4b   : > { %751 = dma.hbm_to_vmem [thread:$0]  (!%p1086_p6), %s1128_s9, 128, %s1158_s11, %s1092_s7, %s1001_s24, %s1002_s27, %s1003_s28  }
  0x4c   : > { %p1341_p8 = scmp.eq.s32.totalorder %s1132_s12, 0  ;;  %p1342_p7 = pneg %p1160_p12 }
  0x4d   : > { %s868_s13 = scalar_lea.hbm %s1327_s0, 256 }
  0x4e   : > { %p1201_p9 = pnand %p1342_p7, %p1341_p8  ;;  %p869_p5 = scmp.ne.s32.totalorder %s1327_s0, %s868_s13 }
  0x4f   : > { %p875_p11 = scmp.lt.u32.totalorder %s868_s13, %s1327_s0 }
  0x50   : > { %p870_p0 = pneg %p1201_p9 }
  0x52   : > { %p871_p6 = pnand %p870_p0, %p869_p5 }
  0x54   : > { %p872_p1 = pneg %p871_p6 }
  0x56   : > { %p877_p13 = pnand %p875_p11, %p872_p1 }
  0x58   : > { %880 = shalt.err (!%p877_p13)
}
  0x59   : > { %s881_s9 = scalar_lea.vmem %s168_s20, 256  ;;  %p889_p10 = scmp.lt.s32.totalorder %s168_s20, %s168_s20 }
  0x5a   : > { %p882_p4 = scmp.ne.s32.totalorder %s168_s20, %s881_s9  ;;  %p890_p8 = scmp.lt.s32.totalorder %s881_s9, %s881_s9 }
  0x5c   : > { %p884_p2 = pnand %p882_p4, %p870_p0  ;;  %p891_p7 = por %p890_p8, %p889_p10 }
  0x5e   : > { %p885_p3 = pneg %p884_p2 }
  0x60   : > { %p892_p12 = pnand %p891_p7, %p885_p3 }
  0x62   : > { %895 = shalt.err (!%p892_p12)
}
  0x63   : > { %744 = dma.hbm_to_vmem [thread:$0]  (!%p1201_p9), %s1327_s0, 256, %s168_s20, [#allocation3], %s1002_s27, %s1002_s27, %s1003_s28  }
  0x64   : > { %p1344_p5 = scmp.ne.s32.totalorder %s1340_s5, 0 }
  0x65   : > { %p1345_p0 = scmp.eq.s32.totalorder (!%p1344_p5), %s1132_s12, 0 }
  0x66   : > { %223 = sbr.rel (%p1344_p5) target bundleno = 376 (0x178), region = 32 }
  0x6d   : > { %969 = dma.done.wait (%p1345_p0), [#allocation3], 256   ;;  %p1346_p6 = pmov %p1345_p0 }
  0x6e   : > { %s229_s10 = sand.u32 1, %s1132_s12   ;;  %s1232_s21 = sand.u32 1, %s990_s16  }
  0x6f   : > { %971 = vsyncadd (%p1346_p6), [#allocation3], 4294967040  ;;  %s653_s8 = sshll.u32 %s1232_s21, 3  ;;  %s230_s6 = scalar_lea.sflag [#allocation6], %s229_s10 }
  0x70   : > { %s233_s13 = scalar_lea.vmem [#allocation5], %s653_s8  ;;  %p1347_p12 = scmp.ne.s32.totalorder %s1337_s26, 0 }
  0x72   : > { %973 = dma.done.wait (%p1347_p12), %s230_s6, 256  }
  0x73   : > { %975 = vsyncadd (%p1347_p12), %s230_s6, 4294967040  ;;  %v802_v0 = vld [vmem:[%s233_s13] sm:$0xff]   ;;  %s242_s27 = scalar_lea.vmem [#allocation7], %s653_s8  ;;  %vm300_vm0 = vcmask 130048   ;;  %v804_v2 = vld [vmem:[#allocation2] sm:$0xff]   ;;  %s655_s28 = sshll.u32 %s1232_s21, 4 }
  0x74   : > { %v803_v1 = vld [vmem:[%s242_s27] sm:$0xff]   ;;  %717 = vmatprep.subr.bf16.mxu0 %v802_v0  ;;  %719 = vmatprep.mubr.msk.bf16.mxu0 %vm300_vm0, %v804_v2  ;;  %s269_s26 = scalar_lea.vmem [#allocation8], %s655_s28  ;;  %s276_s20 = scalar_lea.vmem [#allocation9], %s655_s28 }
  0x75   : > { %723 = vmatprep.subr.bf16.mxu1 %v803_v1  ;;  %718 = vmatpush3.bf16.msra.mxu0 %v802_v0  ;;  %v805_v3 = vld [vmem:[#allocation2] sm:$0xff]   ;;  %v806_v4 = vld [vmem:[#allocation2 + $0x8] sm:$0xff]   ;;  %s491_s5 = sshll.u32 %s269_s26, 4  ;;  %s506_s14 = sshll.u32 %s276_s20, 4  ;;  %s1241_s5 = int_to_ptr.vmem [resolvable:$true] %s491_s5  ;;  %s1243_s14 = int_to_ptr.vmem [resolvable:$true] %s506_s14 }
  0x76   : > { %724 = vmatpush3.bf16.msra.mxu1 %v803_v1  ;;  %725 = vmatprep.mubr.msk.bf16.mxu1 %vm300_vm0, %v805_v3  ;;  %v807_v5 = vld [vmem:[#allocation2 + $0x8] sm:$0xff]   ;;  %s677_s23 = sshll.u32 %s1132_s12, 6  ;;  %s474_s10 = scalar_lea.sflag [#allocation4], %s1232_s21 }
  0x77   : > { %s1248_s9 = scalar_lea.hbm %s1330_s3, %s677_s23  ;;  %s1253_s30 = scalar_lea.hbm %s1331_s4, %s677_s23 }
  0x78   : > { %720 = vmatmul.mubr.msk.bf16.vlgmr.msra.gmra.mrb[0].mxu0 %vm300_vm0, %v806_v4  ;;  %s896_s8 = scalar_lea.vmem %s1241_s5, 256  ;;  %p1348_p1 = scmp.ne.s32.totalorder %s1338_s25, 0 }
  0x79   : > { %726 = vmatmul.mubr.msk.bf16.vlgmr.msra.gmra.mrb[0].mxu1 %vm300_vm0, %v807_v5  ;;  %p897_p9 = scmp.ne.s32.totalorder %s1241_s5, %s896_s8  ;;  %s1006_s6 = smov [#allocation8]  }
  0x7a   : > { %s900_s13 = sshll.u32 %s1006_s6, 4  ;;  %s901_s13 = int_to_ptr.vmem [resolvable:$false] %s900_s13 }
  0x7b   : > { %p898_p11 = pnand %p897_p9, %p1348_p1  ;;  %s902_s27 = scalar_lea.vmem %s901_s13, 512 }
  0x7c   : > { %p903_p4 = scmp.lt.s32.totalorder %s1241_s5, %s901_s13  ;;  %p904_p2 = scmp.lt.s32.totalorder %s902_s27, %s896_s8 }
  0x7d   : > { %p899_p13 = pneg %p898_p11 }
  0x7e   : > { %p905_p3 = por %p904_p2, %p903_p4 }
  0x80   : > { %p906_p10 = pnand %p905_p3, %p899_p13 }
 0x14b   : > { %v721_v6 = vpop.f32.mrb[0].mxu0 }
 0x14c   : > { %v727_v7 = vpop.f32.mrb[0].mxu1  ;;  %v341_v8 = vpop.f32.mrb[1].mxu0 }
 0x14d   : > { %v438_v9 = vpop.f32.mrb[1].mxu1  ;;  %v722_v10 = vpop.f32.mrb[2].mxu0 }
 0x14e   : > { %v697_v11 = vpack.c.bf16 %v722_v10, %v721_v6  ;;  %v728_v12 = vpop.f32.mrb[2].mxu1  ;;  %v344_v13 = vpop.f32.mrb[3].mxu0 }
 0x14f   : > { %v707_v14 = vpack.c.bf16 %v728_v12, %v727_v7  ;;  %v692_v15 = vpack.c.bf16 %v344_v13, %v341_v8  ;;  %v441_v16 = vpop.f32.mrb[3].mxu1 }
 0x150   : > { %709 = vst [vmem:[%s269_s26 + $0x8] sm:$0xff] %v697_v11   ;;  %v702_v17 = vpack.c.bf16 %v441_v16, %v438_v9 }
 0x151   : > { %710 = vst [vmem:[%s276_s20 + $0x8] sm:$0xff] %v707_v14   ;;  %693 = vst [vmem:[%s269_s26] sm:$0xff] %v692_v15  }
 0x152   : > { %703 = vst [vmem:[%s276_s20] sm:$0xff] %v702_v17  }
 0x153   : > { %909 = shalt.err (!%p906_p10)
}
 0x154   : > { %s910_s28 = scalar_lea.hbm %s1248_s9, 256  ;;  %s914_s23 = scalar_lea.hbm %s1330_s3, 512 }
 0x155   : > { %p911_p8 = scmp.ne.s32.totalorder %s1248_s9, %s910_s28  ;;  %p915_p0 = scmp.lt.u32.totalorder %s1248_s9, %s1330_s3 }
 0x156   : > { %p916_p6 = scmp.lt.u32.totalorder %s914_s23, %s910_s28  ;;  %p918_p9 = scmp.lt.u32.totalorder %s910_s28, %s1248_s9 }
 0x157   : > { %p912_p7 = pnand %p911_p8, %p1348_p1 }
 0x158   : > { %p917_p12 = por %p916_p6, %p915_p0 }
 0x159   : > { %p913_p5 = pneg %p912_p7 }
 0x15a   : > { %p919_p11 = por %p918_p9, %p917_p12 }
 0x15c   : > { %p920_p13 = pnand %p919_p11, %p913_p5 }
 0x15e   : > { %923 = shalt.err (!%p920_p13)
}
 0x15f   : > { %s1007_s12 = smov 64   ;;  %s1008_s11 = smov 128  }
 0x160   : > { %s1009_s8 = smov 4   ;;  %s479_s6 = scalar_lea.sflag [#allocation10], %s1232_s21 }
 0x161   : > { %737 = dma.vmem_to_hbm [thread:$0]  (%p1348_p1), %s1241_s5, 256, %s1248_s9, %s474_s10, %s1007_s12, %s1008_s11, %s1009_s8  }
 0x162   : > { %s924_s13 = scalar_lea.vmem %s1243_s14, 256  ;;  %s1010_s27 = smov [#allocation9]  }
 0x163   : > { %p925_p4 = scmp.ne.s32.totalorder %s1243_s14, %s924_s13  ;;  %s928_s28 = sshll.u32 %s1010_s27, 4  ;;  %s929_s28 = int_to_ptr.vmem [resolvable:$false] %s928_s28 }
 0x164   : > { %s930_s26 = scalar_lea.vmem %s929_s28, 512  ;;  %p931_p10 = scmp.lt.s32.totalorder %s1243_s14, %s929_s28 }
 0x165   : > { %p926_p2 = pnand %p925_p4, %p1348_p1  ;;  %p932_p8 = scmp.lt.s32.totalorder %s930_s26, %s924_s13 }
 0x167   : > { %p927_p3 = pneg %p926_p2  ;;  %p933_p7 = por %p932_p8, %p931_p10 }
 0x169   : > { %p934_p5 = pnand %p933_p7, %p927_p3 }
 0x16b   : > { %937 = shalt.err (!%p934_p5)
}
 0x16c   : > { %s938_s5 = scalar_lea.hbm %s1253_s30, 256  ;;  %s942_s20 = scalar_lea.hbm %s1331_s4, 512 }
 0x16d   : > { %p939_p0 = scmp.ne.s32.totalorder %s1253_s30, %s938_s5  ;;  %p943_p9 = scmp.lt.u32.totalorder %s1253_s30, %s1331_s4 }
 0x16e   : > { %p944_p11 = scmp.lt.u32.totalorder %s942_s20, %s938_s5  ;;  %p946_p4 = scmp.lt.u32.totalorder %s938_s5, %s1253_s30 }
 0x16f   : > { %p940_p6 = pnand %p939_p0, %p1348_p1 }
 0x170   : > { %p945_p13 = por %p944_p11, %p943_p9 }
 0x171   : > { %p941_p12 = pneg %p940_p6 }
 0x172   : > { %p947_p2 = por %p946_p4, %p945_p13 }
 0x174   : > { %p948_p3 = pnand %p947_p2, %p941_p12 }
 0x176   : > { %951 = shalt.err (!%p948_p3)
}
 0x177   : > { %738 = dma.vmem_to_hbm [thread:$0]  (%p1348_p1), %s1243_s14, 256, %s1253_s30, %s479_s6, %s1007_s12, %s1008_s11, %s1009_s8  }
 0x178 PF: > { %s521_s24 = sand.u32 1, %s986_s15   ;;  %p1349_p10 = scmp.ne.s32.totalorder %s1339_s29, 0 }
 0x179   : > { %p1350_p8 = scmp.ge.s32.totalorder %s998_s18, 2  ;;  %s522_s13 = scalar_lea.sflag [#allocation4], %s521_s24 }
 0x17b   : > { %p753_p7 = pnand %p1350_p8, %p1349_p10 }
 0x17d   : > { %977 = dma.done.wait (!%p753_p7), %s522_s13, 256  }
 0x17e   : > { %979 = vsyncadd (!%p753_p7), %s522_s13, 4294967040  ;;  %s531_s25 = scalar_lea.sflag [#allocation10], %s521_s24 }
 0x17f   : > { %981 = dma.done.wait (!%p753_p7), %s531_s25, 256  }
 0x180   : > { %983 = vsyncadd (!%p753_p7), %s531_s25, 4294967040  ;;  %p22_p1 = scmp.ge.s32.totalorder %s1057_s19, 4   ;;  %s1351_s15 = smov %s990_s16 }
 0x181   : > { %s1352_s16 = smov %s994_s17  ;;  %s1353_s17 = smov %s1066_s22 }
 0x182   : > { %s1354_s18 = smov %s1057_s19  ;;  %24 = sbr.rel (!%p22_p1) target bundleno = 8 (0x8), region = 110 }
 0x189   :  { %536 = vsyncpa [#allocation3], 1 }
 0x18a   :  { %538 = vsyncpa [#allocation3 + $0x1], 1 }
 0x18b   :  { %539 = vsyncpa [#allocation6], 1 }
 0x18c   :  { %541 = vsyncpa [#allocation6 + $0x1], 1 }
 0x18d   :  { %542 = vsyncpa [#allocation4], 1 }
 0x18e   :  { %544 = vsyncpa [#allocation4 + $0x1], 1 }
 0x18f   :  { %545 = vsyncpa [#allocation10], 1 }
 0x190   :  { %547 = vsyncpa [#allocation10 + $0x1], 1 }

// kernel: _lambda_.26
= control target key start
LH: loop header
LB: loop body
LE: loop exit
PB: predicated region body
PF: predicated region fallthrough
CT: control target
= control target key end

     0   :  { %s1586_s0 = inlined_call_operand.hbm [shape: bf16[16,16], index: 0, kind: input, shape index: {}]   ;;  %s1587_s1 = inlined_call_operand.hbm [shape: bf16[16,16], index: 1, kind: input, shape index: {}]   ;;  %s1588_s2 = inlined_call_operand.hbm [shape: bf16[16,16], index: 2, kind: input, shape index: {}]   ;;  %s1589_s3 = inlined_call_operand.hbm [shape: bf16[16,512], index: 3, kind: input, shape index: {}]   ;;  %s1590_s4 = inlined_call_operand.hbm [shape: bf16[16,512], index: 4, kind: input, shape index: {}]   ;;  %s1591_s5 = inlined_call_operand.hbm [shape: bf16[16,512], index: 5, kind: input, shape index: {}]   ;;  %s1592_s6 = inlined_call_operand.hbm [shape: bf16[16,512], index: 6, kind: output, shape index: {}]  }
   0x1   :  { %1616 = sst [smem:[#allocation25_spill]] %s1587_s1 }
   0x2   :  { %1617 = sst [smem:[#allocation26_spill]] %s1589_s3 }
   0x3   :  { %1618 = sst [smem:[#allocation27_spill]] %s1592_s6 }
   0x4   :  { %11 = vsyncpa [#allocation3], 0 }
   0x5   :  { %12 = vsyncpa [#allocation6], 0 }
   0x6   :  { %13 = vsyncpa [#allocation9], 0 }
   0x7   :  { %15 = vsyncpa [#allocation9 + $0x1], 0 }
   0x8   :  { %16 = vsyncpa [#allocation12], 0 }
   0x9   :  { %18 = vsyncpa [#allocation12 + $0x1], 0 }
   0xa   :  { %19 = vsyncpa [#allocation4], 0 }
   0xb   :  { %21 = vsyncpa [#allocation4 + $0x1], 0  ;;  %s1227_s21 = smov 0   ;;  %s1229_s22 = smov 0  }
   0xc   :  { %s1231_s23 = smov 0   ;;  %s1233_s24 = smov 0  }
   0xd LB: > { %1619 = sst [smem:[#allocation19_spill]] %s1163_s21  ;;  %s1248_s25 = sadd.s32 4294967295, %s1175_s24   ;;  %s1175_s24 = sphi %s1233_s24, %s1657_s24   ;;  %s1171_s23 = sphi %s1231_s23, %s1661_s23   ;;  %s1167_s22 = sphi %s1229_s22, %s1660_s22   ;;  %s1163_s21 = sphi %s1227_s21, %s1659_s21  }
   0xe   : > { %1620 = sst [smem:[#allocation20_spill]] %s1175_s24  ;;  %s749_s26 = sadd.s32 4294967294, %s1175_s24  }
   0xf   : > { %s1252_s27 = sadd.s32 1, %s1175_s24   ;;  %s97_s28 = sadd.s32 1, %s1171_s23 }
  0x10   : > { %1621 = sst [smem:[#allocation21_spill]] %s1252_s27  ;;  %s94_s29 = ssub.s32 %s1175_s24, %s1252_s27 }
  0x11   : > { %p104_p0 = scmp.ne.s32.totalorder %s1171_s23, %s1167_s22  ;;  %p95_p1 = scmp.eq.s32.totalorder %s94_s29, 0 }
  0x12   : > { %p105_p2 = scmp.eq.s32.totalorder %s1175_s24, 0  ;;  %p110_p3 = scmp.ne.s32.totalorder %s1167_s22, %s1163_s21 }
  0x13   : > { %p1593_p4 = scmp.eq.s32.totalorder %s1248_s25, 0  ;;  %p186_p7 = scmp.eq.s32.totalorder %s1248_s25, 3 }
  0x14   : > { %s1264_s30 = scalar_select %p95_p1, %s1171_s23, %s97_s28  }
  0x15   : > { %p1266_p5 = por %p105_p2, %p104_p0  ;;  %p1272_p6 = por %p1593_p4, %p110_p3 }
  0x16   : > { %1622 = sst [smem:[#allocation22_spill]] %s1264_s30  ;;  %p192_p8 = scmp.eq.s32.totalorder %s749_s26, 3 }
  0x17   : > { %s1623_s7 = scalar_select %p1266_p5, 1, 0 }
  0x18   : > { %s1624_s8 = scalar_select %p1272_p6, 1, 0 }
  0x19   : > { %p750_p9 = scmp.ge.s32.totalorder %s1175_s24, 1  ;;  %p199_p10 = scmp.lt.s32.totalorder %s1175_s24, 5 }
  0x1a   : > { %p1279_p11 = por %p186_p7, %p104_p0  ;;  %p1283_p12 = por %p192_p8, %p110_p3 }
  0x1b   : > { %p1287_p13 = pnand %p750_p9, %p199_p10  ;;  %s1177_s12 = smov [#allocation5]  }
  0x1c   : > { %s1625_s9 = scalar_select %p1279_p11, 1, 0 }
  0x1d   : > { %s1627_s10 = scalar_select %p1283_p12, 1, 0 }
  0x1e   : > { %1626 = sst [smem:[#allocation23_spill]] %s1625_s9  ;;  %p841_p1 = pneg %p1287_p13 }
  0x1f   : > { %1628 = sst [smem:[#allocation24_spill]] %s1627_s10  ;;  %s224_s13 = sshll.u32 %s1177_s12, 4  ;;  %s225_s13 = int_to_ptr.vmem [resolvable:$true] %s224_s13 }
  0x20   : > { %s1629_s11 = scalar_select %p1287_p13, 1, 0 }
  0x21   : > { %p1295_p2 = pnand %p841_p1, %p1593_p4  ;;  %s251_s15 = sand.u32 1, %s1175_s24  }
  0x22   : > { %s1631_s1 = sld [smem:[#allocation25_spill]] }
  0x23   : > { %s1630_s14 = scalar_select %p1295_p2, 1, 0 }
  0x24   : > { %p1309_p7 = pneg %p1295_p2 }
  0x26   : > { %s1632_s26 = scalar_select %p1309_p7, 1, 0 }
  0x28   : > { %s923_s18 = scalar_lea.hbm %s1631_s1, 128 }
  0x29   : > { %p924_p3 = scmp.ne.s32.totalorder %s1631_s1, %s923_s18  ;;  %p930_p10 = scmp.lt.u32.totalorder %s923_s18, %s1631_s1 }
  0x2b   : > { %p926_p8 = pnand %p1309_p7, %p924_p3 }
  0x2d   : > { %p927_p9 = pneg %p926_p8 }
  0x2f   : > { %p932_p1 = pnand %p930_p10, %p927_p9 }
  0x31   : > { %935 = shalt.err (!%p932_p1)
}
  0x32   : > { %s936_s12 = scalar_lea.vmem %s225_s13, 128  ;;  %p944_p11 = scmp.lt.s32.totalorder %s225_s13, %s225_s13 }
  0x33   : > { %p937_p4 = scmp.ne.s32.totalorder %s225_s13, %s936_s12  ;;  %p945_p6 = scmp.lt.s32.totalorder %s936_s12, %s936_s12 }
  0x35   : > { %p939_p0 = pnand %p937_p4, %p1309_p7  ;;  %p946_p13 = por %p945_p6, %p944_p11 }
  0x37   : > { %p940_p12 = pneg %p939_p0 }
  0x39   : > { %p947_p5 = pnand %p946_p13, %p940_p12 }
  0x3b   : > { %950 = shalt.err (!%p947_p5)
}
  0x3c   : > { %s1600_s16 = smov 64   ;;  %s1602_s17 = smov 4  }
  0x3d   : > { %847 = dma.hbm_to_vmem [thread:$0]  (!%p1295_p2), %s1631_s1, 128, %s225_s13, [#allocation6], %s1600_s16, %s1600_s16, %s1602_s17  }
  0x3e   : > { %p1633_p4 = scmp.ne.s32.totalorder %s1623_s7, 0  ;;  %p1634_p6 = scmp.lt.s32.totalorder %s1175_s24, 4 }
  0x3f   : > { %s1599_s28 = sand.u32 1, %s1171_s23   ;;  %s1342_s12 = sshll.u32 %s1175_s24, 6 }
  0x40   : > { %p1332_p11 = pnand %p1634_p6, %p1633_p4  ;;  %s1339_s29 = sshll.u32 %s1599_s28, 3 }
  0x41   : > { %s1636_s3 = sld [smem:[#allocation26_spill]]  ;;  %s255_s7 = scalar_lea.vmem [#allocation8], %s1339_s29 }
  0x42   : > { %s1635_s20 = scalar_select %p1332_p11, 1, 0 }
  0x43   : > { %s261_s13 = sshll.u32 %s255_s7, 4  ;;  %s1353_s19 = scalar_lea.sflag [#allocation9], %s251_s15  ;;  %s1351_s13 = int_to_ptr.vmem [resolvable:$true] %s261_s13 }
  0x44   : > { %p1359_p12 = pneg %p1332_p11 }
  0x47   : > { %s1348_s18 = scalar_lea.hbm %s1636_s3, %s1342_s12  ;;  %s956_s17 = scalar_lea.hbm %s1636_s3, 512 }
  0x48   : > { %s951_s28 = scalar_lea.hbm %s1348_s18, 128  ;;  %p957_p3 = scmp.lt.u32.totalorder %s1348_s18, %s1636_s3 }
  0x49   : > { %p952_p5 = scmp.ne.s32.totalorder %s1348_s18, %s951_s28  ;;  %p958_p8 = scmp.lt.u32.totalorder %s956_s17, %s951_s28 }
  0x4a   : > { %p960_p10 = scmp.lt.u32.totalorder %s951_s28, %s1348_s18 }
  0x4b   : > { %p954_p13 = pnand %p1359_p12, %p952_p5  ;;  %p959_p9 = por %p958_p8, %p957_p3 }
  0x4d   : > { %p955_p0 = pneg %p954_p13  ;;  %p961_p1 = por %p960_p10, %p959_p9 }
  0x4f   : > { %p962_p4 = pnand %p961_p1, %p955_p0 }
  0x51   : > { %965 = shalt.err (!%p962_p4)
}
  0x52   : > { %s966_s15 = scalar_lea.vmem %s1351_s13, 128  ;;  %s1180_s27 = smov [#allocation8]  }
  0x53   : > { %p967_p6 = scmp.ne.s32.totalorder %s1351_s13, %s966_s15  ;;  %s971_s30 = sshll.u32 %s1180_s27, 4  ;;  %s972_s30 = int_to_ptr.vmem [resolvable:$false] %s971_s30 }
  0x54   : > { %s973_s1 = scalar_lea.vmem %s972_s30, 256  ;;  %p974_p2 = scmp.lt.s32.totalorder %s1351_s13, %s972_s30 }
  0x55   : > { %p969_p5 = pnand %p967_p6, %p1359_p12  ;;  %p975_p7 = scmp.lt.s32.totalorder %s973_s1, %s966_s15 }
  0x57   : > { %p970_p13 = pneg %p969_p5  ;;  %p976_p3 = por %p975_p7, %p974_p2 }
  0x59   : > { %p977_p8 = pnand %p976_p3, %p970_p13 }
  0x5b   : > { %980 = shalt.err (!%p977_p8)
}
  0x5c   : > { %s1181_s17 = smov 256   ;;  %s1638_s28 = smov 4  }
  0x5d   : > { %s1639_s7 = smov 64   ;;  %s1182_s3 = smov [#allocation2]  }
  0x5e   : > { %854 = dma.hbm_to_vmem [thread:$0]  (!%p1332_p11), %s1348_s18, 128, %s1351_s13, %s1353_s19, %s1181_s17, %s1639_s7, %s1638_s28  }
  0x5f   : > { %s211_s27 = sshll.u32 %s1182_s3, 4  ;;  %s1183_s10 = smov [#allocation7]   ;;  %s212_s27 = int_to_ptr.vmem [resolvable:$true] %s211_s27 }
  0x60   : > { %s237_s21 = sshll.u32 %s1183_s10, 4  ;;  %s981_s1 = scalar_lea.hbm %s1586_s0, 128  ;;  %s1386_s21 = int_to_ptr.vmem [resolvable:$true] %s237_s21 }
  0x61   : > { %p982_p2 = scmp.ne.s32.totalorder %s1586_s0, %s981_s1  ;;  %p1640_p7 = scmp.ne.s32.totalorder %s1632_s26, 0 }
  0x62   : > { %p988_p10 = scmp.lt.u32.totalorder %s981_s1, %s1586_s0 }
  0x63   : > { %p984_p0 = pnand %p982_p2, %p1640_p7 }
  0x65   : > { %p985_p9 = pneg %p984_p0 }
  0x67   : > { %p990_p1 = pnand %p988_p10, %p985_p9 }
  0x69   : > { %993 = shalt.err (!%p990_p1)
}
  0x6a   : > { %s994_s3 = scalar_lea.vmem %s212_s27, 128  ;;  %p1002_p13 = scmp.lt.s32.totalorder %s212_s27, %s212_s27 }
  0x6b   : > { %p995_p4 = scmp.ne.s32.totalorder %s212_s27, %s994_s3  ;;  %p1003_p3 = scmp.lt.s32.totalorder %s994_s3, %s994_s3 }
  0x6d   : > { %p997_p6 = pnand %p995_p4, %p1640_p7  ;;  %p1004_p8 = por %p1003_p3, %p1002_p13 }
  0x6f   : > { %p998_p5 = pneg %p997_p6 }
  0x71   : > { %p1005_p11 = pnand %p1004_p8, %p998_p5 }
  0x73   : > { %1008 = shalt.err (!%p1005_p11)
}
  0x74   : > { %p1641_p2 = scmp.ne.s32.totalorder %s1630_s14, 0  ;;  %s1009_s13 = scalar_lea.hbm %s1588_s2, 128 }
  0x75   : > { %p1010_p0 = scmp.ne.s32.totalorder %s1588_s2, %s1009_s13  ;;  %p1016_p10 = scmp.lt.u32.totalorder %s1009_s13, %s1588_s2 }
  0x76   : > { %844 = dma.hbm_to_vmem [thread:$0]  (!%p1641_p2), %s1586_s0, 128, %s212_s27, [#allocation3], %s1639_s7, %s1639_s7, %s1638_s28  }
  0x77   : > { %p1012_p11 = pnand %p1010_p0, %p1640_p7 }
  0x79   : > { %p1013_p9 = pneg %p1012_p11 }
  0x7b   : > { %p1018_p1 = pnand %p1016_p10, %p1013_p9 }
  0x7d   : > { %1021 = shalt.err (!%p1018_p1)
}
  0x7e   : > { %s1022_s27 = scalar_lea.vmem %s1386_s21, 128  ;;  %p1030_p13 = scmp.lt.s32.totalorder %s1386_s21, %s1386_s21 }
  0x7f   : > { %p1023_p4 = scmp.ne.s32.totalorder %s1386_s21, %s1022_s27  ;;  %p1031_p3 = scmp.lt.s32.totalorder %s1022_s27, %s1022_s27 }
  0x81   : > { %p1025_p6 = pnand %p1023_p4, %p1640_p7  ;;  %p1032_p8 = por %p1031_p3, %p1030_p13 }
  0x83   : > { %p1026_p5 = pneg %p1025_p6 }
  0x85   : > { %p1033_p0 = pnand %p1032_p8, %p1026_p5 }
  0x87   : > { %1036 = shalt.err (!%p1033_p0)
}
  0x88   : > { %850 = dma.hbm_to_vmem [thread:$0]  (!%p1641_p2), %s1588_s2, 128, %s1386_s21, [#allocation6], %s1639_s7, %s1639_s7, %s1638_s28  }
  0x89   : > { %s1439_s9 = scalar_lea.hbm %s1590_s4, %s1342_s12  ;;  %s275_s14 = scalar_lea.vmem [#allocation10], %s1339_s29 }
  0x8a   : > { %s281_s10 = sshll.u32 %s275_s14, 4  ;;  %s1037_s13 = scalar_lea.hbm %s1439_s9, 128  ;;  %s1442_s10 = int_to_ptr.vmem [resolvable:$true] %s281_s10 }
  0x8b   : > { %p1038_p7 = scmp.ne.s32.totalorder %s1439_s9, %s1037_s13  ;;  %s1042_s30 = scalar_lea.hbm %s1590_s4, 512 }
  0x8c   : > { %p1043_p2 = scmp.lt.u32.totalorder %s1439_s9, %s1590_s4  ;;  %p1044_p10 = scmp.lt.u32.totalorder %s1042_s30, %s1037_s13 }
  0x8d   : > { %p1040_p11 = pnand %p1038_p7, %p1359_p12  ;;  %p1046_p4 = scmp.lt.u32.totalorder %s1037_s13, %s1439_s9 }
  0x8e   : > { %p1045_p1 = por %p1044_p10, %p1043_p2 }
  0x8f   : > { %p1041_p9 = pneg %p1040_p11 }
  0x90   : > { %p1047_p6 = por %p1046_p4, %p1045_p1 }
  0x92   : > { %p1048_p5 = pnand %p1047_p6, %p1041_p9 }
  0x94   : > { %1051 = shalt.err (!%p1048_p5)
}
  0x95   : > { %s1052_s27 = scalar_lea.vmem %s1442_s10, 128  ;;  %s1184_s3 = smov [#allocation10]  }
  0x96   : > { %p1053_p13 = scmp.ne.s32.totalorder %s1442_s10, %s1052_s27  ;;  %s1057_s6 = sshll.u32 %s1184_s3, 4  ;;  %s1058_s6 = int_to_ptr.vmem [resolvable:$false] %s1057_s6 }
  0x97   : > { %s1059_s26 = scalar_lea.vmem %s1058_s6, 256  ;;  %p1060_p0 = scmp.lt.s32.totalorder %s1442_s10, %s1058_s6 }
  0x98   : > { %p1055_p3 = pnand %p1053_p13, %p1359_p12  ;;  %p1061_p7 = scmp.lt.s32.totalorder %s1059_s26, %s1052_s27 }
  0x9a   : > { %p1056_p8 = pneg %p1055_p3  ;;  %p1062_p11 = por %p1061_p7, %p1060_p0 }
  0x9c   : > { %p1063_p2 = pnand %p1062_p11, %p1056_p8 }
  0x9e   : > { %1066 = shalt.err (!%p1063_p2)
}
  0x9f   : > { %p1642_p9 = scmp.ne.s32.totalorder %s1635_s20, 0  ;;  %s1473_s13 = scalar_lea.hbm %s1591_s5, %s1342_s12 }
  0xa0   : > { %s295_s15 = scalar_lea.vmem [#allocation11], %s1339_s29  ;;  %s1643_s30 = sand.u32 1, %s1171_s23  }
  0xa1   : > { %857 = dma.hbm_to_vmem [thread:$0]  (!%p1642_p9), %s1439_s9, 128, %s1442_s10, %s1353_s19, %s1181_s17, %s1639_s7, %s1638_s28  }
  0xa2   : > { %s301_s21 = sshll.u32 %s295_s15, 4  ;;  %s1480_s1 = scalar_lea.sflag [#allocation12], %s1643_s30  ;;  %s1476_s21 = int_to_ptr.vmem [resolvable:$true] %s301_s21 }
  0xa3   : > { %s1067_s18 = scalar_lea.hbm %s1473_s13, 128  ;;  %s1072_s12 = scalar_lea.hbm %s1591_s5, 512 }
  0xa4   : > { %p1068_p10 = scmp.ne.s32.totalorder %s1473_s13, %s1067_s18  ;;  %p1073_p6 = scmp.lt.u32.totalorder %s1473_s13, %s1591_s5 }
  0xa5   : > { %p1074_p5 = scmp.lt.u32.totalorder %s1072_s12, %s1067_s18  ;;  %p1076_p3 = scmp.lt.u32.totalorder %s1067_s18, %s1473_s13 }
  0xa6   : > { %p1070_p1 = pnand %p1068_p10, %p1359_p12 }
  0xa7   : > { %p1075_p13 = por %p1074_p5, %p1073_p6 }
  0xa8   : > { %p1071_p4 = pneg %p1070_p1 }
  0xa9   : > { %p1077_p8 = por %p1076_p3, %p1075_p13 }
  0xab   : > { %p1078_p0 = pnand %p1077_p8, %p1071_p4 }
  0xad   : > { %1081 = shalt.err (!%p1078_p0)
}
  0xae   : > { %s1082_s29 = scalar_lea.vmem %s1476_s21, 128  ;;  %s1185_s3 = smov [#allocation11]  }
  0xaf   : > { %p1083_p7 = scmp.ne.s32.totalorder %s1476_s21, %s1082_s29  ;;  %s1087_s6 = sshll.u32 %s1185_s3, 4  ;;  %s1088_s6 = int_to_ptr.vmem [resolvable:$false] %s1087_s6 }
  0xb0   : > { %s1089_s26 = scalar_lea.vmem %s1088_s6, 256  ;;  %p1090_p10 = scmp.lt.s32.totalorder %s1476_s21, %s1088_s6 }
  0xb1   : > { %p1085_p11 = pnand %p1083_p7, %p1359_p12  ;;  %p1091_p1 = scmp.lt.s32.totalorder %s1089_s26, %s1082_s29 }
  0xb3   : > { %p1086_p2 = pneg %p1085_p11  ;;  %p1092_p6 = por %p1091_p1, %p1090_p10 }
  0xb5   : > { %p1093_p5 = pnand %p1092_p6, %p1086_p2 }
  0xb7   : > { %1096 = shalt.err (!%p1093_p5)
}
  0xb8   : > { %860 = dma.hbm_to_vmem [thread:$0]  (!%p1642_p9), %s1473_s13, 128, %s1476_s21, %s1480_s1, %s1181_s17, %s1639_s7, %s1638_s28  }
  0xb9   : > { %p1644_p12 = scmp.ne.s32.totalorder %s1629_s11, 0 }
  0xba   : > { %p1645_p4 = scmp.eq.s32.totalorder (!%p1644_p12), %s1248_s25, 0 }
  0xbb   : > { %313 = sbr.rel (%p1644_p12) target bundleno = 463 (0x1cf), region = 44 }
  0xc2   : > { %1142 = dma.done.wait (%p1645_p4), [#allocation3], 128   ;;  %p1646_p13 = pmov %p1645_p4 }
  0xc3   : > { %p1647_p3 = pmov %p1645_p4 }
  0xc4   : > { %1144 = vsyncadd (%p1646_p13), [#allocation3], 4294967168 }
  0xc5   : > { %1146 = dma.done.wait (%p1647_p3), [#allocation6], 256   ;;  %p1648_p8 = pmov %p1647_p3 }
  0xc6   : > { %s327_s16 = sand.u32 1, %s1248_s25   ;;  %s1519_s20 = sand.u32 1, %s1167_s22  }
  0xc7   : > { %1148 = vsyncadd (%p1648_p8), [#allocation6], 4294967040  ;;  %s1522_s11 = sshll.u32 %s1519_s20, 3  ;;  %s328_s17 = scalar_lea.sflag [#allocation9], %s327_s16 }
  0xc8   : > { %s331_s28 = scalar_lea.vmem [#allocation8], %s1522_s11  ;;  %p1649_p9 = scmp.ne.s32.totalorder %s1624_s8, 0 }
  0xca   : > { %1150 = dma.done.wait (%p1649_p9), %s328_s17, 256  }
  0xcb   : > { %1152 = vsyncadd (%p1649_p9), %s328_s17, 4294967040  ;;  %s340_s7 = scalar_lea.vmem [#allocation10], %s1522_s11  ;;  %s346_s24 = scalar_lea.sflag [#allocation12], %s1519_s20 }
  0xcc   : > { %s349_s14 = scalar_lea.vmem [#allocation11], %s1522_s11 }
  0xcd   : > { %1154 = dma.done.wait (%p1649_p9), %s346_s24, 128  }
  0xce   : > { %1156 = vsyncadd (%p1649_p9), %s346_s24, 4294967168  ;;  %v1186_v0 = vmov 0.0   ;;  %vm1187_vm0 = vmmov 0   ;;  %v391_v1 = vld [vmem:[%s331_s28] sm:$0xff]   ;;  %vm408_vm1 = vcmask 130048   ;;  %v919_v4 = vld [vmem:[%s340_s7] sm:$0xff]  }
  0xcf   : > { %803 = vmatprep.subr.bf16.mxu0 %v1186_v0  ;;  %805 = vmatprep.mubr.msk.bf16.mxu0 %vm1187_vm0, %v1186_v0  ;;  %v917_v2 = vld [vmem:[#allocation2] sm:$0xff]   ;;  %v920_v5 = vld [vmem:[#allocation5] sm:$0xff]   ;;  %v921_v6 = vld [vmem:[#allocation7] sm:$0xff]   ;;  %v575_v14 = vunpack.c.l.bf16 %v391_v1  ;;  %v576_v19 = vunpack.c.h.bf16 %v391_v1  ;;  %s1650_s8 = sld [smem:[#allocation23_spill]]  ;;  %s781_s13 = sshll.u32 %s1248_s25, 6 }
  0xd0   : > { %797 = vmatprep.subr.bf16.mxu1 %v1186_v0  ;;  %799 = vmatprep.mubr.msk.bf16.mxu1 %vm1187_vm0, %v1186_v0  ;;  %v918_v3 = vld [vmem:[%s349_s14] sm:$0xff]   ;;  %s387_s15 = scalar_lea.vmem [#allocation13], %s1522_s11  ;;  %s1651_s18 = sld [smem:[#allocation27_spill]] }
  0xd1   : > { %804 = vmatpush3.bf16.msra.mxu0 %v391_v1  ;;  %798 = vmatpush3.bf16.msra.mxu1 %v919_v4  ;;  %s602_s21 = sshll.u32 %s387_s15, 4  ;;  %s590_s9 = scalar_lea.sflag [#allocation4], %s1519_s20  ;;  %s1543_s21 = int_to_ptr.vmem [resolvable:$true] %s602_s21 }
  0xd2   : > { %809 = vmatprep.subr.bf16.mxu0 %v1186_v0  ;;  %s1097_s12 = scalar_lea.vmem %s1543_s21, 128  ;;  %s1188_s25 = smov [#allocation13]  }
  0xd3   : > { %p1098_p0 = scmp.ne.s32.totalorder %s1543_s21, %s1097_s12  ;;  %s1101_s10 = sshll.u32 %s1188_s25, 4  ;;  %s1102_s10 = int_to_ptr.vmem [resolvable:$false] %s1101_s10 }
  0xd4   : > { %806 = vmatmul.mubr.msk.bf16.vlgmr.msra.gmra.mrb[0].mxu0 %vm408_vm1, %v917_v2  ;;  %800 = vmatmul.mubr.msk.bf16.vlgmr.msra.gmra.mrb[0].mxu1 %vm408_vm1, %v920_v5  ;;  %s1103_s27 = scalar_lea.vmem %s1102_s10, 256  ;;  %p1104_p10 = scmp.lt.s32.totalorder %s1543_s21, %s1102_s10 }
  0xd5   : > { %810 = vmatpush3.bf16.msra.mxu0 %v918_v3  ;;  %811 = vmatprep.mubr.msk.bf16.mxu0 %vm1187_vm0, %v1186_v0  ;;  %p1652_p7 = scmp.ne.s32.totalorder %s1650_s8, 0  ;;  %p1105_p1 = scmp.lt.s32.totalorder %s1103_s27, %s1097_s12 }
  0xd6   : > { %s1541_s19 = scalar_lea.hbm %s1651_s18, %s781_s13 }
  0xd7   : > { %p1099_p11 = pnand %p1098_p0, %p1652_p7  ;;  %p1106_p6 = por %p1105_p1, %p1104_p10 }
  0xd9   : > { %p1100_p2 = pneg %p1099_p11 }
  0xdb   : > { %p1107_p5 = pnand %p1106_p6, %p1100_p2 }
  0xe0   : > { %812 = vmatmul.mubr.msk.bf16.vlgmr.msra.gmra.mrb[0].mxu0 %vm408_vm1, %v921_v6 }
 0x1a7   : > { %v446_v7 = vpop.f32.mrb[0].mxu1 }
 0x1a8   : > { %v801_v8 = vpop.f32.mrb[1].mxu1 }
 0x1a9   : > { %v449_v9 = vpop.f32.mrb[2].mxu1 }
 0x1aa   : > { %v802_v10 = vpop.f32.mrb[3].mxu1 }
 0x1b3   : > { %v560_v11 = vpop.f32.mrb[0].mxu0 }
 0x1b4   : > { %v815_v12 = vadd.f32 %v560_v11, %v446_v7  ;;  %v813_v13 = vpop.f32.mrb[1].mxu0 }
 0x1b5   : > { %v563_v15 = vpop.f32.mrb[2].mxu0 }
 0x1b6   : > { %vm569_vm2 = vcmp.ge.f32.partialorder %v815_v12, 0.0  ;;  %v571_v16 = vmul.f32 0.1, %v815_v12  ;;  %v816_v17 = vadd.f32 %v563_v15, %v449_v9  ;;  %v814_v18 = vpop.f32.mrb[3].mxu0 }
 0x1b8   : > { %v573_v20 = vsel %vm569_vm2, %v815_v12, %v571_v16  ;;  %vm570_vm3 = vcmp.ge.f32.partialorder %v816_v17, 0.0  ;;  %v572_v21 = vmul.f32 0.1, %v816_v17 }
 0x1b9   : > { %v577_v22 = vadd.f32 %v575_v14, %v573_v20 }
 0x1ba   : > { %v574_v23 = vsel %vm570_vm3, %v816_v17, %v572_v21 }
 0x1bb   : > { %v578_v24 = vadd.f32 %v576_v19, %v574_v23 }
 0x1bd   : > { %v789_v25 = vpack.c.bf16 %v578_v24, %v577_v22 }
 0x1bf   : > { %790 = vst [vmem:[%s387_s15] sm:$0xff] %v789_v25  }
 0x1c0   : > { %1110 = shalt.err (!%p1107_p5)
}
 0x1c1   : > { %s1111_s29 = scalar_lea.hbm %s1541_s19, 128  ;;  %s1115_s26 = scalar_lea.hbm %s1651_s18, 512 }
 0x1c2   : > { %p1112_p12 = scmp.ne.s32.totalorder %s1541_s19, %s1111_s29  ;;  %p1116_p3 = scmp.lt.u32.totalorder %s1541_s19, %s1651_s18 }
 0x1c3   : > { %p1117_p8 = scmp.lt.u32.totalorder %s1115_s26, %s1111_s29  ;;  %p1119_p0 = scmp.lt.u32.totalorder %s1111_s29, %s1541_s19 }
 0x1c4   : > { %p1113_p4 = pnand %p1112_p12, %p1652_p7 }
 0x1c5   : > { %p1118_p9 = por %p1117_p8, %p1116_p3 }
 0x1c6   : > { %p1114_p13 = pneg %p1113_p4 }
 0x1c7   : > { %p1120_p11 = por %p1119_p0, %p1118_p9 }
 0x1c9   : > { %p1121_p2 = pnand %p1120_p11, %p1114_p13 }
 0x1cb   : > { %1124 = shalt.err (!%p1121_p2)
}
 0x1cc   : > { %s1189_s17 = smov 64   ;;  %s1190_s28 = smov 256  }
 0x1cd   : > { %s1191_s7 = smov 4  }
 0x1ce   : > { %839 = dma.vmem_to_hbm [thread:$0]  (%p1652_p7), %s1543_s21, 128, %s1541_s19, %s590_s9, %s1189_s17, %s1190_s28, %s1191_s7  }
 0x1cf PF: > { %s1653_s24 = sld [smem:[#allocation20_spill]]  ;;  %s1654_s14 = sld [smem:[#allocation19_spill]] }
 0x1d0   : > { %s1655_s13 = sld [smem:[#allocation24_spill]] }
 0x1d5   : > { %p872_p10 = scmp.ge.s32.totalorder %s1653_s24, 2  ;;  %s617_s15 = sand.u32 1, %s1654_s14  }
 0x1d6   : > { %p1656_p1 = scmp.ne.s32.totalorder %s1655_s13, 0  ;;  %s618_s30 = scalar_lea.sflag [#allocation4], %s617_s15 }
 0x1d8   : > { %p862_p6 = pnand %p872_p10, %p1656_p1 }
 0x1da   : > { %1158 = dma.done.wait (!%p862_p6), %s618_s30, 128  }
 0x1db   : > { %1160 = vsyncadd (!%p862_p6), %s618_s30, 4294967168  ;;  %s1657_s24 = sld [smem:[#allocation21_spill]]  ;;  %s1658_s1 = sld [smem:[#allocation22_spill]] }
 0x1dc   : > { %s1659_s21 = smov %s1167_s22  ;;  %s1660_s22 = smov %s1171_s23 }
 0x1e1   : > { %p24_p5 = scmp.ge.s32.totalorder %s1657_s24, 6   ;;  %s1661_s23 = smov %s1658_s1 }
 0x1e3   :  { %26 = sbr.rel (!%p24_p5) target bundleno = 13 (0xd), region = 126 }
 0x1ea   :  { %623 = vsyncpa [#allocation3], 1 }
 0x1eb   :  { %625 = vsyncpa [#allocation3 + $0x1], 1 }
 0x1ec   :  { %626 = vsyncpa [#allocation6], 1 }
 0x1ed   :  { %627 = vsyncpa [#allocation9], 1 }
 0x1ee   :  { %629 = vsyncpa [#allocation9 + $0x1], 1 }
 0x1ef   :  { %630 = vsyncpa [#allocation12], 1 }
 0x1f0   :  { %632 = vsyncpa [#allocation12 + $0x1], 1 }
 0x1f1   :  { %633 = vsyncpa [#allocation4], 1 }
 0x1f2   :  { %635 = vsyncpa [#allocation4 + $0x1], 1 }

// kernel: _lambda_.28
= control target key start
LH: loop header
LB: loop body
LE: loop exit
PB: predicated region body
PF: predicated region fallthrough
CT: control target
= control target key end

     0   :  { %9 = vsyncpa [#allocation3], 0  ;;  %s560_s0 = inlined_call_operand.hbm [shape: bf16[16,16], index: 0, kind: input, shape index: {}]   ;;  %s561_s1 = inlined_call_operand.hbm [shape: bf16[16,64], index: 1, kind: input, shape index: {}]   ;;  %s562_s2 = inlined_call_operand.hbm [shape: bf16[16,128], index: 2, kind: input, shape index: {}]   ;;  %s563_s3 = inlined_call_operand.hbm [shape: bf16[64,128], index: 3, kind: input, shape index: {}]   ;;  %s564_s4 = inlined_call_operand.hbm [shape: bf16[16,128], index: 4, kind: output, shape index: {}]  }
   0x1   :  { %10 = vsyncpa [#allocation6], 0 }
   0x2   :  { %11 = vsyncpa [#allocation9], 0 }
   0x3   :  { %12 = vsyncpa [#allocation4], 0  ;;  %s437_s15 = smov [#allocation5]   ;;  %s438_s17 = smov [#allocation2]  }
   0x4   :  { %s30_s16 = sshll.u32 %s437_s15, 4  ;;  %s18_s18 = sshll.u32 %s438_s17, 4  ;;  %s31_s16 = int_to_ptr.vmem [resolvable:$true] %s30_s16  ;;  %s471_s18 = int_to_ptr.vmem [resolvable:$true] %s18_s18 }
   0x5   :  { %s319_s21 = scalar_lea.hbm %s561_s1, 128 }
   0x6   :  { %p320_p0 = scmp.ne.s32.totalorder %s561_s1, %s319_s21  ;;  %p323_p1 = scmp.lt.u32.totalorder %s319_s21, %s561_s1 }
   0x8   :  { %p325_p2 = pnand %p323_p1, %p320_p0 }
   0xa   :  { %328 = shalt.err (!%p325_p2)
}
   0xb   :  { %s329_s26 = scalar_lea.vmem %s31_s16, 128  ;;  %p334_p4 = scmp.lt.s32.totalorder %s31_s16, %s31_s16 }
   0xc   :  { %p330_p3 = scmp.ne.s32.totalorder %s31_s16, %s329_s26  ;;  %p335_p5 = scmp.lt.s32.totalorder %s329_s26, %s329_s26 }
   0xe   :  { %p336_p6 = por %p335_p5, %p334_p4 }
  0x10   :  { %p337_p7 = pnand %p336_p6, %p330_p3 }
  0x12   :  { %340 = shalt.err (!%p337_p7)
}
  0x13   :  { %s439_s27 = smov 64   ;;  %s440_s28 = smov 4  }
  0x14   :  { %36 = dma.hbm_to_vmem [thread:$0]  %s561_s1, 128, %s31_s16, [#allocation6], %s439_s27, %s439_s27, %s440_s28  }
  0x15   :  { %s341_s7 = scalar_lea.hbm %s560_s0, 128 }
  0x16   :  { %p342_p8 = scmp.ne.s32.totalorder %s560_s0, %s341_s7  ;;  %p345_p9 = scmp.lt.u32.totalorder %s341_s7, %s560_s0 }
  0x18   :  { %p347_p10 = pnand %p345_p9, %p342_p8 }
  0x1a   :  { %350 = shalt.err (!%p347_p10)
}
  0x1b   :  { %s351_s12 = scalar_lea.vmem %s471_s18, 128  ;;  %p356_p12 = scmp.lt.s32.totalorder %s471_s18, %s471_s18 }
  0x1c   :  { %p352_p11 = scmp.ne.s32.totalorder %s471_s18, %s351_s12  ;;  %p357_p13 = scmp.lt.s32.totalorder %s351_s12, %s351_s12 }
  0x1e   :  { %p358_p0 = por %p357_p13, %p356_p12 }
  0x20   :  { %p359_p1 = pnand %p358_p0, %p352_p11 }
  0x22   :  { %362 = shalt.err (!%p359_p1)
}
  0x23   :  { %24 = dma.hbm_to_vmem [thread:$0]  %s560_s0, 128, %s471_s18, [#allocation3], %s439_s27, %s439_s27, %s440_s28  }
  0x24   :  { %s441_s14 = smov [#allocation7]   ;;  %s442_s16 = smov [#allocation8]  }
  0x25   :  { %s42_s15 = sshll.u32 %s441_s14, 4  ;;  %s54_s17 = sshll.u32 %s442_s16, 4  ;;  %s43_s15 = int_to_ptr.vmem [resolvable:$true] %s42_s15  ;;  %s508_s17 = int_to_ptr.vmem [resolvable:$true] %s54_s17 }
  0x26   :  { %s363_s21 = scalar_lea.hbm %s562_s2, 128 }
  0x27   :  { %p364_p2 = scmp.ne.s32.totalorder %s562_s2, %s363_s21  ;;  %p367_p3 = scmp.lt.u32.totalorder %s363_s21, %s562_s2 }
  0x29   :  { %p369_p4 = pnand %p367_p3, %p364_p2 }
  0x2b   :  { %372 = shalt.err (!%p369_p4)
}
  0x2c   :  { %s373_s0 = scalar_lea.vmem %s43_s15, 128  ;;  %p378_p6 = scmp.lt.s32.totalorder %s43_s15, %s43_s15 }
  0x2d   :  { %p374_p5 = scmp.ne.s32.totalorder %s43_s15, %s373_s0  ;;  %p379_p7 = scmp.lt.s32.totalorder %s373_s0, %s373_s0 }
  0x2f   :  { %p380_p8 = por %p379_p7, %p378_p6 }
  0x31   :  { %p381_p9 = pnand %p380_p8, %p374_p5 }
  0x33   :  { %384 = shalt.err (!%p381_p9)
}
  0x34   :  { %48 = dma.hbm_to_vmem [thread:$0]  %s562_s2, 128, %s43_s15, [#allocation6], %s439_s27, %s439_s27, %s440_s28  }
  0x35   :  { %s385_s5 = scalar_lea.hbm %s563_s3, 512 }
  0x36   :  { %p386_p10 = scmp.ne.s32.totalorder %s563_s3, %s385_s5  ;;  %p389_p11 = scmp.lt.u32.totalorder %s385_s5, %s563_s3 }
  0x38   :  { %p391_p12 = pnand %p389_p11, %p386_p10 }
  0x3a   :  { %394 = shalt.err (!%p391_p12)
}
  0x3b   :  { %s395_s10 = scalar_lea.vmem %s508_s17, 512  ;;  %p400_p0 = scmp.lt.s32.totalorder %s508_s17, %s508_s17 }
  0x3c   :  { %p396_p13 = scmp.ne.s32.totalorder %s508_s17, %s395_s10  ;;  %p401_p1 = scmp.lt.s32.totalorder %s395_s10, %s395_s10 }
  0x3e   :  { %p402_p2 = por %p401_p1, %p400_p0 }
  0x40   :  { %p403_p3 = pnand %p402_p2, %p396_p13 }
  0x42   :  { %406 = shalt.err (!%p403_p3)
}
  0x43   :  { %60 = dma.hbm_to_vmem [thread:$0]  %s563_s3, 512, %s508_s17, [#allocation9], %s439_s27, %s439_s27, %s440_s28  }
  0x44   :  { %429 = dma.done.wait [#allocation3], 128  }
  0x45   :  { %430 = vsyncadd [#allocation3], 4294967168 }
  0x46   :  { %431 = dma.done.wait [#allocation6], 256  }
  0x47   :  { %432 = vsyncadd [#allocation6], 4294967040 }
  0x48   :  { %433 = dma.done.wait [#allocation9], 512  }
  0x49   :  { %434 = vsyncadd [#allocation9], 4294966784  ;;  %v443_v0 = vmov 0.0   ;;  %vm444_vm0 = vmmov 0   ;;  %v311_v1 = vld [vmem:[#allocation8] sm:$0xff]   ;;  %v312_v2 = vld [vmem:[#allocation8 + $0x8] sm:$0xff]  }
  0x4a   :  { %282 = vmatprep.subr.bf16.mxu1 %v443_v0  ;;  %294 = vmatprep.subr.bf16.mxu0 %v443_v0  ;;  %v76_v3 = vld [vmem:[#allocation7] sm:$0xff]   ;;  %v316_v4 = vld [vmem:[#allocation2] sm:$0xff]   ;;  %v313_v5 = vld [vmem:[#allocation8 + $0x10] sm:$0xff]   ;;  %vm173_vm1 = vcmask 130048   ;;  %vm117_vm2 = vcmask 523264   ;;  %s445_s3 = smov [#allocation10]  }
  0x4b   :  { %296 = vmatprep.mubr.msk.bf16.mxu0 %vm444_vm0, %v443_v0  ;;  %290 = vmatprep.mubr.msk.bf16.mxu1 %vm444_vm0, %v443_v0  ;;  %v315_v6 = vld [vmem:[#allocation8 + $0x18] sm:$0xff]   ;;  %v317_v7 = vld [vmem:[#allocation5] sm:$0xff]   ;;  %v224_v15 = vunpack.c.l.bf16 %v76_v3  ;;  %v225_v20 = vunpack.c.h.bf16 %v76_v3  ;;  %s243_s12 = sshll.u32 %s445_s3, 4  ;;  %s244_s12 = int_to_ptr.vmem [resolvable:$true] %s243_s12 }
  0x4c   :  { %283 = vmatpush3.bf16.msra.mxu1 %v311_v1  ;;  %295 = vmatpush3.bf16.msra.mxu0 %v76_v3  ;;  %s407_s1 = scalar_lea.vmem %s244_s12, 128  ;;  %p412_p5 = scmp.lt.s32.totalorder %s244_s12, %s244_s12 }
  0x4d   :  { %284 = vmatprep.subr.bf16.mxu1 %v443_v0  ;;  %p408_p4 = scmp.ne.s32.totalorder %s244_s12, %s407_s1  ;;  %p413_p6 = scmp.lt.s32.totalorder %s407_s1, %s407_s1 }
  0x4f   :  { %297 = vmatmul.mubr.msk.bf16.vlgmr.msra.gmra.mrb[0].mxu0 %vm173_vm1, %v316_v4  ;;  %p414_p7 = por %p413_p6, %p412_p5 }
  0x50   :  { %285 = vmatpush3.bf16.msra.mxu1 %v312_v2 }
  0x51   :  { %286 = vmatprep.subr.bf16.mxu1 %v443_v0  ;;  %p415_p8 = pnand %p414_p7, %p408_p4 }
  0x54   :  { %287 = vmatpush3.bf16.msra.mxu1 %v313_v5 }
  0x55   :  { %288 = vmatprep.subr.bf16.mxu1 %v443_v0 }
  0x58   :  { %289 = vmatpush3.bf16.msra.mxu1 %v315_v6 }
  0x5b   :  { %291 = vmatmul.mubr.msk.bf16.vlgmr.msra.gmra.mrb[0].mxu1 %vm117_vm2, %v317_v7 }
 0x122   :  { %v211_v8 = vpop.f32.mrb[0].mxu0 }
 0x123   :  { %v298_v9 = vpop.f32.mrb[1].mxu0 }
 0x124   :  { %v214_v10 = vpop.f32.mrb[2].mxu0 }
 0x125   :  { %v299_v11 = vpop.f32.mrb[3].mxu0 }
 0x12e   :  { %v155_v12 = vpop.f32.mrb[0].mxu1 }
 0x12f   :  { %v212_v13 = vadd.f32 %v211_v8, %v155_v12  ;;  %v292_v14 = vpop.f32.mrb[1].mxu1 }
 0x130   :  { %v158_v16 = vpop.f32.mrb[2].mxu1 }
 0x131   :  { %vm218_vm3 = vcmp.ge.f32.partialorder %v212_v13, 0.0  ;;  %v220_v17 = vmul.f32 0.1, %v212_v13  ;;  %v215_v18 = vadd.f32 %v214_v10, %v158_v16  ;;  %v293_v19 = vpop.f32.mrb[3].mxu1 }
 0x133   :  { %v222_v21 = vsel %vm218_vm3, %v212_v13, %v220_v17  ;;  %vm219_vm4 = vcmp.ge.f32.partialorder %v215_v18, 0.0  ;;  %v221_v22 = vmul.f32 0.1, %v215_v18 }
 0x134   :  { %v226_v23 = vadd.f32 %v224_v15, %v222_v21 }
 0x135   :  { %v223_v24 = vsel %vm219_vm4, %v215_v18, %v221_v22 }
 0x136   :  { %v227_v25 = vadd.f32 %v225_v20, %v223_v24 }
 0x138   :  { %v273_v26 = vpack.c.bf16 %v227_v25, %v226_v23 }
 0x13a   :  { %274 = vst [vmem:[#allocation10] sm:$0xff] %v273_v26  }
 0x13b   :  { %418 = shalt.err (!%p415_p8)
}
 0x13c   :  { %s419_s15 = scalar_lea.hbm %s564_s4, 128 }
 0x13d   :  { %p420_p9 = scmp.ne.s32.totalorder %s564_s4, %s419_s15  ;;  %p423_p10 = scmp.lt.u32.totalorder %s419_s15, %s564_s4 }
 0x13f   :  { %p425_p11 = pnand %p423_p10, %p420_p9 }
 0x141   :  { %428 = shalt.err (!%p425_p11)
}
 0x142   :  { %249 = dma.vmem_to_hbm [thread:$0]  %s244_s12, 128, %s564_s4, [#allocation4], %s439_s27, %s439_s27, %s440_s28  }
 0x143   :  { %435 = dma.done.wait [#allocation4], 128  }
 0x144   :  { %436 = vsyncadd [#allocation4], 4294967168 }
 0x145   :  { %253 = vsyncpa [#allocation3], 1 }
 0x146   :  { %254 = vsyncpa [#allocation6], 1 }
 0x147   :  { %255 = vsyncpa [#allocation9], 1 }
 0x148   :  { %256 = vsyncpa [#allocation4], 1 }

// kernel: _lambda_.23
= control target key start
LH: loop header
LB: loop body
LE: loop exit
PB: predicated region body
PF: predicated region fallthrough
CT: control target
= control target key end

     0   :  { %13 = vsyncpa [#allocation3], 0  ;;  %s1090_s0 = inlined_call_operand.hbm [shape: bf16[16,16], index: 0, kind: input, shape index: {}]   ;;  %s1091_s1 = inlined_call_operand.hbm [shape: bf16[16,16], index: 1, kind: input, shape index: {}]   ;;  %s1092_s2 = inlined_call_operand.hbm [shape: bf16[16,64], index: 2, kind: input, shape index: {}]   ;;  %s1093_s3 = inlined_call_operand.hbm [shape: bf16[16,16], index: 3, kind: input, shape index: {}]   ;;  %s1094_s4 = inlined_call_operand.hbm [shape: bf16[16,64], index: 4, kind: input, shape index: {}]   ;;  %s1095_s5 = inlined_call_operand.hbm [shape: bf16[16,128], index: 5, kind: input, shape index: {}]   ;;  %s1096_s6 = inlined_call_operand.hbm [shape: bf16[64,128], index: 6, kind: input, shape index: {}]   ;;  %s1097_s7 = inlined_call_operand.hbm [shape: bf16[64,128], index: 7, kind: input, shape index: {}]   ;;  %s1098_s8 = inlined_call_operand.hbm [shape: bf16[16,128], index: 8, kind: output, shape index: {}]  }
   0x1   :  { %14 = vsyncpa [#allocation6], 0 }
   0x2   :  { %15 = vsyncpa [#allocation9], 0 }
   0x3   :  { %16 = vsyncpa [#allocation12], 0 }
   0x4   :  { %17 = vsyncpa [#allocation15], 0 }
   0x5   :  { %18 = vsyncpa [#allocation4], 0  ;;  %s856_s27 = smov [#allocation5]   ;;  %s857_s29 = smov [#allocation8]  }
   0x6   :  { %s36_s28 = sshll.u32 %s856_s27, 4  ;;  %s60_s30 = sshll.u32 %s857_s29, 4  ;;  %s37_s28 = int_to_ptr.vmem [resolvable:$true] %s36_s28  ;;  %s914_s30 = int_to_ptr.vmem [resolvable:$true] %s60_s30 }
   0x7   :  { %s646_s11 = scalar_lea.hbm %s1091_s1, 128 }
   0x8   :  { %p647_p0 = scmp.ne.s32.totalorder %s1091_s1, %s646_s11  ;;  %p650_p1 = scmp.lt.u32.totalorder %s646_s11, %s1091_s1 }
   0xa   :  { %p652_p2 = pnand %p650_p1, %p647_p0 }
   0xc   :  { %655 = shalt.err (!%p652_p2)
}
   0xd   :  { %s656_s16 = scalar_lea.vmem %s37_s28, 128  ;;  %p661_p4 = scmp.lt.s32.totalorder %s37_s28, %s37_s28 }
   0xe   :  { %p657_p3 = scmp.ne.s32.totalorder %s37_s28, %s656_s16  ;;  %p662_p5 = scmp.lt.s32.totalorder %s656_s16, %s656_s16 }
  0x10   :  { %p663_p6 = por %p662_p5, %p661_p4 }
  0x12   :  { %p664_p7 = pnand %p663_p6, %p657_p3 }
  0x14   :  { %667 = shalt.err (!%p664_p7)
}
  0x15   :  { %s858_s17 = smov 64   ;;  %s859_s18 = smov 4  }
  0x16   :  { %42 = dma.hbm_to_vmem [thread:$0]  %s1091_s1, 128, %s37_s28, [#allocation6], %s858_s17, %s858_s17, %s859_s18  }
  0x17   :  { %s668_s23 = scalar_lea.hbm %s1093_s3, 128 }
  0x18   :  { %p669_p8 = scmp.ne.s32.totalorder %s1093_s3, %s668_s23  ;;  %p672_p9 = scmp.lt.u32.totalorder %s668_s23, %s1093_s3 }
  0x1a   :  { %p674_p10 = pnand %p672_p9, %p669_p8 }
  0x1c   :  { %677 = shalt.err (!%p674_p10)
}
  0x1d   :  { %s678_s29 = scalar_lea.vmem %s914_s30, 128  ;;  %p683_p12 = scmp.lt.s32.totalorder %s914_s30, %s914_s30 }
  0x1e   :  { %p679_p11 = scmp.ne.s32.totalorder %s914_s30, %s678_s29  ;;  %p684_p13 = scmp.lt.s32.totalorder %s678_s29, %s678_s29 }
  0x20   :  { %p685_p0 = por %p684_p13, %p683_p12 }
  0x22   :  { %p686_p1 = pnand %p685_p0, %p679_p11 }
  0x24   :  { %689 = shalt.err (!%p686_p1)
}
  0x25   :  { %66 = dma.hbm_to_vmem [thread:$0]  %s1093_s3, 128, %s914_s30, [#allocation9], %s858_s17, %s858_s17, %s859_s18  }
  0x26   :  { %s860_s9 = smov [#allocation11]   ;;  %s861_s11 = smov [#allocation2]  }
  0x27   :  { %s84_s10 = sshll.u32 %s860_s9, 4  ;;  %s24_s12 = sshll.u32 %s861_s11, 4  ;;  %s85_s10 = int_to_ptr.vmem [resolvable:$true] %s84_s10  ;;  %s951_s12 = int_to_ptr.vmem [resolvable:$true] %s24_s12 }
  0x28   :  { %s690_s15 = scalar_lea.hbm %s1095_s5, 128 }
  0x29   :  { %p691_p2 = scmp.ne.s32.totalorder %s1095_s5, %s690_s15  ;;  %p694_p3 = scmp.lt.u32.totalorder %s690_s15, %s1095_s5 }
  0x2b   :  { %p696_p4 = pnand %p694_p3, %p691_p2 }
  0x2d   :  { %699 = shalt.err (!%p696_p4)
}
  0x2e   :  { %s700_s3 = scalar_lea.vmem %s85_s10, 128  ;;  %p705_p6 = scmp.lt.s32.totalorder %s85_s10, %s85_s10 }
  0x2f   :  { %p701_p5 = scmp.ne.s32.totalorder %s85_s10, %s700_s3  ;;  %p706_p7 = scmp.lt.s32.totalorder %s700_s3, %s700_s3 }
  0x31   :  { %p707_p8 = por %p706_p7, %p705_p6 }
  0x33   :  { %p708_p9 = pnand %p707_p8, %p701_p5 }
  0x35   :  { %711 = shalt.err (!%p708_p9)
}
  0x36   :  { %90 = dma.hbm_to_vmem [thread:$0]  %s1095_s5, 128, %s85_s10, [#allocation12], %s858_s17, %s858_s17, %s859_s18  }
  0x37   :  { %s712_s25 = scalar_lea.hbm %s1090_s0, 128 }
  0x38   :  { %p713_p10 = scmp.ne.s32.totalorder %s1090_s0, %s712_s25  ;;  %p716_p11 = scmp.lt.u32.totalorder %s712_s25, %s1090_s0 }
  0x3a   :  { %p718_p12 = pnand %p716_p11, %p713_p10 }
  0x3c   :  { %721 = shalt.err (!%p718_p12)
}
  0x3d   :  { %s722_s28 = scalar_lea.vmem %s951_s12, 128  ;;  %p727_p0 = scmp.lt.s32.totalorder %s951_s12, %s951_s12 }
  0x3e   :  { %p723_p13 = scmp.ne.s32.totalorder %s951_s12, %s722_s28  ;;  %p728_p1 = scmp.lt.s32.totalorder %s722_s28, %s722_s28 }
  0x40   :  { %p729_p2 = por %p728_p1, %p727_p0 }
  0x42   :  { %p730_p3 = pnand %p729_p2, %p723_p13 }
  0x44   :  { %733 = shalt.err (!%p730_p3)
}
  0x45   :  { %30 = dma.hbm_to_vmem [thread:$0]  %s1090_s0, 128, %s951_s12, [#allocation3], %s858_s17, %s858_s17, %s859_s18  }
  0x46   :  { %s862_s10 = smov [#allocation7]   ;;  %s863_s13 = smov [#allocation10]  }
  0x47   :  { %s48_s11 = sshll.u32 %s862_s10, 4  ;;  %s72_s14 = sshll.u32 %s863_s13, 4  ;;  %s49_s11 = int_to_ptr.vmem [resolvable:$true] %s48_s11  ;;  %s988_s14 = int_to_ptr.vmem [resolvable:$true] %s72_s14 }
  0x48   :  { %s734_s19 = scalar_lea.hbm %s1092_s2, 128 }
  0x49   :  { %p735_p4 = scmp.ne.s32.totalorder %s1092_s2, %s734_s19  ;;  %p738_p5 = scmp.lt.u32.totalorder %s734_s19, %s1092_s2 }
  0x4b   :  { %p740_p6 = pnand %p738_p5, %p735_p4 }
  0x4d   :  { %743 = shalt.err (!%p740_p6)
}
  0x4e   :  { %s744_s0 = scalar_lea.vmem %s49_s11, 128  ;;  %p749_p8 = scmp.lt.s32.totalorder %s49_s11, %s49_s11 }
  0x4f   :  { %p745_p7 = scmp.ne.s32.totalorder %s49_s11, %s744_s0  ;;  %p750_p9 = scmp.lt.s32.totalorder %s744_s0, %s744_s0 }
  0x51   :  { %p751_p10 = por %p750_p9, %p749_p8 }
  0x53   :  { %p752_p11 = pnand %p751_p10, %p745_p7 }
  0x55   :  { %755 = shalt.err (!%p752_p11)
}
  0x56   :  { %54 = dma.hbm_to_vmem [thread:$0]  %s1092_s2, 128, %s49_s11, [#allocation6], %s858_s17, %s858_s17, %s859_s18  }
  0x57   :  { %s756_s25 = scalar_lea.hbm %s1094_s4, 128 }
  0x58   :  { %p757_p12 = scmp.ne.s32.totalorder %s1094_s4, %s756_s25  ;;  %p760_p13 = scmp.lt.u32.totalorder %s756_s25, %s1094_s4 }
  0x5a   :  { %p762_p0 = pnand %p760_p13, %p757_p12 }
  0x5c   :  { %765 = shalt.err (!%p762_p0)
}
  0x5d   :  { %s766_s28 = scalar_lea.vmem %s988_s14, 128  ;;  %p771_p2 = scmp.lt.s32.totalorder %s988_s14, %s988_s14 }
  0x5e   :  { %p767_p1 = scmp.ne.s32.totalorder %s988_s14, %s766_s28  ;;  %p772_p3 = scmp.lt.s32.totalorder %s766_s28, %s766_s28 }
  0x60   :  { %p773_p4 = por %p772_p3, %p771_p2 }
  0x62   :  { %p774_p5 = pnand %p773_p4, %p767_p1 }
  0x64   :  { %777 = shalt.err (!%p774_p5)
}
  0x65   :  { %78 = dma.hbm_to_vmem [thread:$0]  %s1094_s4, 128, %s988_s14, [#allocation9], %s858_s17, %s858_s17, %s859_s18  }
  0x66   :  { %s864_s9 = smov [#allocation13]   ;;  %s865_s11 = smov [#allocation14]  }
  0x67   :  { %s96_s10 = sshll.u32 %s864_s9, 4  ;;  %s108_s13 = sshll.u32 %s865_s11, 4  ;;  %s97_s10 = int_to_ptr.vmem [resolvable:$true] %s96_s10  ;;  %s1025_s13 = int_to_ptr.vmem [resolvable:$true] %s108_s13 }
  0x68   :  { %s778_s19 = scalar_lea.hbm %s1096_s6, 512 }
  0x69   :  { %p779_p6 = scmp.ne.s32.totalorder %s1096_s6, %s778_s19  ;;  %p782_p7 = scmp.lt.u32.totalorder %s778_s19, %s1096_s6 }
  0x6b   :  { %p784_p8 = pnand %p782_p7, %p779_p6 }
  0x6d   :  { %787 = shalt.err (!%p784_p8)
}
  0x6e   :  { %s788_s4 = scalar_lea.vmem %s97_s10, 512  ;;  %p793_p10 = scmp.lt.s32.totalorder %s97_s10, %s97_s10 }
  0x6f   :  { %p789_p9 = scmp.ne.s32.totalorder %s97_s10, %s788_s4  ;;  %p794_p11 = scmp.lt.s32.totalorder %s788_s4, %s788_s4 }
  0x71   :  { %p795_p12 = por %p794_p11, %p793_p10 }
  0x73   :  { %p796_p13 = pnand %p795_p12, %p789_p9 }
  0x75   :  { %799 = shalt.err (!%p796_p13)
}
  0x76   :  { %102 = dma.hbm_to_vmem [thread:$0]  %s1096_s6, 512, %s97_s10, [#allocation12], %s858_s17, %s858_s17, %s859_s18  }
  0x77   :  { %s800_s23 = scalar_lea.hbm %s1097_s7, 512 }
  0x78   :  { %p801_p0 = scmp.ne.s32.totalorder %s1097_s7, %s800_s23  ;;  %p804_p1 = scmp.lt.u32.totalorder %s800_s23, %s1097_s7 }
  0x7a   :  { %p806_p2 = pnand %p804_p1, %p801_p0 }
  0x7c   :  { %809 = shalt.err (!%p806_p2)
}
  0x7d   :  { %s810_s29 = scalar_lea.vmem %s1025_s13, 512  ;;  %p815_p4 = scmp.lt.s32.totalorder %s1025_s13, %s1025_s13 }
  0x7e   :  { %p811_p3 = scmp.ne.s32.totalorder %s1025_s13, %s810_s29  ;;  %p816_p5 = scmp.lt.s32.totalorder %s810_s29, %s810_s29 }
  0x80   :  { %p817_p6 = por %p816_p5, %p815_p4 }
  0x82   :  { %p818_p7 = pnand %p817_p6, %p811_p3 }
  0x84   :  { %821 = shalt.err (!%p818_p7)
}
  0x85   :  { %114 = dma.hbm_to_vmem [thread:$0]  %s1097_s7, 512, %s1025_s13, [#allocation15], %s858_s17, %s858_s17, %s859_s18  }
  0x86   :  { %844 = dma.done.wait [#allocation3], 128  }
  0x87   :  { %845 = vsyncadd [#allocation3], 4294967168 }
  0x88   :  { %846 = dma.done.wait [#allocation6], 256  }
  0x89   :  { %847 = vsyncadd [#allocation6], 4294967040 }
  0x8a   :  { %848 = dma.done.wait [#allocation9], 256  }
  0x8b   :  { %849 = vsyncadd [#allocation9], 4294967040 }
  0x8c   :  { %850 = dma.done.wait [#allocation12], 640  }
  0x8d   :  { %851 = vsyncadd [#allocation12], 4294966656 }
  0x8e   :  { %852 = dma.done.wait [#allocation15], 512  }
  0x8f   :  { %853 = vsyncadd [#allocation15], 4294966784  ;;  %v866_v0 = vmov 0.0   ;;  %vm867_vm0 = vmmov 0   ;;  %v631_v1 = vld [vmem:[#allocation13] sm:$0xff]   ;;  %v1064_v2 = vld [vmem:[#allocation11] sm:$0xff]  }
  0x90   :  { %570 = vmatprep.subr.bf16.mxu0 %v866_v0  ;;  %588 = vmatprep.subr.bf16.mxu1 %v866_v0  ;;  %v633_v3 = vld [vmem:[#allocation13 + $0x8] sm:$0xff]   ;;  %v634_v4 = vld [vmem:[#allocation2] sm:$0xff]   ;;  %vm242_vm1 = vcmask 130048   ;;  %v635_v5 = vld [vmem:[#allocation14] sm:$0xff]   ;;  %vm183_vm2 = vcmask 523264   ;;  %v491_v40 = vunpack.c.l.bf16 %v1064_v2  ;;  %v492_v45 = vunpack.c.h.bf16 %v1064_v2  ;;  %s868_s7 = smov [#allocation16]  }
  0x91   :  { %590 = vmatprep.mubr.msk.bf16.mxu1 %vm867_vm0, %v866_v0  ;;  %578 = vmatprep.mubr.msk.bf16.mxu0 %vm867_vm0, %v866_v0  ;;  %v636_v6 = vld [vmem:[#allocation13 + $0x10] sm:$0xff]   ;;  %v637_v7 = vld [vmem:[#allocation14 + $0x8] sm:$0xff]   ;;  %v638_v8 = vld [vmem:[#allocation13 + $0x18] sm:$0xff]   ;;  %s510_s28 = sshll.u32 %s868_s7, 4  ;;  %s511_s28 = int_to_ptr.vmem [resolvable:$true] %s510_s28 }
  0x92   :  { %571 = vmatpush3.bf16.msra.mxu0 %v631_v1  ;;  %589 = vmatpush3.bf16.msra.mxu1 %v1064_v2  ;;  %v639_v9 = vld [vmem:[#allocation14 + $0x10] sm:$0xff]   ;;  %v640_v10 = vld [vmem:[#allocation7] sm:$0xff]   ;;  %v641_v11 = vld [vmem:[#allocation14 + $0x18] sm:$0xff]   ;;  %s822_s2 = scalar_lea.vmem %s511_s28, 128  ;;  %p827_p9 = scmp.lt.s32.totalorder %s511_s28, %s511_s28 }
  0x93   :  { %572 = vmatprep.subr.bf16.mxu0 %v866_v0  ;;  %594 = vmatprep.subr.bf16.mxu1 %v866_v0  ;;  %v642_v12 = vld [vmem:[#allocation10] sm:$0xff]   ;;  %v643_v25 = vld [vmem:[#allocation5] sm:$0xff]   ;;  %v644_v32 = vld [vmem:[#allocation8] sm:$0xff]   ;;  %p823_p8 = scmp.ne.s32.totalorder %s511_s28, %s822_s2  ;;  %p828_p10 = scmp.lt.s32.totalorder %s822_s2, %s822_s2 }
  0x95   :  { %591 = vmatmul.mubr.msk.bf16.vlgmr.msra.gmra.mrb[0].mxu1 %vm242_vm1, %v634_v4  ;;  %p829_p11 = por %p828_p10, %p827_p9 }
  0x96   :  { %573 = vmatpush3.bf16.msra.mxu0 %v633_v3  ;;  %595 = vmatpush3.bf16.msra.mxu1 %v635_v5 }
  0x97   :  { %574 = vmatprep.subr.bf16.mxu0 %v866_v0  ;;  %602 = vmatprep.mubr.msk.bf16.mxu1 %vm867_vm0, %v866_v0  ;;  %p830_p12 = pnand %p829_p11, %p823_p8 }
  0x98   :  { %596 = vmatprep.subr.bf16.mxu1 %v866_v0 }
  0x9a   :  { %575 = vmatpush3.bf16.msra.mxu0 %v636_v6  ;;  %597 = vmatpush3.bf16.msra.mxu1 %v637_v7 }
  0x9b   :  { %576 = vmatprep.subr.bf16.mxu0 %v866_v0  ;;  %598 = vmatprep.subr.bf16.mxu1 %v866_v0 }
  0x9e   :  { %577 = vmatpush3.bf16.msra.mxu0 %v638_v8  ;;  %599 = vmatpush3.bf16.msra.mxu1 %v639_v9 }
  0x9f   :  { %582 = vmatprep.subr.bf16.mxu0 %v866_v0  ;;  %600 = vmatprep.subr.bf16.mxu1 %v866_v0 }
  0xa1   :  { %579 = vmatmul.mubr.msk.bf16.vlgmr.msra.gmra.mrb[0].mxu0 %vm183_vm2, %v640_v10 }
  0xa2   :  { %584 = vmatprep.mubr.msk.bf16.mxu0 %vm867_vm0, %v866_v0  ;;  %601 = vmatpush3.bf16.msra.mxu1 %v641_v11 }
  0xa3   :  { %606 = vmatprep.subr.bf16.mxu1 %v866_v0 }
  0xa5   :  { %603 = vmatmul.mubr.msk.bf16.vlgmr.msra.gmra.mrb[4].mxu1 %vm183_vm2, %v642_v12 }
  0xa6   :  { %608 = vmatprep.mubr.msk.bf16.mxu1 %vm867_vm0, %v866_v0 }
 0x174   :  { %v221_v13 = vpop.f32.mrb[0].mxu0 }
 0x175   :  { %vm228_vm3 = vcmp.ge.f32.partialorder %v221_v13, 0.0  ;;  %v230_v14 = vmul.f32 0.1, %v221_v13  ;;  %v580_v15 = vpop.f32.mrb[1].mxu0 }
 0x176   :  { %v224_v16 = vpop.f32.mrb[2].mxu0 }
 0x177   :  { %v232_v17 = vsel %vm228_vm3, %v221_v13, %v230_v14  ;;  %vm229_vm4 = vcmp.ge.f32.partialorder %v224_v16, 0.0  ;;  %v231_v18 = vmul.f32 0.1, %v224_v16  ;;  %v581_v19 = vpop.f32.mrb[3].mxu0 }
 0x178   :  { %v418_v22 = vpop.f32.mrb[4].mxu1 }
 0x179   :  { %v233_v20 = vsel %vm229_vm4, %v224_v16, %v231_v18  ;;  %v427_v23 = vmul.f32 0.1, %v418_v22  ;;  %v604_v24 = vpop.f32.mrb[5].mxu1  ;;  %vm425_vm5 = vcmp.ge.f32.partialorder %v418_v22, 0.0 }
 0x17a   :  { %v236_v21 = vpack.c.bf16 %v233_v20, %v232_v17  ;;  %v421_v26 = vpop.f32.mrb[6].mxu1 }
 0x17b   :  { %vm426_vm6 = vcmp.ge.f32.partialorder %v421_v26, 0.0  ;;  %v428_v27 = vmul.f32 0.1, %v421_v26  ;;  %v605_v28 = vpop.f32.mrb[7].mxu1  ;;  %v429_v29 = vsel %vm425_vm5, %v418_v22, %v427_v23 }
 0x17c   :  { %583 = vmatpush3.bf16.msra.mxu0 %v236_v21 }
 0x17d   :  { %v430_v30 = vsel %vm426_vm6, %v421_v26, %v428_v27 }
 0x17e   :  { %v433_v31 = vpack.c.bf16 %v430_v30, %v429_v29 }
 0x17f   :  { %585 = vmatmul.mubr.msk.bf16.vlgmr.msra.gmra.mrb[4].mxu0 %vm242_vm1, %v643_v25 }
 0x180   :  { %607 = vmatpush3.bf16.msra.mxu1 %v433_v31 }
 0x183   :  { %609 = vmatmul.mubr.msk.bf16.vlgmr.msra.gmra.mrb[0].mxu1 %vm242_vm1, %v644_v32 }
 0x252   :  { %v280_v33 = vpop.f32.mrb[4].mxu0 }
 0x253   :  { %v586_v34 = vpop.f32.mrb[5].mxu0 }
 0x254   :  { %v283_v35 = vpop.f32.mrb[6].mxu0 }
 0x255   :  { %v587_v36 = vpop.f32.mrb[7].mxu0 }
 0x256   :  { %v476_v37 = vpop.f32.mrb[0].mxu1 }
 0x257   :  { %v612_v38 = vadd.f32 %v476_v37, %v280_v33  ;;  %v610_v39 = vpop.f32.mrb[1].mxu1 }
 0x258   :  { %v479_v41 = vpop.f32.mrb[2].mxu1 }
 0x259   :  { %vm485_vm7 = vcmp.ge.f32.partialorder %v612_v38, 0.0  ;;  %v487_v42 = vmul.f32 0.1, %v612_v38  ;;  %v613_v43 = vadd.f32 %v479_v41, %v283_v35  ;;  %v611_v44 = vpop.f32.mrb[3].mxu1 }
 0x25b   :  { %v489_v46 = vsel %vm485_vm7, %v612_v38, %v487_v42  ;;  %vm486_vm8 = vcmp.ge.f32.partialorder %v613_v43, 0.0  ;;  %v488_v47 = vmul.f32 0.1, %v613_v43 }
 0x25c   :  { %v493_v48 = vadd.f32 %v491_v40, %v489_v46 }
 0x25d   :  { %v490_v49 = vsel %vm486_vm8, %v613_v43, %v488_v47 }
 0x25e   :  { %v494_v50 = vadd.f32 %v492_v45, %v490_v49 }
 0x260   :  { %v552_v51 = vpack.c.bf16 %v494_v50, %v493_v48 }
 0x262   :  { %553 = vst [vmem:[#allocation16] sm:$0xff] %v552_v51  }
 0x263   :  { %833 = shalt.err (!%p830_p12)
}
 0x264   :  { %s834_s10 = scalar_lea.hbm %s1098_s8, 128 }
 0x265   :  { %p835_p13 = scmp.ne.s32.totalorder %s1098_s8, %s834_s10  ;;  %p838_p0 = scmp.lt.u32.totalorder %s834_s10, %s1098_s8 }
 0x267   :  { %p840_p1 = pnand %p838_p0, %p835_p13 }
 0x269   :  { %843 = shalt.err (!%p840_p1)
}
 0x26a   :  { %516 = dma.vmem_to_hbm [thread:$0]  %s511_s28, 128, %s1098_s8, [#allocation4], %s858_s17, %s858_s17, %s859_s18  }
 0x26b   :  { %854 = dma.done.wait [#allocation4], 128  }
 0x26c   :  { %855 = vsyncadd [#allocation4], 4294967168 }
 0x26d   :  { %520 = vsyncpa [#allocation3], 1 }
 0x26e   :  { %521 = vsyncpa [#allocation6], 1 }
 0x26f   :  { %522 = vsyncpa [#allocation9], 1 }
 0x270   :  { %523 = vsyncpa [#allocation12], 1 }
 0x271   :  { %524 = vsyncpa [#allocation15], 1 }
 0x272   :  { %525 = vsyncpa [#allocation4], 1 }

// kernel: _lambda_.29
= control target key start
LH: loop header
LB: loop body
LE: loop exit
PB: predicated region body
PF: predicated region fallthrough
CT: control target
= control target key end

     0   :  { %7 = vsyncpa [#allocation3], 0  ;;  %s425_s0 = inlined_call_operand.hbm [shape: bf16[64,16], index: 0, kind: input, shape index: {}]   ;;  %s426_s1 = inlined_call_operand.hbm [shape: bf16[16,128], index: 1, kind: input, shape index: {}]   ;;  %s427_s2 = inlined_call_operand.hbm [shape: bf16[64,128], index: 2, kind: output, shape index: {}]  }
   0x1   :  { %8 = vsyncpa [#allocation6], 0 }
   0x2   :  { %9 = vsyncpa [#allocation4], 0  ;;  %s360_s9 = smov [#allocation2]   ;;  %s288_s13 = scalar_lea.hbm %s425_s0, 512 }
   0x3   :  { %s15_s10 = sshll.u32 %s360_s9, 4  ;;  %p289_p0 = scmp.ne.s32.totalorder %s425_s0, %s288_s13  ;;  %s16_s10 = int_to_ptr.vmem [resolvable:$true] %s15_s10 }
   0x4   :  { %p292_p1 = scmp.lt.u32.totalorder %s288_s13, %s425_s0 }
   0x6   :  { %p294_p2 = pnand %p292_p1, %p289_p0 }
   0x8   :  { %297 = shalt.err (!%p294_p2)
}
   0x9   :  { %s298_s18 = scalar_lea.vmem %s16_s10, 512  ;;  %p303_p4 = scmp.lt.s32.totalorder %s16_s10, %s16_s10 }
   0xa   :  { %p299_p3 = scmp.ne.s32.totalorder %s16_s10, %s298_s18  ;;  %p304_p5 = scmp.lt.s32.totalorder %s298_s18, %s298_s18 }
   0xc   :  { %p305_p6 = por %p304_p5, %p303_p4 }
   0xe   :  { %p306_p7 = pnand %p305_p6, %p299_p3 }
  0x10   :  { %309 = shalt.err (!%p306_p7)
}
  0x11   :  { %s361_s19 = smov 64   ;;  %s362_s20 = smov 4  }
  0x12   :  { %21 = dma.hbm_to_vmem [thread:$0]  %s425_s0, 512, %s16_s10, [#allocation3], %s361_s19, %s361_s19, %s362_s20  }
  0x13   :  { %s363_s23 = smov [#allocation5]   ;;  %s310_s27 = scalar_lea.hbm %s426_s1, 128 }
  0x14   :  { %s27_s24 = sshll.u32 %s363_s23, 4  ;;  %p311_p8 = scmp.ne.s32.totalorder %s426_s1, %s310_s27  ;;  %s28_s24 = int_to_ptr.vmem [resolvable:$true] %s27_s24 }
  0x15   :  { %p314_p9 = scmp.lt.u32.totalorder %s310_s27, %s426_s1 }
  0x17   :  { %p316_p10 = pnand %p314_p9, %p311_p8 }
  0x19   :  { %319 = shalt.err (!%p316_p10)
}
  0x1a   :  { %s320_s4 = scalar_lea.vmem %s28_s24, 128  ;;  %p325_p12 = scmp.lt.s32.totalorder %s28_s24, %s28_s24 }
  0x1b   :  { %p321_p11 = scmp.ne.s32.totalorder %s28_s24, %s320_s4  ;;  %p326_p13 = scmp.lt.s32.totalorder %s320_s4, %s320_s4 }
  0x1d   :  { %p327_p0 = por %p326_p13, %p325_p12 }
  0x1f   :  { %p328_p1 = pnand %p327_p0, %p321_p11 }
  0x21   :  { %331 = shalt.err (!%p328_p1)
}
  0x22   :  { %33 = dma.hbm_to_vmem [thread:$0]  %s426_s1, 128, %s28_s24, [#allocation6], %s361_s19, %s361_s19, %s362_s20  }
  0x23   :  { %354 = dma.done.wait [#allocation3], 512  }
  0x24   :  { %355 = vsyncadd [#allocation3], 4294966784 }
  0x25   :  { %356 = dma.done.wait [#allocation6], 128  }
  0x26   :  { %357 = vsyncadd [#allocation6], 4294967168  ;;  %v283_v0 = vld [vmem:[#allocation5] sm:$0xff]   ;;  %vm77_vm0 = vcmask 130048   ;;  %v285_v2 = vld [vmem:[#allocation2 + $0x10] sm:$0xff]   ;;  %s364_s1 = smov [#allocation7]  }
  0x27   :  { %v284_v1 = vld [vmem:[#allocation2] sm:$0xff]   ;;  %266 = vmatprep.subr.bf16.mxu0 %v283_v0  ;;  %276 = vmatprep.subr.bf16.mxu1 %v283_v0  ;;  %v286_v3 = vld [vmem:[#allocation2 + $0x8] sm:$0xff]   ;;  %v287_v4 = vld [vmem:[#allocation2 + $0x18] sm:$0xff]   ;;  %s200_s6 = sshll.u32 %s364_s1, 4  ;;  %s201_s6 = int_to_ptr.vmem [resolvable:$true] %s200_s6 }
  0x28   :  { %267 = vmatpush3.bf16.msra.mxu0 %v283_v0  ;;  %277 = vmatpush3.bf16.msra.mxu1 %v283_v0  ;;  %s332_s7 = scalar_lea.vmem %s201_s6, 512  ;;  %p337_p3 = scmp.lt.s32.totalorder %s201_s6, %s201_s6 }
  0x29   :  { %268 = vmatprep.mubr.msk.bf16.mxu0 %vm77_vm0, %v284_v1  ;;  %272 = vmatprep.mubr.msk.bf16.mxu1 %vm77_vm0, %v285_v2  ;;  %p333_p2 = scmp.ne.s32.totalorder %s201_s6, %s332_s7  ;;  %p338_p4 = scmp.lt.s32.totalorder %s332_s7, %s332_s7 }
  0x2b   :  { %269 = vmatmul.mubr.msk.bf16.vlgmr.msra.gmra.mrb[0].mxu0 %vm77_vm0, %v286_v3  ;;  %273 = vmatmul.mubr.msk.bf16.vlgmr.msra.gmra.mrb[0].mxu1 %vm77_vm0, %v287_v4  ;;  %p339_p5 = por %p338_p4, %p337_p3 }
  0x2d   :  { %p340_p6 = pnand %p339_p5, %p333_p2 }
  0xfe   :  { %v270_v5 = vpop.f32.mrb[0].mxu0  ;;  %v274_v6 = vpop.f32.mrb[0].mxu1 }
  0xff   :  { %v124_v7 = vpop.f32.mrb[1].mxu0  ;;  %v140_v8 = vpop.f32.mrb[1].mxu1 }
 0x100   :  { %v271_v9 = vpop.f32.mrb[2].mxu0  ;;  %v275_v10 = vpop.f32.mrb[2].mxu1 }
 0x101   :  { %v246_v11 = vpack.c.bf16 %v271_v9, %v270_v5  ;;  %v256_v12 = vpack.c.bf16 %v275_v10, %v274_v6  ;;  %v127_v13 = vpop.f32.mrb[3].mxu0  ;;  %v143_v14 = vpop.f32.mrb[3].mxu1 }
 0x102   :  { %v241_v15 = vpack.c.bf16 %v127_v13, %v124_v7  ;;  %v251_v16 = vpack.c.bf16 %v143_v14, %v140_v8 }
 0x103   :  { %258 = vst [vmem:[#allocation7 + $0x8] sm:$0xff] %v246_v11   ;;  %260 = vst [vmem:[#allocation7 + $0x18] sm:$0xff] %v256_v12  }
 0x104   :  { %242 = vst [vmem:[#allocation7] sm:$0xff] %v241_v15   ;;  %259 = vst [vmem:[#allocation7 + $0x10] sm:$0xff] %v251_v16  }
 0x105   :  { %343 = shalt.err (!%p340_p6)
}
 0x106   :  { %s344_s10 = scalar_lea.hbm %s427_s2, 512 }
 0x107   :  { %p345_p7 = scmp.ne.s32.totalorder %s427_s2, %s344_s10  ;;  %p348_p8 = scmp.lt.u32.totalorder %s344_s10, %s427_s2 }
 0x109   :  { %p350_p9 = pnand %p348_p8, %p345_p7 }
 0x10b   :  { %353 = shalt.err (!%p350_p9)
}
 0x10c   :  { %206 = dma.vmem_to_hbm [thread:$0]  %s201_s6, 512, %s427_s2, [#allocation4], %s361_s19, %s361_s19, %s362_s20  }
 0x10d   :  { %358 = dma.done.wait [#allocation4], 512  }
 0x10e   :  { %359 = vsyncadd [#allocation4], 4294966784 }
 0x10f   :  { %210 = vsyncpa [#allocation3], 1 }
 0x110   :  { %211 = vsyncpa [#allocation6], 1 }
 0x111   :  { %212 = vsyncpa [#allocation4], 1 }

// kernel: _lambda_.30
= control target key start
LH: loop header
LB: loop body
LE: loop exit
PB: predicated region body
PF: predicated region fallthrough
CT: control target
= control target key end

     0   :  { %s1196_s0 = inlined_call_operand.hbm [shape: bf16[16,16], index: 0, kind: input, shape index: {}]   ;;  %s1197_s1 = inlined_call_operand.hbm [shape: bf16[16,16], index: 1, kind: input, shape index: {}]   ;;  %s1198_s2 = inlined_call_operand.hbm [shape: bf16[16,512], index: 2, kind: input, shape index: {}]   ;;  %s1199_s3 = inlined_call_operand.hbm [shape: bf16[16,512], index: 3, kind: input, shape index: {}]   ;;  %s1200_s4 = inlined_call_operand.hbm [shape: bf16[16,512], index: 4, kind: output, shape index: {}]  }
   0x1   :  { %1217 = sst [smem:[#allocation19_spill]] %s1196_s0 }
   0x2   :  { %1218 = sst [smem:[#allocation20_spill]] %s1198_s2 }
   0x3   :  { %9 = vsyncpa [#allocation3], 0 }
   0x4   :  { %10 = vsyncpa [#allocation6], 0 }
   0x5   :  { %11 = vsyncpa [#allocation4], 0 }
   0x6   :  { %13 = vsyncpa [#allocation4 + $0x1], 0  ;;  %s910_s15 = smov 0   ;;  %s912_s16 = smov 0  }
   0x7   :  { %s914_s17 = smov 0   ;;  %s916_s18 = smov 0  }
   0x8 LB: > { %1219 = sst [smem:[#allocation14_spill]] %s858_s15  ;;  %s931_s19 = sadd.s32 4294967295, %s870_s18   ;;  %s870_s18 = sphi %s916_s18, %s1252_s18   ;;  %s866_s17 = sphi %s914_s17, %s1254_s17   ;;  %s862_s16 = sphi %s912_s16, %s1256_s16   ;;  %s858_s15 = sphi %s910_s15, %s1255_s15  }
   0x9   : > { %1220 = sst [smem:[#allocation15_spill]] %s866_s17  ;;  %s543_s20 = sadd.s32 4294967294, %s870_s18  }
   0xa   : > { %s935_s21 = sadd.s32 1, %s870_s18   ;;  %s68_s22 = sadd.s32 1, %s866_s17 }
   0xb   : > { %1221 = sst [smem:[#allocation16_spill]] %s935_s21  ;;  %s65_s23 = ssub.s32 %s870_s18, %s935_s21 }
   0xc   : > { %p75_p0 = scmp.ne.s32.totalorder %s866_s17, %s862_s16  ;;  %p66_p1 = scmp.eq.s32.totalorder %s65_s23, 0 }
   0xd   : > { %p76_p2 = scmp.eq.s32.totalorder %s870_s18, 0  ;;  %p81_p3 = scmp.ne.s32.totalorder %s862_s16, %s858_s15 }
   0xe   : > { %p1201_p4 = scmp.eq.s32.totalorder %s931_s19, 0  ;;  %p131_p7 = scmp.eq.s32.totalorder %s931_s19, 3 }
   0xf   : > { %s947_s24 = scalar_select %p66_p1, %s866_s17, %s68_s22  }
  0x10   : > { %p949_p5 = por %p76_p2, %p75_p0  ;;  %p955_p6 = por %p1201_p4, %p81_p3 }
  0x11   : > { %1222 = sst [smem:[#allocation17_spill]] %s947_s24  ;;  %p137_p8 = scmp.eq.s32.totalorder %s543_s20, 3 }
  0x12   : > { %s1223_s25 = scalar_select %p949_p5, 1, 0 }
  0x13   : > { %s1224_s26 = scalar_select %p955_p6, 1, 0 }
  0x14   : > { %p544_p9 = scmp.ge.s32.totalorder %s870_s18, 1  ;;  %p144_p10 = scmp.lt.s32.totalorder %s870_s18, 5 }
  0x15   : > { %p962_p11 = por %p131_p7, %p75_p0  ;;  %p966_p12 = por %p137_p8, %p81_p3 }
  0x16   : > { %p970_p13 = pnand %p544_p9, %p144_p10  ;;  %s872_s30 = smov [#allocation2]  }
  0x17   : > { %s1225_s27 = scalar_select %p962_p11, 1, 0 }
  0x18   : > { %s1226_s28 = scalar_select %p966_p12, 1, 0 }
  0x19   : > { %s1228_s29 = scalar_select %p970_p13, 1, 0 }
  0x1a   : > { %1227 = sst [smem:[#allocation18_spill]] %s1226_s28  ;;  %p609_p1 = pneg %p970_p13 }
  0x1b   : > { %s156_s5 = sshll.u32 %s872_s30, 4  ;;  %s183_s7 = sand.u32 1, %s870_s18   ;;  %s157_s5 = int_to_ptr.vmem [resolvable:$true] %s156_s5 }
  0x1c   : > { %p978_p2 = pnand %p609_p1, %p1201_p4  ;;  %s1230_s0 = sld [smem:[#allocation19_spill]] }
  0x1e   : > { %p1208_p7 = pneg %p978_p2 }
  0x22   : > { %s680_s10 = scalar_lea.hbm %s1230_s0, 128 }
  0x23   : > { %p681_p3 = scmp.ne.s32.totalorder %s1230_s0, %s680_s10  ;;  %p687_p10 = scmp.lt.u32.totalorder %s680_s10, %s1230_s0 }
  0x25   : > { %p683_p8 = pnand %p1208_p7, %p681_p3 }
  0x27   : > { %p684_p9 = pneg %p683_p8 }
  0x29   : > { %p689_p1 = pnand %p687_p10, %p684_p9 }
  0x2b   : > { %692 = shalt.err (!%p689_p1)
}
  0x2c   : > { %s693_s20 = scalar_lea.vmem %s157_s5, 128  ;;  %p701_p11 = scmp.lt.s32.totalorder %s157_s5, %s157_s5 }
  0x2d   : > { %p694_p4 = scmp.ne.s32.totalorder %s157_s5, %s693_s20  ;;  %p702_p6 = scmp.lt.s32.totalorder %s693_s20, %s693_s20 }
  0x2f   : > { %p696_p0 = pnand %p694_p4, %p1208_p7  ;;  %p703_p13 = por %p702_p6, %p701_p11 }
  0x31   : > { %p697_p12 = pneg %p696_p0 }
  0x33   : > { %p704_p5 = pnand %p703_p13, %p697_p12 }
  0x35   : > { %707 = shalt.err (!%p704_p5)
}
  0x36   : > { %s1206_s22 = smov 64   ;;  %s874_s23 = smov 4  }
  0x37   : > { %612 = dma.hbm_to_vmem [thread:$0]  (!%p978_p2), %s1230_s0, 128, %s157_s5, [#allocation3], %s1206_s22, %s1206_s22, %s874_s23  }
  0x38   : > { %p1231_p4 = scmp.ne.s32.totalorder %s1223_s25, 0  ;;  %p1232_p6 = scmp.lt.s32.totalorder %s870_s18, 4 }
  0x39   : > { %s185_s10 = sand.u32 1, %s866_s17   ;;  %s1205_s12 = sshll.u32 %s870_s18, 6 }
  0x3a   : > { %p1013_p11 = pnand %p1232_p6, %p1231_p4  ;;  %s1018_s11 = sshll.u32 %s185_s10, 3 }
  0x3b   : > { %s1234_s2 = sld [smem:[#allocation20_spill]]  ;;  %s187_s25 = scalar_lea.vmem [#allocation7], %s1018_s11 }
  0x3c   : > { %s1233_s9 = scalar_select %p1013_p11, 1, 0 }
  0x3d   : > { %s193_s5 = sshll.u32 %s187_s25, 4  ;;  %s1031_s30 = scalar_lea.sflag [#allocation3], %s183_s7  ;;  %s1029_s5 = int_to_ptr.vmem [resolvable:$true] %s193_s5 }
  0x3e   : > { %p1214_p12 = pneg %p1013_p11 }
  0x41   : > { %s1026_s20 = scalar_lea.hbm %s1234_s2, %s1205_s12  ;;  %s713_s14 = scalar_lea.hbm %s1234_s2, 512 }
  0x42   : > { %s708_s8 = scalar_lea.hbm %s1026_s20, 128  ;;  %p714_p3 = scmp.lt.u32.totalorder %s1026_s20, %s1234_s2 }
  0x43   : > { %p709_p5 = scmp.ne.s32.totalorder %s1026_s20, %s708_s8  ;;  %p715_p8 = scmp.lt.u32.totalorder %s713_s14, %s708_s8 }
  0x44   : > { %p717_p10 = scmp.lt.u32.totalorder %s708_s8, %s1026_s20 }
  0x45   : > { %p711_p13 = pnand %p1214_p12, %p709_p5  ;;  %p716_p9 = por %p715_p8, %p714_p3 }
  0x47   : > { %p712_p0 = pneg %p711_p13  ;;  %p718_p1 = por %p717_p10, %p716_p9 }
  0x49   : > { %p719_p4 = pnand %p718_p1, %p712_p0 }
  0x4b   : > { %722 = shalt.err (!%p719_p4)
}
  0x4c   : > { %s723_s7 = scalar_lea.vmem %s1029_s5, 128  ;;  %s875_s25 = smov [#allocation7]  }
  0x4d   : > { %p724_p6 = scmp.ne.s32.totalorder %s1029_s5, %s723_s7  ;;  %s728_s10 = sshll.u32 %s875_s25, 4  ;;  %s729_s10 = int_to_ptr.vmem [resolvable:$false] %s728_s10 }
  0x4e   : > { %s730_s22 = scalar_lea.vmem %s729_s10, 256  ;;  %p731_p7 = scmp.lt.s32.totalorder %s1029_s5, %s729_s10 }
  0x4f   : > { %p726_p5 = pnand %p724_p6, %p1214_p12  ;;  %p732_p3 = scmp.lt.s32.totalorder %s730_s22, %s723_s7 }
  0x51   : > { %p727_p13 = pneg %p726_p5  ;;  %p733_p8 = por %p732_p3, %p731_p7 }
  0x53   : > { %p734_p9 = pnand %p733_p8, %p727_p13 }
  0x55   : > { %737 = shalt.err (!%p734_p9)
}
  0x56   : > { %s876_s12 = smov 256   ;;  %s1235_s8 = smov 64  }
  0x57   : > { %619 = dma.hbm_to_vmem [thread:$0]  (!%p1013_p11), %s1026_s20, 128, %s1029_s5, %s1031_s30, %s876_s12, %s1235_s8, %s874_s23  }
  0x58   : > { %s877_s13 = smov [#allocation5]   ;;  %s1236_s25 = sshll.u32 %s870_s18, 6 }
  0x59   : > { %s169_s14 = sshll.u32 %s877_s13, 4  ;;  %s1067_s22 = scalar_lea.hbm %s1199_s3, %s1236_s25  ;;  %s170_s14 = int_to_ptr.vmem [resolvable:$true] %s169_s14 }
  0x5a   : > { %s207_s0 = scalar_lea.vmem [#allocation8], %s1018_s11  ;;  %s738_s21 = scalar_lea.hbm %s1197_s1, 128 }
  0x5b   : > { %s213_s2 = sshll.u32 %s207_s0, 4  ;;  %p739_p7 = scmp.ne.s32.totalorder %s1197_s1, %s738_s21  ;;  %s1093_s2 = int_to_ptr.vmem [resolvable:$true] %s213_s2 }
  0x5c   : > { %p1237_p0 = pneg %p978_p2  ;;  %p745_p4 = scmp.lt.u32.totalorder %s738_s21, %s1197_s1 }
  0x5e   : > { %p741_p10 = pnand %p739_p7, %p1237_p0 }
  0x60   : > { %p742_p1 = pneg %p741_p10 }
  0x62   : > { %p747_p6 = pnand %p745_p4, %p742_p1 }
  0x64   : > { %750 = shalt.err (!%p747_p6)
}
  0x65   : > { %s751_s11 = scalar_lea.vmem %s170_s14, 128  ;;  %p1238_p13 = pmov %p1237_p0 }
  0x66   : > { %p752_p5 = scmp.ne.s32.totalorder %s170_s14, %s751_s11  ;;  %p759_p9 = scmp.lt.s32.totalorder %s170_s14, %s170_s14 }
  0x67   : > { %p760_p12 = scmp.lt.s32.totalorder %s751_s11, %s751_s11 }
  0x68   : > { %p754_p3 = pnand %p752_p5, %p1238_p13 }
  0x69   : > { %p761_p11 = por %p760_p12, %p759_p9 }
  0x6a   : > { %p755_p8 = pneg %p754_p3 }
  0x6c   : > { %p762_p0 = pnand %p761_p11, %p755_p8 }
  0x6e   : > { %765 = shalt.err (!%p762_p0)
}
  0x6f   : > { %615 = dma.hbm_to_vmem [thread:$0]  (!%p978_p2), %s1197_s1, 128, %s170_s14, [#allocation6], %s1235_s8, %s1235_s8, %s874_s23  }
  0x70   : > { %s766_s17 = scalar_lea.hbm %s1067_s22, 128  ;;  %p1239_p11 = scmp.ne.s32.totalorder %s1233_s9, 0 }
  0x71   : > { %p767_p12 = scmp.ne.s32.totalorder %s1067_s22, %s766_s17  ;;  %s771_s28 = scalar_lea.hbm %s1199_s3, 512 }
  0x72   : > { %p1240_p7 = pneg %p1239_p11  ;;  %p772_p4 = scmp.lt.u32.totalorder %s1067_s22, %s1199_s3 }
  0x73   : > { %p773_p6 = scmp.lt.u32.totalorder %s771_s28, %s766_s17  ;;  %p775_p13 = scmp.lt.u32.totalorder %s766_s17, %s1067_s22 }
  0x74   : > { %p769_p10 = pnand %p767_p12, %p1240_p7 }
  0x75   : > { %p774_p5 = por %p773_p6, %p772_p4 }
  0x76   : > { %p770_p1 = pneg %p769_p10 }
  0x77   : > { %p776_p2 = por %p775_p13, %p774_p5 }
  0x79   : > { %p777_p3 = pnand %p776_p2, %p770_p1 }
  0x7b   : > { %780 = shalt.err (!%p777_p3)
}
  0x7c   : > { %s781_s14 = scalar_lea.vmem %s1093_s2, 128  ;;  %p1241_p9 = pmov %p1240_p7 }
  0x7d   : > { %p782_p8 = scmp.ne.s32.totalorder %s1093_s2, %s781_s14  ;;  %s878_s25 = smov [#allocation8]  }
  0x7e   : > { %s786_s7 = sshll.u32 %s878_s25, 4  ;;  %s787_s7 = int_to_ptr.vmem [resolvable:$false] %s786_s7 }
  0x7f   : > { %p784_p0 = pnand %p782_p8, %p1241_p9  ;;  %s788_s10 = scalar_lea.vmem %s787_s7, 256 }
  0x80   : > { %p789_p7 = scmp.lt.s32.totalorder %s1093_s2, %s787_s7  ;;  %p790_p10 = scmp.lt.s32.totalorder %s788_s10, %s781_s14 }
  0x81   : > { %p785_p12 = pneg %p784_p0 }
  0x82   : > { %p791_p4 = por %p790_p10, %p789_p7 }
  0x84   : > { %p792_p6 = pnand %p791_p4, %p785_p12 }
  0x86   : > { %795 = shalt.err (!%p792_p6)
}
  0x87   : > { %622 = dma.hbm_to_vmem [thread:$0]  (!%p1239_p11), %s1067_s22, 128, %s1093_s2, %s1031_s30, %s876_s12, %s1235_s8, %s874_s23  }
  0x88   : > { %p1242_p1 = scmp.ne.s32.totalorder %s1228_s29, 0 }
  0x89   : > { %p1243_p5 = scmp.eq.s32.totalorder (!%p1242_p1), %s931_s19, 0 }
  0x8a   : > { %225 = sbr.rel (%p1242_p1) target bundleno = 399 (0x18f), region = 36 }
  0x91   : > { %841 = dma.done.wait (%p1243_p5), [#allocation3], 128   ;;  %p1244_p13 = pmov %p1243_p5 }
  0x92   : > { %p1245_p2 = pmov %p1243_p5 }
  0x93   : > { %843 = vsyncadd (%p1244_p13), [#allocation3], 4294967168 }
  0x94   : > { %845 = dma.done.wait (%p1245_p2), [#allocation6], 128   ;;  %p1246_p3 = pmov %p1245_p2 }
  0x95   : > { %s235_s2 = sand.u32 1, %s931_s19   ;;  %s237_s23 = sand.u32 1, %s862_s16  }
  0x96   : > { %847 = vsyncadd (%p1246_p3), [#allocation6], 4294967168  ;;  %s1136_s29 = sshll.u32 %s237_s23, 3  ;;  %s236_s9 = scalar_lea.sflag [#allocation3], %s235_s2 }
  0x97   : > { %s239_s30 = scalar_lea.vmem [#allocation7], %s1136_s29  ;;  %p1247_p11 = scmp.ne.s32.totalorder %s1224_s26, 0 }
  0x99   : > { %849 = dma.done.wait (%p1247_p11), %s236_s9, 256  }
  0x9a   : > { %851 = vsyncadd (%p1247_p11), %s236_s9, 4294967040  ;;  %v879_v0 = vmov 0.0   ;;  %vm880_vm0 = vmmov 0   ;;  %s248_s12 = scalar_lea.vmem [#allocation8], %s1136_s29  ;;  %v281_v2 = vld [vmem:[%s239_s30] sm:$0xff]   ;;  %v677_v3 = vld [vmem:[#allocation5] sm:$0xff]  }
  0x9b   : > { %581 = vmatprep.subr.bf16.mxu1 %v879_v0  ;;  %587 = vmatprep.subr.bf16.mxu0 %v879_v0  ;;  %v675_v1 = vld [vmem:[%s248_s12] sm:$0xff]   ;;  %vm298_vm1 = vcmask 130048   ;;  %v404_v12 = vunpack.c.l.bf16 %v281_v2  ;;  %v405_v17 = vunpack.c.h.bf16 %v281_v2  ;;  %s567_s26 = sshll.u32 %s931_s19, 6  ;;  %s277_s8 = scalar_lea.vmem [#allocation9], %s1136_s29 }
  0x9c   : > { %583 = vmatprep.mubr.msk.bf16.mxu1 %vm880_vm0, %v879_v0  ;;  %589 = vmatprep.mubr.msk.bf16.mxu0 %vm880_vm0, %v879_v0  ;;  %v678_v4 = vld [vmem:[#allocation2] sm:$0xff]   ;;  %s431_s22 = sshll.u32 %s277_s8, 4  ;;  %s1149_s11 = scalar_lea.hbm %s1200_s4, %s567_s26  ;;  %s1151_s22 = int_to_ptr.vmem [resolvable:$true] %s431_s22 }
  0x9d   : > { %582 = vmatpush3.bf16.msra.mxu1 %v675_v1  ;;  %588 = vmatpush3.bf16.msra.mxu0 %v281_v2  ;;  %s1155_s0 = scalar_lea.sflag [#allocation4], %s237_s23  ;;  %s796_s19 = scalar_lea.vmem %s1151_s22, 128 }
  0x9e   : > { %p797_p8 = scmp.ne.s32.totalorder %s1151_s22, %s796_s19  ;;  %p1248_p9 = scmp.ne.s32.totalorder %s1225_s27, 0 }
  0x9f   : > { %s881_s15 = smov [#allocation9]  }
  0xa0   : > { %584 = vmatmul.mubr.msk.bf16.vlgmr.msra.gmra.mrb[0].mxu1 %vm298_vm1, %v677_v3  ;;  %590 = vmatmul.mubr.msk.bf16.vlgmr.msra.gmra.mrb[0].mxu0 %vm298_vm1, %v678_v4  ;;  %p798_p0 = pnand %p797_p8, %p1248_p9  ;;  %s800_s17 = sshll.u32 %s881_s15, 4  ;;  %s801_s17 = int_to_ptr.vmem [resolvable:$false] %s800_s17 }
  0xa1   : > { %s802_s21 = scalar_lea.vmem %s801_s17, 256  ;;  %p803_p7 = scmp.lt.s32.totalorder %s1151_s22, %s801_s17 }
  0xa2   : > { %p799_p12 = pneg %p798_p0  ;;  %p804_p10 = scmp.lt.s32.totalorder %s802_s21, %s796_s19 }
  0xa4   : > { %p805_p4 = por %p804_p10, %p803_p7 }
  0xa6   : > { %p806_p6 = pnand %p805_p4, %p799_p12 }
 0x173   : > { %v336_v5 = vpop.f32.mrb[0].mxu1  ;;  %v391_v7 = vpop.f32.mrb[0].mxu0 }
 0x174   : > { %v585_v6 = vpop.f32.mrb[1].mxu1  ;;  %v392_v9 = vadd.f32 %v391_v7, %v336_v5  ;;  %v591_v10 = vpop.f32.mrb[1].mxu0 }
 0x175   : > { %v339_v8 = vpop.f32.mrb[2].mxu1  ;;  %v394_v13 = vpop.f32.mrb[2].mxu0 }
 0x176   : > { %v586_v11 = vpop.f32.mrb[3].mxu1  ;;  %vm398_vm2 = vcmp.ge.f32.partialorder %v392_v9, 0.0  ;;  %v400_v14 = vmul.f32 0.1, %v392_v9  ;;  %v395_v15 = vadd.f32 %v394_v13, %v339_v8  ;;  %v592_v16 = vpop.f32.mrb[3].mxu0 }
 0x178   : > { %v402_v18 = vsel %vm398_vm2, %v392_v9, %v400_v14  ;;  %vm399_vm3 = vcmp.ge.f32.partialorder %v395_v15, 0.0  ;;  %v401_v19 = vmul.f32 0.1, %v395_v15 }
 0x179   : > { %v406_v20 = vadd.f32 %v404_v12, %v402_v18 }
 0x17a   : > { %v403_v21 = vsel %vm399_vm3, %v395_v15, %v401_v19 }
 0x17b   : > { %v407_v22 = vadd.f32 %v405_v17, %v403_v21 }
 0x17d   : > { %v575_v23 = vpack.c.bf16 %v407_v22, %v406_v20 }
 0x17f   : > { %576 = vst [vmem:[%s277_s8] sm:$0xff] %v575_v23  }
 0x180   : > { %809 = shalt.err (!%p806_p6)
}
 0x181   : > { %s810_s24 = scalar_lea.hbm %s1149_s11, 128  ;;  %s814_s13 = scalar_lea.hbm %s1200_s4, 512 }
 0x182   : > { %p811_p1 = scmp.ne.s32.totalorder %s1149_s11, %s810_s24  ;;  %p815_p2 = scmp.lt.u32.totalorder %s1149_s11, %s1200_s4 }
 0x183   : > { %p816_p3 = scmp.lt.u32.totalorder %s814_s13, %s810_s24  ;;  %p818_p8 = scmp.lt.u32.totalorder %s810_s24, %s1149_s11 }
 0x184   : > { %p812_p5 = pnand %p811_p1, %p1248_p9 }
 0x185   : > { %p817_p11 = por %p816_p3, %p815_p2 }
 0x186   : > { %p813_p13 = pneg %p812_p5 }
 0x187   : > { %p819_p0 = por %p818_p8, %p817_p11 }
 0x189   : > { %p820_p12 = pnand %p819_p0, %p813_p13 }
 0x18b   : > { %823 = shalt.err (!%p820_p12)
}
 0x18c   : > { %s882_s7 = smov 64   ;;  %s883_s10 = smov 256  }
 0x18d   : > { %s884_s2 = smov 4  }
 0x18e   : > { %607 = dma.vmem_to_hbm [thread:$0]  (%p1248_p9), %s1151_s22, 128, %s1149_s11, %s1155_s0, %s882_s7, %s883_s10, %s884_s2  }
 0x18f PF: > { %s1249_s23 = sld [smem:[#allocation14_spill]]  ;;  %s1250_s29 = sld [smem:[#allocation18_spill]] }
 0x190   : > { %p632_p7 = scmp.ge.s32.totalorder %s870_s18, 2 }
 0x195   : > { %s446_s9 = sand.u32 1, %s1249_s23   ;;  %p1251_p10 = scmp.ne.s32.totalorder %s1250_s29, 0 }
 0x196   : > { %s447_s30 = scalar_lea.sflag [#allocation4], %s446_s9 }
 0x197   : > { %p624_p4 = pnand %p632_p7, %p1251_p10 }
 0x199   : > { %853 = dma.done.wait (!%p624_p4), %s447_s30, 128  }
 0x19a   : > { %855 = vsyncadd (!%p624_p4), %s447_s30, 4294967168  ;;  %s1252_s18 = sld [smem:[#allocation16_spill]]  ;;  %s1253_s12 = sld [smem:[#allocation15_spill]] }
 0x19b   : > { %s1254_s17 = sld [smem:[#allocation17_spill]]  ;;  %s1255_s15 = smov %s862_s16 }
 0x1a0   : > { %p16_p6 = scmp.ge.s32.totalorder %s1252_s18, 6   ;;  %s1256_s16 = smov %s1253_s12 }
 0x1a2   :  { %18 = sbr.rel (!%p16_p6) target bundleno = 8 (0x8), region = 99 }
 0x1a9   :  { %452 = vsyncpa [#allocation3], 1 }
 0x1aa   :  { %454 = vsyncpa [#allocation3 + $0x1], 1 }
 0x1ab   :  { %455 = vsyncpa [#allocation6], 1 }
 0x1ac   :  { %456 = vsyncpa [#allocation4], 1 }
 0x1ad   :  { %458 = vsyncpa [#allocation4 + $0x1], 1 }

</bundles_post_ra>
